<compile_context>
chip_gen: v7x
topology: tpu7x:2x2x1
jax: 0.10.0
libtpu: 0.0.40
codegen_flags: <defaults>
</compile_context>

<pallas_src>
import math
from functools import partial

import numpy as np
import jax
import jax.numpy as jnp
from jax import lax
from jax.experimental import pallas as pl
from jax.experimental.pallas import tpu as pltpu

EMBED = 128
HEADS = 8
HEAD_DIM = EMBED // HEADS
FF = 512
LSTM_HIDDEN = 128
PRED_WINDOW = 90
LN_EPS = 1e-5
N_LAYER_ARGS = 12  # refs per transformer encoder layer

LAYER_KEYS = ("qkvT", "qkv_b", "woT", "wo_b", "n1_g", "n1_b",
              "ff1T", "ff1_b", "ff2T", "ff2_b", "n2_g", "n2_b")


# ----------------------------------------------------------------------------
# In-kernel helpers (operate on traced values held in VMEM / vregs)
# ----------------------------------------------------------------------------
def _bf16(v):
    return v.astype(jnp.bfloat16)


def _layernorm(x, g, b):
    mu = jnp.mean(x, axis=-1, keepdims=True)
    var = jnp.mean(jnp.square(x - mu), axis=-1, keepdims=True)
    return (x - mu) * lax.rsqrt(var + LN_EPS) * g + b


def _mha(x, qkvT, qkv_b, woT, wo_b, B, S):
    """x: (B*S, E) f32 rows in batch-major order. Full multi-head self-attention.
    qkvT already has the 1/sqrt(head_dim) scale folded into its Q block."""
    qkv = jnp.dot(_bf16(x), qkvT, preferred_element_type=jnp.float32) + qkv_b  # (B*S, 3E)
    q = qkv[:, :EMBED]
    k = qkv[:, EMBED:2 * EMBED]
    v = qkv[:, 2 * EMBED:]
    heads = []
    for h in range(HEADS):
        lo, hi = h * HEAD_DIM, (h + 1) * HEAD_DIM
        qh = q[:, lo:hi].reshape(B, S, HEAD_DIM)
        kh = k[:, lo:hi].reshape(B, S, HEAD_DIM)
        vh = v[:, lo:hi].reshape(B, S, HEAD_DIM)
        s = jnp.einsum("bid,bjd->bij", qh, kh,
                       preferred_element_type=jnp.float32)           # (B, S, S)
        s = s - jnp.max(s, axis=-1, keepdims=True)
        p = jnp.exp(s)
        p = p / jnp.sum(p, axis=-1, keepdims=True)
        oh = jnp.einsum("bij,bjd->bid", p, vh,
                        preferred_element_type=jnp.float32)           # (B, S, d)
        heads.append(oh.reshape(B * S, HEAD_DIM))
    # Concat over heads (lane concat) and ONE K=128 output projection.
    o = jnp.concatenate(heads, axis=-1)                               # (B*S, E)
    return jnp.dot(_bf16(o), woT, preferred_element_type=jnp.float32) + wo_b


def _enc_layer(x, prm, B, S):
    # Post-norm (PyTorch norm_first=False), ReLU FFN, dropout = identity.
    (qkvT, qkv_b, woT, wo_b, n1g, n1b, ff1T, ff1b, ff2T, ff2b, n2g, n2b) = prm
    attn = _mha(x, qkvT, qkv_b, woT, wo_b, B, S)
    y = _layernorm(x + attn, n1g, n1b)
    h = jnp.dot(_bf16(y), ff1T, preferred_element_type=jnp.float32) + ff1b
    h = jnp.maximum(h, 0.0)
    h = jnp.dot(_bf16(h), ff2T, preferred_element_type=jnp.float32) + ff2b
    return _layernorm(y + h, n2g, n2b)


def _lstm_cell(gates, c):
    H = LSTM_HIDDEN
    i = jax.nn.sigmoid(gates[:, 0 * H:1 * H])
    f = jax.nn.sigmoid(gates[:, 1 * H:2 * H])
    g = jnp.tanh(gates[:, 2 * H:3 * H])
    o = jax.nn.sigmoid(gates[:, 3 * H:4 * H])
    c_new = f * c + i * g
    return o * jnp.tanh(c_new), c_new


# ----------------------------------------------------------------------------
# Single fused kernel
# ----------------------------------------------------------------------------
def _fused_kernel(*refs, B, S, n_layers):
    # refs = x, pe, embT, emb_b, <12 per encoder layer>...,
    #        wih1T, b1, whh1T, w2T, b2,
    #        v1T, v1_b, v2T, v2_b, fc1T, fc2T, fc_b, out
    x_ref, pe_ref, embT_ref, embb_ref = refs[0:4]
    li = 4 + n_layers * N_LAYER_ARGS
    layer_refs = refs[4:li]
    wih1T_ref, b1_ref, whh1T_ref, w2T_ref, b2_ref = refs[li:li + 5]
    (v1T_ref, v1b_ref, v2T_ref, v2b_ref,
     fc1T_ref, fc2T_ref, fcb_ref) = refs[li + 5:li + 12]
    o_ref = refs[li + 12]

    x = x_ref[...]                                   # (B*S, D) f32, batch-major
    xb = _bf16(x)                                    # shared by both branches
    H = LSTM_HIDDEN

    # ---------------- transformer branch ----------------
    t = jnp.dot(xb, embT_ref[...], preferred_element_type=jnp.float32) + embb_ref[...]
    t = t + pe_ref[...]                              # positional encoding
    for l in range(n_layers):
        prm = tuple(r[...] for r in
                    layer_refs[l * N_LAYER_ARGS:(l + 1) * N_LAYER_ARGS])
        t = _enc_layer(t, prm, B, S)
    # Last sequence position per batch: rows b*S + (S-1)  (leading-dim slices).
    trans_out = jnp.concatenate(
        [t[b * S + S - 1: b * S + S, :] for b in range(B)], axis=0)   # (B, E)

    # ---------------- 2-layer LSTM branch ----------------
    # Layer-1 input gates for every time step in one matmul; the recurrence is
    # statically unrolled (S is small & fixed).  Layer-2 uses the pre-stacked
    # [wih2T; whh2T] weight so each step needs a single K=256 matmul.
    xg1 = jnp.dot(xb, wih1T_ref[...], preferred_element_type=jnp.float32) + b1_ref[...]
    whh1T = whh1T_ref[...]
    w2T = w2T_ref[...]
    b2 = b2_ref[...]
    # Regroup batch-major rows into per-time-step (B, 4H) slabs once, up front.
    xg1_steps = [
        jnp.concatenate([xg1[b * S + ts: b * S + ts + 1, :] for b in range(B)], axis=0)
        for ts in range(S)
    ]

    h1 = jnp.zeros((B, H), jnp.float32)
    c1 = jnp.zeros((B, H), jnp.float32)
    h2 = jnp.zeros((B, H), jnp.float32)
    c2 = jnp.zeros((B, H), jnp.float32)
    for ts in range(S):                              # static unroll
        g1 = xg1_steps[ts] + jnp.dot(_bf16(h1), whh1T,
                                     preferred_element_type=jnp.float32)
        h1, c1 = _lstm_cell(g1, c1)
        hcat = jnp.concatenate([h1, h2], axis=1)     # (B, 2H)
        g2 = jnp.dot(_bf16(hcat), w2T, preferred_element_type=jnp.float32) + b2
        h2, c2 = _lstm_cell(g2, c2)
    lstm_out = h2                                    # (B, H)

    # ---------------- cross-attention + FC head ----------------
    # CrossAtt softmax over a singleton key axis == 1, so out == v(x2):
    #   att1(trans_out, lstm_out) -> v1(lstm_out)
    #   att2(lstm_out, trans_out) -> v2(trans_out)
    # concat([a, b]) @ fc^T == a @ fc1T + b @ fc2T (fc weight pre-split).
    trans_att = jnp.dot(_bf16(lstm_out), v1T_ref[...],
                        preferred_element_type=jnp.float32) + v1b_ref[...]
    lstm_att = jnp.dot(_bf16(trans_out), v2T_ref[...],
                       preferred_element_type=jnp.float32) + v2b_ref[...]
    out = (jnp.dot(_bf16(trans_att), fc1T_ref[...], preferred_element_type=jnp.float32)
           + jnp.dot(_bf16(lstm_att), fc2T_ref[...], preferred_element_type=jnp.float32)
           + fcb_ref[...])
    o_ref[...] = out                                 # (B, PRED_WINDOW)


# ----------------------------------------------------------------------------
# Forward pass (one pallas_call, no grid, everything VMEM-resident)
# ----------------------------------------------------------------------------
def _pos_encoding_np(seq_len, embed):
    pos = np.arange(seq_len, dtype=np.float32)[:, None]
    div = np.exp(np.arange(0, embed, 2, dtype=np.float32)
                 * (-math.log(10000.0) / embed))
    pe = np.zeros((seq_len, embed), np.float32)
    pe[:, 0::2] = np.sin(pos * div)
    pe[:, 1::2] = np.cos(pos * div)
    return pe                                        # (S, E)


@jax.jit
def hybrid_forward(params, x):
    B, S, D = x.shape
    n_layers = len(params["trans_layers"])
    # Positional encoding depends only on static shapes -> baked as a constant.
    pe = jnp.asarray(np.tile(_pos_encoding_np(S, EMBED), (B, 1)))     # (B*S, E)

    args = [x.reshape(B * S, D), pe, params["embT"], params["emb_b"]]
    for lyr in params["trans_layers"]:
        args += [lyr[k] for k in LAYER_KEYS]
    args += [params["lstm1"]["wihT"], params["lstm1"]["b"], params["lstm1"]["whhT"],
             params["lstm2"]["wT"], params["lstm2"]["b"]]
    args += [params["att1"]["vT"], params["att1"]["v_b"],
             params["att2"]["vT"], params["att2"]["v_b"],
             params["fc1T"], params["fc2T"], params["fc_b"]]

    vspec = pl.BlockSpec(memory_space=pltpu.MemorySpace.VMEM)
    # TODO(synk): on v7x the two branches could be split across the two
    # TensorCores via pl.core_map; kept single-core (portable, and each branch
    # is only a few microseconds).
    return pl.pallas_call(
        partial(_fused_kernel, B=B, S=S, n_layers=n_layers),
        out_shape=jax.ShapeDtypeStruct((B, PRED_WINDOW), jnp.float32),
        in_specs=[vspec] * len(args),
        out_specs=vspec,
    )(*args)


# ----------------------------------------------------------------------------
# Deterministic parameter init (synthetic; weights pre-transposed (in, out),
# matrices in bf16, biases / LN params in f32)
# ----------------------------------------------------------------------------
def init_params(key, input_dim):
    keys = iter(jax.random.split(key, 64))

    def nrm(shape, scale=0.02):
        return scale * jax.random.normal(next(keys), shape, jnp.float32)

    def bf(a):
        return a.astype(jnp.bfloat16)

    params = {
        "embT": bf(nrm((input_dim, EMBED))),
        "emb_b": nrm((1, EMBED)),
    }

    att_scale = 1.0 / math.sqrt(HEAD_DIM)
    layers = []
    for _ in range(2):
        qkvT = nrm((EMBED, 3 * EMBED))
        qkv_b = nrm((1, 3 * EMBED))
        # Fold the 1/sqrt(head_dim) attention scale into the Q block of the
        # in-projection weight AND bias (exactly how PyTorch applies it).
        qkvT = qkvT.at[:, :EMBED].multiply(att_scale)
        qkv_b = qkv_b.at[:, :EMBED].multiply(att_scale)
        layers.append(dict(
            qkvT=bf(qkvT), qkv_b=qkv_b,
            woT=bf(nrm((EMBED, EMBED))), wo_b=nrm((1, EMBED)),
            n1_g=jnp.ones((1, EMBED), jnp.float32),
            n1_b=jnp.zeros((1, EMBED), jnp.float32),
            ff1T=bf(nrm((EMBED, FF))), ff1_b=nrm((1, FF)),
            ff2T=bf(nrm((FF, EMBED))), ff2_b=nrm((1, EMBED)),
            n2_g=jnp.ones((1, EMBED), jnp.float32),
            n2_b=jnp.zeros((1, EMBED), jnp.float32),
        ))
    params["trans_layers"] = layers

    H = LSTM_HIDDEN
    params["lstm1"] = dict(
        wihT=bf(nrm((input_dim, 4 * H))),
        whhT=bf(nrm((H, 4 * H))),
        b=nrm((1, 4 * H)),                            # b_ih + b_hh folded
    )
    wih2T = nrm((H, 4 * H))
    whh2T = nrm((H, 4 * H))
    params["lstm2"] = dict(
        wT=bf(jnp.concatenate([wih2T, whh2T], axis=0)),   # (2H, 4H) stacked
        b=nrm((1, 4 * H)),                            # b_ih + b_hh folded
    )

    # CrossAtt: only the v projection affects the output (softmax over a
    # singleton key axis is identically 1); q/k params would be dead compute.
    for name in ("att1", "att2"):
        params[name] = dict(vT=bf(nrm((EMBED, EMBED))), v_b=nrm((1, EMBED)))

    fcT = nrm((2 * EMBED, PRED_WINDOW))
    params["fc1T"] = bf(fcT[:EMBED])                  # multiplies trans_att
    params["fc2T"] = bf(fcT[EMBED:])                  # multiplies lstm_att
    params["fc_b"] = nrm((1, PRED_WINDOW))
    return params


if __name__ == "__main__":
    key = jax.random.PRNGKey(0)
    pkey, xkey = jax.random.split(key)
    B, S, D = 2, 8, 16                                # batch, seq, input_dim
    params = init_params(pkey, D)
    x = jax.random.normal(xkey, (B, S, D), jnp.float32)
    out = hybrid_forward(params, x)
    jax.block_until_ready(out)
    assert out.shape == (B, PRED_WINDOW) and out.dtype == jnp.float32
    assert bool(jnp.all(jnp.isfinite(out)))
    print("KERNEL_OK")
</pallas_src>

<mosaic_0001>
module attributes {stable_mosaic.version = 11 : i64} {
  func.func @_fused_kernel(%arg0: memref<16x16xf32, #tpu.memory_space<vmem>>, %arg1: memref<16x128xf32, #tpu.memory_space<vmem>>, %arg2: memref<16x128xbf16, #tpu.memory_space<vmem>>, %arg3: memref<1x128xf32, #tpu.memory_space<vmem>>, %arg4: memref<128x384xbf16, #tpu.memory_space<vmem>>, %arg5: memref<1x384xf32, #tpu.memory_space<vmem>>, %arg6: memref<128x128xbf16, #tpu.memory_space<vmem>>, %arg7: memref<1x128xf32, #tpu.memory_space<vmem>>, %arg8: memref<1x128xf32, #tpu.memory_space<vmem>>, %arg9: memref<1x128xf32, #tpu.memory_space<vmem>>, %arg10: memref<128x512xbf16, #tpu.memory_space<vmem>>, %arg11: memref<1x512xf32, #tpu.memory_space<vmem>>, %arg12: memref<512x128xbf16, #tpu.memory_space<vmem>>, %arg13: memref<1x128xf32, #tpu.memory_space<vmem>>, %arg14: memref<1x128xf32, #tpu.memory_space<vmem>>, %arg15: memref<1x128xf32, #tpu.memory_space<vmem>>, %arg16: memref<128x384xbf16, #tpu.memory_space<vmem>>, %arg17: memref<1x384xf32, #tpu.memory_space<vmem>>, %arg18: memref<128x128xbf16, #tpu.memory_space<vmem>>, %arg19: memref<1x128xf32, #tpu.memory_space<vmem>>, %arg20: memref<1x128xf32, #tpu.memory_space<vmem>>, %arg21: memref<1x128xf32, #tpu.memory_space<vmem>>, %arg22: memref<128x512xbf16, #tpu.memory_space<vmem>>, %arg23: memref<1x512xf32, #tpu.memory_space<vmem>>, %arg24: memref<512x128xbf16, #tpu.memory_space<vmem>>, %arg25: memref<1x128xf32, #tpu.memory_space<vmem>>, %arg26: memref<1x128xf32, #tpu.memory_space<vmem>>, %arg27: memref<1x128xf32, #tpu.memory_space<vmem>>, %arg28: memref<16x512xbf16, #tpu.memory_space<vmem>>, %arg29: memref<1x512xf32, #tpu.memory_space<vmem>>, %arg30: memref<128x512xbf16, #tpu.memory_space<vmem>>, %arg31: memref<256x512xbf16, #tpu.memory_space<vmem>>, %arg32: memref<1x512xf32, #tpu.memory_space<vmem>>, %arg33: memref<128x128xbf16, #tpu.memory_space<vmem>>, %arg34: memref<1x128xf32, #tpu.memory_space<vmem>>, %arg35: memref<128x128xbf16, #tpu.memory_space<vmem>>, %arg36: memref<1x128xf32, #tpu.memory_space<vmem>>, %arg37: memref<128x90xbf16, #tpu.memory_space<vmem>>, %arg38: memref<128x90xbf16, #tpu.memory_space<vmem>>, %arg39: memref<1x90xf32, #tpu.memory_space<vmem>>, %arg40: memref<2x90xf32, #tpu.memory_space<vmem>>) attributes {dimension_semantics = [], scalar_prefetch = 0 : i64, scratch_operands = 0 : i64, tpu.core_type = #tpu.core_type<tc>} {
    %c0 = arith.constant 0 : index
    %c0_0 = arith.constant 0 : index
    %0 = vector.load %arg0[%c0, %c0_0] : memref<16x16xf32, #tpu.memory_space<vmem>>, vector<16x16xf32>
    %1 = arith.truncf %0 : vector<16x16xf32> to vector<16x16xbf16>
    %c0_1 = arith.constant 0 : index
    %c0_2 = arith.constant 0 : index
    %2 = vector.load %arg2[%c0_1, %c0_2] : memref<16x128xbf16, #tpu.memory_space<vmem>>, vector<16x128xbf16>
    %cst = arith.constant dense<0.000000e+00> : vector<16x128xf32>
    %3 = tpu.matmul %1, %2, %cst {dimension_numbers = #tpu.dot_dimension_numbers<[1], [0], [0], [1], [0, 0, 1, 1], [], []>} : vector<16x16xbf16>, vector<16x128xbf16>, vector<16x128xf32> -> vector<16x128xf32>
    %c0_3 = arith.constant 0 : index
    %c0_4 = arith.constant 0 : index
    %4 = vector.load %arg3[%c0_3, %c0_4] : memref<1x128xf32, #tpu.memory_space<vmem>>, vector<1x128xf32>
    %5 = vector.broadcast %4 : vector<1x128xf32> to vector<16x128xf32>
    %6 = arith.addf %3, %5 : vector<16x128xf32>
    %c0_5 = arith.constant 0 : index
    %c0_6 = arith.constant 0 : index
    %7 = vector.load %arg1[%c0_5, %c0_6] : memref<16x128xf32, #tpu.memory_space<vmem>>, vector<16x128xf32>
    %8 = arith.addf %6, %7 : vector<16x128xf32>
    %c0_7 = arith.constant 0 : index
    %c0_8 = arith.constant 0 : index
    %9 = vector.load %arg4[%c0_7, %c0_8] : memref<128x384xbf16, #tpu.memory_space<vmem>>, vector<128x384xbf16>
    %c0_9 = arith.constant 0 : index
    %c0_10 = arith.constant 0 : index
    %10 = vector.load %arg5[%c0_9, %c0_10] : memref<1x384xf32, #tpu.memory_space<vmem>>, vector<1x384xf32>
    %c0_11 = arith.constant 0 : index
    %c0_12 = arith.constant 0 : index
    %11 = vector.load %arg6[%c0_11, %c0_12] : memref<128x128xbf16, #tpu.memory_space<vmem>>, vector<128x128xbf16>
    %c0_13 = arith.constant 0 : index
    %c0_14 = arith.constant 0 : index
    %12 = vector.load %arg7[%c0_13, %c0_14] : memref<1x128xf32, #tpu.memory_space<vmem>>, vector<1x128xf32>
    %c0_15 = arith.constant 0 : index
    %c0_16 = arith.constant 0 : index
    %13 = vector.load %arg8[%c0_15, %c0_16] : memref<1x128xf32, #tpu.memory_space<vmem>>, vector<1x128xf32>
    %c0_17 = arith.constant 0 : index
    %c0_18 = arith.constant 0 : index
    %14 = vector.load %arg9[%c0_17, %c0_18] : memref<1x128xf32, #tpu.memory_space<vmem>>, vector<1x128xf32>
    %c0_19 = arith.constant 0 : index
    %c0_20 = arith.constant 0 : index
    %15 = vector.load %arg10[%c0_19, %c0_20] : memref<128x512xbf16, #tpu.memory_space<vmem>>, vector<128x512xbf16>
    %c0_21 = arith.constant 0 : index
    %c0_22 = arith.constant 0 : index
    %16 = vector.load %arg11[%c0_21, %c0_22] : memref<1x512xf32, #tpu.memory_space<vmem>>, vector<1x512xf32>
    %c0_23 = arith.constant 0 : index
    %c0_24 = arith.constant 0 : index
    %17 = vector.load %arg12[%c0_23, %c0_24] : memref<512x128xbf16, #tpu.memory_space<vmem>>, vector<512x128xbf16>
    %c0_25 = arith.constant 0 : index
    %c0_26 = arith.constant 0 : index
    %18 = vector.load %arg13[%c0_25, %c0_26] : memref<1x128xf32, #tpu.memory_space<vmem>>, vector<1x128xf32>
    %c0_27 = arith.constant 0 : index
    %c0_28 = arith.constant 0 : index
    %19 = vector.load %arg14[%c0_27, %c0_28] : memref<1x128xf32, #tpu.memory_space<vmem>>, vector<1x128xf32>
    %c0_29 = arith.constant 0 : index
    %c0_30 = arith.constant 0 : index
    %20 = vector.load %arg15[%c0_29, %c0_30] : memref<1x128xf32, #tpu.memory_space<vmem>>, vector<1x128xf32>
    %21 = arith.truncf %8 : vector<16x128xf32> to vector<16x128xbf16>
    %cst_31 = arith.constant dense<0.000000e+00> : vector<16x384xf32>
    %22 = tpu.matmul %21, %9, %cst_31 {dimension_numbers = #tpu.dot_dimension_numbers<[1], [0], [0], [1], [0, 0, 1, 1], [], []>} : vector<16x128xbf16>, vector<128x384xbf16>, vector<16x384xf32> -> vector<16x384xf32>
    %23 = vector.broadcast %10 : vector<1x384xf32> to vector<16x384xf32>
    %24 = arith.addf %22, %23 : vector<16x384xf32>
    %25 = vector.extract_strided_slice %24 {offsets = [0, 0], sizes = [16, 128], strides = [1, 1]} : vector<16x384xf32> to vector<16x128xf32>
    %26 = vector.extract_strided_slice %24 {offsets = [0, 128], sizes = [16, 128], strides = [1, 1]} : vector<16x384xf32> to vector<16x128xf32>
    %27 = vector.extract_strided_slice %24 {offsets = [0, 256], sizes = [16, 128], strides = [1, 1]} : vector<16x384xf32> to vector<16x128xf32>
    %28 = vector.extract_strided_slice %25 {offsets = [0, 0], sizes = [16, 16], strides = [1, 1]} : vector<16x128xf32> to vector<16x16xf32>
    %29 = vector.shape_cast %28 : vector<16x16xf32> to vector<2x8x16xf32>
    %30 = vector.extract_strided_slice %26 {offsets = [0, 0], sizes = [16, 16], strides = [1, 1]} : vector<16x128xf32> to vector<16x16xf32>
    %31 = vector.shape_cast %30 : vector<16x16xf32> to vector<2x8x16xf32>
    %32 = vector.extract_strided_slice %27 {offsets = [0, 0], sizes = [16, 16], strides = [1, 1]} : vector<16x128xf32> to vector<16x16xf32>
    %33 = vector.shape_cast %32 : vector<16x16xf32> to vector<2x8x16xf32>
    "tpu.trace_start"() <{level = 10 : i32, message = "bid,bjd->bij"}> : () -> ()
    %cst_32 = arith.constant dense<0.000000e+00> : vector<2x8x8xf32>
    %34 = tpu.matmul %29, %31, %cst_32 {dimension_numbers = #tpu.dot_dimension_numbers<[2], [2], [1], [1], [0, 0, 0, 1, 1, 1], [0], [0]>} : vector<2x8x16xf32>, vector<2x8x16xf32>, vector<2x8x8xf32> -> vector<2x8x8xf32>
    "tpu.trace_stop"() : () -> ()
    %cst_33 = arith.constant dense<0xFF800000> : vector<2x8xf32>
    %35 = vector.multi_reduction <maximumf>, %34, %cst_33 [2] : vector<2x8x8xf32> to vector<2x8xf32>
    %36 = vector.shape_cast %35 : vector<2x8xf32> to vector<2x8x1xf32>
    %37 = vector.broadcast %36 : vector<2x8x1xf32> to vector<2x8x8xf32>
    %38 = arith.subf %34, %37 : vector<2x8x8xf32>
    %39 = math.exp %38 : vector<2x8x8xf32>
    %cst_34 = arith.constant dense<0.000000e+00> : vector<2x8xf32>
    %40 = vector.multi_reduction <add>, %39, %cst_34 [2] : vector<2x8x8xf32> to vector<2x8xf32>
    %41 = vector.shape_cast %40 : vector<2x8xf32> to vector<2x8x1xf32>
    %42 = vector.broadcast %41 : vector<2x8x1xf32> to vector<2x8x8xf32>
    %43 = arith.divf %39, %42 : vector<2x8x8xf32>
    "tpu.trace_start"() <{level = 10 : i32, message = "bij,bjd->bid"}> : () -> ()
    %cst_35 = arith.constant dense<0.000000e+00> : vector<2x8x16xf32>
    %44 = tpu.matmul %43, %33, %cst_35 {dimension_numbers = #tpu.dot_dimension_numbers<[2], [1], [1], [2], [0, 0, 0, 1, 1, 2], [0], [0]>} : vector<2x8x8xf32>, vector<2x8x16xf32>, vector<2x8x16xf32> -> vector<2x8x16xf32>
    "tpu.trace_stop"() : () -> ()
    %45 = vector.shape_cast %44 : vector<2x8x16xf32> to vector<16x16xf32>
    %46 = vector.extract_strided_slice %25 {offsets = [0, 16], sizes = [16, 16], strides = [1, 1]} : vector<16x128xf32> to vector<16x16xf32>
    %47 = vector.shape_cast %46 : vector<16x16xf32> to vector<2x8x16xf32>
    %48 = vector.extract_strided_slice %26 {offsets = [0, 16], sizes = [16, 16], strides = [1, 1]} : vector<16x128xf32> to vector<16x16xf32>
    %49 = vector.shape_cast %48 : vector<16x16xf32> to vector<2x8x16xf32>
    %50 = vector.extract_strided_slice %27 {offsets = [0, 16], sizes = [16, 16], strides = [1, 1]} : vector<16x128xf32> to vector<16x16xf32>
    %51 = vector.shape_cast %50 : vector<16x16xf32> to vector<2x8x16xf32>
    "tpu.trace_start"() <{level = 10 : i32, message = "bid,bjd->bij"}> : () -> ()
    %cst_36 = arith.constant dense<0.000000e+00> : vector<2x8x8xf32>
    %52 = tpu.matmul %47, %49, %cst_36 {dimension_numbers = #tpu.dot_dimension_numbers<[2], [2], [1], [1], [0, 0, 0, 1, 1, 1], [0], [0]>} : vector<2x8x16xf32>, vector<2x8x16xf32>, vector<2x8x8xf32> -> vector<2x8x8xf32>
    "tpu.trace_stop"() : () -> ()
    %cst_37 = arith.constant dense<0xFF800000> : vector<2x8xf32>
    %53 = vector.multi_reduction <maximumf>, %52, %cst_37 [2] : vector<2x8x8xf32> to vector<2x8xf32>
    %54 = vector.shape_cast %53 : vector<2x8xf32> to vector<2x8x1xf32>
    %55 = vector.broadcast %54 : vector<2x8x1xf32> to vector<2x8x8xf32>
    %56 = arith.subf %52, %55 : vector<2x8x8xf32>
    %57 = math.exp %56 : vector<2x8x8xf32>
    %cst_38 = arith.constant dense<0.000000e+00> : vector<2x8xf32>
    %58 = vector.multi_reduction <add>, %57, %cst_38 [2] : vector<2x8x8xf32> to vector<2x8xf32>
    %59 = vector.shape_cast %58 : vector<2x8xf32> to vector<2x8x1xf32>
    %60 = vector.broadcast %59 : vector<2x8x1xf32> to vector<2x8x8xf32>
    %61 = arith.divf %57, %60 : vector<2x8x8xf32>
    "tpu.trace_start"() <{level = 10 : i32, message = "bij,bjd->bid"}> : () -> ()
    %cst_39 = arith.constant dense<0.000000e+00> : vector<2x8x16xf32>
    %62 = tpu.matmul %61, %51, %cst_39 {dimension_numbers = #tpu.dot_dimension_numbers<[2], [1], [1], [2], [0, 0, 0, 1, 1, 2], [0], [0]>} : vector<2x8x8xf32>, vector<2x8x16xf32>, vector<2x8x16xf32> -> vector<2x8x16xf32>
    "tpu.trace_stop"() : () -> ()
    %63 = vector.shape_cast %62 : vector<2x8x16xf32> to vector<16x16xf32>
    %64 = vector.extract_strided_slice %25 {offsets = [0, 32], sizes = [16, 16], strides = [1, 1]} : vector<16x128xf32> to vector<16x16xf32>
    %65 = vector.shape_cast %64 : vector<16x16xf32> to vector<2x8x16xf32>
    %66 = vector.extract_strided_slice %26 {offsets = [0, 32], sizes = [16, 16], strides = [1, 1]} : vector<16x128xf32> to vector<16x16xf32>
    %67 = vector.shape_cast %66 : vector<16x16xf32> to vector<2x8x16xf32>
    %68 = vector.extract_strided_slice %27 {offsets = [0, 32], sizes = [16, 16], strides = [1, 1]} : vector<16x128xf32> to vector<16x16xf32>
    %69 = vector.shape_cast %68 : vector<16x16xf32> to vector<2x8x16xf32>
    "tpu.trace_start"() <{level = 10 : i32, message = "bid,bjd->bij"}> : () -> ()
    %cst_40 = arith.constant dense<0.000000e+00> : vector<2x8x8xf32>
    %70 = tpu.matmul %65, %67, %cst_40 {dimension_numbers = #tpu.dot_dimension_numbers<[2], [2], [1], [1], [0, 0, 0, 1, 1, 1], [0], [0]>} : vector<2x8x16xf32>, vector<2x8x16xf32>, vector<2x8x8xf32> -> vector<2x8x8xf32>
    "tpu.trace_stop"() : () -> ()
    %cst_41 = arith.constant dense<0xFF800000> : vector<2x8xf32>
    %71 = vector.multi_reduction <maximumf>, %70, %cst_41 [2] : vector<2x8x8xf32> to vector<2x8xf32>
    %72 = vector.shape_cast %71 : vector<2x8xf32> to vector<2x8x1xf32>
    %73 = vector.broadcast %72 : vector<2x8x1xf32> to vector<2x8x8xf32>
    %74 = arith.subf %70, %73 : vector<2x8x8xf32>
    %75 = math.exp %74 : vector<2x8x8xf32>
    %cst_42 = arith.constant dense<0.000000e+00> : vector<2x8xf32>
    %76 = vector.multi_reduction <add>, %75, %cst_42 [2] : vector<2x8x8xf32> to vector<2x8xf32>
    %77 = vector.shape_cast %76 : vector<2x8xf32> to vector<2x8x1xf32>
    %78 = vector.broadcast %77 : vector<2x8x1xf32> to vector<2x8x8xf32>
    %79 = arith.divf %75, %78 : vector<2x8x8xf32>
    "tpu.trace_start"() <{level = 10 : i32, message = "bij,bjd->bid"}> : () -> ()
    %cst_43 = arith.constant dense<0.000000e+00> : vector<2x8x16xf32>
    %80 = tpu.matmul %79, %69, %cst_43 {dimension_numbers = #tpu.dot_dimension_numbers<[2], [1], [1], [2], [0, 0, 0, 1, 1, 2], [0], [0]>} : vector<2x8x8xf32>, vector<2x8x16xf32>, vector<2x8x16xf32> -> vector<2x8x16xf32>
    "tpu.trace_stop"() : () -> ()
    %81 = vector.shape_cast %80 : vector<2x8x16xf32> to vector<16x16xf32>
    %82 = vector.extract_strided_slice %25 {offsets = [0, 48], sizes = [16, 16], strides = [1, 1]} : vector<16x128xf32> to vector<16x16xf32>
    %83 = vector.shape_cast %82 : vector<16x16xf32> to vector<2x8x16xf32>
    %84 = vector.extract_strided_slice %26 {offsets = [0, 48], sizes = [16, 16], strides = [1, 1]} : vector<16x128xf32> to vector<16x16xf32>
    %85 = vector.shape_cast %84 : vector<16x16xf32> to vector<2x8x16xf32>
    %86 = vector.extract_strided_slice %27 {offsets = [0, 48], sizes = [16, 16], strides = [1, 1]} : vector<16x128xf32> to vector<16x16xf32>
    %87 = vector.shape_cast %86 : vector<16x16xf32> to vector<2x8x16xf32>
    "tpu.trace_start"() <{level = 10 : i32, message = "bid,bjd->bij"}> : () -> ()
    %cst_44 = arith.constant dense<0.000000e+00> : vector<2x8x8xf32>
    %88 = tpu.matmul %83, %85, %cst_44 {dimension_numbers = #tpu.dot_dimension_numbers<[2], [2], [1], [1], [0, 0, 0, 1, 1, 1], [0], [0]>} : vector<2x8x16xf32>, vector<2x8x16xf32>, vector<2x8x8xf32> -> vector<2x8x8xf32>
    "tpu.trace_stop"() : () -> ()
    %cst_45 = arith.constant dense<0xFF800000> : vector<2x8xf32>
    %89 = vector.multi_reduction <maximumf>, %88, %cst_45 [2] : vector<2x8x8xf32> to vector<2x8xf32>
    %90 = vector.shape_cast %89 : vector<2x8xf32> to vector<2x8x1xf32>
    %91 = vector.broadcast %90 : vector<2x8x1xf32> to vector<2x8x8xf32>
    %92 = arith.subf %88, %91 : vector<2x8x8xf32>
    %93 = math.exp %92 : vector<2x8x8xf32>
    %cst_46 = arith.constant dense<0.000000e+00> : vector<2x8xf32>
    %94 = vector.multi_reduction <add>, %93, %cst_46 [2] : vector<2x8x8xf32> to vector<2x8xf32>
    %95 = vector.shape_cast %94 : vector<2x8xf32> to vector<2x8x1xf32>
    %96 = vector.broadcast %95 : vector<2x8x1xf32> to vector<2x8x8xf32>
    %97 = arith.divf %93, %96 : vector<2x8x8xf32>
    "tpu.trace_start"() <{level = 10 : i32, message = "bij,bjd->bid"}> : () -> ()
    %cst_47 = arith.constant dense<0.000000e+00> : vector<2x8x16xf32>
    %98 = tpu.matmul %97, %87, %cst_47 {dimension_numbers = #tpu.dot_dimension_numbers<[2], [1], [1], [2], [0, 0, 0, 1, 1, 2], [0], [0]>} : vector<2x8x8xf32>, vector<2x8x16xf32>, vector<2x8x16xf32> -> vector<2x8x16xf32>
    "tpu.trace_stop"() : () -> ()
    %99 = vector.shape_cast %98 : vector<2x8x16xf32> to vector<16x16xf32>
    %100 = vector.extract_strided_slice %25 {offsets = [0, 64], sizes = [16, 16], strides = [1, 1]} : vector<16x128xf32> to vector<16x16xf32>
    %101 = vector.shape_cast %100 : vector<16x16xf32> to vector<2x8x16xf32>
    %102 = vector.extract_strided_slice %26 {offsets = [0, 64], sizes = [16, 16], strides = [1, 1]} : vector<16x128xf32> to vector<16x16xf32>
    %103 = vector.shape_cast %102 : vector<16x16xf32> to vector<2x8x16xf32>
    %104 = vector.extract_strided_slice %27 {offsets = [0, 64], sizes = [16, 16], strides = [1, 1]} : vector<16x128xf32> to vector<16x16xf32>
    %105 = vector.shape_cast %104 : vector<16x16xf32> to vector<2x8x16xf32>
    "tpu.trace_start"() <{level = 10 : i32, message = "bid,bjd->bij"}> : () -> ()
    %cst_48 = arith.constant dense<0.000000e+00> : vector<2x8x8xf32>
    %106 = tpu.matmul %101, %103, %cst_48 {dimension_numbers = #tpu.dot_dimension_numbers<[2], [2], [1], [1], [0, 0, 0, 1, 1, 1], [0], [0]>} : vector<2x8x16xf32>, vector<2x8x16xf32>, vector<2x8x8xf32> -> vector<2x8x8xf32>
    "tpu.trace_stop"() : () -> ()
    %cst_49 = arith.constant dense<0xFF800000> : vector<2x8xf32>
    %107 = vector.multi_reduction <maximumf>, %106, %cst_49 [2] : vector<2x8x8xf32> to vector<2x8xf32>
    %108 = vector.shape_cast %107 : vector<2x8xf32> to vector<2x8x1xf32>
    %109 = vector.broadcast %108 : vector<2x8x1xf32> to vector<2x8x8xf32>
    %110 = arith.subf %106, %109 : vector<2x8x8xf32>
    %111 = math.exp %110 : vector<2x8x8xf32>
    %cst_50 = arith.constant dense<0.000000e+00> : vector<2x8xf32>
    %112 = vector.multi_reduction <add>, %111, %cst_50 [2] : vector<2x8x8xf32> to vector<2x8xf32>
    %113 = vector.shape_cast %112 : vector<2x8xf32> to vector<2x8x1xf32>
    %114 = vector.broadcast %113 : vector<2x8x1xf32> to vector<2x8x8xf32>
    %115 = arith.divf %111, %114 : vector<2x8x8xf32>
    "tpu.trace_start"() <{level = 10 : i32, message = "bij,bjd->bid"}> : () -> ()
    %cst_51 = arith.constant dense<0.000000e+00> : vector<2x8x16xf32>
    %116 = tpu.matmul %115, %105, %cst_51 {dimension_numbers = #tpu.dot_dimension_numbers<[2], [1], [1], [2], [0, 0, 0, 1, 1, 2], [0], [0]>} : vector<2x8x8xf32>, vector<2x8x16xf32>, vector<2x8x16xf32> -> vector<2x8x16xf32>
    "tpu.trace_stop"() : () -> ()
    %117 = vector.shape_cast %116 : vector<2x8x16xf32> to vector<16x16xf32>
    %118 = vector.extract_strided_slice %25 {offsets = [0, 80], sizes = [16, 16], strides = [1, 1]} : vector<16x128xf32> to vector<16x16xf32>
    %119 = vector.shape_cast %118 : vector<16x16xf32> to vector<2x8x16xf32>
    %120 = vector.extract_strided_slice %26 {offsets = [0, 80], sizes = [16, 16], strides = [1, 1]} : vector<16x128xf32> to vector<16x16xf32>
    %121 = vector.shape_cast %120 : vector<16x16xf32> to vector<2x8x16xf32>
    %122 = vector.extract_strided_slice %27 {offsets = [0, 80], sizes = [16, 16], strides = [1, 1]} : vector<16x128xf32> to vector<16x16xf32>
    %123 = vector.shape_cast %122 : vector<16x16xf32> to vector<2x8x16xf32>
    "tpu.trace_start"() <{level = 10 : i32, message = "bid,bjd->bij"}> : () -> ()
    %cst_52 = arith.constant dense<0.000000e+00> : vector<2x8x8xf32>
    %124 = tpu.matmul %119, %121, %cst_52 {dimension_numbers = #tpu.dot_dimension_numbers<[2], [2], [1], [1], [0, 0, 0, 1, 1, 1], [0], [0]>} : vector<2x8x16xf32>, vector<2x8x16xf32>, vector<2x8x8xf32> -> vector<2x8x8xf32>
    "tpu.trace_stop"() : () -> ()
    %cst_53 = arith.constant dense<0xFF800000> : vector<2x8xf32>
    %125 = vector.multi_reduction <maximumf>, %124, %cst_53 [2] : vector<2x8x8xf32> to vector<2x8xf32>
    %126 = vector.shape_cast %125 : vector<2x8xf32> to vector<2x8x1xf32>
    %127 = vector.broadcast %126 : vector<2x8x1xf32> to vector<2x8x8xf32>
    %128 = arith.subf %124, %127 : vector<2x8x8xf32>
    %129 = math.exp %128 : vector<2x8x8xf32>
    %cst_54 = arith.constant dense<0.000000e+00> : vector<2x8xf32>
    %130 = vector.multi_reduction <add>, %129, %cst_54 [2] : vector<2x8x8xf32> to vector<2x8xf32>
    %131 = vector.shape_cast %130 : vector<2x8xf32> to vector<2x8x1xf32>
    %132 = vector.broadcast %131 : vector<2x8x1xf32> to vector<2x8x8xf32>
    %133 = arith.divf %129, %132 : vector<2x8x8xf32>
    "tpu.trace_start"() <{level = 10 : i32, message = "bij,bjd->bid"}> : () -> ()
    %cst_55 = arith.constant dense<0.000000e+00> : vector<2x8x16xf32>
    %134 = tpu.matmul %133, %123, %cst_55 {dimension_numbers = #tpu.dot_dimension_numbers<[2], [1], [1], [2], [0, 0, 0, 1, 1, 2], [0], [0]>} : vector<2x8x8xf32>, vector<2x8x16xf32>, vector<2x8x16xf32> -> vector<2x8x16xf32>
    "tpu.trace_stop"() : () -> ()
    %135 = vector.shape_cast %134 : vector<2x8x16xf32> to vector<16x16xf32>
    %136 = vector.extract_strided_slice %25 {offsets = [0, 96], sizes = [16, 16], strides = [1, 1]} : vector<16x128xf32> to vector<16x16xf32>
    %137 = vector.shape_cast %136 : vector<16x16xf32> to vector<2x8x16xf32>
    %138 = vector.extract_strided_slice %26 {offsets = [0, 96], sizes = [16, 16], strides = [1, 1]} : vector<16x128xf32> to vector<16x16xf32>
    %139 = vector.shape_cast %138 : vector<16x16xf32> to vector<2x8x16xf32>
    %140 = vector.extract_strided_slice %27 {offsets = [0, 96], sizes = [16, 16], strides = [1, 1]} : vector<16x128xf32> to vector<16x16xf32>
    %141 = vector.shape_cast %140 : vector<16x16xf32> to vector<2x8x16xf32>
    "tpu.trace_start"() <{level = 10 : i32, message = "bid,bjd->bij"}> : () -> ()
    %cst_56 = arith.constant dense<0.000000e+00> : vector<2x8x8xf32>
    %142 = tpu.matmul %137, %139, %cst_56 {dimension_numbers = #tpu.dot_dimension_numbers<[2], [2], [1], [1], [0, 0, 0, 1, 1, 1], [0], [0]>} : vector<2x8x16xf32>, vector<2x8x16xf32>, vector<2x8x8xf32> -> vector<2x8x8xf32>
    "tpu.trace_stop"() : () -> ()
    %cst_57 = arith.constant dense<0xFF800000> : vector<2x8xf32>
    %143 = vector.multi_reduction <maximumf>, %142, %cst_57 [2] : vector<2x8x8xf32> to vector<2x8xf32>
    %144 = vector.shape_cast %143 : vector<2x8xf32> to vector<2x8x1xf32>
    %145 = vector.broadcast %144 : vector<2x8x1xf32> to vector<2x8x8xf32>
    %146 = arith.subf %142, %145 : vector<2x8x8xf32>
    %147 = math.exp %146 : vector<2x8x8xf32>
    %cst_58 = arith.constant dense<0.000000e+00> : vector<2x8xf32>
    %148 = vector.multi_reduction <add>, %147, %cst_58 [2] : vector<2x8x8xf32> to vector<2x8xf32>
    %149 = vector.shape_cast %148 : vector<2x8xf32> to vector<2x8x1xf32>
    %150 = vector.broadcast %149 : vector<2x8x1xf32> to vector<2x8x8xf32>
    %151 = arith.divf %147, %150 : vector<2x8x8xf32>
    "tpu.trace_start"() <{level = 10 : i32, message = "bij,bjd->bid"}> : () -> ()
    %cst_59 = arith.constant dense<0.000000e+00> : vector<2x8x16xf32>
    %152 = tpu.matmul %151, %141, %cst_59 {dimension_numbers = #tpu.dot_dimension_numbers<[2], [1], [1], [2], [0, 0, 0, 1, 1, 2], [0], [0]>} : vector<2x8x8xf32>, vector<2x8x16xf32>, vector<2x8x16xf32> -> vector<2x8x16xf32>
    "tpu.trace_stop"() : () -> ()
    %153 = vector.shape_cast %152 : vector<2x8x16xf32> to vector<16x16xf32>
    %154 = vector.extract_strided_slice %25 {offsets = [0, 112], sizes = [16, 16], strides = [1, 1]} : vector<16x128xf32> to vector<16x16xf32>
    %155 = vector.shape_cast %154 : vector<16x16xf32> to vector<2x8x16xf32>
    %156 = vector.extract_strided_slice %26 {offsets = [0, 112], sizes = [16, 16], strides = [1, 1]} : vector<16x128xf32> to vector<16x16xf32>
    %157 = vector.shape_cast %156 : vector<16x16xf32> to vector<2x8x16xf32>
    %158 = vector.extract_strided_slice %27 {offsets = [0, 112], sizes = [16, 16], strides = [1, 1]} : vector<16x128xf32> to vector<16x16xf32>
    %159 = vector.shape_cast %158 : vector<16x16xf32> to vector<2x8x16xf32>
    "tpu.trace_start"() <{level = 10 : i32, message = "bid,bjd->bij"}> : () -> ()
    %cst_60 = arith.constant dense<0.000000e+00> : vector<2x8x8xf32>
    %160 = tpu.matmul %155, %157, %cst_60 {dimension_numbers = #tpu.dot_dimension_numbers<[2], [2], [1], [1], [0, 0, 0, 1, 1, 1], [0], [0]>} : vector<2x8x16xf32>, vector<2x8x16xf32>, vector<2x8x8xf32> -> vector<2x8x8xf32>
    "tpu.trace_stop"() : () -> ()
    %cst_61 = arith.constant dense<0xFF800000> : vector<2x8xf32>
    %161 = vector.multi_reduction <maximumf>, %160, %cst_61 [2] : vector<2x8x8xf32> to vector<2x8xf32>
    %162 = vector.shape_cast %161 : vector<2x8xf32> to vector<2x8x1xf32>
    %163 = vector.broadcast %162 : vector<2x8x1xf32> to vector<2x8x8xf32>
    %164 = arith.subf %160, %163 : vector<2x8x8xf32>
    %165 = math.exp %164 : vector<2x8x8xf32>
    %cst_62 = arith.constant dense<0.000000e+00> : vector<2x8xf32>
    %166 = vector.multi_reduction <add>, %165, %cst_62 [2] : vector<2x8x8xf32> to vector<2x8xf32>
    %167 = vector.shape_cast %166 : vector<2x8xf32> to vector<2x8x1xf32>
    %168 = vector.broadcast %167 : vector<2x8x1xf32> to vector<2x8x8xf32>
    %169 = arith.divf %165, %168 : vector<2x8x8xf32>
    "tpu.trace_start"() <{level = 10 : i32, message = "bij,bjd->bid"}> : () -> ()
    %cst_63 = arith.constant dense<0.000000e+00> : vector<2x8x16xf32>
    %170 = tpu.matmul %169, %159, %cst_63 {dimension_numbers = #tpu.dot_dimension_numbers<[2], [1], [1], [2], [0, 0, 0, 1, 1, 2], [0], [0]>} : vector<2x8x8xf32>, vector<2x8x16xf32>, vector<2x8x16xf32> -> vector<2x8x16xf32>
    "tpu.trace_stop"() : () -> ()
    %171 = vector.shape_cast %170 : vector<2x8x16xf32> to vector<16x16xf32>
    %172 = tpu.concatenate %45, %63, %81, %99, %117, %135, %153, %171 in 1 : vector<16x16xf32>, vector<16x16xf32>, vector<16x16xf32>, vector<16x16xf32>, vector<16x16xf32>, vector<16x16xf32>, vector<16x16xf32>, vector<16x16xf32> -> vector<16x128xf32>
    %173 = arith.truncf %172 : vector<16x128xf32> to vector<16x128xbf16>
    %cst_64 = arith.constant dense<0.000000e+00> : vector<16x128xf32>
    %174 = tpu.matmul %173, %11, %cst_64 {dimension_numbers = #tpu.dot_dimension_numbers<[1], [0], [0], [1], [0, 0, 1, 1], [], []>} : vector<16x128xbf16>, vector<128x128xbf16>, vector<16x128xf32> -> vector<16x128xf32>
    %175 = vector.broadcast %12 : vector<1x128xf32> to vector<16x128xf32>
    %176 = arith.addf %174, %175 : vector<16x128xf32>
    %177 = arith.addf %8, %176 : vector<16x128xf32>
    %cst_65 = arith.constant dense<0.000000e+00> : vector<16xf32>
    %178 = vector.multi_reduction <add>, %177, %cst_65 [1] : vector<16x128xf32> to vector<16xf32>
    %179 = vector.shape_cast %178 : vector<16xf32> to vector<16x1xf32>
    %cst_66 = arith.constant 1.280000e+02 : f32
    %180 = vector.broadcast %cst_66 : f32 to vector<16x1xf32>
    %181 = arith.divf %179, %180 : vector<16x1xf32>
    %182 = vector.broadcast %181 : vector<16x1xf32> to vector<16x128xf32>
    %183 = arith.subf %177, %182 : vector<16x128xf32>
    %184 = arith.mulf %183, %183 : vector<16x128xf32>
    %cst_67 = arith.constant dense<0.000000e+00> : vector<16xf32>
    %185 = vector.multi_reduction <add>, %184, %cst_67 [1] : vector<16x128xf32> to vector<16xf32>
    %186 = vector.shape_cast %185 : vector<16xf32> to vector<16x1xf32>
    %cst_68 = arith.constant 1.280000e+02 : f32
    %187 = vector.broadcast %cst_68 : f32 to vector<16x1xf32>
    %188 = arith.divf %186, %187 : vector<16x1xf32>
    %189 = vector.broadcast %181 : vector<16x1xf32> to vector<16x128xf32>
    %190 = arith.subf %177, %189 : vector<16x128xf32>
    %cst_69 = arith.constant 9.99999974E-6 : f32
    %191 = vector.broadcast %cst_69 : f32 to vector<16x1xf32>
    %192 = arith.addf %188, %191 : vector<16x1xf32>
    %193 = math.rsqrt %192 : vector<16x1xf32>
    %194 = vector.broadcast %193 : vector<16x1xf32> to vector<16x128xf32>
    %195 = arith.mulf %190, %194 : vector<16x128xf32>
    %196 = vector.broadcast %13 : vector<1x128xf32> to vector<16x128xf32>
    %197 = arith.mulf %195, %196 : vector<16x128xf32>
    %198 = vector.broadcast %14 : vector<1x128xf32> to vector<16x128xf32>
    %199 = arith.addf %197, %198 : vector<16x128xf32>
    %200 = arith.truncf %199 : vector<16x128xf32> to vector<16x128xbf16>
    %cst_70 = arith.constant dense<0.000000e+00> : vector<16x512xf32>
    %201 = tpu.matmul %200, %15, %cst_70 {dimension_numbers = #tpu.dot_dimension_numbers<[1], [0], [0], [1], [0, 0, 1, 1], [], []>} : vector<16x128xbf16>, vector<128x512xbf16>, vector<16x512xf32> -> vector<16x512xf32>
    %202 = vector.broadcast %16 : vector<1x512xf32> to vector<16x512xf32>
    %203 = arith.addf %201, %202 : vector<16x512xf32>
    %cst_71 = arith.constant 0.000000e+00 : f32
    %204 = vector.broadcast %cst_71 : f32 to vector<16x512xf32>
    %205 = arith.maximumf %203, %204 : vector<16x512xf32>
    %206 = arith.truncf %205 : vector<16x512xf32> to vector<16x512xbf16>
    %cst_72 = arith.constant dense<0.000000e+00> : vector<16x128xf32>
    %207 = tpu.matmul %206, %17, %cst_72 {dimension_numbers = #tpu.dot_dimension_numbers<[1], [0], [0], [1], [0, 0, 1, 1], [], []>} : vector<16x512xbf16>, vector<512x128xbf16>, vector<16x128xf32> -> vector<16x128xf32>
    %208 = vector.broadcast %18 : vector<1x128xf32> to vector<16x128xf32>
    %209 = arith.addf %207, %208 : vector<16x128xf32>
    %210 = arith.addf %199, %209 : vector<16x128xf32>
    %cst_73 = arith.constant dense<0.000000e+00> : vector<16xf32>
    %211 = vector.multi_reduction <add>, %210, %cst_73 [1] : vector<16x128xf32> to vector<16xf32>
    %212 = vector.shape_cast %211 : vector<16xf32> to vector<16x1xf32>
    %cst_74 = arith.constant 1.280000e+02 : f32
    %213 = vector.broadcast %cst_74 : f32 to vector<16x1xf32>
    %214 = arith.divf %212, %213 : vector<16x1xf32>
    %215 = vector.broadcast %214 : vector<16x1xf32> to vector<16x128xf32>
    %216 = arith.subf %210, %215 : vector<16x128xf32>
    %217 = arith.mulf %216, %216 : vector<16x128xf32>
    %cst_75 = arith.constant dense<0.000000e+00> : vector<16xf32>
    %218 = vector.multi_reduction <add>, %217, %cst_75 [1] : vector<16x128xf32> to vector<16xf32>
    %219 = vector.shape_cast %218 : vector<16xf32> to vector<16x1xf32>
    %cst_76 = arith.constant 1.280000e+02 : f32
    %220 = vector.broadcast %cst_76 : f32 to vector<16x1xf32>
    %221 = arith.divf %219, %220 : vector<16x1xf32>
    %222 = vector.broadcast %214 : vector<16x1xf32> to vector<16x128xf32>
    %223 = arith.subf %210, %222 : vector<16x128xf32>
    %cst_77 = arith.constant 9.99999974E-6 : f32
    %224 = vector.broadcast %cst_77 : f32 to vector<16x1xf32>
    %225 = arith.addf %221, %224 : vector<16x1xf32>
    %226 = math.rsqrt %225 : vector<16x1xf32>
    %227 = vector.broadcast %226 : vector<16x1xf32> to vector<16x128xf32>
    %228 = arith.mulf %223, %227 : vector<16x128xf32>
    %229 = vector.broadcast %19 : vector<1x128xf32> to vector<16x128xf32>
    %230 = arith.mulf %228, %229 : vector<16x128xf32>
    %231 = vector.broadcast %20 : vector<1x128xf32> to vector<16x128xf32>
    %232 = arith.addf %230, %231 : vector<16x128xf32>
    %c0_78 = arith.constant 0 : index
    %c0_79 = arith.constant 0 : index
    %233 = vector.load %arg16[%c0_78, %c0_79] : memref<128x384xbf16, #tpu.memory_space<vmem>>, vector<128x384xbf16>
    %c0_80 = arith.constant 0 : index
    %c0_81 = arith.constant 0 : index
    %234 = vector.load %arg17[%c0_80, %c0_81] : memref<1x384xf32, #tpu.memory_space<vmem>>, vector<1x384xf32>
    %c0_82 = arith.constant 0 : index
    %c0_83 = arith.constant 0 : index
    %235 = vector.load %arg18[%c0_82, %c0_83] : memref<128x128xbf16, #tpu.memory_space<vmem>>, vector<128x128xbf16>
    %c0_84 = arith.constant 0 : index
    %c0_85 = arith.constant 0 : index
    %236 = vector.load %arg19[%c0_84, %c0_85] : memref<1x128xf32, #tpu.memory_space<vmem>>, vector<1x128xf32>
    %c0_86 = arith.constant 0 : index
    %c0_87 = arith.constant 0 : index
    %237 = vector.load %arg20[%c0_86, %c0_87] : memref<1x128xf32, #tpu.memory_space<vmem>>, vector<1x128xf32>
    %c0_88 = arith.constant 0 : index
    %c0_89 = arith.constant 0 : index
    %238 = vector.load %arg21[%c0_88, %c0_89] : memref<1x128xf32, #tpu.memory_space<vmem>>, vector<1x128xf32>
    %c0_90 = arith.constant 0 : index
    %c0_91 = arith.constant 0 : index
    %239 = vector.load %arg22[%c0_90, %c0_91] : memref<128x512xbf16, #tpu.memory_space<vmem>>, vector<128x512xbf16>
    %c0_92 = arith.constant 0 : index
    %c0_93 = arith.constant 0 : index
    %240 = vector.load %arg23[%c0_92, %c0_93] : memref<1x512xf32, #tpu.memory_space<vmem>>, vector<1x512xf32>
    %c0_94 = arith.constant 0 : index
    %c0_95 = arith.constant 0 : index
    %241 = vector.load %arg24[%c0_94, %c0_95] : memref<512x128xbf16, #tpu.memory_space<vmem>>, vector<512x128xbf16>
    %c0_96 = arith.constant 0 : index
    %c0_97 = arith.constant 0 : index
    %242 = vector.load %arg25[%c0_96, %c0_97] : memref<1x128xf32, #tpu.memory_space<vmem>>, vector<1x128xf32>
    %c0_98 = arith.constant 0 : index
    %c0_99 = arith.constant 0 : index
    %243 = vector.load %arg26[%c0_98, %c0_99] : memref<1x128xf32, #tpu.memory_space<vmem>>, vector<1x128xf32>
    %c0_100 = arith.constant 0 : index
    %c0_101 = arith.constant 0 : index
    %244 = vector.load %arg27[%c0_100, %c0_101] : memref<1x128xf32, #tpu.memory_space<vmem>>, vector<1x128xf32>
    %245 = arith.truncf %232 : vector<16x128xf32> to vector<16x128xbf16>
    %cst_102 = arith.constant dense<0.000000e+00> : vector<16x384xf32>
    %246 = tpu.matmul %245, %233, %cst_102 {dimension_numbers = #tpu.dot_dimension_numbers<[1], [0], [0], [1], [0, 0, 1, 1], [], []>} : vector<16x128xbf16>, vector<128x384xbf16>, vector<16x384xf32> -> vector<16x384xf32>
    %247 = vector.broadcast %234 : vector<1x384xf32> to vector<16x384xf32>
    %248 = arith.addf %246, %247 : vector<16x384xf32>
    %249 = vector.extract_strided_slice %248 {offsets = [0, 0], sizes = [16, 128], strides = [1, 1]} : vector<16x384xf32> to vector<16x128xf32>
    %250 = vector.extract_strided_slice %248 {offsets = [0, 128], sizes = [16, 128], strides = [1, 1]} : vector<16x384xf32> to vector<16x128xf32>
    %251 = vector.extract_strided_slice %248 {offsets = [0, 256], sizes = [16, 128], strides = [1, 1]} : vector<16x384xf32> to vector<16x128xf32>
    %252 = vector.extract_strided_slice %249 {offsets = [0, 0], sizes = [16, 16], strides = [1, 1]} : vector<16x128xf32> to vector<16x16xf32>
    %253 = vector.shape_cast %252 : vector<16x16xf32> to vector<2x8x16xf32>
    %254 = vector.extract_strided_slice %250 {offsets = [0, 0], sizes = [16, 16], strides = [1, 1]} : vector<16x128xf32> to vector<16x16xf32>
    %255 = vector.shape_cast %254 : vector<16x16xf32> to vector<2x8x16xf32>
    %256 = vector.extract_strided_slice %251 {offsets = [0, 0], sizes = [16, 16], strides = [1, 1]} : vector<16x128xf32> to vector<16x16xf32>
    %257 = vector.shape_cast %256 : vector<16x16xf32> to vector<2x8x16xf32>
    "tpu.trace_start"() <{level = 10 : i32, message = "bid,bjd->bij"}> : () -> ()
    %cst_103 = arith.constant dense<0.000000e+00> : vector<2x8x8xf32>
    %258 = tpu.matmul %253, %255, %cst_103 {dimension_numbers = #tpu.dot_dimension_numbers<[2], [2], [1], [1], [0, 0, 0, 1, 1, 1], [0], [0]>} : vector<2x8x16xf32>, vector<2x8x16xf32>, vector<2x8x8xf32> -> vector<2x8x8xf32>
    "tpu.trace_stop"() : () -> ()
    %cst_104 = arith.constant dense<0xFF800000> : vector<2x8xf32>
    %259 = vector.multi_reduction <maximumf>, %258, %cst_104 [2] : vector<2x8x8xf32> to vector<2x8xf32>
    %260 = vector.shape_cast %259 : vector<2x8xf32> to vector<2x8x1xf32>
    %261 = vector.broadcast %260 : vector<2x8x1xf32> to vector<2x8x8xf32>
    %262 = arith.subf %258, %261 : vector<2x8x8xf32>
    %263 = math.exp %262 : vector<2x8x8xf32>
    %cst_105 = arith.constant dense<0.000000e+00> : vector<2x8xf32>
    %264 = vector.multi_reduction <add>, %263, %cst_105 [2] : vector<2x8x8xf32> to vector<2x8xf32>
    %265 = vector.shape_cast %264 : vector<2x8xf32> to vector<2x8x1xf32>
    %266 = vector.broadcast %265 : vector<2x8x1xf32> to vector<2x8x8xf32>
    %267 = arith.divf %263, %266 : vector<2x8x8xf32>
    "tpu.trace_start"() <{level = 10 : i32, message = "bij,bjd->bid"}> : () -> ()
    %cst_106 = arith.constant dense<0.000000e+00> : vector<2x8x16xf32>
    %268 = tpu.matmul %267, %257, %cst_106 {dimension_numbers = #tpu.dot_dimension_numbers<[2], [1], [1], [2], [0, 0, 0, 1, 1, 2], [0], [0]>} : vector<2x8x8xf32>, vector<2x8x16xf32>, vector<2x8x16xf32> -> vector<2x8x16xf32>
    "tpu.trace_stop"() : () -> ()
    %269 = vector.shape_cast %268 : vector<2x8x16xf32> to vector<16x16xf32>
    %270 = vector.extract_strided_slice %249 {offsets = [0, 16], sizes = [16, 16], strides = [1, 1]} : vector<16x128xf32> to vector<16x16xf32>
    %271 = vector.shape_cast %270 : vector<16x16xf32> to vector<2x8x16xf32>
    %272 = vector.extract_strided_slice %250 {offsets = [0, 16], sizes = [16, 16], strides = [1, 1]} : vector<16x128xf32> to vector<16x16xf32>
    %273 = vector.shape_cast %272 : vector<16x16xf32> to vector<2x8x16xf32>
    %274 = vector.extract_strided_slice %251 {offsets = [0, 16], sizes = [16, 16], strides = [1, 1]} : vector<16x128xf32> to vector<16x16xf32>
    %275 = vector.shape_cast %274 : vector<16x16xf32> to vector<2x8x16xf32>
    "tpu.trace_start"() <{level = 10 : i32, message = "bid,bjd->bij"}> : () -> ()
    %cst_107 = arith.constant dense<0.000000e+00> : vector<2x8x8xf32>
    %276 = tpu.matmul %271, %273, %cst_107 {dimension_numbers = #tpu.dot_dimension_numbers<[2], [2], [1], [1], [0, 0, 0, 1, 1, 1], [0], [0]>} : vector<2x8x16xf32>, vector<2x8x16xf32>, vector<2x8x8xf32> -> vector<2x8x8xf32>
    "tpu.trace_stop"() : () -> ()
    %cst_108 = arith.constant dense<0xFF800000> : vector<2x8xf32>
    %277 = vector.multi_reduction <maximumf>, %276, %cst_108 [2] : vector<2x8x8xf32> to vector<2x8xf32>
    %278 = vector.shape_cast %277 : vector<2x8xf32> to vector<2x8x1xf32>
    %279 = vector.broadcast %278 : vector<2x8x1xf32> to vector<2x8x8xf32>
    %280 = arith.subf %276, %279 : vector<2x8x8xf32>
    %281 = math.exp %280 : vector<2x8x8xf32>
    %cst_109 = arith.constant dense<0.000000e+00> : vector<2x8xf32>
    %282 = vector.multi_reduction <add>, %281, %cst_109 [2] : vector<2x8x8xf32> to vector<2x8xf32>
    %283 = vector.shape_cast %282 : vector<2x8xf32> to vector<2x8x1xf32>
    %284 = vector.broadcast %283 : vector<2x8x1xf32> to vector<2x8x8xf32>
    %285 = arith.divf %281, %284 : vector<2x8x8xf32>
    "tpu.trace_start"() <{level = 10 : i32, message = "bij,bjd->bid"}> : () -> ()
    %cst_110 = arith.constant dense<0.000000e+00> : vector<2x8x16xf32>
    %286 = tpu.matmul %285, %275, %cst_110 {dimension_numbers = #tpu.dot_dimension_numbers<[2], [1], [1], [2], [0, 0, 0, 1, 1, 2], [0], [0]>} : vector<2x8x8xf32>, vector<2x8x16xf32>, vector<2x8x16xf32> -> vector<2x8x16xf32>
    "tpu.trace_stop"() : () -> ()
    %287 = vector.shape_cast %286 : vector<2x8x16xf32> to vector<16x16xf32>
    %288 = vector.extract_strided_slice %249 {offsets = [0, 32], sizes = [16, 16], strides = [1, 1]} : vector<16x128xf32> to vector<16x16xf32>
    %289 = vector.shape_cast %288 : vector<16x16xf32> to vector<2x8x16xf32>
    %290 = vector.extract_strided_slice %250 {offsets = [0, 32], sizes = [16, 16], strides = [1, 1]} : vector<16x128xf32> to vector<16x16xf32>
    %291 = vector.shape_cast %290 : vector<16x16xf32> to vector<2x8x16xf32>
    %292 = vector.extract_strided_slice %251 {offsets = [0, 32], sizes = [16, 16], strides = [1, 1]} : vector<16x128xf32> to vector<16x16xf32>
    %293 = vector.shape_cast %292 : vector<16x16xf32> to vector<2x8x16xf32>
    "tpu.trace_start"() <{level = 10 : i32, message = "bid,bjd->bij"}> : () -> ()
    %cst_111 = arith.constant dense<0.000000e+00> : vector<2x8x8xf32>
    %294 = tpu.matmul %289, %291, %cst_111 {dimension_numbers = #tpu.dot_dimension_numbers<[2], [2], [1], [1], [0, 0, 0, 1, 1, 1], [0], [0]>} : vector<2x8x16xf32>, vector<2x8x16xf32>, vector<2x8x8xf32> -> vector<2x8x8xf32>
    "tpu.trace_stop"() : () -> ()
    %cst_112 = arith.constant dense<0xFF800000> : vector<2x8xf32>
    %295 = vector.multi_reduction <maximumf>, %294, %cst_112 [2] : vector<2x8x8xf32> to vector<2x8xf32>
    %296 = vector.shape_cast %295 : vector<2x8xf32> to vector<2x8x1xf32>
    %297 = vector.broadcast %296 : vector<2x8x1xf32> to vector<2x8x8xf32>
    %298 = arith.subf %294, %297 : vector<2x8x8xf32>
    %299 = math.exp %298 : vector<2x8x8xf32>
    %cst_113 = arith.constant dense<0.000000e+00> : vector<2x8xf32>
    %300 = vector.multi_reduction <add>, %299, %cst_113 [2] : vector<2x8x8xf32> to vector<2x8xf32>
    %301 = vector.shape_cast %300 : vector<2x8xf32> to vector<2x8x1xf32>
    %302 = vector.broadcast %301 : vector<2x8x1xf32> to vector<2x8x8xf32>
    %303 = arith.divf %299, %302 : vector<2x8x8xf32>
    "tpu.trace_start"() <{level = 10 : i32, message = "bij,bjd->bid"}> : () -> ()
    %cst_114 = arith.constant dense<0.000000e+00> : vector<2x8x16xf32>
    %304 = tpu.matmul %303, %293, %cst_114 {dimension_numbers = #tpu.dot_dimension_numbers<[2], [1], [1], [2], [0, 0, 0, 1, 1, 2], [0], [0]>} : vector<2x8x8xf32>, vector<2x8x16xf32>, vector<2x8x16xf32> -> vector<2x8x16xf32>
    "tpu.trace_stop"() : () -> ()
    %305 = vector.shape_cast %304 : vector<2x8x16xf32> to vector<16x16xf32>
    %306 = vector.extract_strided_slice %249 {offsets = [0, 48], sizes = [16, 16], strides = [1, 1]} : vector<16x128xf32> to vector<16x16xf32>
    %307 = vector.shape_cast %306 : vector<16x16xf32> to vector<2x8x16xf32>
    %308 = vector.extract_strided_slice %250 {offsets = [0, 48], sizes = [16, 16], strides = [1, 1]} : vector<16x128xf32> to vector<16x16xf32>
    %309 = vector.shape_cast %308 : vector<16x16xf32> to vector<2x8x16xf32>
    %310 = vector.extract_strided_slice %251 {offsets = [0, 48], sizes = [16, 16], strides = [1, 1]} : vector<16x128xf32> to vector<16x16xf32>
    %311 = vector.shape_cast %310 : vector<16x16xf32> to vector<2x8x16xf32>
    "tpu.trace_start"() <{level = 10 : i32, message = "bid,bjd->bij"}> : () -> ()
    %cst_115 = arith.constant dense<0.000000e+00> : vector<2x8x8xf32>
    %312 = tpu.matmul %307, %309, %cst_115 {dimension_numbers = #tpu.dot_dimension_numbers<[2], [2], [1], [1], [0, 0, 0, 1, 1, 1], [0], [0]>} : vector<2x8x16xf32>, vector<2x8x16xf32>, vector<2x8x8xf32> -> vector<2x8x8xf32>
    "tpu.trace_stop"() : () -> ()
    %cst_116 = arith.constant dense<0xFF800000> : vector<2x8xf32>
    %313 = vector.multi_reduction <maximumf>, %312, %cst_116 [2] : vector<2x8x8xf32> to vector<2x8xf32>
    %314 = vector.shape_cast %313 : vector<2x8xf32> to vector<2x8x1xf32>
    %315 = vector.broadcast %314 : vector<2x8x1xf32> to vector<2x8x8xf32>
    %316 = arith.subf %312, %315 : vector<2x8x8xf32>
    %317 = math.exp %316 : vector<2x8x8xf32>
    %cst_117 = arith.constant dense<0.000000e+00> : vector<2x8xf32>
    %318 = vector.multi_reduction <add>, %317, %cst_117 [2] : vector<2x8x8xf32> to vector<2x8xf32>
    %319 = vector.shape_cast %318 : vector<2x8xf32> to vector<2x8x1xf32>
    %320 = vector.broadcast %319 : vector<2x8x1xf32> to vector<2x8x8xf32>
    %321 = arith.divf %317, %320 : vector<2x8x8xf32>
    "tpu.trace_start"() <{level = 10 : i32, message = "bij,bjd->bid"}> : () -> ()
    %cst_118 = arith.constant dense<0.000000e+00> : vector<2x8x16xf32>
    %322 = tpu.matmul %321, %311, %cst_118 {dimension_numbers = #tpu.dot_dimension_numbers<[2], [1], [1], [2], [0, 0, 0, 1, 1, 2], [0], [0]>} : vector<2x8x8xf32>, vector<2x8x16xf32>, vector<2x8x16xf32> -> vector<2x8x16xf32>
    "tpu.trace_stop"() : () -> ()
    %323 = vector.shape_cast %322 : vector<2x8x16xf32> to vector<16x16xf32>
    %324 = vector.extract_strided_slice %249 {offsets = [0, 64], sizes = [16, 16], strides = [1, 1]} : vector<16x128xf32> to vector<16x16xf32>
    %325 = vector.shape_cast %324 : vector<16x16xf32> to vector<2x8x16xf32>
    %326 = vector.extract_strided_slice %250 {offsets = [0, 64], sizes = [16, 16], strides = [1, 1]} : vector<16x128xf32> to vector<16x16xf32>
    %327 = vector.shape_cast %326 : vector<16x16xf32> to vector<2x8x16xf32>
    %328 = vector.extract_strided_slice %251 {offsets = [0, 64], sizes = [16, 16], strides = [1, 1]} : vector<16x128xf32> to vector<16x16xf32>
    %329 = vector.shape_cast %328 : vector<16x16xf32> to vector<2x8x16xf32>
    "tpu.trace_start"() <{level = 10 : i32, message = "bid,bjd->bij"}> : () -> ()
    %cst_119 = arith.constant dense<0.000000e+00> : vector<2x8x8xf32>
    %330 = tpu.matmul %325, %327, %cst_119 {dimension_numbers = #tpu.dot_dimension_numbers<[2], [2], [1], [1], [0, 0, 0, 1, 1, 1], [0], [0]>} : vector<2x8x16xf32>, vector<2x8x16xf32>, vector<2x8x8xf32> -> vector<2x8x8xf32>
    "tpu.trace_stop"() : () -> ()
    %cst_120 = arith.constant dense<0xFF800000> : vector<2x8xf32>
    %331 = vector.multi_reduction <maximumf>, %330, %cst_120 [2] : vector<2x8x8xf32> to vector<2x8xf32>
    %332 = vector.shape_cast %331 : vector<2x8xf32> to vector<2x8x1xf32>
    %333 = vector.broadcast %332 : vector<2x8x1xf32> to vector<2x8x8xf32>
    %334 = arith.subf %330, %333 : vector<2x8x8xf32>
    %335 = math.exp %334 : vector<2x8x8xf32>
    %cst_121 = arith.constant dense<0.000000e+00> : vector<2x8xf32>
    %336 = vector.multi_reduction <add>, %335, %cst_121 [2] : vector<2x8x8xf32> to vector<2x8xf32>
    %337 = vector.shape_cast %336 : vector<2x8xf32> to vector<2x8x1xf32>
    %338 = vector.broadcast %337 : vector<2x8x1xf32> to vector<2x8x8xf32>
    %339 = arith.divf %335, %338 : vector<2x8x8xf32>
    "tpu.trace_start"() <{level = 10 : i32, message = "bij,bjd->bid"}> : () -> ()
    %cst_122 = arith.constant dense<0.000000e+00> : vector<2x8x16xf32>
    %340 = tpu.matmul %339, %329, %cst_122 {dimension_numbers = #tpu.dot_dimension_numbers<[2], [1], [1], [2], [0, 0, 0, 1, 1, 2], [0], [0]>} : vector<2x8x8xf32>, vector<2x8x16xf32>, vector<2x8x16xf32> -> vector<2x8x16xf32>
    "tpu.trace_stop"() : () -> ()
    %341 = vector.shape_cast %340 : vector<2x8x16xf32> to vector<16x16xf32>
    %342 = vector.extract_strided_slice %249 {offsets = [0, 80], sizes = [16, 16], strides = [1, 1]} : vector<16x128xf32> to vector<16x16xf32>
    %343 = vector.shape_cast %342 : vector<16x16xf32> to vector<2x8x16xf32>
    %344 = vector.extract_strided_slice %250 {offsets = [0, 80], sizes = [16, 16], strides = [1, 1]} : vector<16x128xf32> to vector<16x16xf32>
    %345 = vector.shape_cast %344 : vector<16x16xf32> to vector<2x8x16xf32>
    %346 = vector.extract_strided_slice %251 {offsets = [0, 80], sizes = [16, 16], strides = [1, 1]} : vector<16x128xf32> to vector<16x16xf32>
    %347 = vector.shape_cast %346 : vector<16x16xf32> to vector<2x8x16xf32>
    "tpu.trace_start"() <{level = 10 : i32, message = "bid,bjd->bij"}> : () -> ()
    %cst_123 = arith.constant dense<0.000000e+00> : vector<2x8x8xf32>
    %348 = tpu.matmul %343, %345, %cst_123 {dimension_numbers = #tpu.dot_dimension_numbers<[2], [2], [1], [1], [0, 0, 0, 1, 1, 1], [0], [0]>} : vector<2x8x16xf32>, vector<2x8x16xf32>, vector<2x8x8xf32> -> vector<2x8x8xf32>
    "tpu.trace_stop"() : () -> ()
    %cst_124 = arith.constant dense<0xFF800000> : vector<2x8xf32>
    %349 = vector.multi_reduction <maximumf>, %348, %cst_124 [2] : vector<2x8x8xf32> to vector<2x8xf32>
    %350 = vector.shape_cast %349 : vector<2x8xf32> to vector<2x8x1xf32>
    %351 = vector.broadcast %350 : vector<2x8x1xf32> to vector<2x8x8xf32>
    %352 = arith.subf %348, %351 : vector<2x8x8xf32>
    %353 = math.exp %352 : vector<2x8x8xf32>
    %cst_125 = arith.constant dense<0.000000e+00> : vector<2x8xf32>
    %354 = vector.multi_reduction <add>, %353, %cst_125 [2] : vector<2x8x8xf32> to vector<2x8xf32>
    %355 = vector.shape_cast %354 : vector<2x8xf32> to vector<2x8x1xf32>
    %356 = vector.broadcast %355 : vector<2x8x1xf32> to vector<2x8x8xf32>
    %357 = arith.divf %353, %356 : vector<2x8x8xf32>
    "tpu.trace_start"() <{level = 10 : i32, message = "bij,bjd->bid"}> : () -> ()
    %cst_126 = arith.constant dense<0.000000e+00> : vector<2x8x16xf32>
    %358 = tpu.matmul %357, %347, %cst_126 {dimension_numbers = #tpu.dot_dimension_numbers<[2], [1], [1], [2], [0, 0, 0, 1, 1, 2], [0], [0]>} : vector<2x8x8xf32>, vector<2x8x16xf32>, vector<2x8x16xf32> -> vector<2x8x16xf32>
    "tpu.trace_stop"() : () -> ()
    %359 = vector.shape_cast %358 : vector<2x8x16xf32> to vector<16x16xf32>
    %360 = vector.extract_strided_slice %249 {offsets = [0, 96], sizes = [16, 16], strides = [1, 1]} : vector<16x128xf32> to vector<16x16xf32>
    %361 = vector.shape_cast %360 : vector<16x16xf32> to vector<2x8x16xf32>
    %362 = vector.extract_strided_slice %250 {offsets = [0, 96], sizes = [16, 16], strides = [1, 1]} : vector<16x128xf32> to vector<16x16xf32>
    %363 = vector.shape_cast %362 : vector<16x16xf32> to vector<2x8x16xf32>
    %364 = vector.extract_strided_slice %251 {offsets = [0, 96], sizes = [16, 16], strides = [1, 1]} : vector<16x128xf32> to vector<16x16xf32>
    %365 = vector.shape_cast %364 : vector<16x16xf32> to vector<2x8x16xf32>
    "tpu.trace_start"() <{level = 10 : i32, message = "bid,bjd->bij"}> : () -> ()
    %cst_127 = arith.constant dense<0.000000e+00> : vector<2x8x8xf32>
    %366 = tpu.matmul %361, %363, %cst_127 {dimension_numbers = #tpu.dot_dimension_numbers<[2], [2], [1], [1], [0, 0, 0, 1, 1, 1], [0], [0]>} : vector<2x8x16xf32>, vector<2x8x16xf32>, vector<2x8x8xf32> -> vector<2x8x8xf32>
    "tpu.trace_stop"() : () -> ()
    %cst_128 = arith.constant dense<0xFF800000> : vector<2x8xf32>
    %367 = vector.multi_reduction <maximumf>, %366, %cst_128 [2] : vector<2x8x8xf32> to vector<2x8xf32>
    %368 = vector.shape_cast %367 : vector<2x8xf32> to vector<2x8x1xf32>
    %369 = vector.broadcast %368 : vector<2x8x1xf32> to vector<2x8x8xf32>
    %370 = arith.subf %366, %369 : vector<2x8x8xf32>
    %371 = math.exp %370 : vector<2x8x8xf32>
    %cst_129 = arith.constant dense<0.000000e+00> : vector<2x8xf32>
    %372 = vector.multi_reduction <add>, %371, %cst_129 [2] : vector<2x8x8xf32> to vector<2x8xf32>
    %373 = vector.shape_cast %372 : vector<2x8xf32> to vector<2x8x1xf32>
    %374 = vector.broadcast %373 : vector<2x8x1xf32> to vector<2x8x8xf32>
    %375 = arith.divf %371, %374 : vector<2x8x8xf32>
    "tpu.trace_start"() <{level = 10 : i32, message = "bij,bjd->bid"}> : () -> ()
    %cst_130 = arith.constant dense<0.000000e+00> : vector<2x8x16xf32>
    %376 = tpu.matmul %375, %365, %cst_130 {dimension_numbers = #tpu.dot_dimension_numbers<[2], [1], [1], [2], [0, 0, 0, 1, 1, 2], [0], [0]>} : vector<2x8x8xf32>, vector<2x8x16xf32>, vector<2x8x16xf32> -> vector<2x8x16xf32>
    "tpu.trace_stop"() : () -> ()
    %377 = vector.shape_cast %376 : vector<2x8x16xf32> to vector<16x16xf32>
    %378 = vector.extract_strided_slice %249 {offsets = [0, 112], sizes = [16, 16], strides = [1, 1]} : vector<16x128xf32> to vector<16x16xf32>
    %379 = vector.shape_cast %378 : vector<16x16xf32> to vector<2x8x16xf32>
    %380 = vector.extract_strided_slice %250 {offsets = [0, 112], sizes = [16, 16], strides = [1, 1]} : vector<16x128xf32> to vector<16x16xf32>
    %381 = vector.shape_cast %380 : vector<16x16xf32> to vector<2x8x16xf32>
    %382 = vector.extract_strided_slice %251 {offsets = [0, 112], sizes = [16, 16], strides = [1, 1]} : vector<16x128xf32> to vector<16x16xf32>
    %383 = vector.shape_cast %382 : vector<16x16xf32> to vector<2x8x16xf32>
    "tpu.trace_start"() <{level = 10 : i32, message = "bid,bjd->bij"}> : () -> ()
    %cst_131 = arith.constant dense<0.000000e+00> : vector<2x8x8xf32>
    %384 = tpu.matmul %379, %381, %cst_131 {dimension_numbers = #tpu.dot_dimension_numbers<[2], [2], [1], [1], [0, 0, 0, 1, 1, 1], [0], [0]>} : vector<2x8x16xf32>, vector<2x8x16xf32>, vector<2x8x8xf32> -> vector<2x8x8xf32>
    "tpu.trace_stop"() : () -> ()
    %cst_132 = arith.constant dense<0xFF800000> : vector<2x8xf32>
    %385 = vector.multi_reduction <maximumf>, %384, %cst_132 [2] : vector<2x8x8xf32> to vector<2x8xf32>
    %386 = vector.shape_cast %385 : vector<2x8xf32> to vector<2x8x1xf32>
    %387 = vector.broadcast %386 : vector<2x8x1xf32> to vector<2x8x8xf32>
    %388 = arith.subf %384, %387 : vector<2x8x8xf32>
    %389 = math.exp %388 : vector<2x8x8xf32>
    %cst_133 = arith.constant dense<0.000000e+00> : vector<2x8xf32>
    %390 = vector.multi_reduction <add>, %389, %cst_133 [2] : vector<2x8x8xf32> to vector<2x8xf32>
    %391 = vector.shape_cast %390 : vector<2x8xf32> to vector<2x8x1xf32>
    %392 = vector.broadcast %391 : vector<2x8x1xf32> to vector<2x8x8xf32>
    %393 = arith.divf %389, %392 : vector<2x8x8xf32>
    "tpu.trace_start"() <{level = 10 : i32, message = "bij,bjd->bid"}> : () -> ()
    %cst_134 = arith.constant dense<0.000000e+00> : vector<2x8x16xf32>
    %394 = tpu.matmul %393, %383, %cst_134 {dimension_numbers = #tpu.dot_dimension_numbers<[2], [1], [1], [2], [0, 0, 0, 1, 1, 2], [0], [0]>} : vector<2x8x8xf32>, vector<2x8x16xf32>, vector<2x8x16xf32> -> vector<2x8x16xf32>
    "tpu.trace_stop"() : () -> ()
    %395 = vector.shape_cast %394 : vector<2x8x16xf32> to vector<16x16xf32>
    %396 = tpu.concatenate %269, %287, %305, %323, %341, %359, %377, %395 in 1 : vector<16x16xf32>, vector<16x16xf32>, vector<16x16xf32>, vector<16x16xf32>, vector<16x16xf32>, vector<16x16xf32>, vector<16x16xf32>, vector<16x16xf32> -> vector<16x128xf32>
    %397 = arith.truncf %396 : vector<16x128xf32> to vector<16x128xbf16>
    %cst_135 = arith.constant dense<0.000000e+00> : vector<16x128xf32>
    %398 = tpu.matmul %397, %235, %cst_135 {dimension_numbers = #tpu.dot_dimension_numbers<[1], [0], [0], [1], [0, 0, 1, 1], [], []>} : vector<16x128xbf16>, vector<128x128xbf16>, vector<16x128xf32> -> vector<16x128xf32>
    %399 = vector.broadcast %236 : vector<1x128xf32> to vector<16x128xf32>
    %400 = arith.addf %398, %399 : vector<16x128xf32>
    %401 = arith.addf %232, %400 : vector<16x128xf32>
    %cst_136 = arith.constant dense<0.000000e+00> : vector<16xf32>
    %402 = vector.multi_reduction <add>, %401, %cst_136 [1] : vector<16x128xf32> to vector<16xf32>
    %403 = vector.shape_cast %402 : vector<16xf32> to vector<16x1xf32>
    %cst_137 = arith.constant 1.280000e+02 : f32
    %404 = vector.broadcast %cst_137 : f32 to vector<16x1xf32>
    %405 = arith.divf %403, %404 : vector<16x1xf32>
    %406 = vector.broadcast %405 : vector<16x1xf32> to vector<16x128xf32>
    %407 = arith.subf %401, %406 : vector<16x128xf32>
    %408 = arith.mulf %407, %407 : vector<16x128xf32>
    %cst_138 = arith.constant dense<0.000000e+00> : vector<16xf32>
    %409 = vector.multi_reduction <add>, %408, %cst_138 [1] : vector<16x128xf32> to vector<16xf32>
    %410 = vector.shape_cast %409 : vector<16xf32> to vector<16x1xf32>
    %cst_139 = arith.constant 1.280000e+02 : f32
    %411 = vector.broadcast %cst_139 : f32 to vector<16x1xf32>
    %412 = arith.divf %410, %411 : vector<16x1xf32>
    %413 = vector.broadcast %405 : vector<16x1xf32> to vector<16x128xf32>
    %414 = arith.subf %401, %413 : vector<16x128xf32>
    %cst_140 = arith.constant 9.99999974E-6 : f32
    %415 = vector.broadcast %cst_140 : f32 to vector<16x1xf32>
    %416 = arith.addf %412, %415 : vector<16x1xf32>
    %417 = math.rsqrt %416 : vector<16x1xf32>
    %418 = vector.broadcast %417 : vector<16x1xf32> to vector<16x128xf32>
    %419 = arith.mulf %414, %418 : vector<16x128xf32>
    %420 = vector.broadcast %237 : vector<1x128xf32> to vector<16x128xf32>
    %421 = arith.mulf %419, %420 : vector<16x128xf32>
    %422 = vector.broadcast %238 : vector<1x128xf32> to vector<16x128xf32>
    %423 = arith.addf %421, %422 : vector<16x128xf32>
    %424 = arith.truncf %423 : vector<16x128xf32> to vector<16x128xbf16>
    %cst_141 = arith.constant dense<0.000000e+00> : vector<16x512xf32>
    %425 = tpu.matmul %424, %239, %cst_141 {dimension_numbers = #tpu.dot_dimension_numbers<[1], [0], [0], [1], [0, 0, 1, 1], [], []>} : vector<16x128xbf16>, vector<128x512xbf16>, vector<16x512xf32> -> vector<16x512xf32>
    %426 = vector.broadcast %240 : vector<1x512xf32> to vector<16x512xf32>
    %427 = arith.addf %425, %426 : vector<16x512xf32>
    %cst_142 = arith.constant 0.000000e+00 : f32
    %428 = vector.broadcast %cst_142 : f32 to vector<16x512xf32>
    %429 = arith.maximumf %427, %428 : vector<16x512xf32>
    %430 = arith.truncf %429 : vector<16x512xf32> to vector<16x512xbf16>
    %cst_143 = arith.constant dense<0.000000e+00> : vector<16x128xf32>
    %431 = tpu.matmul %430, %241, %cst_143 {dimension_numbers = #tpu.dot_dimension_numbers<[1], [0], [0], [1], [0, 0, 1, 1], [], []>} : vector<16x512xbf16>, vector<512x128xbf16>, vector<16x128xf32> -> vector<16x128xf32>
    %432 = vector.broadcast %242 : vector<1x128xf32> to vector<16x128xf32>
    %433 = arith.addf %431, %432 : vector<16x128xf32>
    %434 = arith.addf %423, %433 : vector<16x128xf32>
    %cst_144 = arith.constant dense<0.000000e+00> : vector<16xf32>
    %435 = vector.multi_reduction <add>, %434, %cst_144 [1] : vector<16x128xf32> to vector<16xf32>
    %436 = vector.shape_cast %435 : vector<16xf32> to vector<16x1xf32>
    %cst_145 = arith.constant 1.280000e+02 : f32
    %437 = vector.broadcast %cst_145 : f32 to vector<16x1xf32>
    %438 = arith.divf %436, %437 : vector<16x1xf32>
    %439 = vector.broadcast %438 : vector<16x1xf32> to vector<16x128xf32>
    %440 = arith.subf %434, %439 : vector<16x128xf32>
    %441 = arith.mulf %440, %440 : vector<16x128xf32>
    %cst_146 = arith.constant dense<0.000000e+00> : vector<16xf32>
    %442 = vector.multi_reduction <add>, %441, %cst_146 [1] : vector<16x128xf32> to vector<16xf32>
    %443 = vector.shape_cast %442 : vector<16xf32> to vector<16x1xf32>
    %cst_147 = arith.constant 1.280000e+02 : f32
    %444 = vector.broadcast %cst_147 : f32 to vector<16x1xf32>
    %445 = arith.divf %443, %444 : vector<16x1xf32>
    %446 = vector.broadcast %438 : vector<16x1xf32> to vector<16x128xf32>
    %447 = arith.subf %434, %446 : vector<16x128xf32>
    %cst_148 = arith.constant 9.99999974E-6 : f32
    %448 = vector.broadcast %cst_148 : f32 to vector<16x1xf32>
    %449 = arith.addf %445, %448 : vector<16x1xf32>
    %450 = math.rsqrt %449 : vector<16x1xf32>
    %451 = vector.broadcast %450 : vector<16x1xf32> to vector<16x128xf32>
    %452 = arith.mulf %447, %451 : vector<16x128xf32>
    %453 = vector.broadcast %243 : vector<1x128xf32> to vector<16x128xf32>
    %454 = arith.mulf %452, %453 : vector<16x128xf32>
    %455 = vector.broadcast %244 : vector<1x128xf32> to vector<16x128xf32>
    %456 = arith.addf %454, %455 : vector<16x128xf32>
    %457 = vector.extract_strided_slice %456 {offsets = [7, 0], sizes = [1, 128], strides = [1, 1]} : vector<16x128xf32> to vector<1x128xf32>
    %458 = vector.extract_strided_slice %456 {offsets = [15, 0], sizes = [1, 128], strides = [1, 1]} : vector<16x128xf32> to vector<1x128xf32>
    %459 = tpu.concatenate %457, %458 in 0 : vector<1x128xf32>, vector<1x128xf32> -> vector<2x128xf32>
    %c0_149 = arith.constant 0 : index
    %c0_150 = arith.constant 0 : index
    %460 = vector.load %arg28[%c0_149, %c0_150] : memref<16x512xbf16, #tpu.memory_space<vmem>>, vector<16x512xbf16>
    %cst_151 = arith.constant dense<0.000000e+00> : vector<16x512xf32>
    %461 = tpu.matmul %1, %460, %cst_151 {dimension_numbers = #tpu.dot_dimension_numbers<[1], [0], [0], [1], [0, 0, 1, 1], [], []>} : vector<16x16xbf16>, vector<16x512xbf16>, vector<16x512xf32> -> vector<16x512xf32>
    %c0_152 = arith.constant 0 : index
    %c0_153 = arith.constant 0 : index
    %462 = vector.load %arg29[%c0_152, %c0_153] : memref<1x512xf32, #tpu.memory_space<vmem>>, vector<1x512xf32>
    %463 = vector.broadcast %462 : vector<1x512xf32> to vector<16x512xf32>
    %464 = arith.addf %461, %463 : vector<16x512xf32>
    %c0_154 = arith.constant 0 : index
    %c0_155 = arith.constant 0 : index
    %465 = vector.load %arg30[%c0_154, %c0_155] : memref<128x512xbf16, #tpu.memory_space<vmem>>, vector<128x512xbf16>
    %c0_156 = arith.constant 0 : index
    %c0_157 = arith.constant 0 : index
    %466 = vector.load %arg31[%c0_156, %c0_157] : memref<256x512xbf16, #tpu.memory_space<vmem>>, vector<256x512xbf16>
    %c0_158 = arith.constant 0 : index
    %c0_159 = arith.constant 0 : index
    %467 = vector.load %arg32[%c0_158, %c0_159] : memref<1x512xf32, #tpu.memory_space<vmem>>, vector<1x512xf32>
    %468 = vector.extract_strided_slice %464 {offsets = [0, 0], sizes = [1, 512], strides = [1, 1]} : vector<16x512xf32> to vector<1x512xf32>
    %469 = vector.extract_strided_slice %464 {offsets = [8, 0], sizes = [1, 512], strides = [1, 1]} : vector<16x512xf32> to vector<1x512xf32>
    %470 = tpu.concatenate %468, %469 in 0 : vector<1x512xf32>, vector<1x512xf32> -> vector<2x512xf32>
    %471 = vector.extract_strided_slice %464 {offsets = [1, 0], sizes = [1, 512], strides = [1, 1]} : vector<16x512xf32> to vector<1x512xf32>
    %472 = vector.extract_strided_slice %464 {offsets = [9, 0], sizes = [1, 512], strides = [1, 1]} : vector<16x512xf32> to vector<1x512xf32>
    %473 = tpu.concatenate %471, %472 in 0 : vector<1x512xf32>, vector<1x512xf32> -> vector<2x512xf32>
    %474 = vector.extract_strided_slice %464 {offsets = [2, 0], sizes = [1, 512], strides = [1, 1]} : vector<16x512xf32> to vector<1x512xf32>
    %475 = vector.extract_strided_slice %464 {offsets = [10, 0], sizes = [1, 512], strides = [1, 1]} : vector<16x512xf32> to vector<1x512xf32>
    %476 = tpu.concatenate %474, %475 in 0 : vector<1x512xf32>, vector<1x512xf32> -> vector<2x512xf32>
    %477 = vector.extract_strided_slice %464 {offsets = [3, 0], sizes = [1, 512], strides = [1, 1]} : vector<16x512xf32> to vector<1x512xf32>
    %478 = vector.extract_strided_slice %464 {offsets = [11, 0], sizes = [1, 512], strides = [1, 1]} : vector<16x512xf32> to vector<1x512xf32>
    %479 = tpu.concatenate %477, %478 in 0 : vector<1x512xf32>, vector<1x512xf32> -> vector<2x512xf32>
    %480 = vector.extract_strided_slice %464 {offsets = [4, 0], sizes = [1, 512], strides = [1, 1]} : vector<16x512xf32> to vector<1x512xf32>
    %481 = vector.extract_strided_slice %464 {offsets = [12, 0], sizes = [1, 512], strides = [1, 1]} : vector<16x512xf32> to vector<1x512xf32>
    %482 = tpu.concatenate %480, %481 in 0 : vector<1x512xf32>, vector<1x512xf32> -> vector<2x512xf32>
    %483 = vector.extract_strided_slice %464 {offsets = [5, 0], sizes = [1, 512], strides = [1, 1]} : vector<16x512xf32> to vector<1x512xf32>
    %484 = vector.extract_strided_slice %464 {offsets = [13, 0], sizes = [1, 512], strides = [1, 1]} : vector<16x512xf32> to vector<1x512xf32>
    %485 = tpu.concatenate %483, %484 in 0 : vector<1x512xf32>, vector<1x512xf32> -> vector<2x512xf32>
    %486 = vector.extract_strided_slice %464 {offsets = [6, 0], sizes = [1, 512], strides = [1, 1]} : vector<16x512xf32> to vector<1x512xf32>
    %487 = vector.extract_strided_slice %464 {offsets = [14, 0], sizes = [1, 512], strides = [1, 1]} : vector<16x512xf32> to vector<1x512xf32>
    %488 = tpu.concatenate %486, %487 in 0 : vector<1x512xf32>, vector<1x512xf32> -> vector<2x512xf32>
    %489 = vector.extract_strided_slice %464 {offsets = [7, 0], sizes = [1, 512], strides = [1, 1]} : vector<16x512xf32> to vector<1x512xf32>
    %490 = vector.extract_strided_slice %464 {offsets = [15, 0], sizes = [1, 512], strides = [1, 1]} : vector<16x512xf32> to vector<1x512xf32>
    %491 = tpu.concatenate %489, %490 in 0 : vector<1x512xf32>, vector<1x512xf32> -> vector<2x512xf32>
    %cst_160 = arith.constant 0.000000e+00 : f32
    %492 = vector.broadcast %cst_160 : f32 to vector<2x128xf32>
    %cst_161 = arith.constant 0.000000e+00 : f32
    %493 = vector.broadcast %cst_161 : f32 to vector<2x128xf32>
    %cst_162 = arith.constant 0.000000e+00 : f32
    %494 = vector.broadcast %cst_162 : f32 to vector<2x128xf32>
    %cst_163 = arith.constant 0.000000e+00 : f32
    %495 = vector.broadcast %cst_163 : f32 to vector<2x128xf32>
    %496 = arith.truncf %492 : vector<2x128xf32> to vector<2x128xbf16>
    %cst_164 = arith.constant dense<0.000000e+00> : vector<2x512xf32>
    %497 = tpu.matmul %496, %465, %cst_164 {dimension_numbers = #tpu.dot_dimension_numbers<[1], [0], [0], [1], [0, 0, 1, 1], [], []>} : vector<2x128xbf16>, vector<128x512xbf16>, vector<2x512xf32> -> vector<2x512xf32>
    %498 = arith.addf %470, %497 : vector<2x512xf32>
    %499 = vector.extract_strided_slice %498 {offsets = [0, 0], sizes = [2, 128], strides = [1, 1]} : vector<2x512xf32> to vector<2x128xf32>
    %500 = arith.negf %499 : vector<2x128xf32>
    %501 = math.exp %500 : vector<2x128xf32>
    %cst_165 = arith.constant 1.000000e+00 : f32
    %502 = vector.broadcast %cst_165 : f32 to vector<2x128xf32>
    %503 = arith.addf %502, %501 : vector<2x128xf32>
    %504 = arith.divf %502, %503 : vector<2x128xf32>
    %505 = vector.extract_strided_slice %498 {offsets = [0, 128], sizes = [2, 128], strides = [1, 1]} : vector<2x512xf32> to vector<2x128xf32>
    %506 = arith.negf %505 : vector<2x128xf32>
    %507 = math.exp %506 : vector<2x128xf32>
    %cst_166 = arith.constant 1.000000e+00 : f32
    %508 = vector.broadcast %cst_166 : f32 to vector<2x128xf32>
    %509 = arith.addf %508, %507 : vector<2x128xf32>
    %510 = arith.divf %508, %509 : vector<2x128xf32>
    %511 = vector.extract_strided_slice %498 {offsets = [0, 256], sizes = [2, 128], strides = [1, 1]} : vector<2x512xf32> to vector<2x128xf32>
    %512 = math.tanh %511 : vector<2x128xf32>
    %513 = vector.extract_strided_slice %498 {offsets = [0, 384], sizes = [2, 128], strides = [1, 1]} : vector<2x512xf32> to vector<2x128xf32>
    %514 = arith.negf %513 : vector<2x128xf32>
    %515 = math.exp %514 : vector<2x128xf32>
    %cst_167 = arith.constant 1.000000e+00 : f32
    %516 = vector.broadcast %cst_167 : f32 to vector<2x128xf32>
    %517 = arith.addf %516, %515 : vector<2x128xf32>
    %518 = arith.divf %516, %517 : vector<2x128xf32>
    %519 = arith.mulf %510, %493 : vector<2x128xf32>
    %520 = arith.mulf %504, %512 : vector<2x128xf32>
    %521 = arith.addf %519, %520 : vector<2x128xf32>
    %522 = math.tanh %521 : vector<2x128xf32>
    %523 = arith.mulf %518, %522 : vector<2x128xf32>
    %524 = tpu.concatenate %523, %494 in 1 : vector<2x128xf32>, vector<2x128xf32> -> vector<2x256xf32>
    %525 = arith.truncf %524 : vector<2x256xf32> to vector<2x256xbf16>
    %cst_168 = arith.constant dense<0.000000e+00> : vector<2x512xf32>
    %526 = tpu.matmul %525, %466, %cst_168 {dimension_numbers = #tpu.dot_dimension_numbers<[1], [0], [0], [1], [0, 0, 1, 1], [], []>} : vector<2x256xbf16>, vector<256x512xbf16>, vector<2x512xf32> -> vector<2x512xf32>
    %527 = vector.broadcast %467 : vector<1x512xf32> to vector<2x512xf32>
    %528 = arith.addf %526, %527 : vector<2x512xf32>
    %529 = vector.extract_strided_slice %528 {offsets = [0, 0], sizes = [2, 128], strides = [1, 1]} : vector<2x512xf32> to vector<2x128xf32>
    %530 = arith.negf %529 : vector<2x128xf32>
    %531 = math.exp %530 : vector<2x128xf32>
    %cst_169 = arith.constant 1.000000e+00 : f32
    %532 = vector.broadcast %cst_169 : f32 to vector<2x128xf32>
    %533 = arith.addf %532, %531 : vector<2x128xf32>
    %534 = arith.divf %532, %533 : vector<2x128xf32>
    %535 = vector.extract_strided_slice %528 {offsets = [0, 128], sizes = [2, 128], strides = [1, 1]} : vector<2x512xf32> to vector<2x128xf32>
    %536 = arith.negf %535 : vector<2x128xf32>
    %537 = math.exp %536 : vector<2x128xf32>
    %cst_170 = arith.constant 1.000000e+00 : f32
    %538 = vector.broadcast %cst_170 : f32 to vector<2x128xf32>
    %539 = arith.addf %538, %537 : vector<2x128xf32>
    %540 = arith.divf %538, %539 : vector<2x128xf32>
    %541 = vector.extract_strided_slice %528 {offsets = [0, 256], sizes = [2, 128], strides = [1, 1]} : vector<2x512xf32> to vector<2x128xf32>
    %542 = math.tanh %541 : vector<2x128xf32>
    %543 = vector.extract_strided_slice %528 {offsets = [0, 384], sizes = [2, 128], strides = [1, 1]} : vector<2x512xf32> to vector<2x128xf32>
    %544 = arith.negf %543 : vector<2x128xf32>
    %545 = math.exp %544 : vector<2x128xf32>
    %cst_171 = arith.constant 1.000000e+00 : f32
    %546 = vector.broadcast %cst_171 : f32 to vector<2x128xf32>
    %547 = arith.addf %546, %545 : vector<2x128xf32>
    %548 = arith.divf %546, %547 : vector<2x128xf32>
    %549 = arith.mulf %540, %495 : vector<2x128xf32>
    %550 = arith.mulf %534, %542 : vector<2x128xf32>
    %551 = arith.addf %549, %550 : vector<2x128xf32>
    %552 = math.tanh %551 : vector<2x128xf32>
    %553 = arith.mulf %548, %552 : vector<2x128xf32>
    %554 = arith.truncf %523 : vector<2x128xf32> to vector<2x128xbf16>
    %cst_172 = arith.constant dense<0.000000e+00> : vector<2x512xf32>
    %555 = tpu.matmul %554, %465, %cst_172 {dimension_numbers = #tpu.dot_dimension_numbers<[1], [0], [0], [1], [0, 0, 1, 1], [], []>} : vector<2x128xbf16>, vector<128x512xbf16>, vector<2x512xf32> -> vector<2x512xf32>
    %556 = arith.addf %473, %555 : vector<2x512xf32>
    %557 = vector.extract_strided_slice %556 {offsets = [0, 0], sizes = [2, 128], strides = [1, 1]} : vector<2x512xf32> to vector<2x128xf32>
    %558 = arith.negf %557 : vector<2x128xf32>
    %559 = math.exp %558 : vector<2x128xf32>
    %cst_173 = arith.constant 1.000000e+00 : f32
    %560 = vector.broadcast %cst_173 : f32 to vector<2x128xf32>
    %561 = arith.addf %560, %559 : vector<2x128xf32>
    %562 = arith.divf %560, %561 : vector<2x128xf32>
    %563 = vector.extract_strided_slice %556 {offsets = [0, 128], sizes = [2, 128], strides = [1, 1]} : vector<2x512xf32> to vector<2x128xf32>
    %564 = arith.negf %563 : vector<2x128xf32>
    %565 = math.exp %564 : vector<2x128xf32>
    %cst_174 = arith.constant 1.000000e+00 : f32
    %566 = vector.broadcast %cst_174 : f32 to vector<2x128xf32>
    %567 = arith.addf %566, %565 : vector<2x128xf32>
    %568 = arith.divf %566, %567 : vector<2x128xf32>
    %569 = vector.extract_strided_slice %556 {offsets = [0, 256], sizes = [2, 128], strides = [1, 1]} : vector<2x512xf32> to vector<2x128xf32>
    %570 = math.tanh %569 : vector<2x128xf32>
    %571 = vector.extract_strided_slice %556 {offsets = [0, 384], sizes = [2, 128], strides = [1, 1]} : vector<2x512xf32> to vector<2x128xf32>
    %572 = arith.negf %571 : vector<2x128xf32>
    %573 = math.exp %572 : vector<2x128xf32>
    %cst_175 = arith.constant 1.000000e+00 : f32
    %574 = vector.broadcast %cst_175 : f32 to vector<2x128xf32>
    %575 = arith.addf %574, %573 : vector<2x128xf32>
    %576 = arith.divf %574, %575 : vector<2x128xf32>
    %577 = arith.mulf %568, %521 : vector<2x128xf32>
    %578 = arith.mulf %562, %570 : vector<2x128xf32>
    %579 = arith.addf %577, %578 : vector<2x128xf32>
    %580 = math.tanh %579 : vector<2x128xf32>
    %581 = arith.mulf %576, %580 : vector<2x128xf32>
    %582 = tpu.concatenate %581, %553 in 1 : vector<2x128xf32>, vector<2x128xf32> -> vector<2x256xf32>
    %583 = arith.truncf %582 : vector<2x256xf32> to vector<2x256xbf16>
    %cst_176 = arith.constant dense<0.000000e+00> : vector<2x512xf32>
    %584 = tpu.matmul %583, %466, %cst_176 {dimension_numbers = #tpu.dot_dimension_numbers<[1], [0], [0], [1], [0, 0, 1, 1], [], []>} : vector<2x256xbf16>, vector<256x512xbf16>, vector<2x512xf32> -> vector<2x512xf32>
    %585 = vector.broadcast %467 : vector<1x512xf32> to vector<2x512xf32>
    %586 = arith.addf %584, %585 : vector<2x512xf32>
    %587 = vector.extract_strided_slice %586 {offsets = [0, 0], sizes = [2, 128], strides = [1, 1]} : vector<2x512xf32> to vector<2x128xf32>
    %588 = arith.negf %587 : vector<2x128xf32>
    %589 = math.exp %588 : vector<2x128xf32>
    %cst_177 = arith.constant 1.000000e+00 : f32
    %590 = vector.broadcast %cst_177 : f32 to vector<2x128xf32>
    %591 = arith.addf %590, %589 : vector<2x128xf32>
    %592 = arith.divf %590, %591 : vector<2x128xf32>
    %593 = vector.extract_strided_slice %586 {offsets = [0, 128], sizes = [2, 128], strides = [1, 1]} : vector<2x512xf32> to vector<2x128xf32>
    %594 = arith.negf %593 : vector<2x128xf32>
    %595 = math.exp %594 : vector<2x128xf32>
    %cst_178 = arith.constant 1.000000e+00 : f32
    %596 = vector.broadcast %cst_178 : f32 to vector<2x128xf32>
    %597 = arith.addf %596, %595 : vector<2x128xf32>
    %598 = arith.divf %596, %597 : vector<2x128xf32>
    %599 = vector.extract_strided_slice %586 {offsets = [0, 256], sizes = [2, 128], strides = [1, 1]} : vector<2x512xf32> to vector<2x128xf32>
    %600 = math.tanh %599 : vector<2x128xf32>
    %601 = vector.extract_strided_slice %586 {offsets = [0, 384], sizes = [2, 128], strides = [1, 1]} : vector<2x512xf32> to vector<2x128xf32>
    %602 = arith.negf %601 : vector<2x128xf32>
    %603 = math.exp %602 : vector<2x128xf32>
    %cst_179 = arith.constant 1.000000e+00 : f32
    %604 = vector.broadcast %cst_179 : f32 to vector<2x128xf32>
    %605 = arith.addf %604, %603 : vector<2x128xf32>
    %606 = arith.divf %604, %605 : vector<2x128xf32>
    %607 = arith.mulf %598, %551 : vector<2x128xf32>
    %608 = arith.mulf %592, %600 : vector<2x128xf32>
    %609 = arith.addf %607, %608 : vector<2x128xf32>
    %610 = math.tanh %609 : vector<2x128xf32>
    %611 = arith.mulf %606, %610 : vector<2x128xf32>
    %612 = arith.truncf %581 : vector<2x128xf32> to vector<2x128xbf16>
    %cst_180 = arith.constant dense<0.000000e+00> : vector<2x512xf32>
    %613 = tpu.matmul %612, %465, %cst_180 {dimension_numbers = #tpu.dot_dimension_numbers<[1], [0], [0], [1], [0, 0, 1, 1], [], []>} : vector<2x128xbf16>, vector<128x512xbf16>, vector<2x512xf32> -> vector<2x512xf32>
    %614 = arith.addf %476, %613 : vector<2x512xf32>
    %615 = vector.extract_strided_slice %614 {offsets = [0, 0], sizes = [2, 128], strides = [1, 1]} : vector<2x512xf32> to vector<2x128xf32>
    %616 = arith.negf %615 : vector<2x128xf32>
    %617 = math.exp %616 : vector<2x128xf32>
    %cst_181 = arith.constant 1.000000e+00 : f32
    %618 = vector.broadcast %cst_181 : f32 to vector<2x128xf32>
    %619 = arith.addf %618, %617 : vector<2x128xf32>
    %620 = arith.divf %618, %619 : vector<2x128xf32>
    %621 = vector.extract_strided_slice %614 {offsets = [0, 128], sizes = [2, 128], strides = [1, 1]} : vector<2x512xf32> to vector<2x128xf32>
    %622 = arith.negf %621 : vector<2x128xf32>
    %623 = math.exp %622 : vector<2x128xf32>
    %cst_182 = arith.constant 1.000000e+00 : f32
    %624 = vector.broadcast %cst_182 : f32 to vector<2x128xf32>
    %625 = arith.addf %624, %623 : vector<2x128xf32>
    %626 = arith.divf %624, %625 : vector<2x128xf32>
    %627 = vector.extract_strided_slice %614 {offsets = [0, 256], sizes = [2, 128], strides = [1, 1]} : vector<2x512xf32> to vector<2x128xf32>
    %628 = math.tanh %627 : vector<2x128xf32>
    %629 = vector.extract_strided_slice %614 {offsets = [0, 384], sizes = [2, 128], strides = [1, 1]} : vector<2x512xf32> to vector<2x128xf32>
    %630 = arith.negf %629 : vector<2x128xf32>
    %631 = math.exp %630 : vector<2x128xf32>
    %cst_183 = arith.constant 1.000000e+00 : f32
    %632 = vector.broadcast %cst_183 : f32 to vector<2x128xf32>
    %633 = arith.addf %632, %631 : vector<2x128xf32>
    %634 = arith.divf %632, %633 : vector<2x128xf32>
    %635 = arith.mulf %626, %579 : vector<2x128xf32>
    %636 = arith.mulf %620, %628 : vector<2x128xf32>
    %637 = arith.addf %635, %636 : vector<2x128xf32>
    %638 = math.tanh %637 : vector<2x128xf32>
    %639 = arith.mulf %634, %638 : vector<2x128xf32>
    %640 = tpu.concatenate %639, %611 in 1 : vector<2x128xf32>, vector<2x128xf32> -> vector<2x256xf32>
    %641 = arith.truncf %640 : vector<2x256xf32> to vector<2x256xbf16>
    %cst_184 = arith.constant dense<0.000000e+00> : vector<2x512xf32>
    %642 = tpu.matmul %641, %466, %cst_184 {dimension_numbers = #tpu.dot_dimension_numbers<[1], [0], [0], [1], [0, 0, 1, 1], [], []>} : vector<2x256xbf16>, vector<256x512xbf16>, vector<2x512xf32> -> vector<2x512xf32>
    %643 = vector.broadcast %467 : vector<1x512xf32> to vector<2x512xf32>
    %644 = arith.addf %642, %643 : vector<2x512xf32>
    %645 = vector.extract_strided_slice %644 {offsets = [0, 0], sizes = [2, 128], strides = [1, 1]} : vector<2x512xf32> to vector<2x128xf32>
    %646 = arith.negf %645 : vector<2x128xf32>
    %647 = math.exp %646 : vector<2x128xf32>
    %cst_185 = arith.constant 1.000000e+00 : f32
    %648 = vector.broadcast %cst_185 : f32 to vector<2x128xf32>
    %649 = arith.addf %648, %647 : vector<2x128xf32>
    %650 = arith.divf %648, %649 : vector<2x128xf32>
    %651 = vector.extract_strided_slice %644 {offsets = [0, 128], sizes = [2, 128], strides = [1, 1]} : vector<2x512xf32> to vector<2x128xf32>
    %652 = arith.negf %651 : vector<2x128xf32>
    %653 = math.exp %652 : vector<2x128xf32>
    %cst_186 = arith.constant 1.000000e+00 : f32
    %654 = vector.broadcast %cst_186 : f32 to vector<2x128xf32>
    %655 = arith.addf %654, %653 : vector<2x128xf32>
    %656 = arith.divf %654, %655 : vector<2x128xf32>
    %657 = vector.extract_strided_slice %644 {offsets = [0, 256], sizes = [2, 128], strides = [1, 1]} : vector<2x512xf32> to vector<2x128xf32>
    %658 = math.tanh %657 : vector<2x128xf32>
    %659 = vector.extract_strided_slice %644 {offsets = [0, 384], sizes = [2, 128], strides = [1, 1]} : vector<2x512xf32> to vector<2x128xf32>
    %660 = arith.negf %659 : vector<2x128xf32>
    %661 = math.exp %660 : vector<2x128xf32>
    %cst_187 = arith.constant 1.000000e+00 : f32
    %662 = vector.broadcast %cst_187 : f32 to vector<2x128xf32>
    %663 = arith.addf %662, %661 : vector<2x128xf32>
    %664 = arith.divf %662, %663 : vector<2x128xf32>
    %665 = arith.mulf %656, %609 : vector<2x128xf32>
    %666 = arith.mulf %650, %658 : vector<2x128xf32>
    %667 = arith.addf %665, %666 : vector<2x128xf32>
    %668 = math.tanh %667 : vector<2x128xf32>
    %669 = arith.mulf %664, %668 : vector<2x128xf32>
    %670 = arith.truncf %639 : vector<2x128xf32> to vector<2x128xbf16>
    %cst_188 = arith.constant dense<0.000000e+00> : vector<2x512xf32>
    %671 = tpu.matmul %670, %465, %cst_188 {dimension_numbers = #tpu.dot_dimension_numbers<[1], [0], [0], [1], [0, 0, 1, 1], [], []>} : vector<2x128xbf16>, vector<128x512xbf16>, vector<2x512xf32> -> vector<2x512xf32>
    %672 = arith.addf %479, %671 : vector<2x512xf32>
    %673 = vector.extract_strided_slice %672 {offsets = [0, 0], sizes = [2, 128], strides = [1, 1]} : vector<2x512xf32> to vector<2x128xf32>
    %674 = arith.negf %673 : vector<2x128xf32>
    %675 = math.exp %674 : vector<2x128xf32>
    %cst_189 = arith.constant 1.000000e+00 : f32
    %676 = vector.broadcast %cst_189 : f32 to vector<2x128xf32>
    %677 = arith.addf %676, %675 : vector<2x128xf32>
    %678 = arith.divf %676, %677 : vector<2x128xf32>
    %679 = vector.extract_strided_slice %672 {offsets = [0, 128], sizes = [2, 128], strides = [1, 1]} : vector<2x512xf32> to vector<2x128xf32>
    %680 = arith.negf %679 : vector<2x128xf32>
    %681 = math.exp %680 : vector<2x128xf32>
    %cst_190 = arith.constant 1.000000e+00 : f32
    %682 = vector.broadcast %cst_190 : f32 to vector<2x128xf32>
    %683 = arith.addf %682, %681 : vector<2x128xf32>
    %684 = arith.divf %682, %683 : vector<2x128xf32>
    %685 = vector.extract_strided_slice %672 {offsets = [0, 256], sizes = [2, 128], strides = [1, 1]} : vector<2x512xf32> to vector<2x128xf32>
    %686 = math.tanh %685 : vector<2x128xf32>
    %687 = vector.extract_strided_slice %672 {offsets = [0, 384], sizes = [2, 128], strides = [1, 1]} : vector<2x512xf32> to vector<2x128xf32>
    %688 = arith.negf %687 : vector<2x128xf32>
    %689 = math.exp %688 : vector<2x128xf32>
    %cst_191 = arith.constant 1.000000e+00 : f32
    %690 = vector.broadcast %cst_191 : f32 to vector<2x128xf32>
    %691 = arith.addf %690, %689 : vector<2x128xf32>
    %692 = arith.divf %690, %691 : vector<2x128xf32>
    %693 = arith.mulf %684, %637 : vector<2x128xf32>
    %694 = arith.mulf %678, %686 : vector<2x128xf32>
    %695 = arith.addf %693, %694 : vector<2x128xf32>
    %696 = math.tanh %695 : vector<2x128xf32>
    %697 = arith.mulf %692, %696 : vector<2x128xf32>
    %698 = tpu.concatenate %697, %669 in 1 : vector<2x128xf32>, vector<2x128xf32> -> vector<2x256xf32>
    %699 = arith.truncf %698 : vector<2x256xf32> to vector<2x256xbf16>
    %cst_192 = arith.constant dense<0.000000e+00> : vector<2x512xf32>
    %700 = tpu.matmul %699, %466, %cst_192 {dimension_numbers = #tpu.dot_dimension_numbers<[1], [0], [0], [1], [0, 0, 1, 1], [], []>} : vector<2x256xbf16>, vector<256x512xbf16>, vector<2x512xf32> -> vector<2x512xf32>
    %701 = vector.broadcast %467 : vector<1x512xf32> to vector<2x512xf32>
    %702 = arith.addf %700, %701 : vector<2x512xf32>
    %703 = vector.extract_strided_slice %702 {offsets = [0, 0], sizes = [2, 128], strides = [1, 1]} : vector<2x512xf32> to vector<2x128xf32>
    %704 = arith.negf %703 : vector<2x128xf32>
    %705 = math.exp %704 : vector<2x128xf32>
    %cst_193 = arith.constant 1.000000e+00 : f32
    %706 = vector.broadcast %cst_193 : f32 to vector<2x128xf32>
    %707 = arith.addf %706, %705 : vector<2x128xf32>
    %708 = arith.divf %706, %707 : vector<2x128xf32>
    %709 = vector.extract_strided_slice %702 {offsets = [0, 128], sizes = [2, 128], strides = [1, 1]} : vector<2x512xf32> to vector<2x128xf32>
    %710 = arith.negf %709 : vector<2x128xf32>
    %711 = math.exp %710 : vector<2x128xf32>
    %cst_194 = arith.constant 1.000000e+00 : f32
    %712 = vector.broadcast %cst_194 : f32 to vector<2x128xf32>
    %713 = arith.addf %712, %711 : vector<2x128xf32>
    %714 = arith.divf %712, %713 : vector<2x128xf32>
    %715 = vector.extract_strided_slice %702 {offsets = [0, 256], sizes = [2, 128], strides = [1, 1]} : vector<2x512xf32> to vector<2x128xf32>
    %716 = math.tanh %715 : vector<2x128xf32>
    %717 = vector.extract_strided_slice %702 {offsets = [0, 384], sizes = [2, 128], strides = [1, 1]} : vector<2x512xf32> to vector<2x128xf32>
    %718 = arith.negf %717 : vector<2x128xf32>
    %719 = math.exp %718 : vector<2x128xf32>
    %cst_195 = arith.constant 1.000000e+00 : f32
    %720 = vector.broadcast %cst_195 : f32 to vector<2x128xf32>
    %721 = arith.addf %720, %719 : vector<2x128xf32>
    %722 = arith.divf %720, %721 : vector<2x128xf32>
    %723 = arith.mulf %714, %667 : vector<2x128xf32>
    %724 = arith.mulf %708, %716 : vector<2x128xf32>
    %725 = arith.addf %723, %724 : vector<2x128xf32>
    %726 = math.tanh %725 : vector<2x128xf32>
    %727 = arith.mulf %722, %726 : vector<2x128xf32>
    %728 = arith.truncf %697 : vector<2x128xf32> to vector<2x128xbf16>
    %cst_196 = arith.constant dense<0.000000e+00> : vector<2x512xf32>
    %729 = tpu.matmul %728, %465, %cst_196 {dimension_numbers = #tpu.dot_dimension_numbers<[1], [0], [0], [1], [0, 0, 1, 1], [], []>} : vector<2x128xbf16>, vector<128x512xbf16>, vector<2x512xf32> -> vector<2x512xf32>
    %730 = arith.addf %482, %729 : vector<2x512xf32>
    %731 = vector.extract_strided_slice %730 {offsets = [0, 0], sizes = [2, 128], strides = [1, 1]} : vector<2x512xf32> to vector<2x128xf32>
    %732 = arith.negf %731 : vector<2x128xf32>
    %733 = math.exp %732 : vector<2x128xf32>
    %cst_197 = arith.constant 1.000000e+00 : f32
    %734 = vector.broadcast %cst_197 : f32 to vector<2x128xf32>
    %735 = arith.addf %734, %733 : vector<2x128xf32>
    %736 = arith.divf %734, %735 : vector<2x128xf32>
    %737 = vector.extract_strided_slice %730 {offsets = [0, 128], sizes = [2, 128], strides = [1, 1]} : vector<2x512xf32> to vector<2x128xf32>
    %738 = arith.negf %737 : vector<2x128xf32>
    %739 = math.exp %738 : vector<2x128xf32>
    %cst_198 = arith.constant 1.000000e+00 : f32
    %740 = vector.broadcast %cst_198 : f32 to vector<2x128xf32>
    %741 = arith.addf %740, %739 : vector<2x128xf32>
    %742 = arith.divf %740, %741 : vector<2x128xf32>
    %743 = vector.extract_strided_slice %730 {offsets = [0, 256], sizes = [2, 128], strides = [1, 1]} : vector<2x512xf32> to vector<2x128xf32>
    %744 = math.tanh %743 : vector<2x128xf32>
    %745 = vector.extract_strided_slice %730 {offsets = [0, 384], sizes = [2, 128], strides = [1, 1]} : vector<2x512xf32> to vector<2x128xf32>
    %746 = arith.negf %745 : vector<2x128xf32>
    %747 = math.exp %746 : vector<2x128xf32>
    %cst_199 = arith.constant 1.000000e+00 : f32
    %748 = vector.broadcast %cst_199 : f32 to vector<2x128xf32>
    %749 = arith.addf %748, %747 : vector<2x128xf32>
    %750 = arith.divf %748, %749 : vector<2x128xf32>
    %751 = arith.mulf %742, %695 : vector<2x128xf32>
    %752 = arith.mulf %736, %744 : vector<2x128xf32>
    %753 = arith.addf %751, %752 : vector<2x128xf32>
    %754 = math.tanh %753 : vector<2x128xf32>
    %755 = arith.mulf %750, %754 : vector<2x128xf32>
    %756 = tpu.concatenate %755, %727 in 1 : vector<2x128xf32>, vector<2x128xf32> -> vector<2x256xf32>
    %757 = arith.truncf %756 : vector<2x256xf32> to vector<2x256xbf16>
    %cst_200 = arith.constant dense<0.000000e+00> : vector<2x512xf32>
    %758 = tpu.matmul %757, %466, %cst_200 {dimension_numbers = #tpu.dot_dimension_numbers<[1], [0], [0], [1], [0, 0, 1, 1], [], []>} : vector<2x256xbf16>, vector<256x512xbf16>, vector<2x512xf32> -> vector<2x512xf32>
    %759 = vector.broadcast %467 : vector<1x512xf32> to vector<2x512xf32>
    %760 = arith.addf %758, %759 : vector<2x512xf32>
    %761 = vector.extract_strided_slice %760 {offsets = [0, 0], sizes = [2, 128], strides = [1, 1]} : vector<2x512xf32> to vector<2x128xf32>
    %762 = arith.negf %761 : vector<2x128xf32>
    %763 = math.exp %762 : vector<2x128xf32>
    %cst_201 = arith.constant 1.000000e+00 : f32
    %764 = vector.broadcast %cst_201 : f32 to vector<2x128xf32>
    %765 = arith.addf %764, %763 : vector<2x128xf32>
    %766 = arith.divf %764, %765 : vector<2x128xf32>
    %767 = vector.extract_strided_slice %760 {offsets = [0, 128], sizes = [2, 128], strides = [1, 1]} : vector<2x512xf32> to vector<2x128xf32>
    %768 = arith.negf %767 : vector<2x128xf32>
    %769 = math.exp %768 : vector<2x128xf32>
    %cst_202 = arith.constant 1.000000e+00 : f32
    %770 = vector.broadcast %cst_202 : f32 to vector<2x128xf32>
    %771 = arith.addf %770, %769 : vector<2x128xf32>
    %772 = arith.divf %770, %771 : vector<2x128xf32>
    %773 = vector.extract_strided_slice %760 {offsets = [0, 256], sizes = [2, 128], strides = [1, 1]} : vector<2x512xf32> to vector<2x128xf32>
    %774 = math.tanh %773 : vector<2x128xf32>
    %775 = vector.extract_strided_slice %760 {offsets = [0, 384], sizes = [2, 128], strides = [1, 1]} : vector<2x512xf32> to vector<2x128xf32>
    %776 = arith.negf %775 : vector<2x128xf32>
    %777 = math.exp %776 : vector<2x128xf32>
    %cst_203 = arith.constant 1.000000e+00 : f32
    %778 = vector.broadcast %cst_203 : f32 to vector<2x128xf32>
    %779 = arith.addf %778, %777 : vector<2x128xf32>
    %780 = arith.divf %778, %779 : vector<2x128xf32>
    %781 = arith.mulf %772, %725 : vector<2x128xf32>
    %782 = arith.mulf %766, %774 : vector<2x128xf32>
    %783 = arith.addf %781, %782 : vector<2x128xf32>
    %784 = math.tanh %783 : vector<2x128xf32>
    %785 = arith.mulf %780, %784 : vector<2x128xf32>
    %786 = arith.truncf %755 : vector<2x128xf32> to vector<2x128xbf16>
    %cst_204 = arith.constant dense<0.000000e+00> : vector<2x512xf32>
    %787 = tpu.matmul %786, %465, %cst_204 {dimension_numbers = #tpu.dot_dimension_numbers<[1], [0], [0], [1], [0, 0, 1, 1], [], []>} : vector<2x128xbf16>, vector<128x512xbf16>, vector<2x512xf32> -> vector<2x512xf32>
    %788 = arith.addf %485, %787 : vector<2x512xf32>
    %789 = vector.extract_strided_slice %788 {offsets = [0, 0], sizes = [2, 128], strides = [1, 1]} : vector<2x512xf32> to vector<2x128xf32>
    %790 = arith.negf %789 : vector<2x128xf32>
    %791 = math.exp %790 : vector<2x128xf32>
    %cst_205 = arith.constant 1.000000e+00 : f32
    %792 = vector.broadcast %cst_205 : f32 to vector<2x128xf32>
    %793 = arith.addf %792, %791 : vector<2x128xf32>
    %794 = arith.divf %792, %793 : vector<2x128xf32>
    %795 = vector.extract_strided_slice %788 {offsets = [0, 128], sizes = [2, 128], strides = [1, 1]} : vector<2x512xf32> to vector<2x128xf32>
    %796 = arith.negf %795 : vector<2x128xf32>
    %797 = math.exp %796 : vector<2x128xf32>
    %cst_206 = arith.constant 1.000000e+00 : f32
    %798 = vector.broadcast %cst_206 : f32 to vector<2x128xf32>
    %799 = arith.addf %798, %797 : vector<2x128xf32>
    %800 = arith.divf %798, %799 : vector<2x128xf32>
    %801 = vector.extract_strided_slice %788 {offsets = [0, 256], sizes = [2, 128], strides = [1, 1]} : vector<2x512xf32> to vector<2x128xf32>
    %802 = math.tanh %801 : vector<2x128xf32>
    %803 = vector.extract_strided_slice %788 {offsets = [0, 384], sizes = [2, 128], strides = [1, 1]} : vector<2x512xf32> to vector<2x128xf32>
    %804 = arith.negf %803 : vector<2x128xf32>
    %805 = math.exp %804 : vector<2x128xf32>
    %cst_207 = arith.constant 1.000000e+00 : f32
    %806 = vector.broadcast %cst_207 : f32 to vector<2x128xf32>
    %807 = arith.addf %806, %805 : vector<2x128xf32>
    %808 = arith.divf %806, %807 : vector<2x128xf32>
    %809 = arith.mulf %800, %753 : vector<2x128xf32>
    %810 = arith.mulf %794, %802 : vector<2x128xf32>
    %811 = arith.addf %809, %810 : vector<2x128xf32>
    %812 = math.tanh %811 : vector<2x128xf32>
    %813 = arith.mulf %808, %812 : vector<2x128xf32>
    %814 = tpu.concatenate %813, %785 in 1 : vector<2x128xf32>, vector<2x128xf32> -> vector<2x256xf32>
    %815 = arith.truncf %814 : vector<2x256xf32> to vector<2x256xbf16>
    %cst_208 = arith.constant dense<0.000000e+00> : vector<2x512xf32>
    %816 = tpu.matmul %815, %466, %cst_208 {dimension_numbers = #tpu.dot_dimension_numbers<[1], [0], [0], [1], [0, 0, 1, 1], [], []>} : vector<2x256xbf16>, vector<256x512xbf16>, vector<2x512xf32> -> vector<2x512xf32>
    %817 = vector.broadcast %467 : vector<1x512xf32> to vector<2x512xf32>
    %818 = arith.addf %816, %817 : vector<2x512xf32>
    %819 = vector.extract_strided_slice %818 {offsets = [0, 0], sizes = [2, 128], strides = [1, 1]} : vector<2x512xf32> to vector<2x128xf32>
    %820 = arith.negf %819 : vector<2x128xf32>
    %821 = math.exp %820 : vector<2x128xf32>
    %cst_209 = arith.constant 1.000000e+00 : f32
    %822 = vector.broadcast %cst_209 : f32 to vector<2x128xf32>
    %823 = arith.addf %822, %821 : vector<2x128xf32>
    %824 = arith.divf %822, %823 : vector<2x128xf32>
    %825 = vector.extract_strided_slice %818 {offsets = [0, 128], sizes = [2, 128], strides = [1, 1]} : vector<2x512xf32> to vector<2x128xf32>
    %826 = arith.negf %825 : vector<2x128xf32>
    %827 = math.exp %826 : vector<2x128xf32>
    %cst_210 = arith.constant 1.000000e+00 : f32
    %828 = vector.broadcast %cst_210 : f32 to vector<2x128xf32>
    %829 = arith.addf %828, %827 : vector<2x128xf32>
    %830 = arith.divf %828, %829 : vector<2x128xf32>
    %831 = vector.extract_strided_slice %818 {offsets = [0, 256], sizes = [2, 128], strides = [1, 1]} : vector<2x512xf32> to vector<2x128xf32>
    %832 = math.tanh %831 : vector<2x128xf32>
    %833 = vector.extract_strided_slice %818 {offsets = [0, 384], sizes = [2, 128], strides = [1, 1]} : vector<2x512xf32> to vector<2x128xf32>
    %834 = arith.negf %833 : vector<2x128xf32>
    %835 = math.exp %834 : vector<2x128xf32>
    %cst_211 = arith.constant 1.000000e+00 : f32
    %836 = vector.broadcast %cst_211 : f32 to vector<2x128xf32>
    %837 = arith.addf %836, %835 : vector<2x128xf32>
    %838 = arith.divf %836, %837 : vector<2x128xf32>
    %839 = arith.mulf %830, %783 : vector<2x128xf32>
    %840 = arith.mulf %824, %832 : vector<2x128xf32>
    %841 = arith.addf %839, %840 : vector<2x128xf32>
    %842 = math.tanh %841 : vector<2x128xf32>
    %843 = arith.mulf %838, %842 : vector<2x128xf32>
    %844 = arith.truncf %813 : vector<2x128xf32> to vector<2x128xbf16>
    %cst_212 = arith.constant dense<0.000000e+00> : vector<2x512xf32>
    %845 = tpu.matmul %844, %465, %cst_212 {dimension_numbers = #tpu.dot_dimension_numbers<[1], [0], [0], [1], [0, 0, 1, 1], [], []>} : vector<2x128xbf16>, vector<128x512xbf16>, vector<2x512xf32> -> vector<2x512xf32>
    %846 = arith.addf %488, %845 : vector<2x512xf32>
    %847 = vector.extract_strided_slice %846 {offsets = [0, 0], sizes = [2, 128], strides = [1, 1]} : vector<2x512xf32> to vector<2x128xf32>
    %848 = arith.negf %847 : vector<2x128xf32>
    %849 = math.exp %848 : vector<2x128xf32>
    %cst_213 = arith.constant 1.000000e+00 : f32
    %850 = vector.broadcast %cst_213 : f32 to vector<2x128xf32>
    %851 = arith.addf %850, %849 : vector<2x128xf32>
    %852 = arith.divf %850, %851 : vector<2x128xf32>
    %853 = vector.extract_strided_slice %846 {offsets = [0, 128], sizes = [2, 128], strides = [1, 1]} : vector<2x512xf32> to vector<2x128xf32>
    %854 = arith.negf %853 : vector<2x128xf32>
    %855 = math.exp %854 : vector<2x128xf32>
    %cst_214 = arith.constant 1.000000e+00 : f32
    %856 = vector.broadcast %cst_214 : f32 to vector<2x128xf32>
    %857 = arith.addf %856, %855 : vector<2x128xf32>
    %858 = arith.divf %856, %857 : vector<2x128xf32>
    %859 = vector.extract_strided_slice %846 {offsets = [0, 256], sizes = [2, 128], strides = [1, 1]} : vector<2x512xf32> to vector<2x128xf32>
    %860 = math.tanh %859 : vector<2x128xf32>
    %861 = vector.extract_strided_slice %846 {offsets = [0, 384], sizes = [2, 128], strides = [1, 1]} : vector<2x512xf32> to vector<2x128xf32>
    %862 = arith.negf %861 : vector<2x128xf32>
    %863 = math.exp %862 : vector<2x128xf32>
    %cst_215 = arith.constant 1.000000e+00 : f32
    %864 = vector.broadcast %cst_215 : f32 to vector<2x128xf32>
    %865 = arith.addf %864, %863 : vector<2x128xf32>
    %866 = arith.divf %864, %865 : vector<2x128xf32>
    %867 = arith.mulf %858, %811 : vector<2x128xf32>
    %868 = arith.mulf %852, %860 : vector<2x128xf32>
    %869 = arith.addf %867, %868 : vector<2x128xf32>
    %870 = math.tanh %869 : vector<2x128xf32>
    %871 = arith.mulf %866, %870 : vector<2x128xf32>
    %872 = tpu.concatenate %871, %843 in 1 : vector<2x128xf32>, vector<2x128xf32> -> vector<2x256xf32>
    %873 = arith.truncf %872 : vector<2x256xf32> to vector<2x256xbf16>
    %cst_216 = arith.constant dense<0.000000e+00> : vector<2x512xf32>
    %874 = tpu.matmul %873, %466, %cst_216 {dimension_numbers = #tpu.dot_dimension_numbers<[1], [0], [0], [1], [0, 0, 1, 1], [], []>} : vector<2x256xbf16>, vector<256x512xbf16>, vector<2x512xf32> -> vector<2x512xf32>
    %875 = vector.broadcast %467 : vector<1x512xf32> to vector<2x512xf32>
    %876 = arith.addf %874, %875 : vector<2x512xf32>
    %877 = vector.extract_strided_slice %876 {offsets = [0, 0], sizes = [2, 128], strides = [1, 1]} : vector<2x512xf32> to vector<2x128xf32>
    %878 = arith.negf %877 : vector<2x128xf32>
    %879 = math.exp %878 : vector<2x128xf32>
    %cst_217 = arith.constant 1.000000e+00 : f32
    %880 = vector.broadcast %cst_217 : f32 to vector<2x128xf32>
    %881 = arith.addf %880, %879 : vector<2x128xf32>
    %882 = arith.divf %880, %881 : vector<2x128xf32>
    %883 = vector.extract_strided_slice %876 {offsets = [0, 128], sizes = [2, 128], strides = [1, 1]} : vector<2x512xf32> to vector<2x128xf32>
    %884 = arith.negf %883 : vector<2x128xf32>
    %885 = math.exp %884 : vector<2x128xf32>
    %cst_218 = arith.constant 1.000000e+00 : f32
    %886 = vector.broadcast %cst_218 : f32 to vector<2x128xf32>
    %887 = arith.addf %886, %885 : vector<2x128xf32>
    %888 = arith.divf %886, %887 : vector<2x128xf32>
    %889 = vector.extract_strided_slice %876 {offsets = [0, 256], sizes = [2, 128], strides = [1, 1]} : vector<2x512xf32> to vector<2x128xf32>
    %890 = math.tanh %889 : vector<2x128xf32>
    %891 = vector.extract_strided_slice %876 {offsets = [0, 384], sizes = [2, 128], strides = [1, 1]} : vector<2x512xf32> to vector<2x128xf32>
    %892 = arith.negf %891 : vector<2x128xf32>
    %893 = math.exp %892 : vector<2x128xf32>
    %cst_219 = arith.constant 1.000000e+00 : f32
    %894 = vector.broadcast %cst_219 : f32 to vector<2x128xf32>
    %895 = arith.addf %894, %893 : vector<2x128xf32>
    %896 = arith.divf %894, %895 : vector<2x128xf32>
    %897 = arith.mulf %888, %841 : vector<2x128xf32>
    %898 = arith.mulf %882, %890 : vector<2x128xf32>
    %899 = arith.addf %897, %898 : vector<2x128xf32>
    %900 = math.tanh %899 : vector<2x128xf32>
    %901 = arith.mulf %896, %900 : vector<2x128xf32>
    %902 = arith.truncf %871 : vector<2x128xf32> to vector<2x128xbf16>
    %cst_220 = arith.constant dense<0.000000e+00> : vector<2x512xf32>
    %903 = tpu.matmul %902, %465, %cst_220 {dimension_numbers = #tpu.dot_dimension_numbers<[1], [0], [0], [1], [0, 0, 1, 1], [], []>} : vector<2x128xbf16>, vector<128x512xbf16>, vector<2x512xf32> -> vector<2x512xf32>
    %904 = arith.addf %491, %903 : vector<2x512xf32>
    %905 = vector.extract_strided_slice %904 {offsets = [0, 0], sizes = [2, 128], strides = [1, 1]} : vector<2x512xf32> to vector<2x128xf32>
    %906 = arith.negf %905 : vector<2x128xf32>
    %907 = math.exp %906 : vector<2x128xf32>
    %cst_221 = arith.constant 1.000000e+00 : f32
    %908 = vector.broadcast %cst_221 : f32 to vector<2x128xf32>
    %909 = arith.addf %908, %907 : vector<2x128xf32>
    %910 = arith.divf %908, %909 : vector<2x128xf32>
    %911 = vector.extract_strided_slice %904 {offsets = [0, 128], sizes = [2, 128], strides = [1, 1]} : vector<2x512xf32> to vector<2x128xf32>
    %912 = arith.negf %911 : vector<2x128xf32>
    %913 = math.exp %912 : vector<2x128xf32>
    %cst_222 = arith.constant 1.000000e+00 : f32
    %914 = vector.broadcast %cst_222 : f32 to vector<2x128xf32>
    %915 = arith.addf %914, %913 : vector<2x128xf32>
    %916 = arith.divf %914, %915 : vector<2x128xf32>
    %917 = vector.extract_strided_slice %904 {offsets = [0, 256], sizes = [2, 128], strides = [1, 1]} : vector<2x512xf32> to vector<2x128xf32>
    %918 = math.tanh %917 : vector<2x128xf32>
    %919 = vector.extract_strided_slice %904 {offsets = [0, 384], sizes = [2, 128], strides = [1, 1]} : vector<2x512xf32> to vector<2x128xf32>
    %920 = arith.negf %919 : vector<2x128xf32>
    %921 = math.exp %920 : vector<2x128xf32>
    %cst_223 = arith.constant 1.000000e+00 : f32
    %922 = vector.broadcast %cst_223 : f32 to vector<2x128xf32>
    %923 = arith.addf %922, %921 : vector<2x128xf32>
    %924 = arith.divf %922, %923 : vector<2x128xf32>
    %925 = arith.mulf %916, %869 : vector<2x128xf32>
    %926 = arith.mulf %910, %918 : vector<2x128xf32>
    %927 = arith.addf %925, %926 : vector<2x128xf32>
    %928 = math.tanh %927 : vector<2x128xf32>
    %929 = arith.mulf %924, %928 : vector<2x128xf32>
    %930 = tpu.concatenate %929, %901 in 1 : vector<2x128xf32>, vector<2x128xf32> -> vector<2x256xf32>
    %931 = arith.truncf %930 : vector<2x256xf32> to vector<2x256xbf16>
    %cst_224 = arith.constant dense<0.000000e+00> : vector<2x512xf32>
    %932 = tpu.matmul %931, %466, %cst_224 {dimension_numbers = #tpu.dot_dimension_numbers<[1], [0], [0], [1], [0, 0, 1, 1], [], []>} : vector<2x256xbf16>, vector<256x512xbf16>, vector<2x512xf32> -> vector<2x512xf32>
    %933 = vector.broadcast %467 : vector<1x512xf32> to vector<2x512xf32>
    %934 = arith.addf %932, %933 : vector<2x512xf32>
    %935 = vector.extract_strided_slice %934 {offsets = [0, 0], sizes = [2, 128], strides = [1, 1]} : vector<2x512xf32> to vector<2x128xf32>
    %936 = arith.negf %935 : vector<2x128xf32>
    %937 = math.exp %936 : vector<2x128xf32>
    %cst_225 = arith.constant 1.000000e+00 : f32
    %938 = vector.broadcast %cst_225 : f32 to vector<2x128xf32>
    %939 = arith.addf %938, %937 : vector<2x128xf32>
    %940 = arith.divf %938, %939 : vector<2x128xf32>
    %941 = vector.extract_strided_slice %934 {offsets = [0, 128], sizes = [2, 128], strides = [1, 1]} : vector<2x512xf32> to vector<2x128xf32>
    %942 = arith.negf %941 : vector<2x128xf32>
    %943 = math.exp %942 : vector<2x128xf32>
    %cst_226 = arith.constant 1.000000e+00 : f32
    %944 = vector.broadcast %cst_226 : f32 to vector<2x128xf32>
    %945 = arith.addf %944, %943 : vector<2x128xf32>
    %946 = arith.divf %944, %945 : vector<2x128xf32>
    %947 = vector.extract_strided_slice %934 {offsets = [0, 256], sizes = [2, 128], strides = [1, 1]} : vector<2x512xf32> to vector<2x128xf32>
    %948 = math.tanh %947 : vector<2x128xf32>
    %949 = vector.extract_strided_slice %934 {offsets = [0, 384], sizes = [2, 128], strides = [1, 1]} : vector<2x512xf32> to vector<2x128xf32>
    %950 = arith.negf %949 : vector<2x128xf32>
    %951 = math.exp %950 : vector<2x128xf32>
    %cst_227 = arith.constant 1.000000e+00 : f32
    %952 = vector.broadcast %cst_227 : f32 to vector<2x128xf32>
    %953 = arith.addf %952, %951 : vector<2x128xf32>
    %954 = arith.divf %952, %953 : vector<2x128xf32>
    %955 = arith.mulf %946, %899 : vector<2x128xf32>
    %956 = arith.mulf %940, %948 : vector<2x128xf32>
    %957 = arith.addf %955, %956 : vector<2x128xf32>
    %958 = math.tanh %957 : vector<2x128xf32>
    %959 = arith.mulf %954, %958 : vector<2x128xf32>
    %960 = arith.truncf %959 : vector<2x128xf32> to vector<2x128xbf16>
    %c0_228 = arith.constant 0 : index
    %c0_229 = arith.constant 0 : index
    %961 = vector.load %arg33[%c0_228, %c0_229] : memref<128x128xbf16, #tpu.memory_space<vmem>>, vector<128x128xbf16>
    %cst_230 = arith.constant dense<0.000000e+00> : vector<2x128xf32>
    %962 = tpu.matmul %960, %961, %cst_230 {dimension_numbers = #tpu.dot_dimension_numbers<[1], [0], [0], [1], [0, 0, 1, 1], [], []>} : vector<2x128xbf16>, vector<128x128xbf16>, vector<2x128xf32> -> vector<2x128xf32>
    %c0_231 = arith.constant 0 : index
    %c0_232 = arith.constant 0 : index
    %963 = vector.load %arg34[%c0_231, %c0_232] : memref<1x128xf32, #tpu.memory_space<vmem>>, vector<1x128xf32>
    %964 = vector.broadcast %963 : vector<1x128xf32> to vector<2x128xf32>
    %965 = arith.addf %962, %964 : vector<2x128xf32>
    %966 = arith.truncf %459 : vector<2x128xf32> to vector<2x128xbf16>
    %c0_233 = arith.constant 0 : index
    %c0_234 = arith.constant 0 : index
    %967 = vector.load %arg35[%c0_233, %c0_234] : memref<128x128xbf16, #tpu.memory_space<vmem>>, vector<128x128xbf16>
    %cst_235 = arith.constant dense<0.000000e+00> : vector<2x128xf32>
    %968 = tpu.matmul %966, %967, %cst_235 {dimension_numbers = #tpu.dot_dimension_numbers<[1], [0], [0], [1], [0, 0, 1, 1], [], []>} : vector<2x128xbf16>, vector<128x128xbf16>, vector<2x128xf32> -> vector<2x128xf32>
    %c0_236 = arith.constant 0 : index
    %c0_237 = arith.constant 0 : index
    %969 = vector.load %arg36[%c0_236, %c0_237] : memref<1x128xf32, #tpu.memory_space<vmem>>, vector<1x128xf32>
    %970 = vector.broadcast %969 : vector<1x128xf32> to vector<2x128xf32>
    %971 = arith.addf %968, %970 : vector<2x128xf32>
    %972 = arith.truncf %965 : vector<2x128xf32> to vector<2x128xbf16>
    %c0_238 = arith.constant 0 : index
    %c0_239 = arith.constant 0 : index
    %973 = vector.load %arg37[%c0_238, %c0_239] : memref<128x90xbf16, #tpu.memory_space<vmem>>, vector<128x90xbf16>
    %cst_240 = arith.constant dense<0.000000e+00> : vector<2x90xf32>
    %974 = tpu.matmul %972, %973, %cst_240 {dimension_numbers = #tpu.dot_dimension_numbers<[1], [0], [0], [1], [0, 0, 1, 1], [], []>} : vector<2x128xbf16>, vector<128x90xbf16>, vector<2x90xf32> -> vector<2x90xf32>
    %975 = arith.truncf %971 : vector<2x128xf32> to vector<2x128xbf16>
    %c0_241 = arith.constant 0 : index
    %c0_242 = arith.constant 0 : index
    %976 = vector.load %arg38[%c0_241, %c0_242] : memref<128x90xbf16, #tpu.memory_space<vmem>>, vector<128x90xbf16>
    %cst_243 = arith.constant dense<0.000000e+00> : vector<2x90xf32>
    %977 = tpu.matmul %975, %976, %cst_243 {dimension_numbers = #tpu.dot_dimension_numbers<[1], [0], [0], [1], [0, 0, 1, 1], [], []>} : vector<2x128xbf16>, vector<128x90xbf16>, vector<2x90xf32> -> vector<2x90xf32>
    %978 = arith.addf %974, %977 : vector<2x90xf32>
    %c0_244 = arith.constant 0 : index
    %c0_245 = arith.constant 0 : index
    %979 = vector.load %arg39[%c0_244, %c0_245] : memref<1x90xf32, #tpu.memory_space<vmem>>, vector<1x90xf32>
    %980 = vector.broadcast %979 : vector<1x90xf32> to vector<2x90xf32>
    %981 = arith.addf %978, %980 : vector<2x90xf32>
    %c0_246 = arith.constant 0 : index
    %c0_247 = arith.constant 0 : index
    %982 = vector.load %arg40[%c0_246, %c0_247] : memref<2x90xf32, #tpu.memory_space<vmem>>, vector<2x90xf32>
    tpu.vector_store %arg40[%c0_246, %c0_247], %981 {strides = array<i32>} : memref<2x90xf32, #tpu.memory_space<vmem>>, vector<2x90xf32>,
    return
  }
}

</mosaic_0001>

<bundles_post_ra>
// kernel: hybrid_forward.1
= control target key start
LH: loop header
LB: loop body
LE: loop exit
PB: predicated region body
PF: predicated region fallthrough
CT: control target
= control target key end

     0   :  { %s14622_s6 = smov 1   ;;  %s14623_s10 = smov 2   ;;  %s17773_s0 = inlined_call_operand.smem [shape: u32[41], index: -1, kind: input, shape index: {}] }
   0x1   :  { %s14718_s5 = sld [smem:[%s17773_s0]]   ;;  %s14624_s14 = smov 3  }
   0x2   :  { %s14723_s9 = sld [smem:[%s17773_s0 + %s14622_s6]]   ;;  %s14625_s18 = smov 4  }
   0x3   :  { %s14728_s13 = sld [smem:[%s17773_s0 + %s14623_s10]]   ;;  %s14626_s22 = smov 5  }
   0x4   :  { %s14733_s17 = sld [smem:[%s17773_s0 + %s14624_s14]]   ;;  %s14627_s26 = smov 6  }
   0x5   :  { %s14738_s21 = sld [smem:[%s17773_s0 + %s14625_s18]]   ;;  %s14628_s30 = smov 7  }
   0x6   :  { %s14743_s25 = sld [smem:[%s17773_s0 + %s14626_s22]]   ;;  %s14629_s4 = smov 8  }
   0x7   :  { %18188 = sst [smem:[#allocation71_spill]] %s14718_s5  ;;  %s14630_s10 = smov 9  }
   0x8   :  { %18189 = sst [smem:[#allocation72_spill]] %s14723_s9  ;;  %s14631_s15 = smov 10  }
   0x9   :  { %18190 = sst [smem:[#allocation73_spill]] %s14728_s13  ;;  %s14632_s20 = smov 11  }
   0xa   :  { %s14748_s29 = sld [smem:[%s17773_s0 + %s14627_s26]]   ;;  %s14633_s26 = smov 12  }
   0xb   :  { %18191 = sst [smem:[#allocation74_spill]] %s14738_s21  ;;  %s14634_s1 = smov 13  }
   0xc   :  { %s14753_s3 = sld [smem:[%s17773_s0 + %s14628_s30]]   ;;  %s14635_s7 = smov 14  }
   0xd   :  { %s14758_s8 = sld [smem:[%s17773_s0 + %s14629_s4]]   ;;  %s14637_s22 = smov 16  }
   0xe   :  { %s14763_s14 = sld [smem:[%s17773_s0 + %s14630_s10]]   ;;  %s14638_s28 = smov 17  }
   0xf   :  { %s14768_s19 = sld [smem:[%s17773_s0 + %s14631_s15]]   ;;  %s14636_s15 = smov 15  }
  0x10   :  { %18192 = sst [smem:[#allocation75_spill]] %s14748_s29 }
  0x11   :  { %s14773_s24 = sld [smem:[%s17773_s0 + %s14632_s20]]  }
  0x12   :  { %s14778_s30 = sld [smem:[%s17773_s0 + %s14633_s26]]  }
  0x13   :  { %18193 = sst [smem:[#allocation76_spill]] %s14758_s8 }
  0x14   :  { %s14783_s6 = sld [smem:[%s17773_s0 + %s14634_s1]]  }
  0x15   :  { %18194 = sst [smem:[#allocation77_spill]] %s14768_s19 }
  0x16   :  { %s14788_s12 = sld [smem:[%s17773_s0 + %s14635_s7]]   ;;  %s14639_s7 = smov 18  }
  0x17   :  { %18195 = sst [smem:[#allocation78_spill]] %s14773_s24 }
  0x18   :  { %s14793_s20 = sld [smem:[%s17773_s0 + %s14636_s15]]   ;;  %s14640_s15 = smov 19  }
  0x19   :  { %s14798_s27 = sld [smem:[%s17773_s0 + %s14637_s22]]   ;;  %s14641_s22 = smov 20  }
  0x1a   :  { %18196 = sst [smem:[#allocation79_spill]] %s14783_s6 }
  0x1b   :  { %s14803_s4 = sld [smem:[%s17773_s0 + %s14638_s28]]   ;;  %s14642_s28 = smov 21  }
  0x1c   :  { %s14808_s19 = sld [smem:[%s17773_s0 + %s14639_s7]]   ;;  %s14643_s7 = smov 22  }
  0x1d   :  { %s14813_s9 = sld [smem:[%s17773_s0 + %s14640_s15]]   ;;  %s14644_s15 = smov 23  }
  0x1e   :  { %18197 = sst [smem:[#allocation80_spill]] %s14793_s20 }
  0x1f   :  { %s14818_s5 = sld [smem:[%s17773_s0 + %s14641_s22]]   ;;  %s14645_s22 = smov 24  }
  0x21   :  { %18198 = sst [smem:[#allocation81_spill]] %s14803_s4 }
  0x22   :  { %18199 = sst [smem:[#allocation82_spill]] %s14808_s19 }
  0x23   :  { %18200 = sst [smem:[#allocation83_spill]] %s14813_s9 }
  0x24   :  { %s14823_s4 = sld [smem:[%s17773_s0 + %s14642_s28]]   ;;  %s14646_s28 = smov 25  }
  0x25   :  { %18201 = sst [smem:[#allocation84_spill]] %s14818_s5 }
  0x26   :  { %s14828_s19 = sld [smem:[%s17773_s0 + %s14643_s7]]   ;;  %s14647_s7 = smov 26  }
  0x27   :  { %s14833_s9 = sld [smem:[%s17773_s0 + %s14644_s15]]   ;;  %s14648_s15 = smov 27  }
  0x28   :  { %s14838_s5 = sld [smem:[%s17773_s0 + %s14645_s22]]   ;;  %s14649_s22 = smov 28  }
  0x29   :  { %s14843_s20 = sld [smem:[%s17773_s0 + %s14646_s28]]   ;;  %s14650_s28 = smov 29  }
  0x2a   :  { %s14853_s6 = sld [smem:[%s17773_s0 + %s14648_s15]]   ;;  %s14652_s15 = smov 31  }
  0x2b   :  { %s14863_s24 = sld [smem:[%s17773_s0 + %s14650_s28]]   ;;  %s14654_s28 = smov 33  }
  0x2c   :  { %18202 = sst [smem:[#allocation85_spill]] %s14828_s19 }
  0x2d   :  { %s14848_s19 = sld [smem:[%s17773_s0 + %s14647_s7]]   ;;  %s14651_s7 = smov 30  }
  0x2e   :  { %18203 = sst [smem:[#allocation86_spill]] %s14838_s5 }
  0x2f   :  { %s14858_s5 = sld [smem:[%s17773_s0 + %s14649_s22]]   ;;  %s14653_s22 = smov 32  }
  0x30   :  { %s14873_s8 = sld [smem:[%s17773_s0 + %s14652_s15]]   ;;  %s14656_s15 = smov 35  }
  0x31   :  { %s14883_s29 = sld [smem:[%s17773_s0 + %s14654_s28]]   ;;  %s14658_s28 = smov 37  }
  0x32   :  { %s14893_s21 = sld [smem:[%s17773_s0 + %s14656_s15]]   ;;  %s14660_s15 = smov 39  }
  0x33   :  { %18204 = sst [smem:[#allocation87_spill]] %s14848_s19 }
  0x34   :  { %s14868_s19 = sld [smem:[%s17773_s0 + %s14651_s7]]   ;;  %s14655_s7 = smov 34  }
  0x35   :  { %18205 = sst [smem:[#allocation88_spill]] %s14858_s5 }
  0x36   :  { %s14878_s5 = sld [smem:[%s17773_s0 + %s14653_s22]]   ;;  %s14657_s22 = smov 36  }
  0x37   :  { %s14903_s13 = sld [smem:[%s17773_s0 + %s14658_s28]]  }
  0x38   :  { %18209 = sst [smem:[#allocation92_spill]] %s14893_s21 }
  0x39   :  { %s14913_s21 = sld [smem:[%s17773_s0 + %s14660_s15]]  }
  0x3a   :  { %18206 = sst [smem:[#allocation89_spill]] %s14868_s19 }
  0x3b   :  { %s14888_s19 = sld [smem:[%s17773_s0 + %s14655_s7]]   ;;  %s14659_s7 = smov 38  }
  0x3c   :  { %18207 = sst [smem:[#allocation90_spill]] %s14878_s5 }
  0x3d   :  { %s14898_s5 = sld [smem:[%s17773_s0 + %s14657_s22]]   ;;  %s14661_s22 = smov 40  }
  0x41   :  { %18208 = sst [smem:[#allocation91_spill]] %s14888_s19 }
  0x42   :  { %s14908_s19 = sld [smem:[%s17773_s0 + %s14659_s7]]  }
  0x43   :  { %18210 = sst [smem:[#allocation93_spill]] %s14898_s5 }
  0x44   :  { %s14918_s5 = sld [smem:[%s17773_s0 + %s14661_s22]]  }
  0x45   :  { %86 = vsyncpa [#allocation3], 0 }
  0x46   :  { %87 = vsyncpa [#allocation6], 0 }
  0x47   :  { %88 = vsyncpa [#allocation9], 0 }
  0x48   :  { %89 = vsyncpa [#allocation12], 0 }
  0x49   :  { %90 = vsyncpa [#allocation15], 0 }
  0x4a   :  { %91 = vsyncpa [#allocation18], 0 }
  0x4b   :  { %92 = vsyncpa [#allocation21], 0 }
  0x4c   :  { %93 = vsyncpa [#allocation24], 0 }
  0x4d   :  { %94 = vsyncpa [#allocation27], 0 }
  0x4e   :  { %95 = vsyncpa [#allocation30], 0 }
  0x4f   :  { %96 = vsyncpa [#allocation33], 0 }
  0x50   :  { %97 = vsyncpa [#allocation36], 0 }
  0x51   :  { %98 = vsyncpa [#allocation39], 0 }
  0x52   :  { %99 = vsyncpa [#allocation42], 0 }
  0x53   :  { %100 = vsyncpa [#allocation45], 0 }
  0x54   :  { %101 = vsyncpa [#allocation48], 0 }
  0x55   :  { %102 = vsyncpa [#allocation51], 0 }
  0x56   :  { %103 = vsyncpa [#allocation4], 0  ;;  %s14662_s0 = smov [#allocation5]   ;;  %s14663_s1 = smov [#allocation8]  }
  0x57   :  { %s126_s28 = sshll.u32 %s14662_s0, 4  ;;  %s148_s2 = sshll.u32 %s14663_s1, 4  ;;  %s127_s28 = int_to_ptr.vmem [resolvable:$true] %s126_s28  ;;  %s149_s2 = int_to_ptr.vmem [resolvable:$true] %s148_s2 }
  0x58   :  { %s13860_s7 = scalar_lea.hbm %s14733_s17, 16 }
  0x59   :  { %p13861_p0 = scmp.ne.s32.totalorder %s14733_s17, %s13860_s7  ;;  %p13864_p1 = scmp.lt.u32.totalorder %s13860_s7, %s14733_s17 }
  0x5b   :  { %p13866_p2 = pnand %p13864_p1, %p13861_p0 }
  0x5d   :  { %13869 = shalt.err (!%p13866_p2)
}
  0x5e   :  { %s13870_s10 = scalar_lea.vmem %s127_s28, 16  ;;  %s13874_s11 = scalar_lea.vmem %s127_s28, 32 }
  0x5f   :  { %p13871_p3 = scmp.ne.s32.totalorder %s127_s28, %s13870_s10  ;;  %p13875_p4 = scmp.lt.s32.totalorder %s127_s28, %s127_s28 }
  0x60   :  { %p13876_p5 = scmp.lt.s32.totalorder %s13874_s11, %s13870_s10 }
  0x62   :  { %p13877_p6 = por %p13876_p5, %p13875_p4 }
  0x64   :  { %p13878_p7 = pnand %p13877_p6, %p13871_p3 }
  0x66   :  { %13881 = shalt.err (!%p13878_p7)
}
  0x67   :  { %129 = dma.hbm_to_vmem [thread:$0]  %s14733_s17, 16, %s127_s28, [#allocation6]  }
  0x68   :  { %s13882_s15 = scalar_lea.hbm %s14743_s25, 48 }
  0x69   :  { %p13883_p8 = scmp.ne.s32.totalorder %s14743_s25, %s13882_s15  ;;  %p13886_p9 = scmp.lt.u32.totalorder %s13882_s15, %s14743_s25 }
  0x6b   :  { %p13888_p10 = pnand %p13886_p9, %p13883_p8 }
  0x6d   :  { %13891 = shalt.err (!%p13888_p10)
}
  0x6e   :  { %s13892_s16 = scalar_lea.vmem %s149_s2, 48  ;;  %s13896_s18 = scalar_lea.vmem %s149_s2, 64 }
  0x6f   :  { %p13893_p11 = scmp.ne.s32.totalorder %s149_s2, %s13892_s16  ;;  %p13897_p12 = scmp.lt.s32.totalorder %s149_s2, %s149_s2 }
  0x70   :  { %p13898_p13 = scmp.lt.s32.totalorder %s13896_s18, %s13892_s16 }
  0x72   :  { %p13899_p0 = por %p13898_p13, %p13897_p12 }
  0x74   :  { %p13900_p1 = pnand %p13899_p0, %p13893_p11 }
  0x76   :  { %13903 = shalt.err (!%p13900_p1)
}
  0x77   :  { %151 = dma.hbm_to_vmem [thread:$0]  %s14743_s25, 48, %s149_s2, [#allocation9]  }
  0x78   :  { %s14664_s22 = smov [#allocation11]   ;;  %s14665_s23 = smov [#allocation14]  }
  0x79   :  { %s170_s17 = sshll.u32 %s14664_s22, 4  ;;  %s190_s26 = sshll.u32 %s14665_s23, 4  ;;  %s171_s17 = int_to_ptr.vmem [resolvable:$true] %s170_s17  ;;  %s191_s26 = int_to_ptr.vmem [resolvable:$true] %s190_s26 }
  0x7a   :  { %s13904_s0 = scalar_lea.hbm %s14753_s3, 16 }
  0x7b   :  { %p13905_p2 = scmp.ne.s32.totalorder %s14753_s3, %s13904_s0  ;;  %p13908_p3 = scmp.lt.u32.totalorder %s13904_s0, %s14753_s3 }
  0x7d   :  { %p13910_p4 = pnand %p13908_p3, %p13905_p2 }
  0x7f   :  { %13913 = shalt.err (!%p13910_p4)
}
  0x80   :  { %s13914_s28 = scalar_lea.vmem %s171_s17, 16  ;;  %s13918_s1 = scalar_lea.vmem %s171_s17, 32 }
  0x81   :  { %p13915_p5 = scmp.ne.s32.totalorder %s171_s17, %s13914_s28  ;;  %p13919_p6 = scmp.lt.s32.totalorder %s171_s17, %s171_s17 }
  0x82   :  { %p13920_p7 = scmp.lt.s32.totalorder %s13918_s1, %s13914_s28 }
  0x84   :  { %p13921_p8 = por %p13920_p7, %p13919_p6 }
  0x86   :  { %p13922_p9 = pnand %p13921_p8, %p13915_p5 }
  0x88   :  { %13925 = shalt.err (!%p13922_p9)
}
  0x89   :  { %173 = dma.hbm_to_vmem [thread:$0]  %s14753_s3, 16, %s171_s17, [#allocation12]  }
  0x8a   :  { %s13926_s25 = scalar_lea.hbm %s14763_s14, 16 }
  0x8b   :  { %p13927_p10 = scmp.ne.s32.totalorder %s14763_s14, %s13926_s25  ;;  %p13930_p11 = scmp.lt.u32.totalorder %s13926_s25, %s14763_s14 }
  0x8d   :  { %p13932_p12 = pnand %p13930_p11, %p13927_p10 }
  0x8f   :  { %13935 = shalt.err (!%p13932_p12)
}
  0x90   :  { %s13936_s2 = scalar_lea.vmem %s191_s26, 16  ;;  %s13940_s7 = scalar_lea.vmem %s191_s26, 32 }
  0x91   :  { %p13937_p13 = scmp.ne.s32.totalorder %s191_s26, %s13936_s2  ;;  %p13941_p0 = scmp.lt.s32.totalorder %s191_s26, %s191_s26 }
  0x92   :  { %p13942_p1 = scmp.lt.s32.totalorder %s13940_s7, %s13936_s2 }
  0x94   :  { %p13943_p2 = por %p13942_p1, %p13941_p0 }
  0x96   :  { %p13944_p3 = pnand %p13943_p2, %p13937_p13 }
  0x98   :  { %13947 = shalt.err (!%p13944_p3)
}
  0x99   :  { %193 = dma.hbm_to_vmem [thread:$0]  %s14763_s14, 16, %s191_s26, [#allocation15]  }
  0x9a   :  { %s14666_s10 = smov [#allocation17]   ;;  %s14667_s11 = smov [#allocation20]  }
  0x9b   :  { %s211_s3 = sshll.u32 %s14666_s10, 4  ;;  %s234_s15 = sshll.u32 %s14667_s11, 4  ;;  %s212_s3 = int_to_ptr.vmem [resolvable:$true] %s211_s3  ;;  %s14936_s15 = int_to_ptr.vmem [resolvable:$true] %s234_s15 }
  0x9c   :  { %s13948_s16 = scalar_lea.hbm %s14778_s30, 4096 }
  0x9d   :  { %p13949_p4 = scmp.ne.s32.totalorder %s14778_s30, %s13948_s16  ;;  %p13952_p5 = scmp.lt.u32.totalorder %s13948_s16, %s14778_s30 }
  0x9f   :  { %p13954_p6 = pnand %p13952_p5, %p13949_p4 }
  0xa1   :  { %13957 = shalt.err (!%p13954_p6)
}
  0xa2   :  { %s13958_s18 = scalar_lea.vmem %s212_s3, 4096  ;;  %p13963_p8 = scmp.lt.s32.totalorder %s212_s3, %s212_s3 }
  0xa3   :  { %p13959_p7 = scmp.ne.s32.totalorder %s212_s3, %s13958_s18  ;;  %p13964_p9 = scmp.lt.s32.totalorder %s13958_s18, %s13958_s18 }
  0xa5   :  { %p13965_p10 = por %p13964_p9, %p13963_p8 }
  0xa7   :  { %p13966_p11 = pnand %p13965_p10, %p13959_p7 }
  0xa9   :  { %13969 = shalt.err (!%p13966_p11)
}
  0xaa   :  { %s14668_s14 = smov 64   ;;  %s14669_s22 = smov 4  }
  0xab   :  { %217 = dma.hbm_to_vmem [thread:$0]  %s14778_s30, 4096, %s212_s3, [#allocation18], %s14668_s14, %s14668_s14, %s14669_s22  }
  0xac   :  { %s13970_s17 = scalar_lea.hbm %s14788_s12, 16 }
  0xad   :  { %p13971_p12 = scmp.ne.s32.totalorder %s14788_s12, %s13970_s17  ;;  %p13974_p13 = scmp.lt.u32.totalorder %s13970_s17, %s14788_s12 }
  0xaf   :  { %p13976_p0 = pnand %p13974_p13, %p13971_p12 }
  0xb1   :  { %13979 = shalt.err (!%p13976_p0)
}
  0xb2   :  { %s13980_s23 = scalar_lea.vmem %s14936_s15, 16  ;;  %s13984_s26 = scalar_lea.vmem %s14936_s15, 32 }
  0xb3   :  { %p13981_p1 = scmp.ne.s32.totalorder %s14936_s15, %s13980_s23  ;;  %p13985_p2 = scmp.lt.s32.totalorder %s14936_s15, %s14936_s15 }
  0xb4   :  { %p13986_p3 = scmp.lt.s32.totalorder %s13984_s26, %s13980_s23 }
  0xb6   :  { %p13987_p4 = por %p13986_p3, %p13985_p2 }
  0xb8   :  { %p13988_p5 = pnand %p13987_p4, %p13981_p1 }
  0xba   :  { %13991 = shalt.err (!%p13988_p5)
}
  0xbb   :  { %237 = dma.hbm_to_vmem [thread:$0]  %s14788_s12, 16, %s14936_s15, [#allocation21]  }
  0xbc   :  { %s14670_s30 = smov [#allocation23]   ;;  %s14671_s28 = smov [#allocation26]  }
  0xbd   :  { %s253_s0 = sshll.u32 %s14670_s30, 4  ;;  %s282_s1 = sshll.u32 %s14671_s28, 4  ;;  %s254_s0 = int_to_ptr.vmem [resolvable:$true] %s253_s0  ;;  %s14955_s1 = int_to_ptr.vmem [resolvable:$true] %s282_s1 }
  0xbe   :  { %s13992_s25 = scalar_lea.hbm %s14798_s27, 3072 }
  0xbf   :  { %p13993_p6 = scmp.ne.s32.totalorder %s14798_s27, %s13992_s25  ;;  %p13996_p7 = scmp.lt.u32.totalorder %s13992_s25, %s14798_s27 }
  0xc1   :  { %p13998_p8 = pnand %p13996_p7, %p13993_p6 }
  0xc3   :  { %14001 = shalt.err (!%p13998_p8)
}
  0xc4   :  { %s14002_s2 = scalar_lea.vmem %s254_s0, 3072  ;;  %p14007_p10 = scmp.lt.s32.totalorder %s254_s0, %s254_s0 }
  0xc5   :  { %p14003_p9 = scmp.ne.s32.totalorder %s254_s0, %s14002_s2  ;;  %p14008_p11 = scmp.lt.s32.totalorder %s14002_s2, %s14002_s2 }
  0xc7   :  { %p14009_p12 = por %p14008_p11, %p14007_p10 }
  0xc9   :  { %p14010_p13 = pnand %p14009_p12, %p14003_p9 }
  0xcb   :  { %14013 = shalt.err (!%p14010_p13)
}
  0xcc   :  { %s14672_s12 = smov 192   ;;  %s14673_s7 = smov 12  }
  0xcd   :  { %259 = dma.hbm_to_vmem [thread:$0]  %s14798_s27, 3072, %s254_s0, [#allocation24], %s14672_s12, %s14672_s12, %s14673_s7  }
  0xce   :  { %s14014_s10 = scalar_lea.hbm %s14823_s4, 16 }
  0xcf   :  { %p14015_p0 = scmp.ne.s32.totalorder %s14823_s4, %s14014_s10  ;;  %p14018_p1 = scmp.lt.u32.totalorder %s14014_s10, %s14823_s4 }
  0xd1   :  { %p14020_p2 = pnand %p14018_p1, %p14015_p0 }
  0xd3   :  { %14023 = shalt.err (!%p14020_p2)
}
  0xd4   :  { %s14024_s3 = scalar_lea.vmem %s14955_s1, 16  ;;  %s14028_s11 = scalar_lea.vmem %s14955_s1, 32 }
  0xd5   :  { %p14025_p3 = scmp.ne.s32.totalorder %s14955_s1, %s14024_s3  ;;  %p14029_p4 = scmp.lt.s32.totalorder %s14955_s1, %s14955_s1 }
  0xd6   :  { %p14030_p5 = scmp.lt.s32.totalorder %s14028_s11, %s14024_s3 }
  0xd8   :  { %p14031_p6 = por %p14030_p5, %p14029_p4 }
  0xda   :  { %p14032_p7 = pnand %p14031_p6, %p14025_p3 }
  0xdc   :  { %14035 = shalt.err (!%p14032_p7)
}
  0xdd   :  { %285 = dma.hbm_to_vmem [thread:$0]  %s14823_s4, 16, %s14955_s1, [#allocation27]  }
  0xde   :  { %s14674_s27 = smov [#allocation29]   ;;  %s14675_s16 = smov [#allocation32]  }
  0xdf   :  { %s304_s15 = sshll.u32 %s14674_s27, 4  ;;  %s326_s18 = sshll.u32 %s14675_s16, 4  ;;  %s305_s15 = int_to_ptr.vmem [resolvable:$true] %s304_s15  ;;  %s327_s18 = int_to_ptr.vmem [resolvable:$true] %s326_s18 }
  0xe0   :  { %s14036_s17 = scalar_lea.hbm %s14833_s9, 64 }
  0xe1   :  { %p14037_p8 = scmp.ne.s32.totalorder %s14833_s9, %s14036_s17  ;;  %p14040_p9 = scmp.lt.u32.totalorder %s14036_s17, %s14833_s9 }
  0xe3   :  { %p14042_p10 = pnand %p14040_p9, %p14037_p8 }
  0xe5   :  { %14045 = shalt.err (!%p14042_p10)
}
  0xe6   :  { %s14046_s23 = scalar_lea.vmem %s305_s15, 64  ;;  %p14051_p12 = scmp.lt.s32.totalorder %s305_s15, %s305_s15 }
  0xe7   :  { %p14047_p11 = scmp.ne.s32.totalorder %s305_s15, %s14046_s23  ;;  %p14052_p13 = scmp.lt.s32.totalorder %s14046_s23, %s14046_s23 }
  0xe9   :  { %p14053_p0 = por %p14052_p13, %p14051_p12 }
  0xeb   :  { %p14054_p1 = pnand %p14053_p0, %p14047_p11 }
  0xed   :  { %14057 = shalt.err (!%p14054_p1)
}
  0xee   :  { %307 = dma.hbm_to_vmem [thread:$0]  %s14833_s9, 64, %s305_s15, [#allocation30]  }
  0xef   :  { %s14058_s4 = scalar_lea.hbm %s14843_s20, 16 }
  0xf0   :  { %p14059_p2 = scmp.ne.s32.totalorder %s14843_s20, %s14058_s4  ;;  %p14062_p3 = scmp.lt.u32.totalorder %s14058_s4, %s14843_s20 }
  0xf2   :  { %p14064_p4 = pnand %p14062_p3, %p14059_p2 }
  0xf4   :  { %14067 = shalt.err (!%p14064_p4)
}
  0xf5   :  { %s14068_s26 = scalar_lea.vmem %s327_s18, 16  ;;  %s14072_s30 = scalar_lea.vmem %s327_s18, 32 }
  0xf6   :  { %p14069_p5 = scmp.ne.s32.totalorder %s327_s18, %s14068_s26  ;;  %p14073_p6 = scmp.lt.s32.totalorder %s327_s18, %s327_s18 }
  0xf7   :  { %p14074_p7 = scmp.lt.s32.totalorder %s14072_s30, %s14068_s26 }
  0xf9   :  { %p14075_p8 = por %p14074_p7, %p14073_p6 }
  0xfb   :  { %p14076_p9 = pnand %p14075_p8, %p14069_p5 }
  0xfd   :  { %14079 = shalt.err (!%p14076_p9)
}
  0xfe   :  { %329 = dma.hbm_to_vmem [thread:$0]  %s14843_s20, 16, %s327_s18, [#allocation33]  }
  0xff   :  { %s14676_s0 = smov [#allocation35]   ;;  %s14677_s28 = smov [#allocation38]  }
 0x100   :  { %s346_s9 = sshll.u32 %s14676_s0, 4  ;;  %s368_s1 = sshll.u32 %s14677_s28, 4  ;;  %s347_s9 = int_to_ptr.vmem [resolvable:$true] %s346_s9  ;;  %s369_s1 = int_to_ptr.vmem [resolvable:$true] %s368_s1 }
 0x101   :  { %s14080_s25 = scalar_lea.hbm %s14853_s6, 16 }
 0x102   :  { %p14081_p10 = scmp.ne.s32.totalorder %s14853_s6, %s14080_s25  ;;  %p14084_p11 = scmp.lt.u32.totalorder %s14080_s25, %s14853_s6 }
 0x104   :  { %p14086_p12 = pnand %p14084_p11, %p14081_p10 }
 0x106   :  { %14089 = shalt.err (!%p14086_p12)
}
 0x107   :  { %s14090_s2 = scalar_lea.vmem %s347_s9, 16  ;;  %s14094_s10 = scalar_lea.vmem %s347_s9, 32 }
 0x108   :  { %p14091_p13 = scmp.ne.s32.totalorder %s347_s9, %s14090_s2  ;;  %p14095_p0 = scmp.lt.s32.totalorder %s347_s9, %s347_s9 }
 0x109   :  { %p14096_p1 = scmp.lt.s32.totalorder %s14094_s10, %s14090_s2 }
 0x10b   :  { %p14097_p2 = por %p14096_p1, %p14095_p0 }
 0x10d   :  { %p14098_p3 = pnand %p14097_p2, %p14091_p13 }
 0x10f   :  { %14101 = shalt.err (!%p14098_p3)
}
 0x110   :  { %349 = dma.hbm_to_vmem [thread:$0]  %s14853_s6, 16, %s347_s9, [#allocation36]  }
 0x111   :  { %s14102_s20 = scalar_lea.hbm %s14863_s24, 64 }
 0x112   :  { %p14103_p4 = scmp.ne.s32.totalorder %s14863_s24, %s14102_s20  ;;  %p14106_p5 = scmp.lt.u32.totalorder %s14102_s20, %s14863_s24 }
 0x114   :  { %p14108_p6 = pnand %p14106_p5, %p14103_p4 }
 0x116   :  { %14111 = shalt.err (!%p14108_p6)
}
 0x117   :  { %s14112_s3 = scalar_lea.vmem %s369_s1, 64  ;;  %p14117_p8 = scmp.lt.s32.totalorder %s369_s1, %s369_s1 }
 0x118   :  { %p14113_p7 = scmp.ne.s32.totalorder %s369_s1, %s14112_s3  ;;  %p14118_p9 = scmp.lt.s32.totalorder %s14112_s3, %s14112_s3 }
 0x11a   :  { %p14119_p10 = por %p14118_p9, %p14117_p8 }
 0x11c   :  { %p14120_p11 = pnand %p14119_p10, %p14113_p7 }
 0x11e   :  { %14123 = shalt.err (!%p14120_p11)
}
 0x11f   :  { %371 = dma.hbm_to_vmem [thread:$0]  %s14863_s24, 64, %s369_s1, [#allocation39]  }
 0x120   :  { %s14678_s11 = smov [#allocation41]   ;;  %s14679_s6 = smov [#allocation44]  }
 0x121   :  { %s389_s27 = sshll.u32 %s14678_s11, 4  ;;  %s411_s15 = sshll.u32 %s14679_s6, 4  ;;  %s390_s27 = int_to_ptr.vmem [resolvable:$true] %s389_s27  ;;  %s14990_s15 = int_to_ptr.vmem [resolvable:$true] %s411_s15 }
 0x122   :  { %s14124_s16 = scalar_lea.hbm %s14873_s8, 8192 }
 0x123   :  { %p14125_p12 = scmp.ne.s32.totalorder %s14873_s8, %s14124_s16  ;;  %p14128_p13 = scmp.lt.u32.totalorder %s14124_s16, %s14873_s8 }
 0x125   :  { %p14130_p0 = pnand %p14128_p13, %p14125_p12 }
 0x127   :  { %14133 = shalt.err (!%p14130_p0)
}
 0x128   :  { %s14134_s18 = scalar_lea.vmem %s390_s27, 8192  ;;  %p14139_p2 = scmp.lt.s32.totalorder %s390_s27, %s390_s27 }
 0x129   :  { %p14135_p1 = scmp.ne.s32.totalorder %s390_s27, %s14134_s18  ;;  %p14140_p3 = scmp.lt.s32.totalorder %s14134_s18, %s14134_s18 }
 0x12b   :  { %p14141_p4 = por %p14140_p3, %p14139_p2 }
 0x12d   :  { %p14142_p5 = pnand %p14141_p4, %p14135_p1 }
 0x12f   :  { %14145 = shalt.err (!%p14142_p5)
}
 0x130   :  { %s14680_s24 = smov 256   ;;  %s14681_s17 = smov 16  }
 0x131   :  { %395 = dma.hbm_to_vmem [thread:$0]  %s14873_s8, 8192, %s390_s27, [#allocation42], %s14680_s24, %s14680_s24, %s14681_s17  }
 0x132   :  { %s14146_s23 = scalar_lea.hbm %s14883_s29, 1024 }
 0x133   :  { %p14147_p6 = scmp.ne.s32.totalorder %s14883_s29, %s14146_s23  ;;  %p14150_p7 = scmp.lt.u32.totalorder %s14146_s23, %s14883_s29 }
 0x135   :  { %p14152_p8 = pnand %p14150_p7, %p14147_p6 }
 0x137   :  { %14155 = shalt.err (!%p14152_p8)
}
 0x138   :  { %s14156_s4 = scalar_lea.vmem %s14990_s15, 1024  ;;  %p14161_p10 = scmp.lt.s32.totalorder %s14990_s15, %s14990_s15 }
 0x139   :  { %p14157_p9 = scmp.ne.s32.totalorder %s14990_s15, %s14156_s4  ;;  %p14162_p11 = scmp.lt.s32.totalorder %s14156_s4, %s14156_s4 }
 0x13b   :  { %p14163_p12 = por %p14162_p11, %p14161_p10 }
 0x13d   :  { %p14164_p13 = pnand %p14163_p12, %p14157_p9 }
 0x13f   :  { %14167 = shalt.err (!%p14164_p13)
}
 0x140   :  { %s18211_s8 = sld [smem:[#allocation92_spill]]  ;;  %s14682_s26 = smov [#allocation47]  }
 0x141   :  { %417 = dma.hbm_to_vmem [thread:$0]  %s14883_s29, 1024, %s14990_s15, [#allocation45], %s14668_s14, %s14668_s14, %s14669_s22  }
 0x142   :  { %s433_s30 = sshll.u32 %s14682_s26, 4  ;;  %s14683_s0 = smov [#allocation2]   ;;  %s434_s30 = int_to_ptr.vmem [resolvable:$true] %s433_s30 }
 0x143   :  { %s113_s9 = sshll.u32 %s14683_s0, 4  ;;  %s15011_s9 = int_to_ptr.vmem [resolvable:$true] %s113_s9 }
 0x146   :  { %s14168_s28 = scalar_lea.hbm %s18211_s8, 1024 }
 0x147   :  { %p14169_p0 = scmp.ne.s32.totalorder %s18211_s8, %s14168_s28  ;;  %p14172_p1 = scmp.lt.u32.totalorder %s14168_s28, %s18211_s8 }
 0x149   :  { %p14174_p2 = pnand %p14172_p1, %p14169_p0 }
 0x14b   :  { %14177 = shalt.err (!%p14174_p2)
}
 0x14c   :  { %s14178_s1 = scalar_lea.vmem %s434_s30, 1024  ;;  %p14183_p4 = scmp.lt.s32.totalorder %s434_s30, %s434_s30 }
 0x14d   :  { %p14179_p3 = scmp.ne.s32.totalorder %s434_s30, %s14178_s1  ;;  %p14184_p5 = scmp.lt.s32.totalorder %s14178_s1, %s14178_s1 }
 0x14f   :  { %p14185_p6 = por %p14184_p5, %p14183_p4 }
 0x151   :  { %p14186_p7 = pnand %p14185_p6, %p14179_p3 }
 0x153   :  { %14189 = shalt.err (!%p14186_p7)
}
 0x154   :  { %s18212_s29 = sld [smem:[#allocation73_spill]] }
 0x155   :  { %439 = dma.hbm_to_vmem [thread:$0]  %s18211_s8, 1024, %s434_s30, [#allocation48], %s14668_s14, %s14668_s14, %s14669_s22  }
 0x15a   :  { %s14190_s25 = scalar_lea.hbm %s18212_s29, 128 }
 0x15b   :  { %p14191_p8 = scmp.ne.s32.totalorder %s18212_s29, %s14190_s25  ;;  %p14194_p9 = scmp.lt.u32.totalorder %s14190_s25, %s18212_s29 }
 0x15d   :  { %p14196_p10 = pnand %p14194_p9, %p14191_p8 }
 0x15f   :  { %14199 = shalt.err (!%p14196_p10)
}
 0x160   :  { %s14200_s2 = scalar_lea.vmem %s15011_s9, 128  ;;  %p14205_p12 = scmp.lt.s32.totalorder %s15011_s9, %s15011_s9 }
 0x161   :  { %p14201_p11 = scmp.ne.s32.totalorder %s15011_s9, %s14200_s2  ;;  %p14206_p13 = scmp.lt.s32.totalorder %s14200_s2, %s14200_s2 }
 0x163   :  { %p14207_p0 = por %p14206_p13, %p14205_p12 }
 0x165   :  { %p14208_p1 = pnand %p14207_p0, %p14201_p11 }
 0x167   :  { %14211 = shalt.err (!%p14208_p1)
}
 0x168   :  { %s18213_s10 = sld [smem:[#allocation74_spill]]  ;;  %s14684_s20 = smov [#allocation7]  }
 0x169   :  { %119 = dma.hbm_to_vmem [thread:$0]  %s18212_s29, 128, %s15011_s9, [#allocation3], %s14668_s14, %s14668_s14, %s14669_s22  }
 0x16a   :  { %s135_s3 = sshll.u32 %s14684_s20, 4  ;;  %s14685_s11 = smov [#allocation10]   ;;  %s136_s3 = int_to_ptr.vmem [resolvable:$true] %s135_s3 }
 0x16b   :  { %s157_s27 = sshll.u32 %s14685_s11, 4  ;;  %s15032_s27 = int_to_ptr.vmem [resolvable:$true] %s157_s27 }
 0x16e   :  { %s14212_s6 = scalar_lea.hbm %s18213_s10, 3072 }
 0x16f   :  { %p14213_p2 = scmp.ne.s32.totalorder %s18213_s10, %s14212_s6  ;;  %p14216_p3 = scmp.lt.u32.totalorder %s14212_s6, %s18213_s10 }
 0x171   :  { %p14218_p4 = pnand %p14216_p3, %p14213_p2 }
 0x173   :  { %14221 = shalt.err (!%p14218_p4)
}
 0x174   :  { %s14222_s15 = scalar_lea.vmem %s136_s3, 3072  ;;  %p14227_p6 = scmp.lt.s32.totalorder %s136_s3, %s136_s3 }
 0x175   :  { %p14223_p5 = scmp.ne.s32.totalorder %s136_s3, %s14222_s15  ;;  %p14228_p7 = scmp.lt.s32.totalorder %s14222_s15, %s14222_s15 }
 0x177   :  { %p14229_p8 = por %p14228_p7, %p14227_p6 }
 0x179   :  { %p14230_p9 = pnand %p14229_p8, %p14223_p5 }
 0x17b   :  { %14233 = shalt.err (!%p14230_p9)
}
 0x17c   :  { %s18214_s16 = sld [smem:[#allocation75_spill]] }
 0x17d   :  { %141 = dma.hbm_to_vmem [thread:$0]  %s18213_s10, 3072, %s136_s3, [#allocation6], %s14672_s12, %s14672_s12, %s14673_s7  }
 0x182   :  { %s14234_s18 = scalar_lea.hbm %s18214_s16, 1024 }
 0x183   :  { %p14235_p10 = scmp.ne.s32.totalorder %s18214_s16, %s14234_s18  ;;  %p14238_p11 = scmp.lt.u32.totalorder %s14234_s18, %s18214_s16 }
 0x185   :  { %p14240_p12 = pnand %p14238_p11, %p14235_p10 }
 0x187   :  { %14243 = shalt.err (!%p14240_p12)
}
 0x188   :  { %s14244_s23 = scalar_lea.vmem %s15032_s27, 1024  ;;  %p14249_p0 = scmp.lt.s32.totalorder %s15032_s27, %s15032_s27 }
 0x189   :  { %p14245_p13 = scmp.ne.s32.totalorder %s15032_s27, %s14244_s23  ;;  %p14250_p1 = scmp.lt.s32.totalorder %s14244_s23, %s14244_s23 }
 0x18b   :  { %p14251_p2 = por %p14250_p1, %p14249_p0 }
 0x18d   :  { %p14252_p3 = pnand %p14251_p2, %p14245_p13 }
 0x18f   :  { %14255 = shalt.err (!%p14252_p3)
}
 0x190   :  { %s18215_s12 = sld [smem:[#allocation76_spill]]  ;;  %s14686_s7 = smov [#allocation13]  }
 0x191   :  { %163 = dma.hbm_to_vmem [thread:$0]  %s18214_s16, 1024, %s15032_s27, [#allocation9], %s14668_s14, %s14668_s14, %s14669_s22  }
 0x192   :  { %s180_s4 = sshll.u32 %s14686_s7, 4  ;;  %s14687_s8 = smov [#allocation16]   ;;  %s181_s4 = int_to_ptr.vmem [resolvable:$true] %s180_s4 }
 0x193   :  { %s202_s26 = sshll.u32 %s14687_s8, 4  ;;  %s203_s26 = int_to_ptr.vmem [resolvable:$true] %s202_s26 }
 0x196   :  { %s14256_s30 = scalar_lea.hbm %s18215_s12, 16 }
 0x197   :  { %p14257_p4 = scmp.ne.s32.totalorder %s18215_s12, %s14256_s30  ;;  %p14260_p5 = scmp.lt.u32.totalorder %s14256_s30, %s18215_s12 }
 0x199   :  { %p14262_p6 = pnand %p14260_p5, %p14257_p4 }
 0x19b   :  { %14265 = shalt.err (!%p14262_p6)
}
 0x19c   :  { %s14266_s0 = scalar_lea.vmem %s181_s4, 16  ;;  %s14270_s9 = scalar_lea.vmem %s181_s4, 32 }
 0x19d   :  { %p14267_p7 = scmp.ne.s32.totalorder %s181_s4, %s14266_s0  ;;  %p14271_p8 = scmp.lt.s32.totalorder %s181_s4, %s181_s4 }
 0x19e   :  { %p14272_p9 = scmp.lt.s32.totalorder %s14270_s9, %s14266_s0 }
 0x1a0   :  { %p14273_p10 = por %p14272_p9, %p14271_p8 }
 0x1a2   :  { %p14274_p11 = pnand %p14273_p10, %p14267_p7 }
 0x1a4   :  { %14277 = shalt.err (!%p14274_p11)
}
 0x1a5   :  { %s18216_s28 = sld [smem:[#allocation78_spill]] }
 0x1a6   :  { %183 = dma.hbm_to_vmem [thread:$0]  %s18215_s12, 16, %s181_s4, [#allocation12]  }
 0x1ab   :  { %s14278_s1 = scalar_lea.hbm %s18216_s28, 64 }
 0x1ac   :  { %p14279_p12 = scmp.ne.s32.totalorder %s18216_s28, %s14278_s1  ;;  %p14282_p13 = scmp.lt.u32.totalorder %s14278_s1, %s18216_s28 }
 0x1ae   :  { %p14284_p0 = pnand %p14282_p13, %p14279_p12 }
 0x1b0   :  { %14287 = shalt.err (!%p14284_p0)
}
 0x1b1   :  { %s14288_s29 = scalar_lea.vmem %s203_s26, 64  ;;  %p14293_p2 = scmp.lt.s32.totalorder %s203_s26, %s203_s26 }
 0x1b2   :  { %p14289_p1 = scmp.ne.s32.totalorder %s203_s26, %s14288_s29  ;;  %p14294_p3 = scmp.lt.s32.totalorder %s14288_s29, %s14288_s29 }
 0x1b4   :  { %p14295_p4 = por %p14294_p3, %p14293_p2 }
 0x1b6   :  { %p14296_p5 = pnand %p14295_p4, %p14289_p1 }
 0x1b8   :  { %14299 = shalt.err (!%p14296_p5)
}
 0x1b9   :  { %s18217_s25 = sld [smem:[#allocation79_spill]]  ;;  %s14688_s2 = smov [#allocation19]  }
 0x1ba   :  { %205 = dma.hbm_to_vmem [thread:$0]  %s18216_s28, 64, %s203_s26, [#allocation15]  }
 0x1bb   :  { %s224_s10 = sshll.u32 %s14688_s2, 4  ;;  %s14689_s20 = smov [#allocation22]   ;;  %s225_s10 = int_to_ptr.vmem [resolvable:$true] %s224_s10 }
 0x1bc   :  { %s244_s3 = sshll.u32 %s14689_s20, 4  ;;  %s245_s3 = int_to_ptr.vmem [resolvable:$true] %s244_s3 }
 0x1bf   :  { %s14300_s11 = scalar_lea.hbm %s18217_s25, 16 }
 0x1c0   :  { %p14301_p6 = scmp.ne.s32.totalorder %s18217_s25, %s14300_s11  ;;  %p14304_p7 = scmp.lt.u32.totalorder %s14300_s11, %s18217_s25 }
 0x1c2   :  { %p14306_p8 = pnand %p14304_p7, %p14301_p6 }
 0x1c4   :  { %14309 = shalt.err (!%p14306_p8)
}
 0x1c5   :  { %s14310_s27 = scalar_lea.vmem %s225_s10, 16  ;;  %s14314_s6 = scalar_lea.vmem %s225_s10, 32 }
 0x1c6   :  { %p14311_p9 = scmp.ne.s32.totalorder %s225_s10, %s14310_s27  ;;  %p14315_p10 = scmp.lt.s32.totalorder %s225_s10, %s225_s10 }
 0x1c7   :  { %p14316_p11 = scmp.lt.s32.totalorder %s14314_s6, %s14310_s27 }
 0x1c9   :  { %p14317_p12 = por %p14316_p11, %p14315_p10 }
 0x1cb   :  { %p14318_p13 = pnand %p14317_p12, %p14311_p9 }
 0x1cd   :  { %14321 = shalt.err (!%p14318_p13)
}
 0x1ce   :  { %s18218_s15 = sld [smem:[#allocation80_spill]] }
 0x1cf   :  { %227 = dma.hbm_to_vmem [thread:$0]  %s18217_s25, 16, %s225_s10, [#allocation18]  }
 0x1d4   :  { %s14322_s16 = scalar_lea.hbm %s18218_s15, 16 }
 0x1d5   :  { %p14323_p0 = scmp.ne.s32.totalorder %s18218_s15, %s14322_s16  ;;  %p14326_p1 = scmp.lt.u32.totalorder %s14322_s16, %s18218_s15 }
 0x1d7   :  { %p14328_p2 = pnand %p14326_p1, %p14323_p0 }
 0x1d9   :  { %14331 = shalt.err (!%p14328_p2)
}
 0x1da   :  { %s14332_s18 = scalar_lea.vmem %s245_s3, 16  ;;  %s14336_s23 = scalar_lea.vmem %s245_s3, 32 }
 0x1db   :  { %p14333_p3 = scmp.ne.s32.totalorder %s245_s3, %s14332_s18  ;;  %p14337_p4 = scmp.lt.s32.totalorder %s245_s3, %s245_s3 }
 0x1dc   :  { %p14338_p5 = scmp.lt.s32.totalorder %s14336_s23, %s14332_s18 }
 0x1de   :  { %p14339_p6 = por %p14338_p5, %p14337_p4 }
 0x1e0   :  { %p14340_p7 = pnand %p14339_p6, %p14333_p3 }
 0x1e2   :  { %14343 = shalt.err (!%p14340_p7)
}
 0x1e3   :  { %s18219_s12 = sld [smem:[#allocation84_spill]]  ;;  %s14690_s7 = smov [#allocation25]  }
 0x1e4   :  { %247 = dma.hbm_to_vmem [thread:$0]  %s18218_s15, 16, %s245_s3, [#allocation21]  }
 0x1e5   :  { %s272_s4 = sshll.u32 %s14690_s7, 4  ;;  %s14691_s8 = smov [#allocation28]   ;;  %s273_s4 = int_to_ptr.vmem [resolvable:$true] %s272_s4 }
 0x1e6   :  { %s291_s26 = sshll.u32 %s14691_s8, 4  ;;  %s15069_s26 = int_to_ptr.vmem [resolvable:$true] %s291_s26 }
 0x1e9   :  { %s14344_s30 = scalar_lea.hbm %s18219_s12, 16 }
 0x1ea   :  { %p14345_p8 = scmp.ne.s32.totalorder %s18219_s12, %s14344_s30  ;;  %p14348_p9 = scmp.lt.u32.totalorder %s14344_s30, %s18219_s12 }
 0x1ec   :  { %p14350_p10 = pnand %p14348_p9, %p14345_p8 }
 0x1ee   :  { %14353 = shalt.err (!%p14350_p10)
}
 0x1ef   :  { %s14354_s0 = scalar_lea.vmem %s273_s4, 16  ;;  %s14358_s9 = scalar_lea.vmem %s273_s4, 32 }
 0x1f0   :  { %p14355_p11 = scmp.ne.s32.totalorder %s273_s4, %s14354_s0  ;;  %p14359_p12 = scmp.lt.s32.totalorder %s273_s4, %s273_s4 }
 0x1f1   :  { %p14360_p13 = scmp.lt.s32.totalorder %s14358_s9, %s14354_s0 }
 0x1f3   :  { %p14361_p0 = por %p14360_p13, %p14359_p12 }
 0x1f5   :  { %p14362_p1 = pnand %p14361_p0, %p14355_p11 }
 0x1f7   :  { %14365 = shalt.err (!%p14362_p1)
}
 0x1f8   :  { %s18220_s28 = sld [smem:[#allocation85_spill]] }
 0x1f9   :  { %275 = dma.hbm_to_vmem [thread:$0]  %s18219_s12, 16, %s273_s4, [#allocation24]  }
 0x1fe   :  { %s14366_s1 = scalar_lea.hbm %s18220_s28, 4096 }
 0x1ff   :  { %p14367_p2 = scmp.ne.s32.totalorder %s18220_s28, %s14366_s1  ;;  %p14370_p3 = scmp.lt.u32.totalorder %s14366_s1, %s18220_s28 }
 0x201   :  { %p14372_p4 = pnand %p14370_p3, %p14367_p2 }
 0x203   :  { %14375 = shalt.err (!%p14372_p4)
}
 0x204   :  { %s14376_s29 = scalar_lea.vmem %s15069_s26, 4096  ;;  %p14381_p6 = scmp.lt.s32.totalorder %s15069_s26, %s15069_s26 }
 0x205   :  { %p14377_p5 = scmp.ne.s32.totalorder %s15069_s26, %s14376_s29  ;;  %p14382_p7 = scmp.lt.s32.totalorder %s14376_s29, %s14376_s29 }
 0x207   :  { %p14383_p8 = por %p14382_p7, %p14381_p6 }
 0x209   :  { %p14384_p9 = pnand %p14383_p8, %p14377_p5 }
 0x20b   :  { %14387 = shalt.err (!%p14384_p9)
}
 0x20c   :  { %s18221_s25 = sld [smem:[#allocation86_spill]]  ;;  %s14692_s2 = smov [#allocation31]  }
 0x20d   :  { %297 = dma.hbm_to_vmem [thread:$0]  %s18220_s28, 4096, %s15069_s26, [#allocation27], %s14680_s24, %s14680_s24, %s14681_s17  }
 0x20e   :  { %s313_s10 = sshll.u32 %s14692_s2, 4  ;;  %s14693_s20 = smov [#allocation34]   ;;  %s314_s10 = int_to_ptr.vmem [resolvable:$true] %s313_s10 }
 0x20f   :  { %s336_s3 = sshll.u32 %s14693_s20, 4  ;;  %s337_s3 = int_to_ptr.vmem [resolvable:$true] %s336_s3 }
 0x212   :  { %s14388_s11 = scalar_lea.hbm %s18221_s25, 4096 }
 0x213   :  { %p14389_p10 = scmp.ne.s32.totalorder %s18221_s25, %s14388_s11  ;;  %p14392_p11 = scmp.lt.u32.totalorder %s14388_s11, %s18221_s25 }
 0x215   :  { %p14394_p12 = pnand %p14392_p11, %p14389_p10 }
 0x217   :  { %14397 = shalt.err (!%p14394_p12)
}
 0x218   :  { %s14398_s27 = scalar_lea.vmem %s314_s10, 4096  ;;  %p14403_p0 = scmp.lt.s32.totalorder %s314_s10, %s314_s10 }
 0x219   :  { %p14399_p13 = scmp.ne.s32.totalorder %s314_s10, %s14398_s27  ;;  %p14404_p1 = scmp.lt.s32.totalorder %s14398_s27, %s14398_s27 }
 0x21b   :  { %p14405_p2 = por %p14404_p1, %p14403_p0 }
 0x21d   :  { %p14406_p3 = pnand %p14405_p2, %p14399_p13 }
 0x21f   :  { %14409 = shalt.err (!%p14406_p3)
}
 0x220   :  { %s18222_s6 = sld [smem:[#allocation87_spill]] }
 0x221   :  { %319 = dma.hbm_to_vmem [thread:$0]  %s18221_s25, 4096, %s314_s10, [#allocation30], %s14668_s14, %s14668_s14, %s14669_s22  }
 0x226   :  { %s14410_s15 = scalar_lea.hbm %s18222_s6, 16 }
 0x227   :  { %p14411_p4 = scmp.ne.s32.totalorder %s18222_s6, %s14410_s15  ;;  %p14414_p5 = scmp.lt.u32.totalorder %s14410_s15, %s18222_s6 }
 0x229   :  { %p14416_p6 = pnand %p14414_p5, %p14411_p4 }
 0x22b   :  { %14419 = shalt.err (!%p14416_p6)
}
 0x22c   :  { %s14420_s16 = scalar_lea.vmem %s337_s3, 16  ;;  %s14424_s18 = scalar_lea.vmem %s337_s3, 32 }
 0x22d   :  { %p14421_p7 = scmp.ne.s32.totalorder %s337_s3, %s14420_s16  ;;  %p14425_p8 = scmp.lt.s32.totalorder %s337_s3, %s337_s3 }
 0x22e   :  { %p14426_p9 = scmp.lt.s32.totalorder %s14424_s18, %s14420_s16 }
 0x230   :  { %p14427_p10 = por %p14426_p9, %p14425_p8 }
 0x232   :  { %p14428_p11 = pnand %p14427_p10, %p14421_p7 }
 0x234   :  { %14431 = shalt.err (!%p14428_p11)
}
 0x235   :  { %s18223_s23 = sld [smem:[#allocation88_spill]]  ;;  %s14694_s12 = smov [#allocation37]  }
 0x236   :  { %339 = dma.hbm_to_vmem [thread:$0]  %s18222_s6, 16, %s337_s3, [#allocation33]  }
 0x237   :  { %s355_s22 = sshll.u32 %s14694_s12, 4  ;;  %s14695_s7 = smov [#allocation40]   ;;  %s356_s22 = int_to_ptr.vmem [resolvable:$true] %s355_s22 }
 0x238   :  { %s377_s4 = sshll.u32 %s14695_s7, 4  ;;  %s15098_s4 = int_to_ptr.vmem [resolvable:$true] %s377_s4 }
 0x23b   :  { %s14432_s8 = scalar_lea.hbm %s18223_s23, 512 }
 0x23c   :  { %p14433_p12 = scmp.ne.s32.totalorder %s18223_s23, %s14432_s8  ;;  %p14436_p13 = scmp.lt.u32.totalorder %s14432_s8, %s18223_s23 }
 0x23e   :  { %p14438_p0 = pnand %p14436_p13, %p14433_p12 }
 0x240   :  { %14441 = shalt.err (!%p14438_p0)
}
 0x241   :  { %s14442_s26 = scalar_lea.vmem %s356_s22, 512  ;;  %p14447_p2 = scmp.lt.s32.totalorder %s356_s22, %s356_s22 }
 0x242   :  { %p14443_p1 = scmp.ne.s32.totalorder %s356_s22, %s14442_s26  ;;  %p14448_p3 = scmp.lt.s32.totalorder %s14442_s26, %s14442_s26 }
 0x244   :  { %p14449_p4 = por %p14448_p3, %p14447_p2 }
 0x246   :  { %p14450_p5 = pnand %p14449_p4, %p14443_p1 }
 0x248   :  { %14453 = shalt.err (!%p14450_p5)
}
 0x249   :  { %s18224_s30 = sld [smem:[#allocation89_spill]] }
 0x24a   :  { %361 = dma.hbm_to_vmem [thread:$0]  %s18223_s23, 512, %s356_s22, [#allocation36], %s14680_s24, %s14680_s24, %s14681_s17  }
 0x24f   :  { %s14454_s0 = scalar_lea.hbm %s18224_s30, 4096 }
 0x250   :  { %p14455_p6 = scmp.ne.s32.totalorder %s18224_s30, %s14454_s0  ;;  %p14458_p7 = scmp.lt.u32.totalorder %s14454_s0, %s18224_s30 }
 0x252   :  { %p14460_p8 = pnand %p14458_p7, %p14455_p6 }
 0x254   :  { %14463 = shalt.err (!%p14460_p8)
}
 0x255   :  { %s14464_s9 = scalar_lea.vmem %s15098_s4, 4096  ;;  %p14469_p10 = scmp.lt.s32.totalorder %s15098_s4, %s15098_s4 }
 0x256   :  { %p14465_p9 = scmp.ne.s32.totalorder %s15098_s4, %s14464_s9  ;;  %p14470_p11 = scmp.lt.s32.totalorder %s14464_s9, %s14464_s9 }
 0x258   :  { %p14471_p12 = por %p14470_p11, %p14469_p10 }
 0x25a   :  { %p14472_p13 = pnand %p14471_p12, %p14465_p9 }
 0x25c   :  { %14475 = shalt.err (!%p14472_p13)
}
 0x25d   :  { %s18225_s28 = sld [smem:[#allocation90_spill]]  ;;  %s14696_s1 = smov [#allocation43]  }
 0x25e   :  { %383 = dma.hbm_to_vmem [thread:$0]  %s18224_s30, 4096, %s15098_s4, [#allocation39], %s14680_s24, %s14680_s24, %s14681_s17  }
 0x25f   :  { %s402_s29 = sshll.u32 %s14696_s1, 4  ;;  %s14697_s25 = smov [#allocation46]   ;;  %s403_s29 = int_to_ptr.vmem [resolvable:$true] %s402_s29 }
 0x260   :  { %s424_s2 = sshll.u32 %s14697_s25, 4  ;;  %s425_s2 = int_to_ptr.vmem [resolvable:$true] %s424_s2 }
 0x263   :  { %s14476_s10 = scalar_lea.hbm %s18225_s28, 64 }
 0x264   :  { %p14477_p0 = scmp.ne.s32.totalorder %s18225_s28, %s14476_s10  ;;  %p14480_p1 = scmp.lt.u32.totalorder %s14476_s10, %s18225_s28 }
 0x266   :  { %p14482_p2 = pnand %p14480_p1, %p14477_p0 }
 0x268   :  { %14485 = shalt.err (!%p14482_p2)
}
 0x269   :  { %s14486_s20 = scalar_lea.vmem %s403_s29, 64  ;;  %p14491_p4 = scmp.lt.s32.totalorder %s403_s29, %s403_s29 }
 0x26a   :  { %p14487_p3 = scmp.ne.s32.totalorder %s403_s29, %s14486_s20  ;;  %p14492_p5 = scmp.lt.s32.totalorder %s14486_s20, %s14486_s20 }
 0x26c   :  { %p14493_p6 = por %p14492_p5, %p14491_p4 }
 0x26e   :  { %p14494_p7 = pnand %p14493_p6, %p14487_p3 }
 0x270   :  { %14497 = shalt.err (!%p14494_p7)
}
 0x271   :  { %s18226_s24 = sld [smem:[#allocation91_spill]] }
 0x272   :  { %405 = dma.hbm_to_vmem [thread:$0]  %s18225_s28, 64, %s403_s29, [#allocation42]  }
 0x277   :  { %s14498_s3 = scalar_lea.hbm %s18226_s24, 16 }
 0x278   :  { %p14499_p8 = scmp.ne.s32.totalorder %s18226_s24, %s14498_s3  ;;  %p14502_p9 = scmp.lt.u32.totalorder %s14498_s3, %s18226_s24 }
 0x27a   :  { %p14504_p10 = pnand %p14502_p9, %p14499_p8 }
 0x27c   :  { %14507 = shalt.err (!%p14504_p10)
}
 0x27d   :  { %s14508_s11 = scalar_lea.vmem %s425_s2, 16  ;;  %s14512_s27 = scalar_lea.vmem %s425_s2, 32 }
 0x27e   :  { %p14509_p11 = scmp.ne.s32.totalorder %s425_s2, %s14508_s11  ;;  %p14513_p12 = scmp.lt.s32.totalorder %s425_s2, %s425_s2 }
 0x27f   :  { %p14514_p13 = scmp.lt.s32.totalorder %s14512_s27, %s14508_s11 }
 0x281   :  { %p14515_p0 = por %p14514_p13, %p14513_p12 }
 0x283   :  { %p14516_p1 = pnand %p14515_p0, %p14509_p11 }
 0x285   :  { %14519 = shalt.err (!%p14516_p1)
}
 0x286   :  { %s18227_s6 = sld [smem:[#allocation93_spill]]  ;;  %s14698_s15 = smov [#allocation49]  }
 0x287   :  { %427 = dma.hbm_to_vmem [thread:$0]  %s18226_s24, 16, %s425_s2, [#allocation45]  }
 0x288   :  { %s446_s16 = sshll.u32 %s14698_s15, 4  ;;  %s14699_s18 = smov [#allocation50]   ;;  %s447_s16 = int_to_ptr.vmem [resolvable:$true] %s446_s16 }
 0x289   :  { %s460_s23 = sshll.u32 %s14699_s18, 4  ;;  %s461_s23 = int_to_ptr.vmem [resolvable:$true] %s460_s23 }
 0x28c   :  { %s14520_s12 = scalar_lea.hbm %s18227_s6, 16 }
 0x28d   :  { %p14521_p2 = scmp.ne.s32.totalorder %s18227_s6, %s14520_s12  ;;  %p14524_p3 = scmp.lt.u32.totalorder %s14520_s12, %s18227_s6 }
 0x28f   :  { %p14526_p4 = pnand %p14524_p3, %p14521_p2 }
 0x291   :  { %14529 = shalt.err (!%p14526_p4)
}
 0x292   :  { %s14530_s22 = scalar_lea.vmem %s447_s16, 16  ;;  %s14534_s7 = scalar_lea.vmem %s447_s16, 32 }
 0x293   :  { %p14531_p5 = scmp.ne.s32.totalorder %s447_s16, %s14530_s22  ;;  %p14535_p6 = scmp.lt.s32.totalorder %s447_s16, %s447_s16 }
 0x294   :  { %p14536_p7 = scmp.lt.s32.totalorder %s14534_s7, %s14530_s22 }
 0x296   :  { %p14537_p8 = por %p14536_p7, %p14535_p6 }
 0x298   :  { %p14538_p9 = pnand %p14537_p8, %p14531_p5 }
 0x29a   :  { %14541 = shalt.err (!%p14538_p9)
}
 0x29b   :  { %449 = dma.hbm_to_vmem [thread:$0]  %s18227_s6, 16, %s447_s16, [#allocation48]  }
 0x29c   :  { %s14542_s4 = scalar_lea.hbm %s14913_s21, 16 }
 0x29d   :  { %p14543_p10 = scmp.ne.s32.totalorder %s14913_s21, %s14542_s4  ;;  %p14546_p11 = scmp.lt.u32.totalorder %s14542_s4, %s14913_s21 }
 0x29f   :  { %p14548_p12 = pnand %p14546_p11, %p14543_p10 }
 0x2a1   :  { %14551 = shalt.err (!%p14548_p12)
}
 0x2a2   :  { %s14552_s8 = scalar_lea.vmem %s461_s23, 16  ;;  %s14556_s26 = scalar_lea.vmem %s461_s23, 32 }
 0x2a3   :  { %p14553_p13 = scmp.ne.s32.totalorder %s461_s23, %s14552_s8  ;;  %p14557_p0 = scmp.lt.s32.totalorder %s461_s23, %s461_s23 }
 0x2a4   :  { %p14558_p1 = scmp.lt.s32.totalorder %s14556_s26, %s14552_s8 }
 0x2a6   :  { %p14559_p2 = por %p14558_p1, %p14557_p0 }
 0x2a8   :  { %p14560_p3 = pnand %p14559_p2, %p14553_p13 }
 0x2aa   :  { %14563 = shalt.err (!%p14560_p3)
}
 0x2ab   :  { %463 = dma.hbm_to_vmem [thread:$0]  %s14913_s21, 16, %s461_s23, [#allocation51]  }
 0x2ac   :  { %14586 = dma.done.wait [#allocation3], 128  }
 0x2ad   :  { %14587 = vsyncadd [#allocation3], 4294967168 }
 0x2ae   :  { %14588 = dma.done.wait [#allocation6], 3088  }
 0x2af   :  { %14589 = vsyncadd [#allocation6], 4294964208 }
 0x2b0   :  { %14590 = dma.done.wait [#allocation9], 1072  }
 0x2b1   :  { %14591 = vsyncadd [#allocation9], 4294966224 }
 0x2b2   :  { %14592 = dma.done.wait [#allocation12], 32  }
 0x2b3   :  { %14593 = vsyncadd [#allocation12], 4294967264 }
 0x2b4   :  { %14594 = dma.done.wait [#allocation15], 80  }
 0x2b5   :  { %14595 = vsyncadd [#allocation15], 4294967216 }
 0x2b6   :  { %14596 = dma.done.wait [#allocation18], 4112  }
 0x2b7   :  { %14597 = vsyncadd [#allocation18], 4294963184 }
 0x2b8   :  { %14598 = dma.done.wait [#allocation21], 32  }
 0x2b9   :  { %14599 = vsyncadd [#allocation21], 4294967264 }
 0x2ba   :  { %14600 = dma.done.wait [#allocation24], 3088  }
 0x2bb   :  { %14601 = vsyncadd [#allocation24], 4294964208 }
 0x2bc   :  { %14602 = dma.done.wait [#allocation27], 4112  }
 0x2bd   :  { %14603 = vsyncadd [#allocation27], 4294963184 }
 0x2be   :  { %14604 = dma.done.wait [#allocation30], 4160  }
 0x2bf   :  { %14605 = vsyncadd [#allocation30], 4294963136 }
 0x2c0   :  { %14606 = dma.done.wait [#allocation33], 32  }
 0x2c1   :  { %14607 = vsyncadd [#allocation33], 4294967264 }
 0x2c2   :  { %14608 = dma.done.wait [#allocation36], 528  }
 0x2c3   :  { %14609 = vsyncadd [#allocation36], 4294966768 }
 0x2c4   :  { %14610 = dma.done.wait [#allocation39], 4160  }
 0x2c5   :  { %14611 = vsyncadd [#allocation39], 4294963136 }
 0x2c6   :  { %14612 = dma.done.wait [#allocation42], 8256  }
 0x2c7   :  { %14613 = vsyncadd [#allocation42], 4294959040 }
 0x2c8   :  { %14614 = dma.done.wait [#allocation45], 1040  }
 0x2c9   :  { %14615 = vsyncadd [#allocation45], 4294966256 }
 0x2ca   :  { %14616 = dma.done.wait [#allocation48], 1040  }
 0x2cb   :  { %14617 = vsyncadd [#allocation48], 4294966256 }
 0x2cc   :  { %14618 = dma.done.wait [#allocation51], 16  }
 0x2cd   :  { %14619 = vsyncadd [#allocation51], 4294967280  ;;  %s18228_s21 = sld [smem:[#allocation71_spill]]  ;;  %v17795_v0 = vmov 0.0   ;;  %vm14701_vm0 = vmmov 0   ;;  %v12845_v1 = vld [vmem:[#allocation2] sm:$0xff]   ;;  %v782_v42 = vlaneseq }
 0x2ce   :  { %12201 = vmatprep.subr.bf16.mxu0 %v17795_v0  ;;  %12203 = vmatprep.mubr.msk.bf16.mxu0 %vm14701_vm0, %v17795_v0  ;;  %vm579_vm1 = vcmask 130048   ;;  %v12846_v5 = vld [vmem:[#allocation7 + $0x4] ss:$12 sps:$4 sm:$0xff]   ;;  %v12848_v6 = vld [vmem:[#allocation7] ss:$12 sps:$4 sm:$0xff]   ;;  %s18229_s30 = sld [smem:[#allocation72_spill]] }
 0x2cf   :  { %12202 = vmatpush3.bf16.msra.mxu0 %v12845_v1  ;;  %v12849_v7 = vld [vmem:[#allocation7 + $0x8] ss:$12 sps:$4 sm:$0xff]   ;;  %925 = vmatprep.subr.bf16.mxu1 %v12846_v5  ;;  %v12852_v9 = vld [vmem:[#allocation7 + $0x18] ss:$12 sps:$4 sm:$0xff]   ;;  %v12853_v10 = vld [vmem:[#allocation7 + $0x20] ss:$12 sps:$4 sm:$0xff]  }
 0x2d0   :  { %12207 = vmatprep.subr.bf16.mxu0 %v17795_v0  ;;  %v12850_v8 = vld [vmem:[#allocation7 + $0x1c] ss:$12 sps:$4 sm:$0xff]   ;;  %926 = vmatpush1.bf16.msra.mxu1 %v12848_v6  ;;  %v12854_v11 = vld [vmem:[#allocation7 + $0x34] ss:$12 sps:$4 sm:$0xff]   ;;  %v12857_v13 = vld [vmem:[#allocation7 + $0x38] ss:$12 sps:$4 sm:$0xff]  }
 0x2d1   :  { %927 = vmatprep.subr.bf16.mxu1 %v12850_v8  ;;  %v12856_v12 = vld [vmem:[#allocation7 + $0x30] ss:$12 sps:$4 sm:$0xff]   ;;  %v12858_v14 = vld [vmem:[#allocation7 + $0x4c] ss:$12 sps:$4 sm:$0xff]   ;;  %v12860_v15 = vld [vmem:[#allocation7 + $0x48] ss:$12 sps:$4 sm:$0xff]  }
 0x2d2   :  { %v12861_v16 = vld [vmem:[#allocation7 + $0x50] ss:$12 sps:$4 sm:$0xff]   ;;  %v12864_v18 = vld [vmem:[#allocation7 + $0x60] ss:$12 sps:$4 sm:$0xff]   ;;  %v12865_v19 = vld [vmem:[#allocation7 + $0x68] ss:$12 sps:$4 sm:$0xff]  }
 0x2d3   :  { %v561_v2 = vld [vmem:[%s18228_s21] sm:$0xff]  ;;  %v562_v3 = vld [vmem:[%s18228_s21 + $0x8] sm:$0xff]  ;;  %v17797_v29 = vmov 0   ;;  %v15169_v43 = vshrl.u32 %v782_v42, 7  ;;  %s14703_s0 = smov 112   ;;  %vm1161_vm2 = vcmask 64512  }
 0x2d4   :  { %v15140_v4 = vpack.c.bf16 %v562_v3, %v561_v2  ;;  %928 = vmatpush1.bf16.msra.mxu1 %v12852_v9  ;;  %v12862_v17 = vld [vmem:[#allocation7 + $0x64] ss:$12 sps:$4 sm:$0xff]   ;;  %v12866_v20 = vld [vmem:[#allocation7 + $0x7c] ss:$12 sps:$4 sm:$0xff]   ;;  %v12869_v22 = vld [vmem:[#allocation7 + $0x80] ss:$12 sps:$4 sm:$0xff]   ;;  %957 = vmatprep.mubr.bf16.mxu1 %v17797_v29 }
 0x2d5   :  { %929 = vmatprep.subr.bf16.mxu1 %v12854_v11  ;;  %v12868_v21 = vld [vmem:[#allocation7 + $0x78] ss:$12 sps:$4 sm:$0xff]   ;;  %v12870_v23 = vld [vmem:[#allocation7 + $0x94] ss:$12 sps:$4 sm:$0xff]   ;;  %v12872_v24 = vld [vmem:[#allocation7 + $0x90] ss:$12 sps:$4 sm:$0xff]  }
 0x2d6   :  { %12204 = vmatmul.mubr.msk.bf16.vlgmr.msra.gmra.mrb[0].mxu0 %vm579_vm1, %v15140_v4  ;;  %v12873_v25 = vld [vmem:[#allocation7 + $0x98] ss:$12 sps:$4 sm:$0xff]   ;;  %v12876_v27 = vld [vmem:[#allocation7 + $0xa8] ss:$12 sps:$4 sm:$0xff]   ;;  %v12877_v28 = vld [vmem:[#allocation7 + $0xb0] ss:$12 sps:$4 sm:$0xff]  }
 0x2d7   :  { %12208 = vmatpush3.bf16.msra.mxu0 %v12849_v7  ;;  %12223 = vmatprep.mubr.msk.bf16.mxu0 %vm14701_vm0, %v17795_v0  ;;  %v12874_v26 = vld [vmem:[#allocation7 + $0xac] ss:$12 sps:$4 sm:$0xff]   ;;  %v11423_v30 = vld [vmem:[#allocation5] ss:$0 sm:$0xff]  ;;  %v15172_v44 = vsub.s32 2, %v15169_v43  ;;  %v15175_v46 = vsub.s32 1, %v15169_v43 }
 0x2d8   :  { %12209 = vmatprep.subr.bf16.mxu0 %v17795_v0  ;;  %930 = vmatpush1.bf16.msra.mxu1 %v12856_v12  ;;  %v624_v34 = vld [vmem:[%s18229_s30] sm:$0xff]  ;;  %v625_v36 = vld [vmem:[%s18229_s30 + $0x8] sm:$0xff]  ;;  %v15178_v47 = vsub.s32 0, %v15169_v43  ;;  %s14704_s9 = smov 96   ;;  %s14705_s28 = smov 80   ;;  %vm3700_vm3 = vcmask 261120  }
 0x2d9   :  { %931 = vmatprep.subr.bf16.mxu1 %v12858_v14  ;;  %18230 = vst [vmem:[#allocation94_spill] sm:$0xff] %v15172_v44  ;;  %v660_v45 = vld [vmem:[#allocation8] sm:$0x7]  ;;  %18231 = vst [vmem:[#allocation95_spill] sm:$0xff] %v15175_v46  ;;  %s14706_s1 = smov 48   ;;  %s14707_s29 = smov 32  }
 0x2da   :  { %18232 = vst [vmem:[#allocation96_spill] sm:$0xff] %v15178_v47  ;;  %v793_v48 = vrot.slane %v660_v45, %v15172_v44  ;;  %v789_v49 = vrot.slane %v660_v45, %v15175_v46  ;;  %v785_v52 = vrot.slane %v660_v45, %v15178_v47  ;;  %vm3703_vm4 = vcmask 392192   ;;  %s18233_s25 = sld [smem:[#allocation77_spill]]  ;;  %s18235_s2 = sld [smem:[#allocation81_spill]] }
 0x2db   :  { %12210 = vmatpush3.bf16.msra.mxu0 %v12853_v10  ;;  %vm3706_vm5 = vcmask 523264   ;;  %vm3709_vm6 = vcmask 654336   ;;  %vm3712_vm7 = vcmask 785408   ;;  %vm3715_vm8 = vcmask 916480   ;;  %s18236_s10 = sld [smem:[#allocation82_spill]] }
 0x2dc   :  { %12211 = vmatprep.subr.bf16.mxu0 %v17795_v0  ;;  %932 = vmatpush1.bf16.msra.mxu1 %v12860_v15  ;;  %vm8280_vm9 = vcmask 1040384   ;;  %vm11350_vm10 = vcmask 730112  }
 0x2dd   :  { %933 = vmatprep.subr.bf16.mxu1 %v12862_v17 }
 0x2df   :  { %12212 = vmatpush3.bf16.msra.mxu0 %v12857_v13 }
 0x2e0   :  { %12213 = vmatprep.subr.bf16.mxu0 %v17795_v0  ;;  %934 = vmatpush1.bf16.msra.mxu1 %v12864_v18 }
 0x2e1   :  { %935 = vmatprep.subr.bf16.mxu1 %v12866_v20 }
 0x2e3   :  { %12214 = vmatpush3.bf16.msra.mxu0 %v12861_v16 }
 0x2e4   :  { %12215 = vmatprep.subr.bf16.mxu0 %v17795_v0  ;;  %936 = vmatpush1.bf16.msra.mxu1 %v12868_v21 }
 0x2e5   :  { %937 = vmatprep.subr.bf16.mxu1 %v12870_v23 }
 0x2e7   :  { %12216 = vmatpush3.bf16.msra.mxu0 %v12865_v19 }
 0x2e8   :  { %12217 = vmatprep.subr.bf16.mxu0 %v17795_v0  ;;  %938 = vmatpush1.bf16.msra.mxu1 %v12872_v24 }
 0x2e9   :  { %939 = vmatprep.subr.bf16.mxu1 %v12874_v26 }
 0x2eb   :  { %12218 = vmatpush3.bf16.msra.mxu0 %v12869_v22 }
 0x2ec   :  { %12219 = vmatprep.subr.bf16.mxu0 %v17795_v0  ;;  %940 = vmatpush1.bf16.msra.mxu1 %v12876_v27 }
 0x2ed   :  { %12237 = vmatprep.subr.mxu1 %v17795_v0 }
 0x2ef   :  { %12220 = vmatpush3.bf16.msra.mxu0 %v12873_v25 }
 0x2f0   :  { %12221 = vmatprep.subr.bf16.mxu0 %v17795_v0 }
 0x2f3   :  { %12222 = vmatpush3.bf16.msra.mxu0 %v12877_v28 }
 0x2f4   :  { %12227 = vmatprep.subr.mxu0 %v17795_v0 }
 0x3a9   :  { %v617_v31 = vpop.f32.mrb[0].mxu0 }
 0x3aa   :  { %v618_v32 = vadd.f32 %v11423_v30, %v617_v31  ;;  %v12205_v33 = vpop.f32.mrb[1].mxu0 }
 0x3ab   :  { %v620_v35 = vpop.f32.mrb[2].mxu0 }
 0x3ac   :  { %v621_v37 = vadd.f32 %v11423_v30, %v620_v35  ;;  %v12206_v38 = vpop.f32.mrb[3].mxu0  ;;  %v15159_v39 = vadd.f32 %v624_v34, %v618_v32 }
 0x3ae   :  { %v15161_v40 = vadd.f32 %v625_v36, %v621_v37 }
 0x3b0   :  { %v780_v41 = vpack.c.bf16 %v15161_v40, %v15159_v39 }
 0x3b2   :  { %958 = vmatmul.mubr.bf16.vlgmr.msra.gmra.mrb[0].mxu1 %v780_v41  ;;  %12224 = vmatmul.mubr.bf16.vlgmr.msra.gmra.mrb[4].mxu0 %v780_v41 }
 0x3b3   :  { %12229 = vmatprep.mubr.msk.f32.mxu0 %vm14701_vm0, %v17795_v0  ;;  %12239 = vmatprep.mubr.msk.f32.mxu1 %vm14701_vm0, %v17795_v0 }
 0x485   :  { %v959_v50 = vpop.f32.mrb[0].mxu1  ;;  %v1002_v51 = vpop.f32.mrb[4].mxu0 }
 0x486   :  { %v15183_v53 = vadd.f32 %v1002_v51, %v793_v48  ;;  %v961_v54 = vpop.f32.mrb[1].mxu1  ;;  %v12225_v55 = vpop.f32.mrb[5].mxu0  ;;  %v15193_v62 = vadd.f32 %v959_v50, %v785_v52 }
 0x487   :  { %v15185_v56 = vadd.f32 %v961_v54, %v789_v49  ;;  %v963_v57 = vpop.f32.mrb[2].mxu1  ;;  %v1005_v58 = vpop.f32.mrb[6].mxu0 }
 0x488   :  { %v965_v59 = vpop.f32.mrb[3].mxu1  ;;  %v12226_v60 = vpop.f32.mrb[7].mxu0  ;;  %12238 = vmatpush3.msra.mxu1 %v15183_v53  ;;  %v15204_v63 = vadd.f32 %v963_v57, %v785_v52  ;;  %v15207_v1 = vadd.f32 %v1005_v58, %v793_v48 }
 0x489   :  { %v15188_v61 = vadd.f32 %v965_v59, %v789_v49  ;;  %12228 = vmatpush3.xpose.msk.msra.mxu0 %vm579_vm1, %v15185_v56  ;;  %12247 = vmatprep.subr.mxu1 %v17795_v0 }
 0x48a   :  { %12232 = vmatprep.subr.mxu0 %v17795_v0 }
 0x48b   :  { %1410 = vrot.lane.b32.xlu1 %v15188_v61, %s14703_s0 }
 0x48c   :  { %12230 = vmatmul.mubr.msk.f32.vlgmr.msra.gmra.mrb[8].mxu0 %vm579_vm1, %v15193_v62 }
 0x48d   :  { %12233 = vmatpush3.xpose.msk.msra.mxu0 %vm579_vm1, %v15188_v61  ;;  %12234 = vmatprep.mubr.msk.f32.mxu0 %vm14701_vm0, %v17795_v0 }
 0x48e   :  { %12242 = vmatprep.subr.mxu0 %v17795_v0 }
 0x48f   :  { %1330 = vrot.lane.b32.xlu1 %v15193_v62, %s14703_s0 }
 0x490   :  { %12235 = vmatmul.mubr.msk.f32.vlgmr.msra.gmra.mrb[10].mxu0 %vm579_vm1, %v15204_v63 }
 0x491   :  { %12243 = vmatpush3.msra.mxu0 %v15207_v1  ;;  %12244 = vmatprep.mubr.msk.f32.mxu0 %vm14701_vm0, %v17795_v0 }
 0x492   :  { %12252 = vmatprep.subr.mxu0 %v17795_v0 }
 0x4fd   :  { %v1411_v19 = vpop.permute.xlu1 %1410 }
 0x501   :  { %v1331_v20 = vpop.permute.xlu1 %1330 }
 0x55f   :  { %v1081_v2 = vpop.f32.mrb[8].mxu0 }
 0x560   :  { %v12231_v3 = vpop.f32.mrb[9].mxu0  ;;  %v1162_v5 = vsel %vm1161_vm2, %v1081_v2, -inf }
 0x561   :  { %1163 = vmax.xlane.f32.xlu0 %v1162_v5 }
 0x563   :  { %v1157_v6 = vpop.f32.mrb[10].mxu0 }
 0x564   :  { %v12236_v7 = vpop.f32.mrb[11].mxu0  ;;  %v1165_v8 = vsel %vm1161_vm2, %v1157_v6, -inf }
 0x565   :  { %1166 = vmax.xlane.f32.xlu0 %v1165_v8 }
 0x57b   :  { %1332 = vrot.lane.b32.xlu0 %v15185_v56, %s14703_s0 }
 0x5ee   :  { %v1164_v9 = vpop.xlane.xlu0 %1163 }
 0x5ef   :  { %v1168_v10 = vsub.f32 %v1081_v2, %v1164_v9 }
 0x5f1   :  { %v1170_v11 = vmul.f32 1.442695, %v1168_v10 }
 0x5f2   :  { %v1167_v12 = vpop.xlane.xlu0 %1166 }
 0x5f3   :  { %13268 = vpow2.f32 %v1170_v11  ;;  %v1169_v13 = vsub.f32 %v1157_v6, %v1167_v12 }
 0x5f5   :  { %v1172_v14 = vmul.f32 1.442695, %v1169_v13 }
 0x5f6   :  { %v1333_v25 = vpop.permute.xlu0 %1332 }
 0x5f7   :  { %13270 = vpow2.f32 %v1172_v14 }
 0x5fd   :  { %v13269_v15 = vpop.eup %13268 }
 0x5fe   :  { %v1174_v16 = vsel %vm1161_vm2, %v13269_v15, 0.0 }
 0x5ff   :  { %1175 = vadd.xlane.f32.xlu1 %v1174_v16 }
 0x601   :  { %v13271_v17 = vpop.eup %13270 }
 0x602   :  { %v1177_v18 = vsel %vm1161_vm2, %v13271_v17, 0.0 }
 0x603   :  { %1178 = vadd.xlane.f32.xlu1 %v1177_v18 }
 0x614   :  { %1408 = vrot.lane.b32.xlu1 %v15204_v63, %s14703_s0 }
 0x68c   :  { %v1176_v21 = vpop.xlane.xlu1 %1175 }
 0x68d   :  { %13272 = vrcp.f32 %v1176_v21 }
 0x690   :  { %v1179_v22 = vpop.xlane.xlu1 %1178 }
 0x691   :  { %13274 = vrcp.f32 %v1179_v22 }
 0x694   :  { %v1409_v28 = vpop.permute.xlu1 %1408 }
 0x697   :  { %v13273_v23 = vpop.eup %13272 }
 0x698   :  { %v1181_v24 = vmul.f32 %v13273_v23, %v13269_v15 }
 0x69a   :  { %12240 = vmatmul.mubr.msk.f32.vlgmr.msra.gmra.mrb[4].mxu1 %vm1161_vm2, %v1181_v24 }
 0x69b   :  { %v13275_v26 = vpop.eup %13274  ;;  %12248 = vmatpush3.xpose.msk.msra.mxu1 %vm579_vm1, %v1333_v25  ;;  %12249 = vmatprep.mubr.msk.f32.mxu1 %vm14701_vm0, %v17795_v0 }
 0x69c   :  { %v1183_v27 = vmul.f32 %v13275_v26, %v13271_v17  ;;  %12257 = vmatprep.subr.mxu1 %v17795_v0 }
 0x69e   :  { %12245 = vmatmul.mubr.msk.f32.vlgmr.msra.gmra.mrb[12].mxu0 %vm1161_vm2, %v1183_v27  ;;  %12250 = vmatmul.mubr.msk.f32.vlgmr.msra.gmra.mrb[6].mxu1 %vm579_vm1, %v1331_v20 }
 0x69f   :  { %12253 = vmatpush3.xpose.msk.msra.mxu0 %vm579_vm1, %v1411_v19  ;;  %12254 = vmatprep.mubr.msk.f32.mxu0 %vm14701_vm0, %v17795_v0 }
 0x6a0   :  { %12262 = vmatprep.subr.mxu0 %v17795_v0  ;;  %12259 = vmatprep.mubr.msk.f32.mxu1 %vm14701_vm0, %v17795_v0 }
 0x6a2   :  { %12255 = vmatmul.mubr.msk.f32.vlgmr.msra.gmra.mrb[14].mxu0 %vm579_vm1, %v1409_v28 }
 0x6a3   :  { %12264 = vmatprep.mubr.msk.f32.mxu0 %vm14701_vm0, %v17795_v0 }
 0x76d   :  { %v15241_v30 = vpop.f32.mrb[4].mxu1 }
 0x76e   :  { %v12241_v31 = vpop.f32.mrb[5].mxu1 }
 0x771   :  { %v15243_v32 = vpop.f32.mrb[12].mxu0  ;;  %v1404_v33 = vpop.f32.mrb[6].mxu1 }
 0x772   :  { %v12246_v34 = vpop.f32.mrb[13].mxu0  ;;  %v12251_v35 = vpop.f32.mrb[7].mxu1  ;;  %v1486_v36 = vsel %vm1161_vm2, %v1404_v33, -inf }
 0x773   :  { %1487 = vmax.xlane.f32.xlu0 %v1486_v36 }
 0x775   :  { %v1482_v37 = vpop.f32.mrb[14].mxu0 }
 0x776   :  { %v12256_v38 = vpop.f32.mrb[15].mxu0  ;;  %v1489_v41 = vsel %vm1161_vm2, %v1482_v37, -inf }
 0x777   :  { %1490 = vmax.xlane.f32.xlu1 %v1489_v41 }
 0x788   :  { %1586 = vrot.lane.b32.xlu1 %v15207_v1, %s14703_s0 }
 0x789   :  { %1509 = vrot.lane.b32.xlu0 %v15183_v53, %s14703_s0 }
 0x78c   :  { %1664 = vrot.lane.b32.xlu1 %v15185_v56, %s14704_s9 }
 0x790   :  { %1742 = vrot.lane.b32.xlu1 %v15188_v61, %s14704_s9 }
 0x794   :  { %1740 = vrot.lane.b32.xlu1 %v15204_v63, %s14704_s9 }
 0x800   :  { %v1488_v42 = vpop.xlane.xlu0 %1487 }
 0x801   :  { %v1492_v45 = vsub.f32 %v1404_v33, %v1488_v42 }
 0x803   :  { %v1494_v48 = vmul.f32 1.442695, %v1492_v45 }
 0x804   :  { %v1510_v49 = vpop.permute.xlu0 %1509  ;;  %v1491_v50 = vpop.xlane.xlu1 %1490 }
 0x805   :  { %13276 = vpow2.f32 %v1494_v48  ;;  %v1493_v51 = vsub.f32 %v1482_v37, %v1491_v50  ;;  %12258 = vmatpush3.msra.mxu1 %v1510_v49 }
 0x806   :  { %12267 = vmatprep.subr.mxu1 %v17795_v0 }
 0x807   :  { %v1496_v52 = vmul.f32 1.442695, %v1493_v51 }
 0x808   :  { %v1587_v54 = vpop.permute.xlu1 %1586 }
 0x809   :  { %13278 = vpow2.f32 %v1496_v52  ;;  %12263 = vmatpush3.msra.mxu0 %v1587_v54 }
 0x80a   :  { %12272 = vmatprep.subr.mxu0 %v17795_v0 }
 0x80c   :  { %v1665_v3 = vpop.permute.xlu1 %1664 }
 0x80f   :  { %v13277_v55 = vpop.eup %13276 }
 0x810   :  { %v1498_v57 = vsel %vm1161_vm2, %v13277_v55, 0.0  ;;  %v1743_v8 = vpop.permute.xlu1 %1742 }
 0x811   :  { %1499 = vadd.xlane.f32.xlu0 %v1498_v57 }
 0x813   :  { %v13279_v58 = vpop.eup %13278 }
 0x814   :  { %v1501_v59 = vsel %vm1161_vm2, %v13279_v58, 0.0  ;;  %v1741_v11 = vpop.permute.xlu1 %1740 }
 0x815   :  { %1502 = vadd.xlane.f32.xlu0 %v1501_v59 }
 0x82b   :  { %1662 = vrot.lane.b32.xlu0 %v15193_v62, %s14704_s9 }
 0x89e   :  { %v1500_v60 = vpop.xlane.xlu0 %1499 }
 0x89f   :  { %13280 = vrcp.f32 %v1500_v60 }
 0x8a2   :  { %v1503_v2 = vpop.xlane.xlu0 %1502 }
 0x8a3   :  { %13282 = vrcp.f32 %v1503_v2 }
 0x8a6   :  { %v1663_v10 = vpop.permute.xlu0 %1662 }
 0x8a9   :  { %v13281_v5 = vpop.eup %13280 }
 0x8aa   :  { %v1505_v6 = vmul.f32 %v13281_v5, %v13277_v55 }
 0x8ac   :  { %12260 = vmatmul.mubr.msk.f32.vlgmr.msra.gmra.mrb[8].mxu1 %vm1161_vm2, %v1505_v6 }
 0x8ad   :  { %v13283_v7 = vpop.eup %13282  ;;  %12268 = vmatpush3.xpose.msk.msra.mxu1 %vm579_vm1, %v1665_v3  ;;  %12269 = vmatprep.mubr.msk.f32.mxu1 %vm14701_vm0, %v17795_v0 }
 0x8ae   :  { %v1507_v9 = vmul.f32 %v13283_v7, %v13279_v58  ;;  %12277 = vmatprep.subr.mxu1 %v17795_v0 }
 0x8b0   :  { %12265 = vmatmul.mubr.msk.f32.vlgmr.msra.gmra.mrb[16].mxu0 %vm1161_vm2, %v1507_v9  ;;  %12270 = vmatmul.mubr.msk.f32.vlgmr.msra.gmra.mrb[10].mxu1 %vm579_vm1, %v1663_v10 }
 0x8b1   :  { %12273 = vmatpush3.xpose.msk.msra.mxu0 %vm579_vm1, %v1743_v8  ;;  %12274 = vmatprep.mubr.msk.f32.mxu0 %vm14701_vm0, %v17795_v0 }
 0x8b2   :  { %12282 = vmatprep.subr.mxu0 %v17795_v0  ;;  %12279 = vmatprep.mubr.msk.f32.mxu1 %vm14701_vm0, %v17795_v0 }
 0x8b4   :  { %12275 = vmatmul.mubr.msk.f32.vlgmr.msra.gmra.mrb[18].mxu0 %vm579_vm1, %v1741_v11 }
 0x8b5   :  { %12284 = vmatprep.mubr.msk.f32.mxu0 %vm14701_vm0, %v17795_v0 }
 0x97f   :  { %v15279_v12 = vpop.f32.mrb[8].mxu1 }
 0x980   :  { %v12261_v13 = vpop.f32.mrb[9].mxu1 }
 0x983   :  { %v15281_v14 = vpop.f32.mrb[16].mxu0  ;;  %v1736_v15 = vpop.f32.mrb[10].mxu1 }
 0x984   :  { %v12775_v16 = vpack.i.bf16 %v15281_v14, %v15279_v12  ;;  %v12266_v17 = vpop.f32.mrb[17].mxu0  ;;  %v12271_v18 = vpop.f32.mrb[11].mxu1  ;;  %v1818_v19 = vsel %vm1161_vm2, %v1736_v15, -inf }
 0x985   :  { %1819 = vmax.xlane.f32.xlu0 %v1818_v19 }
 0x987   :  { %v1814_v20 = vpop.f32.mrb[18].mxu0 }
 0x988   :  { %v12276_v21 = vpop.f32.mrb[19].mxu0  ;;  %v1821_v22 = vsel %vm1161_vm2, %v1814_v20, -inf }
 0x989   :  { %1822 = vmax.xlane.f32.xlu1 %v1821_v22 }
 0x99a   :  { %1916 = vrot.lane.b32.xlu1 %v15207_v1, %s14704_s9 }
 0x99b   :  { %1840 = vrot.lane.b32.xlu0 %v15183_v53, %s14704_s9 }
 0x99e   :  { %1994 = vrot.lane.b32.xlu1 %v15185_v56, %s14705_s28 }
 0x9a2   :  { %2072 = vrot.lane.b32.xlu1 %v15188_v61, %s14705_s28 }
 0x9a6   :  { %2070 = vrot.lane.b32.xlu1 %v15204_v63, %s14705_s28 }
 0xa12   :  { %v1820_v23 = vpop.xlane.xlu0 %1819 }
 0xa13   :  { %v1824_v24 = vsub.f32 %v1736_v15, %v1820_v23 }
 0xa15   :  { %v1826_v25 = vmul.f32 1.442695, %v1824_v24 }
 0xa16   :  { %v1841_v26 = vpop.permute.xlu0 %1840  ;;  %v1823_v27 = vpop.xlane.xlu1 %1822 }
 0xa17   :  { %13284 = vpow2.f32 %v1826_v25  ;;  %v1825_v28 = vsub.f32 %v1814_v20, %v1823_v27  ;;  %12278 = vmatpush3.msra.mxu1 %v1841_v26 }
 0xa18   :  { %12287 = vmatprep.subr.mxu1 %v17795_v0 }
 0xa19   :  { %v1828_v31 = vmul.f32 1.442695, %v1825_v28 }
 0xa1a   :  { %v1917_v33 = vpop.permute.xlu1 %1916 }
 0xa1b   :  { %13286 = vpow2.f32 %v1828_v31  ;;  %12283 = vmatpush3.msra.mxu0 %v1917_v33 }
 0xa1c   :  { %12292 = vmatprep.subr.mxu0 %v17795_v0 }
 0xa1e   :  { %v1995_v42 = vpop.permute.xlu1 %1994 }
 0xa21   :  { %v13285_v34 = vpop.eup %13284 }
 0xa22   :  { %v1830_v35 = vsel %vm1161_vm2, %v13285_v34, 0.0  ;;  %v2073_v50 = vpop.permute.xlu1 %2072 }
 0xa23   :  { %1831 = vadd.xlane.f32.xlu0 %v1830_v35 }
 0xa25   :  { %v13287_v36 = vpop.eup %13286 }
 0xa26   :  { %v1833_v37 = vsel %vm1161_vm2, %v13287_v36, 0.0  ;;  %v2071_v54 = vpop.permute.xlu1 %2070 }
 0xa27   :  { %1834 = vadd.xlane.f32.xlu0 %v1833_v37 }
 0xa3d   :  { %1992 = vrot.lane.b32.xlu0 %v15193_v62, %s14705_s28 }
 0xab0   :  { %v1832_v38 = vpop.xlane.xlu0 %1831 }
 0xab1   :  { %13288 = vrcp.f32 %v1832_v38 }
 0xab4   :  { %v1835_v41 = vpop.xlane.xlu0 %1834 }
 0xab5   :  { %13290 = vrcp.f32 %v1835_v41 }
 0xab8   :  { %v1993_v52 = vpop.permute.xlu0 %1992 }
 0xabb   :  { %v13289_v45 = vpop.eup %13288 }
 0xabc   :  { %v1837_v48 = vmul.f32 %v13289_v45, %v13285_v34 }
 0xabe   :  { %12280 = vmatmul.mubr.msk.f32.vlgmr.msra.gmra.mrb[12].mxu1 %vm1161_vm2, %v1837_v48 }
 0xabf   :  { %v13291_v49 = vpop.eup %13290  ;;  %12288 = vmatpush3.xpose.msk.msra.mxu1 %vm579_vm1, %v1995_v42  ;;  %12289 = vmatprep.mubr.msk.f32.mxu1 %vm14701_vm0, %v17795_v0 }
 0xac0   :  { %v1839_v51 = vmul.f32 %v13291_v49, %v13287_v36  ;;  %12297 = vmatprep.subr.mxu1 %v17795_v0 }
 0xac2   :  { %12285 = vmatmul.mubr.msk.f32.vlgmr.msra.gmra.mrb[20].mxu0 %vm1161_vm2, %v1839_v51  ;;  %12290 = vmatmul.mubr.msk.f32.vlgmr.msra.gmra.mrb[14].mxu1 %vm579_vm1, %v1993_v52 }
 0xac3   :  { %12293 = vmatpush3.xpose.msk.msra.mxu0 %vm579_vm1, %v2073_v50  ;;  %12294 = vmatprep.mubr.msk.f32.mxu0 %vm14701_vm0, %v17795_v0 }
 0xac4   :  { %12302 = vmatprep.subr.mxu0 %v17795_v0  ;;  %12299 = vmatprep.mubr.msk.f32.mxu1 %vm14701_vm0, %v17795_v0 }
 0xac6   :  { %12295 = vmatmul.mubr.msk.f32.vlgmr.msra.gmra.mrb[22].mxu0 %vm579_vm1, %v2071_v54 }
 0xac7   :  { %12304 = vmatprep.mubr.msk.f32.mxu0 %vm14701_vm0, %v17795_v0 }
 0xb91   :  { %v15319_v55 = vpop.f32.mrb[12].mxu1 }
 0xb92   :  { %v12281_v57 = vpop.f32.mrb[13].mxu1 }
 0xb95   :  { %v15321_v58 = vpop.f32.mrb[20].mxu0  ;;  %v2066_v59 = vpop.f32.mrb[14].mxu1 }
 0xb96   :  { %v12780_v60 = vpack.i.bf16 %v15321_v58, %v15319_v55  ;;  %v12286_v2 = vpop.f32.mrb[21].mxu0  ;;  %v12291_v3 = vpop.f32.mrb[15].mxu1  ;;  %v2148_v5 = vsel %vm1161_vm2, %v2066_v59, -inf }
 0xb97   :  { %2149 = vmax.xlane.f32.xlu0 %v2148_v5 }
 0xb99   :  { %v2144_v6 = vpop.f32.mrb[22].mxu0 }
 0xb9a   :  { %v12296_v7 = vpop.f32.mrb[23].mxu0  ;;  %v2151_v8 = vsel %vm1161_vm2, %v2144_v6, -inf }
 0xb9b   :  { %2152 = vmax.xlane.f32.xlu1 %v2151_v8 }
 0xbac   :  { %2246 = vrot.lane.b32.xlu1 %v15207_v1, %s14705_s28 }
 0xbad   :  { %2170 = vrot.lane.b32.xlu0 %v15183_v53, %s14705_s28 }
 0xbb0   :  { %2324 = vrot.lane.b32.xlu1 %v15185_v56, %s14668_s14 }
 0xbb4   :  { %2402 = vrot.lane.b32.xlu1 %v15188_v61, %s14668_s14 }
 0xbb8   :  { %2400 = vrot.lane.b32.xlu1 %v15204_v63, %s14668_s14 }
 0xc24   :  { %v2150_v9 = vpop.xlane.xlu0 %2149 }
 0xc25   :  { %v2154_v10 = vsub.f32 %v2066_v59, %v2150_v9 }
 0xc27   :  { %v2156_v11 = vmul.f32 1.442695, %v2154_v10 }
 0xc28   :  { %v2171_v13 = vpop.permute.xlu0 %2170  ;;  %v2153_v15 = vpop.xlane.xlu1 %2152 }
 0xc29   :  { %13292 = vpow2.f32 %v2156_v11  ;;  %v2155_v17 = vsub.f32 %v2144_v6, %v2153_v15  ;;  %12298 = vmatpush3.msra.mxu1 %v2171_v13 }
 0xc2a   :  { %12307 = vmatprep.subr.mxu1 %v17795_v0 }
 0xc2b   :  { %v2158_v18 = vmul.f32 1.442695, %v2155_v17 }
 0xc2c   :  { %v2247_v19 = vpop.permute.xlu1 %2246 }
 0xc2d   :  { %13294 = vpow2.f32 %v2158_v18  ;;  %12303 = vmatpush3.msra.mxu0 %v2247_v19 }
 0xc2e   :  { %12312 = vmatprep.subr.mxu0 %v17795_v0 }
 0xc30   :  { %v2325_v26 = vpop.permute.xlu1 %2324 }
 0xc33   :  { %v13293_v20 = vpop.eup %13292 }
 0xc34   :  { %v2160_v21 = vsel %vm1161_vm2, %v13293_v20, 0.0  ;;  %v2403_v33 = vpop.permute.xlu1 %2402 }
 0xc35   :  { %2161 = vadd.xlane.f32.xlu0 %v2160_v21 }
 0xc37   :  { %v13295_v22 = vpop.eup %13294 }
 0xc38   :  { %v2163_v23 = vsel %vm1161_vm2, %v13295_v22, 0.0  ;;  %v2401_v36 = vpop.permute.xlu1 %2400 }
 0xc39   :  { %2164 = vadd.xlane.f32.xlu0 %v2163_v23 }
 0xc4f   :  { %2322 = vrot.lane.b32.xlu0 %v15193_v62, %s14668_s14 }
 0xcc2   :  { %v2162_v24 = vpop.xlane.xlu0 %2161 }
 0xcc3   :  { %13296 = vrcp.f32 %v2162_v24 }
 0xcc6   :  { %v2165_v25 = vpop.xlane.xlu0 %2164 }
 0xcc7   :  { %13298 = vrcp.f32 %v2165_v25 }
 0xcca   :  { %v2323_v35 = vpop.permute.xlu0 %2322 }
 0xccd   :  { %v13297_v27 = vpop.eup %13296 }
 0xcce   :  { %v2167_v28 = vmul.f32 %v13297_v27, %v13293_v20 }
 0xcd0   :  { %12300 = vmatmul.mubr.msk.f32.vlgmr.msra.gmra.mrb[16].mxu1 %vm1161_vm2, %v2167_v28 }
 0xcd1   :  { %v13299_v31 = vpop.eup %13298  ;;  %12308 = vmatpush3.xpose.msk.msra.mxu1 %vm579_vm1, %v2325_v26  ;;  %12309 = vmatprep.mubr.msk.f32.mxu1 %vm14701_vm0, %v17795_v0 }
 0xcd2   :  { %v2169_v34 = vmul.f32 %v13299_v31, %v13295_v22  ;;  %12317 = vmatprep.subr.mxu1 %v17795_v0 }
 0xcd4   :  { %12305 = vmatmul.mubr.msk.f32.vlgmr.msra.gmra.mrb[24].mxu0 %vm1161_vm2, %v2169_v34  ;;  %12310 = vmatmul.mubr.msk.f32.vlgmr.msra.gmra.mrb[18].mxu1 %vm579_vm1, %v2323_v35 }
 0xcd5   :  { %12313 = vmatpush3.xpose.msk.msra.mxu0 %vm579_vm1, %v2403_v33  ;;  %12314 = vmatprep.mubr.msk.f32.mxu0 %vm14701_vm0, %v17795_v0 }
 0xcd6   :  { %12322 = vmatprep.subr.mxu0 %v17795_v0  ;;  %12319 = vmatprep.mubr.msk.f32.mxu1 %vm14701_vm0, %v17795_v0 }
 0xcd8   :  { %12315 = vmatmul.mubr.msk.f32.vlgmr.msra.gmra.mrb[26].mxu0 %vm579_vm1, %v2401_v36 }
 0xcd9   :  { %12324 = vmatprep.mubr.msk.f32.mxu0 %vm14701_vm0, %v17795_v0 }
 0xda3   :  { %v15359_v37 = vpop.f32.mrb[16].mxu1 }
 0xda4   :  { %v12301_v38 = vpop.f32.mrb[17].mxu1 }
 0xda7   :  { %v15361_v41 = vpop.f32.mrb[24].mxu0  ;;  %v2396_v42 = vpop.f32.mrb[18].mxu1 }
 0xda8   :  { %v12785_v45 = vpack.i.bf16 %v15361_v41, %v15359_v37  ;;  %v12306_v48 = vpop.f32.mrb[25].mxu0  ;;  %v12311_v49 = vpop.f32.mrb[19].mxu1  ;;  %v2478_v50 = vsel %vm1161_vm2, %v2396_v42, -inf  ;;  %v12878_v41 = vld [vmem:[#allocation10] sm:$0xff]  }
 0xda9   :  { %2479 = vmax.xlane.f32.xlu0 %v2478_v50 }
 0xdab   :  { %v2474_v51 = vpop.f32.mrb[26].mxu0 }
 0xdac   :  { %v12316_v52 = vpop.f32.mrb[27].mxu0  ;;  %v2481_v54 = vsel %vm1161_vm2, %v2474_v51, -inf }
 0xdad   :  { %2482 = vmax.xlane.f32.xlu1 %v2481_v54 }
 0xdbe   :  { %2576 = vrot.lane.b32.xlu1 %v15207_v1, %s14668_s14 }
 0xdbf   :  { %2500 = vrot.lane.b32.xlu0 %v15183_v53, %s14668_s14 }
 0xdc2   :  { %2654 = vrot.lane.b32.xlu1 %v15185_v56, %s14706_s1 }
 0xdc6   :  { %2732 = vrot.lane.b32.xlu1 %v15188_v61, %s14706_s1 }
 0xdca   :  { %2730 = vrot.lane.b32.xlu1 %v15204_v63, %s14706_s1 }
 0xe36   :  { %v2480_v57 = vpop.xlane.xlu0 %2479 }
 0xe37   :  { %v2484_v59 = vsub.f32 %v2396_v42, %v2480_v57 }
 0xe39   :  { %v2486_v2 = vmul.f32 1.442695, %v2484_v59 }
 0xe3a   :  { %v2501_v3 = vpop.permute.xlu0 %2500  ;;  %v2483_v5 = vpop.xlane.xlu1 %2482 }
 0xe3b   :  { %13300 = vpow2.f32 %v2486_v2  ;;  %v2485_v6 = vsub.f32 %v2474_v51, %v2483_v5  ;;  %12318 = vmatpush3.msra.mxu1 %v2501_v3 }
 0xe3c   :  { %12327 = vmatprep.subr.mxu1 %v17795_v0 }
 0xe3d   :  { %v2488_v7 = vmul.f32 1.442695, %v2485_v6 }
 0xe3e   :  { %v2577_v8 = vpop.permute.xlu1 %2576 }
 0xe3f   :  { %13302 = vpow2.f32 %v2488_v7  ;;  %12323 = vmatpush3.msra.mxu0 %v2577_v8 }
 0xe40   :  { %12332 = vmatprep.subr.mxu0 %v17795_v0 }
 0xe42   :  { %v2655_v18 = vpop.permute.xlu1 %2654 }
 0xe45   :  { %v13301_v9 = vpop.eup %13300 }
 0xe46   :  { %v2490_v10 = vsel %vm1161_vm2, %v13301_v9, 0.0  ;;  %v2733_v22 = vpop.permute.xlu1 %2732 }
 0xe47   :  { %2491 = vadd.xlane.f32.xlu0 %v2490_v10 }
 0xe49   :  { %v13303_v11 = vpop.eup %13302 }
 0xe4a   :  { %v2493_v13 = vsel %vm1161_vm2, %v13303_v11, 0.0  ;;  %v2731_v25 = vpop.permute.xlu1 %2730 }
 0xe4b   :  { %2494 = vadd.xlane.f32.xlu0 %v2493_v13 }
 0xe61   :  { %2652 = vrot.lane.b32.xlu0 %v15193_v62, %s14706_s1 }
 0xed4   :  { %v2492_v15 = vpop.xlane.xlu0 %2491 }
 0xed5   :  { %13304 = vrcp.f32 %v2492_v15 }
 0xed8   :  { %v2495_v17 = vpop.xlane.xlu0 %2494 }
 0xed9   :  { %13306 = vrcp.f32 %v2495_v17 }
 0xedc   :  { %v2653_v24 = vpop.permute.xlu0 %2652 }
 0xedf   :  { %v13305_v19 = vpop.eup %13304 }
 0xee0   :  { %v2497_v20 = vmul.f32 %v13305_v19, %v13301_v9 }
 0xee2   :  { %12320 = vmatmul.mubr.msk.f32.vlgmr.msra.gmra.mrb[20].mxu1 %vm1161_vm2, %v2497_v20 }
 0xee3   :  { %v13307_v21 = vpop.eup %13306  ;;  %12328 = vmatpush3.xpose.msk.msra.mxu1 %vm579_vm1, %v2655_v18  ;;  %12329 = vmatprep.mubr.msk.f32.mxu1 %vm14701_vm0, %v17795_v0 }
 0xee4   :  { %v2499_v23 = vmul.f32 %v13307_v21, %v13303_v11  ;;  %12337 = vmatprep.subr.mxu1 %v17795_v0 }
 0xee6   :  { %12325 = vmatmul.mubr.msk.f32.vlgmr.msra.gmra.mrb[28].mxu0 %vm1161_vm2, %v2499_v23  ;;  %12330 = vmatmul.mubr.msk.f32.vlgmr.msra.gmra.mrb[22].mxu1 %vm579_vm1, %v2653_v24 }
 0xee7   :  { %12333 = vmatpush3.xpose.msk.msra.mxu0 %vm579_vm1, %v2733_v22  ;;  %12334 = vmatprep.mubr.msk.f32.mxu0 %vm14701_vm0, %v17795_v0 }
 0xee8   :  { %12342 = vmatprep.subr.mxu0 %v17795_v0  ;;  %12339 = vmatprep.mubr.msk.f32.mxu1 %vm14701_vm0, %v17795_v0 }
 0xeea   :  { %12335 = vmatmul.mubr.msk.f32.vlgmr.msra.gmra.mrb[30].mxu0 %vm579_vm1, %v2731_v25 }
 0xeeb   :  { %12344 = vmatprep.mubr.msk.f32.mxu0 %vm14701_vm0, %v17795_v0 }
 0xfb5   :  { %v15399_v26 = vpop.f32.mrb[20].mxu1 }
 0xfb6   :  { %v12321_v27 = vpop.f32.mrb[21].mxu1 }
 0xfb9   :  { %v15401_v28 = vpop.f32.mrb[28].mxu0  ;;  %v2726_v31 = vpop.f32.mrb[22].mxu1 }
 0xfba   :  { %v12790_v33 = vpack.i.bf16 %v15401_v28, %v15399_v26  ;;  %v12326_v34 = vpop.f32.mrb[29].mxu0  ;;  %v12331_v35 = vpop.f32.mrb[23].mxu1  ;;  %v2808_v36 = vsel %vm1161_vm2, %v2726_v31, -inf }
 0xfbb   :  { %2809 = vmax.xlane.f32.xlu0 %v2808_v36 }
 0xfbd   :  { %v2804_v38 = vpop.f32.mrb[30].mxu0 }
 0xfbe   :  { %v12336_v42 = vpop.f32.mrb[31].mxu0  ;;  %v2811_v48 = vsel %vm1161_vm2, %v2804_v38, -inf }
 0xfbf   :  { %2812 = vmax.xlane.f32.xlu1 %v2811_v48 }
 0xfd0   :  { %2906 = vrot.lane.b32.xlu1 %v15207_v1, %s14706_s1 }
 0xfd1   :  { %2830 = vrot.lane.b32.xlu0 %v15183_v53, %s14706_s1 }
 0xfd4   :  { %2984 = vrot.lane.b32.xlu1 %v15185_v56, %s14707_s29 }
 0xfd8   :  { %3062 = vrot.lane.b32.xlu1 %v15188_v61, %s14707_s29 }
 0xfdc   :  { %3060 = vrot.lane.b32.xlu1 %v15204_v63, %s14707_s29 }
0x1048   :  { %v2810_v49 = vpop.xlane.xlu0 %2809 }
0x1049   :  { %v2814_v50 = vsub.f32 %v2726_v31, %v2810_v49 }
0x104b   :  { %v2816_v51 = vmul.f32 1.442695, %v2814_v50 }
0x104c   :  { %v2831_v52 = vpop.permute.xlu0 %2830  ;;  %v2813_v54 = vpop.xlane.xlu1 %2812 }
0x104d   :  { %13308 = vpow2.f32 %v2816_v51  ;;  %v2815_v57 = vsub.f32 %v2804_v38, %v2813_v54  ;;  %12338 = vmatpush3.msra.mxu1 %v2831_v52 }
0x104e   :  { %12347 = vmatprep.subr.mxu1 %v17795_v0 }
0x104f   :  { %v2818_v59 = vmul.f32 1.442695, %v2815_v57 }
0x1050   :  { %v2907_v2 = vpop.permute.xlu1 %2906 }
0x1051   :  { %13310 = vpow2.f32 %v2818_v59  ;;  %12343 = vmatpush3.msra.mxu0 %v2907_v2 }
0x1052   :  { %12352 = vmatprep.subr.mxu0 %v17795_v0 }
0x1054   :  { %v2985_v10 = vpop.permute.xlu1 %2984 }
0x1057   :  { %v13309_v3 = vpop.eup %13308 }
0x1058   :  { %v2820_v5 = vsel %vm1161_vm2, %v13309_v3, 0.0  ;;  %v3063_v17 = vpop.permute.xlu1 %3062 }
0x1059   :  { %2821 = vadd.xlane.f32.xlu0 %v2820_v5 }
0x105b   :  { %v13311_v6 = vpop.eup %13310 }
0x105c   :  { %v2823_v7 = vsel %vm1161_vm2, %v13311_v6, 0.0  ;;  %v3061_v20 = vpop.permute.xlu1 %3060 }
0x105d   :  { %2824 = vadd.xlane.f32.xlu0 %v2823_v7 }
0x1073   :  { %2982 = vrot.lane.b32.xlu0 %v15193_v62, %s14707_s29 }
0x10e6   :  { %v2822_v8 = vpop.xlane.xlu0 %2821 }
0x10e7   :  { %13312 = vrcp.f32 %v2822_v8 }
0x10ea   :  { %v2825_v9 = vpop.xlane.xlu0 %2824 }
0x10eb   :  { %13314 = vrcp.f32 %v2825_v9 }
0x10ee   :  { %v2983_v19 = vpop.permute.xlu0 %2982 }
0x10f1   :  { %v13313_v11 = vpop.eup %13312 }
0x10f2   :  { %v2827_v13 = vmul.f32 %v13313_v11, %v13309_v3 }
0x10f4   :  { %12340 = vmatmul.mubr.msk.f32.vlgmr.msra.gmra.mrb[24].mxu1 %vm1161_vm2, %v2827_v13 }
0x10f5   :  { %v13315_v15 = vpop.eup %13314  ;;  %12348 = vmatpush3.xpose.msk.msra.mxu1 %vm579_vm1, %v2985_v10  ;;  %12349 = vmatprep.mubr.msk.f32.mxu1 %vm14701_vm0, %v17795_v0 }
0x10f6   :  { %v2829_v18 = vmul.f32 %v13315_v15, %v13311_v6  ;;  %12357 = vmatprep.subr.mxu1 %v17795_v0 }
0x10f8   :  { %12345 = vmatmul.mubr.msk.f32.vlgmr.msra.gmra.mrb[32].mxu0 %vm1161_vm2, %v2829_v18  ;;  %12350 = vmatmul.mubr.msk.f32.vlgmr.msra.gmra.mrb[26].mxu1 %vm579_vm1, %v2983_v19 }
0x10f9   :  { %12353 = vmatpush3.xpose.msk.msra.mxu0 %vm579_vm1, %v3063_v17  ;;  %12354 = vmatprep.mubr.msk.f32.mxu0 %vm14701_vm0, %v17795_v0 }
0x10fa   :  { %12362 = vmatprep.subr.mxu0 %v17795_v0  ;;  %12359 = vmatprep.mubr.msk.f32.mxu1 %vm14701_vm0, %v17795_v0 }
0x10fc   :  { %12355 = vmatmul.mubr.msk.f32.vlgmr.msra.gmra.mrb[34].mxu0 %vm579_vm1, %v3061_v20 }
0x10fd   :  { %12364 = vmatprep.mubr.msk.f32.mxu0 %vm14701_vm0, %v17795_v0 }
0x11c7   :  { %v15439_v21 = vpop.f32.mrb[24].mxu1 }
0x11c8   :  { %v12341_v22 = vpop.f32.mrb[25].mxu1 }
0x11cb   :  { %v15441_v23 = vpop.f32.mrb[32].mxu0  ;;  %v3056_v24 = vpop.f32.mrb[26].mxu1 }
0x11cc   :  { %v12795_v25 = vpack.i.bf16 %v15441_v23, %v15439_v21  ;;  %v12346_v27 = vpop.f32.mrb[33].mxu0  ;;  %v12351_v31 = vpop.f32.mrb[27].mxu1  ;;  %v3138_v34 = vsel %vm1161_vm2, %v3056_v24, -inf  ;;  %v12880_v21 = vld [vmem:[#allocation10 + $0x10] sm:$0xff]   ;;  %v12881_v23 = vld [vmem:[#allocation10 + $0x18] sm:$0xff]  }
0x11cd   :  { %3139 = vmax.xlane.f32.xlu0 %v3138_v34 }
0x11cf   :  { %v3134_v35 = vpop.f32.mrb[34].mxu0 }
0x11d0   :  { %v12356_v36 = vpop.f32.mrb[35].mxu0  ;;  %v3141_v38 = vsel %vm1161_vm2, %v3134_v35, -inf }
0x11d1   :  { %3142 = vmax.xlane.f32.xlu1 %v3141_v38 }
0x11e2   :  { %3236 = vrot.lane.b32.xlu1 %v15207_v1, %s14707_s29 }
0x11e3   :  { %3160 = vrot.lane.b32.xlu0 %v15183_v53, %s14707_s29 }
0x11e6   :  { %3314 = vrot.lane.b32.xlu1 %v15185_v56, %s14681_s17 }
0x11ea   :  { %3392 = vrot.lane.b32.xlu1 %v15188_v61, %s14681_s17 }
0x11ee   :  { %3390 = vrot.lane.b32.xlu1 %v15204_v63, %s14681_s17 }
0x125a   :  { %v3140_v42 = vpop.xlane.xlu0 %3139 }
0x125b   :  { %v3144_v48 = vsub.f32 %v3056_v24, %v3140_v42 }
0x125d   :  { %v3146_v49 = vmul.f32 1.442695, %v3144_v48 }
0x125e   :  { %v3161_v50 = vpop.permute.xlu0 %3160  ;;  %v3143_v51 = vpop.xlane.xlu1 %3142 }
0x125f   :  { %13316 = vpow2.f32 %v3146_v49  ;;  %v3145_v52 = vsub.f32 %v3134_v35, %v3143_v51  ;;  %12358 = vmatpush3.msra.mxu1 %v3161_v50  ;;  %v12883_v50 = vld [vmem:[#allocation10 + $0x28] sm:$0xff]   ;;  %v12884_v51 = vld [vmem:[#allocation10 + $0x30] sm:$0xff]  }
0x1260   :  { %12367 = vmatprep.subr.mxu1 %v17795_v0 }
0x1261   :  { %v3148_v54 = vmul.f32 1.442695, %v3145_v52  ;;  %v12885_v52 = vld [vmem:[#allocation10 + $0x38] sm:$0xff]  }
0x1262   :  { %v3237_v57 = vpop.permute.xlu1 %3236 }
0x1263   :  { %13318 = vpow2.f32 %v3148_v54  ;;  %12363 = vmatpush3.msra.mxu0 %v3237_v57 }
0x1264   :  { %12372 = vmatprep.subr.mxu0 %v17795_v0 }
0x1266   :  { %v3315_v5 = vpop.permute.xlu1 %3314 }
0x1269   :  { %v13317_v56 = vpop.eup %13316 }
0x126a   :  { %v3150_v61 = vsel %vm1161_vm2, %v13317_v56, 0.0  ;;  %v3393_v9 = vpop.permute.xlu1 %3392 }
0x126b   :  { %3151 = vadd.xlane.f32.xlu0 %v3150_v61 }
0x126d   :  { %v13319_v63 = vpop.eup %13318 }
0x126e   :  { %v3153_v59 = vsel %vm1161_vm2, %v13319_v63, 0.0  ;;  %v3391_v11 = vpop.permute.xlu1 %3390 }
0x126f   :  { %3154 = vadd.xlane.f32.xlu0 %v3153_v59 }
0x1285   :  { %3312 = vrot.lane.b32.xlu0 %v15193_v62, %s14681_s17 }
0x12f8   :  { %v3152_v2 = vpop.xlane.xlu0 %3151 }
0x12f9   :  { %13320 = vrcp.f32 %v3152_v2 }
0x12fc   :  { %v3155_v3 = vpop.xlane.xlu0 %3154 }
0x12fd   :  { %13322 = vrcp.f32 %v3155_v3 }
0x1300   :  { %v3313_v62 = vpop.permute.xlu0 %3312 }
0x1303   :  { %v13321_v6 = vpop.eup %13320 }
0x1304   :  { %v3157_v7 = vmul.f32 %v13321_v6, %v13317_v56 }
0x1306   :  { %12360 = vmatmul.mubr.msk.f32.vlgmr.msra.gmra.mrb[28].mxu1 %vm1161_vm2, %v3157_v7 }
0x1307   :  { %v13323_v8 = vpop.eup %13322  ;;  %12368 = vmatpush3.xpose.msk.msra.mxu1 %vm579_vm1, %v3315_v5  ;;  %12369 = vmatprep.mubr.msk.f32.mxu1 %vm14701_vm0, %v17795_v0 }
0x1308   :  { %v3159_v10 = vmul.f32 %v13323_v8, %v13319_v63  ;;  %12377 = vmatprep.subr.mxu1 %v17795_v0 }
0x130a   :  { %12365 = vmatmul.mubr.msk.f32.vlgmr.msra.gmra.mrb[36].mxu0 %vm1161_vm2, %v3159_v10  ;;  %12370 = vmatmul.mubr.msk.f32.vlgmr.msra.gmra.mrb[30].mxu1 %vm579_vm1, %v3313_v62 }
0x130b   :  { %12373 = vmatpush3.xpose.msk.msra.mxu0 %vm579_vm1, %v3393_v9  ;;  %12374 = vmatprep.mubr.msk.f32.mxu0 %vm14701_vm0, %v17795_v0 }
0x130c   :  { %12382 = vmatprep.subr.mxu0 %v17795_v0  ;;  %12379 = vmatprep.mubr.msk.f32.mxu1 %vm14701_vm0, %v17795_v0 }
0x130e   :  { %12375 = vmatmul.mubr.msk.f32.vlgmr.msra.gmra.mrb[38].mxu0 %vm579_vm1, %v3391_v11 }
0x130f   :  { %12384 = vmatprep.mubr.msk.f32.mxu0 %vm14701_vm0, %v17795_v0 }
0x13d9   :  { %v3232_v13 = vpop.f32.mrb[28].mxu1 }
0x13da   :  { %v12361_v15 = vpop.f32.mrb[29].mxu1 }
0x13dd   :  { %v3308_v17 = vpop.f32.mrb[36].mxu0  ;;  %v3386_v18 = vpop.f32.mrb[30].mxu1 }
0x13de   :  { %v12800_v19 = vpack.i.bf16 %v3308_v17, %v3232_v13  ;;  %v12366_v20 = vpop.f32.mrb[37].mxu0  ;;  %v12371_v22 = vpop.f32.mrb[31].mxu1  ;;  %v3468_v24 = vsel %vm1161_vm2, %v3386_v18, -inf }
0x13df   :  { %3469 = vmax.xlane.f32.xlu0 %v3468_v24 }
0x13e1   :  { %v3464_v27 = vpop.f32.mrb[38].mxu0 }
0x13e2   :  { %v12376_v31 = vpop.f32.mrb[39].mxu0  ;;  %v3471_v34 = vsel %vm1161_vm2, %v3464_v27, -inf }
0x13e3   :  { %3472 = vmax.xlane.f32.xlu1 %v3471_v34 }
0x13f4   :  { %3566 = vrot.lane.b32.xlu1 %v15207_v1, %s14681_s17 }
0x13f8   :  { %12776 = vrot.lane.b32.xlu1 %v12775_v16, %s14681_s17 }
0x13fc   :  { %12781 = vrot.lane.b32.xlu1 %v12780_v60, %s14707_s29 }
0x1400   :  { %12791 = vrot.lane.b32.xlu1 %v12790_v33, %s14668_s14 }
0x1404   :  { %12801 = vrot.lane.b32.xlu1 %v12800_v19, %s14704_s9 }
0x146c   :  { %v3470_v35 = vpop.xlane.xlu0 %3469 }
0x146d   :  { %v3474_v36 = vsub.f32 %v3386_v18, %v3470_v35 }
0x146f   :  { %v3476_v1 = vmul.f32 1.442695, %v3474_v36 }
0x1470   :  { %v3473_v38 = vpop.xlane.xlu1 %3472 }
0x1471   :  { %13324 = vpow2.f32 %v3476_v1  ;;  %v3475_v42 = vsub.f32 %v3464_v27, %v3473_v38 }
0x1473   :  { %v3478_v12 = vmul.f32 1.442695, %v3475_v42 }
0x1474   :  { %v3567_v14 = vpop.permute.xlu1 %3566 }
0x1475   :  { %13326 = vpow2.f32 %v3478_v12  ;;  %12383 = vmatpush3.msra.mxu0 %v3567_v14 }
0x1478   :  { %v12777_v59 = vpop.permute.xlu1 %12776 }
0x1479   :  { %v12779_v5 = vunpack.i.h.bf16 %v12777_v59  ;;  %v12778_v6 = vunpack.i.l.bf16 %v12777_v59 }
0x147b   :  { %v13325_v16 = vpop.eup %13324  ;;  %v3699_v13 = vsel %vm579_vm1, %v15243_v32, %v12779_v5  ;;  %v3698_v15 = vsel %vm579_vm1, %v15241_v30, %v12778_v6  ;;  %v12900_v6 = vld [vmem:[%s18233_s25 + $0x44] ss:$16 sps:$4 sm:$0xff]  }
0x147c   :  { %v3480_v55 = vsel %vm1161_vm2, %v13325_v16, 0.0  ;;  %v12782_v2 = vpop.permute.xlu1 %12781 }
0x147d   :  { %3481 = vadd.xlane.f32.xlu0 %v3480_v55  ;;  %v12784_v7 = vunpack.i.h.bf16 %v12782_v2  ;;  %v12783_v8 = vunpack.i.l.bf16 %v12782_v2 }
0x147f   :  { %v13327_v58 = vpop.eup %13326  ;;  %v3701_v17 = vsel %vm3700_vm3, %v3698_v15, %v12783_v8  ;;  %v3702_v18 = vsel %vm3700_vm3, %v3699_v13, %v12784_v7  ;;  %v12903_v7 = vld [vmem:[%s18233_s25 + $0x4c] ss:$16 sps:$4 sm:$0xff]   ;;  %v12898_v8 = vld [vmem:[%s18233_s25 + $0x40] ss:$16 sps:$4 sm:$0xff]   ;;  %v12907_v13 = vld [vmem:[%s18233_s25 + $0x68] ss:$16 sps:$4 sm:$0xff]  }
0x1480   :  { %v3483_v60 = vsel %vm1161_vm2, %v13327_v58, 0.0  ;;  %v12792_v9 = vpop.permute.xlu1 %12791  ;;  %v12912_v15 = vld [vmem:[%s18233_s25 + $0x84] ss:$16 sps:$4 sm:$0xff]  }
0x1481   :  { %3484 = vadd.xlane.f32.xlu0 %v3483_v60  ;;  %v12794_v27 = vunpack.i.h.bf16 %v12792_v9  ;;  %v12793_v31 = vunpack.i.l.bf16 %v12792_v9  ;;  %v12901_v9 = vld [vmem:[%s18233_s25 + $0x48] ss:$16 sps:$4 sm:$0xff]  }
0x1484   :  { %v12802_v34 = vpop.permute.xlu1 %12801 }
0x1485   :  { %v12804_v1 = vunpack.i.h.bf16 %v12802_v34  ;;  %v12803_v38 = vunpack.i.l.bf16 %v12802_v34  ;;  %v12927_v34 = vld [vmem:[%s18233_s25 + $0xcc] ss:$16 sps:$4 sm:$0xff]  }
0x1497   :  { %3490 = vrot.lane.b32.xlu0 %v15183_v53, %s14681_s17 }
0x149b   :  { %12786 = vrot.lane.b32.xlu0 %v12785_v45, %s14706_s1  ;;  %v12879_v45 = vld [vmem:[#allocation10 + $0x8] sm:$0xff]  }
0x149f   :  { %12796 = vrot.lane.b32.xlu0 %v12795_v25, %s14705_s28  ;;  %v12882_v25 = vld [vmem:[#allocation10 + $0x20] sm:$0xff]  }
0x150a   :  { %v3482_v26 = vpop.xlane.xlu0 %3481 }
0x150b   :  { %13328 = vrcp.f32 %v3482_v26 }
0x150e   :  { %v3485_v28 = vpop.xlane.xlu0 %3484 }
0x150f   :  { %13330 = vrcp.f32 %v3485_v28  ;;  %v11498_v28 = vld [vmem:[#allocation11] ss:$0 sm:$0xff] }
0x1512   :  { %v3491_v33 = vpop.permute.xlu0 %3490 }
0x1513   :  { %12378 = vmatpush3.msra.mxu1 %v3491_v33 }
0x1514   :  { %12387 = vmatprep.subr.bf16.mxu1 %v17795_v0 }
0x1515   :  { %v13329_v48 = vpop.eup %13328 }
0x1516   :  { %v3487_v53 = vmul.f32 %v13329_v48, %v13325_v16  ;;  %v12787_v3 = vpop.permute.xlu0 %12786 }
0x1517   :  { %v12789_v10 = vunpack.i.h.bf16 %v12787_v3  ;;  %v12788_v62 = vunpack.i.l.bf16 %v12787_v3 }
0x1518   :  { %12380 = vmatmul.mubr.msk.f32.vlgmr.msra.gmra.mrb[32].mxu1 %vm1161_vm2, %v3487_v53 }
0x1519   :  { %v13331_v49 = vpop.eup %13330  ;;  %12403 = vmatprep.mubr.msk.bf16.mxu1 %vm14701_vm0, %v17795_v0  ;;  %12388 = vmatpush3.bf16.msra.mxu1 %v12878_v41  ;;  %v3704_v19 = vsel %vm3703_vm4, %v3701_v17, %v12788_v62  ;;  %v3705_v20 = vsel %vm3703_vm4, %v3702_v18, %v12789_v10  ;;  %v12906_v10 = vld [vmem:[%s18233_s25 + $0x64] ss:$16 sps:$4 sm:$0xff]   ;;  %v12909_v62 = vld [vmem:[%s18233_s25 + $0x6c] ss:$16 sps:$4 sm:$0xff]   ;;  %v12910_v18 = vld [vmem:[%s18233_s25 + $0x80] ss:$16 sps:$4 sm:$0xff]  }
0x151a   :  { %v3489_v37 = vmul.f32 %v13331_v49, %v13327_v58  ;;  %12389 = vmatprep.subr.bf16.mxu1 %v17795_v0  ;;  %v12797_v11 = vpop.permute.xlu0 %12796  ;;  %v3707_v32 = vsel %vm3706_vm5, %v3704_v19, %v12793_v31  ;;  %v3708_v35 = vsel %vm3706_vm5, %v3705_v20, %v12794_v27  ;;  %v12915_v17 = vld [vmem:[%s18233_s25 + $0x8c] ss:$16 sps:$4 sm:$0xff]   ;;  %v12913_v19 = vld [vmem:[%s18233_s25 + $0x88] ss:$16 sps:$4 sm:$0xff]   ;;  %v12918_v20 = vld [vmem:[%s18233_s25 + $0xa4] ss:$16 sps:$4 sm:$0xff]  }
0x151b   :  { %v12799_v22 = vunpack.i.h.bf16 %v12797_v11  ;;  %v12798_v24 = vunpack.i.l.bf16 %v12797_v11  ;;  %v12904_v11 = vld [vmem:[%s18233_s25 + $0x60] ss:$16 sps:$4 sm:$0xff]   ;;  %v12919_v27 = vld [vmem:[%s18233_s25 + $0xa8] ss:$16 sps:$4 sm:$0xff]   ;;  %v12924_v31 = vld [vmem:[%s18233_s25 + $0xc4] ss:$16 sps:$4 sm:$0xff]  }
0x151c   :  { %12385 = vmatmul.mubr.msk.f32.vlgmr.msra.gmra.mrb[40].mxu0 %vm1161_vm2, %v3489_v37 }
0x151d   :  { %4069 = vmatprep.mubr.bf16.mxu0 %v17797_v29  ;;  %12390 = vmatpush3.bf16.msra.mxu1 %v12879_v45  ;;  %v3710_v30 = vsel %vm3709_vm6, %v3707_v32, %v12798_v24  ;;  %v3711_v36 = vsel %vm3709_vm6, %v3708_v35, %v12799_v22  ;;  %v12921_v22 = vld [vmem:[%s18233_s25 + $0xac] ss:$16 sps:$4 sm:$0xff]   ;;  %v12916_v24 = vld [vmem:[%s18233_s25 + $0xa0] ss:$16 sps:$4 sm:$0xff]   ;;  %v12925_v35 = vld [vmem:[%s18233_s25 + $0xc8] ss:$16 sps:$4 sm:$0xff]  }
0x151e   :  { %12391 = vmatprep.subr.bf16.mxu1 %v17795_v0  ;;  %v3713_v16 = vsel %vm3712_vm7, %v3710_v30, %v12803_v38  ;;  %v3714_v55 = vsel %vm3712_vm7, %v3711_v36, %v12804_v1  ;;  %v12922_v32 = vld [vmem:[%s18233_s25 + $0xc0] ss:$16 sps:$4 sm:$0xff]   ;;  %v12930_v30 = vld [vmem:[%s18233_s25 + $0xe4] ss:$16 sps:$4 sm:$0xff]   ;;  %v12933_v36 = vld [vmem:[%s18233_s25 + $0xec] ss:$16 sps:$4 sm:$0xff]  }
0x151f   :  { %v12928_v1 = vld [vmem:[%s18233_s25 + $0xe0] ss:$16 sps:$4 sm:$0xff]   ;;  %v12931_v38 = vld [vmem:[%s18233_s25 + $0xe8] ss:$16 sps:$4 sm:$0xff]  }
0x1521   :  { %12392 = vmatpush3.bf16.msra.mxu1 %v12880_v21 }
0x1522   :  { %12393 = vmatprep.subr.bf16.mxu1 %v17795_v0 }
0x1525   :  { %12394 = vmatpush3.bf16.msra.mxu1 %v12881_v23  ;;  %v12886_v23 = vld [vmem:[%s18233_s25] ss:$16 sps:$4 sm:$0xff]  }
0x1526   :  { %12395 = vmatprep.subr.bf16.mxu1 %v17795_v0 }
0x1529   :  { %12396 = vmatpush3.bf16.msra.mxu1 %v12882_v25  ;;  %v12888_v25 = vld [vmem:[%s18233_s25 + $0x4] ss:$16 sps:$4 sm:$0xff]  }
0x152a   :  { %12397 = vmatprep.subr.bf16.mxu1 %v17795_v0  ;;  %4037 = vmatprep.subr.bf16.mxu0 %v12888_v25  ;;  %v12936_v25 = vld [vmem:[#allocation17] sm:$0xff]  }
0x152b   :  { %4038 = vmatpush1.bf16.msra.mxu0 %v12886_v23 }
0x152d   :  { %12398 = vmatpush3.bf16.msra.mxu1 %v12883_v50  ;;  %v12889_v50 = vld [vmem:[%s18233_s25 + $0x8] ss:$16 sps:$4 sm:$0xff]  }
0x152e   :  { %12399 = vmatprep.subr.bf16.mxu1 %v17795_v0 }
0x1531   :  { %12400 = vmatpush3.bf16.msra.mxu1 %v12884_v51  ;;  %v12891_v51 = vld [vmem:[%s18233_s25 + $0xc] ss:$16 sps:$4 sm:$0xff]  }
0x1532   :  { %12401 = vmatprep.subr.bf16.mxu1 %v17795_v0 }
0x1535   :  { %12402 = vmatpush3.bf16.msra.mxu1 %v12885_v52  ;;  %v12894_v52 = vld [vmem:[%s18233_s25 + $0x24] ss:$16 sps:$4 sm:$0xff]  }
0x1536   :  { %4080 = vmatprep.subr.bf16.mxu1 %v12891_v51  ;;  %4039 = vmatprep.subr.bf16.mxu0 %v12894_v52  ;;  %v12938_v52 = vld [vmem:[#allocation17 + $0x48] sm:$0xff]  }
0x15eb   :  { %v3562_v54 = vpop.f32.mrb[32].mxu1 }
0x15ec   :  { %v12381_v57 = vpop.f32.mrb[33].mxu1 }
0x15ed   :  { %v12892_v57 = vld [vmem:[%s18233_s25 + $0x20] ss:$16 sps:$4 sm:$0xff]  }
0x15ee   :  { %4040 = vmatpush1.bf16.msra.mxu0 %v12892_v57  ;;  %v12940_v57 = vld [vmem:[#allocation17 + $0x8] sm:$0xff]  }
0x15ef   :  { %v3638_v56 = vpop.f32.mrb[40].mxu0  ;;  %4041 = vmatprep.subr.bf16.mxu0 %v12900_v6  ;;  %v12950_v6 = vld [vmem:[#allocation17 + $0x60] sm:$0xff]  }
0x15f0   :  { %v12805_v61 = vpack.i.bf16 %v3638_v56, %v3562_v54  ;;  %v12386_v63 = vpop.f32.mrb[41].mxu0  ;;  %v12897_v54 = vld [vmem:[%s18233_s25 + $0x2c] ss:$16 sps:$4 sm:$0xff]  }
0x15f2   :  { %12806 = vrot.lane.b32.xlu0 %v12805_v61, %s14703_s0  ;;  %4042 = vmatpush1.bf16.msra.mxu0 %v12898_v8  ;;  %v12952_v8 = vld [vmem:[#allocation17 + $0x20] sm:$0xff]  }
0x15f3   :  { %4043 = vmatprep.subr.bf16.mxu0 %v12906_v10  ;;  %v12954_v10 = vld [vmem:[#allocation17 + $0x68] sm:$0xff]  }
0x15f6   :  { %4044 = vmatpush1.bf16.msra.mxu0 %v12904_v11  ;;  %v12956_v11 = vld [vmem:[#allocation17 + $0x28] sm:$0xff]  }
0x15f7   :  { %4045 = vmatprep.subr.bf16.mxu0 %v12912_v15  ;;  %v12958_v15 = vld [vmem:[#allocation17 + $0x70] sm:$0xff]  }
0x15fa   :  { %4046 = vmatpush1.bf16.msra.mxu0 %v12910_v18  ;;  %v12960_v18 = vld [vmem:[#allocation17 + $0x30] sm:$0xff]  }
0x15fb   :  { %4047 = vmatprep.subr.bf16.mxu0 %v12918_v20  ;;  %v12962_v20 = vld [vmem:[#allocation17 + $0x78] sm:$0xff]  }
0x15fe   :  { %4048 = vmatpush1.bf16.msra.mxu0 %v12916_v24  ;;  %v12964_v24 = vld [vmem:[#allocation17 + $0x38] sm:$0xff]  }
0x15ff   :  { %4049 = vmatprep.subr.bf16.mxu0 %v12924_v31  ;;  %v712_v31 = vld [vmem:[#allocation16] sm:$0xf] }
0x1602   :  { %4050 = vmatpush1.bf16.msra.mxu0 %v12922_v32  ;;  %v3860_v32 = vrot.slane %v712_v31, %v15178_v47 }
0x1603   :  { %4051 = vmatprep.subr.bf16.mxu0 %v12930_v30  ;;  %v3864_v30 = vrot.slane %v712_v31, %v15175_v46 }
0x1606   :  { %4052 = vmatpush1.bf16.msra.mxu0 %v12928_v1 }
0x1664   :  { %v12807_v42 = vpop.permute.xlu0 %12806 }
0x1665   :  { %v12809_v12 = vunpack.i.h.bf16 %v12807_v42  ;;  %v12808_v14 = vunpack.i.l.bf16 %v12807_v42  ;;  %v12934_v42 = vld [vmem:[#allocation17 + $0x40] sm:$0xff]  }
0x1666   :  { %11995 = vmatprep.subr.bf16.mxu0 %v12934_v42 }
0x1667   :  { %v3717_v58 = vsel %vm3715_vm8, %v3714_v55, %v12809_v12  ;;  %v3716_v60 = vsel %vm3715_vm8, %v3713_v16, %v12808_v14  ;;  %v12935_v12 = vld [vmem:[#allocation17 + $0xc0] sm:$0xff]  }
0x1668   :  { %v3718_v26 = vpack.c.bf16 %v3717_v58, %v3716_v60 }
0x166a   :  { %12404 = vmatmul.mubr.bf16.vlgmr.msra.gmra.mrb[36].mxu1 %v3718_v26 }
0x166b   :  { %4112 = vmatprep.mubr.bf16.mxu1 %v17797_v29  ;;  %4081 = vmatpush1.bf16.msra.mxu1 %v12889_v50  ;;  %v12937_v50 = vld [vmem:[#allocation17 + $0x80] sm:$0xff]  }
0x166c   :  { %4082 = vmatprep.subr.bf16.mxu1 %v12897_v54  ;;  %v12939_v54 = vld [vmem:[#allocation17 + $0xc8] sm:$0xff]  }
0x173d   :  { %v3807_v33 = vpop.f32.mrb[36].mxu1 }
0x173e   :  { %v3808_v48 = vadd.f32 %v11498_v28, %v3807_v33  ;;  %v12405_v53 = vpop.f32.mrb[37].mxu1 }
0x173f   :  { %v3810_v49 = vpop.f32.mrb[38].mxu1 }
0x1740   :  { %v3811_v37 = vadd.f32 %v11498_v28, %v3810_v49  ;;  %v12406_v41 = vpop.f32.mrb[39].mxu1  ;;  %v3814_v45 = vadd.f32 %v3808_v48, %v15159_v39  ;;  %v12895_v39 = vld [vmem:[%s18233_s25 + $0x28] ss:$16 sps:$4 sm:$0xff]   ;;  %v11507_v48 = vld [vmem:[#allocation13] ss:$0 sm:$0xff] }
0x1741   :  { %4083 = vmatpush1.bf16.msra.mxu1 %v12895_v39  ;;  %v11508_v41 = vld [vmem:[#allocation14] ss:$0 sm:$0xff]  ;;  %v12941_v39 = vld [vmem:[#allocation17 + $0x88] sm:$0xff]  }
0x1742   :  { %3816 = vadd.xlane.f32.xlu1 %v3814_v45  ;;  %v3815_v21 = vadd.f32 %v3811_v37, %v15161_v40  ;;  %4084 = vmatprep.subr.bf16.mxu1 %v12903_v7  ;;  %v12951_v7 = vld [vmem:[#allocation17 + $0xe0] sm:$0xff]  }
0x1744   :  { %3818 = vadd.xlane.f32.xlu0 %v3815_v21 }
0x1745   :  { %4085 = vmatpush1.bf16.msra.mxu1 %v12901_v9  ;;  %v12953_v9 = vld [vmem:[#allocation17 + $0xa0] sm:$0xff]  }
0x1746   :  { %4086 = vmatprep.subr.bf16.mxu1 %v12909_v62  ;;  %v12955_v62 = vld [vmem:[#allocation17 + $0xe8] sm:$0xff]  }
0x1749   :  { %4087 = vmatpush1.bf16.msra.mxu1 %v12907_v13  ;;  %v12957_v13 = vld [vmem:[#allocation17 + $0xa8] sm:$0xff]  }
0x174a   :  { %4088 = vmatprep.subr.bf16.mxu1 %v12915_v17  ;;  %v12959_v17 = vld [vmem:[#allocation17 + $0xf0] sm:$0xff]  }
0x174d   :  { %4089 = vmatpush1.bf16.msra.mxu1 %v12913_v19  ;;  %v12961_v19 = vld [vmem:[#allocation17 + $0xb0] sm:$0xff]  }
0x174e   :  { %4090 = vmatprep.subr.bf16.mxu1 %v12921_v22  ;;  %v12963_v22 = vld [vmem:[#allocation17 + $0xf8] sm:$0xff]  }
0x1751   :  { %4091 = vmatpush1.bf16.msra.mxu1 %v12919_v27  ;;  %v12965_v27 = vld [vmem:[#allocation17 + $0xb8] sm:$0xff]  }
0x1752   :  { %4092 = vmatprep.subr.bf16.mxu1 %v12927_v34  ;;  %v15591_v34 = vsub.s32 3, %v15169_v43 }
0x1754   :  { %18234 = vst [vmem:[#allocation97_spill] sm:$0xff] %v15591_v34 }
0x1755   :  { %4093 = vmatpush1.bf16.msra.mxu1 %v12925_v35  ;;  %v3868_v35 = vrot.slane %v712_v31, %v15172_v44 }
0x1756   :  { %4094 = vmatprep.subr.bf16.mxu1 %v12933_v36  ;;  %v3872_v36 = vrot.slane %v712_v31, %v15591_v34  ;;  %v12972_v31 = vld [vmem:[#allocation23 + $0x1c] ss:$12 sps:$4 sm:$0xff]  }
0x1759   :  { %4095 = vmatpush1.bf16.msra.mxu1 %v12931_v38 }
0x175a   :  { %12017 = vmatprep.subr.bf16.mxu1 %v12935_v12 }
0x17cf   :  { %v3817_v40 = vpop.xlane.xlu1 %3816 }
0x17d0   :  { %v3821_v56 = vmul.f32 0.0078125, %v3817_v40  ;;  %v12942_v40 = vld [vmem:[#allocation17 + $0x50] sm:$0xff]  }
0x17d1   :  { %v3819_v61 = vpop.xlane.xlu0 %3818 }
0x17d2   :  { %v15549_v63 = vsub.f32 %v3814_v45, %v3821_v56  ;;  %v3822_v59 = vmul.f32 0.0078125, %v3819_v61  ;;  %v12943_v56 = vld [vmem:[#allocation17 + $0xd0] sm:$0xff]  }
0x17d3   :  { %v12944_v61 = vld [vmem:[#allocation17 + $0x10] sm:$0xff]  }
0x17d4   :  { %v15551_v2 = vsub.f32 %v3815_v21, %v3822_v59  ;;  %v3825_v3 = vmul.f32 %v15549_v63, %v15549_v63  ;;  %v12946_v59 = vld [vmem:[#allocation17 + $0x58] sm:$0xff]  }
0x17d6   :  { %3827 = vadd.xlane.f32.xlu0 %v3825_v3  ;;  %v3826_v5 = vmul.f32 %v15551_v2, %v15551_v2  ;;  %v12948_v3 = vld [vmem:[#allocation17 + $0x18] sm:$0xff]  }
0x17da   :  { %3829 = vadd.xlane.f32.xlu0 %v3826_v5  ;;  %v12949_v5 = vld [vmem:[#allocation17 + $0x98] sm:$0xff]  }
0x1863   :  { %v3828_v14 = vpop.xlane.xlu0 %3827 }
0x1864   :  { %v3831_v16 = vmul.f32 0.0078125, %v3828_v14 }
0x1866   :  { %v3833_v55 = vadd.f32 1e-05, %v3831_v16 }
0x1867   :  { %v3830_v58 = vpop.xlane.xlu0 %3829 }
0x1868   :  { %13332 = vrsqrt.f32 %v3833_v55  ;;  %v3832_v60 = vmul.f32 0.0078125, %v3830_v58 }
0x186a   :  { %v3834_v26 = vadd.f32 1e-05, %v3832_v60 }
0x186c   :  { %13334 = vrsqrt.f32 %v3834_v26 }
0x1872   :  { %v13333_v28 = vpop.eup %13332 }
0x1873   :  { %v3837_v33 = vmul.f32 %v13333_v28, %v15549_v63  ;;  %v12945_v63 = vld [vmem:[#allocation17 + $0x90] sm:$0xff]  }
0x1875   :  { %v3845_v37 = vmul.f32 %v11507_v48, %v3837_v33 }
0x1876   :  { %v13335_v53 = vpop.eup %13334 }
0x1877   :  { %v3838_v49 = vmul.f32 %v13335_v53, %v15551_v2  ;;  %v15583_v21 = vadd.f32 %v11508_v41, %v3845_v37  ;;  %v12947_v2 = vld [vmem:[#allocation17 + $0xd8] sm:$0xff]  }
0x1879   :  { %v3846_v45 = vmul.f32 %v11507_v48, %v3838_v49 }
0x187b   :  { %v15585_v23 = vadd.f32 %v11508_v41, %v3846_v45 }
0x187d   :  { %v3855_v51 = vpack.c.bf16 %v15585_v23, %v15583_v21 }
0x187f   :  { %4070 = vmatmul.mubr.bf16.vlgmr.msra.gmra.mrb[44].mxu0 %v3855_v51  ;;  %4113 = vmatmul.mubr.bf16.vlgmr.msra.gmra.mrb[40].mxu1 %v3855_v51 }
0x1880   :  { %11996 = vmatpush3.bf16.msra.mxu0 %v12936_v25  ;;  %12018 = vmatpush3.bf16.msra.mxu1 %v12937_v50 }
0x1881   :  { %11997 = vmatprep.subr.bf16.mxu0 %v12938_v52  ;;  %12019 = vmatprep.subr.bf16.mxu1 %v12939_v54 }
0x1884   :  { %11998 = vmatpush3.bf16.msra.mxu0 %v12940_v57  ;;  %12020 = vmatpush3.bf16.msra.mxu1 %v12941_v39 }
0x1885   :  { %11999 = vmatprep.subr.bf16.mxu0 %v12942_v40  ;;  %12021 = vmatprep.subr.bf16.mxu1 %v12943_v56 }
0x1888   :  { %12000 = vmatpush3.bf16.msra.mxu0 %v12944_v61  ;;  %12022 = vmatpush3.bf16.msra.mxu1 %v12945_v63 }
0x1889   :  { %12001 = vmatprep.subr.bf16.mxu0 %v12946_v59  ;;  %12023 = vmatprep.subr.bf16.mxu1 %v12947_v2  ;;  %v11541_v59 = vld [vmem:[#allocation19] ss:$0 sm:$0xff] }
0x188c   :  { %12002 = vmatpush3.bf16.msra.mxu0 %v12948_v3  ;;  %12024 = vmatpush3.bf16.msra.mxu1 %v12949_v5 }
0x188d   :  { %12003 = vmatprep.subr.bf16.mxu0 %v12950_v6  ;;  %12025 = vmatprep.subr.bf16.mxu1 %v12951_v7 }
0x1890   :  { %12004 = vmatpush3.bf16.msra.mxu0 %v12952_v8  ;;  %12026 = vmatpush3.bf16.msra.mxu1 %v12953_v9 }
0x1891   :  { %12005 = vmatprep.subr.bf16.mxu0 %v12954_v10  ;;  %12027 = vmatprep.subr.bf16.mxu1 %v12955_v62 }
0x1894   :  { %12006 = vmatpush3.bf16.msra.mxu0 %v12956_v11  ;;  %12028 = vmatpush3.bf16.msra.mxu1 %v12957_v13 }
0x1895   :  { %12007 = vmatprep.subr.bf16.mxu0 %v12958_v15  ;;  %12029 = vmatprep.subr.bf16.mxu1 %v12959_v17 }
0x1898   :  { %12008 = vmatpush3.bf16.msra.mxu0 %v12960_v18  ;;  %12030 = vmatpush3.bf16.msra.mxu1 %v12961_v19 }
0x1899   :  { %12009 = vmatprep.subr.bf16.mxu0 %v12962_v20  ;;  %12031 = vmatprep.subr.bf16.mxu1 %v12963_v22  ;;  %v12966_v22 = vld [vmem:[#allocation23] ss:$12 sps:$4 sm:$0xff]  }
0x189c   :  { %12010 = vmatpush3.bf16.msra.mxu0 %v12964_v24  ;;  %12032 = vmatpush3.bf16.msra.mxu1 %v12965_v27  ;;  %v12968_v24 = vld [vmem:[#allocation23 + $0x4] ss:$12 sps:$4 sm:$0xff]   ;;  %v12969_v27 = vld [vmem:[#allocation23 + $0x8] ss:$12 sps:$4 sm:$0xff]  }
0x189d   :  { %12407 = vmatprep.subr.bf16.mxu1 %v17795_v0  ;;  %4752 = vmatprep.subr.bf16.mxu0 %v12968_v24 }
0x1952   :  { %v4071_v1 = vpop.f32.mrb[44].mxu0  ;;  %v4114_v38 = vpop.f32.mrb[40].mxu1 }
0x1953   :  { %v4072_v42 = vadd.f32 %v4071_v1, %v3860_v32  ;;  %v4115_v12 = vadd.f32 %v4114_v38, %v3868_v35  ;;  %v4073_v14 = vpop.f32.mrb[45].mxu0  ;;  %v4116_v16 = vpop.f32.mrb[41].mxu1 }
0x1954   :  { %v4074_v55 = vadd.f32 %v4073_v14, %v3864_v30  ;;  %v4117_v58 = vadd.f32 %v4116_v16, %v3872_v36  ;;  %v4075_v60 = vpop.f32.mrb[46].mxu0  ;;  %v4118_v26 = vpop.f32.mrb[42].mxu1  ;;  %v12976_v14 = vld [vmem:[#allocation23 + $0x34] ss:$12 sps:$4 sm:$0xff]   ;;  %v12974_v16 = vld [vmem:[#allocation23 + $0x30] ss:$12 sps:$4 sm:$0xff]  }
0x1955   :  { %v4076_v43 = vadd.f32 %v4075_v60, %v3860_v32  ;;  %v4119_v28 = vadd.f32 %v4118_v26, %v3868_v35  ;;  %v4077_v33 = vpop.f32.mrb[47].mxu0  ;;  %v4120_v48 = vpop.f32.mrb[43].mxu1  ;;  %v4123_v37 = vmax.f32 %v4072_v42, 0.0  ;;  %v4125_v41 = vmax.f32 %v4115_v12, 0.0  ;;  %v12973_v32 = vld [vmem:[#allocation23 + $0x20] ss:$12 sps:$4 sm:$0xff]  }
0x1956   :  { %v4078_v53 = vadd.f32 %v4077_v33, %v3864_v30  ;;  %v4121_v49 = vadd.f32 %v4120_v48, %v3872_v36  ;;  %v4124_v50 = vmax.f32 %v4074_v55, 0.0  ;;  %v4126_v51 = vmax.f32 %v4117_v58, 0.0  ;;  %v12970_v35 = vld [vmem:[#allocation23 + $0x18] ss:$12 sps:$4 sm:$0xff]   ;;  %v12978_v60 = vld [vmem:[#allocation23 + $0x48] ss:$12 sps:$4 sm:$0xff]  }
0x1957   :  { %v4127_v45 = vmax.f32 %v4076_v43, 0.0  ;;  %v4129_v25 = vmax.f32 %v4119_v28, 0.0  ;;  %v12977_v55 = vld [vmem:[#allocation23 + $0x38] ss:$12 sps:$4 sm:$0xff]   ;;  %v12981_v26 = vld [vmem:[#allocation23 + $0x50] ss:$12 sps:$4 sm:$0xff]  }
0x1958   :  { %v4128_v52 = vmax.f32 %v4078_v53, 0.0  ;;  %v4130_v54 = vmax.f32 %v4121_v49, 0.0  ;;  %v12980_v58 = vld [vmem:[#allocation23 + $0x4c] ss:$12 sps:$4 sm:$0xff]   ;;  %v12984_v43 = vld [vmem:[#allocation23 + $0x64] ss:$12 sps:$4 sm:$0xff]  }
0x1959   :  { %v4131_v57 = vpack.c.bf16 %v4127_v45, %v4123_v37  ;;  %v4133_v39 = vpack.c.bf16 %v4129_v25, %v4125_v41  ;;  %v12982_v28 = vld [vmem:[#allocation23 + $0x60] ss:$12 sps:$4 sm:$0xff]   ;;  %v12985_v33 = vld [vmem:[#allocation23 + $0x68] ss:$12 sps:$4 sm:$0xff]   ;;  %v12986_v53 = vld [vmem:[#allocation23 + $0x78] ss:$12 sps:$4 sm:$0xff]  }
0x195a   :  { %v4132_v40 = vpack.c.bf16 %v4128_v52, %v4124_v50  ;;  %v4134_v56 = vpack.c.bf16 %v4130_v54, %v4126_v51  ;;  %v12988_v48 = vld [vmem:[#allocation23 + $0x7c] ss:$12 sps:$4 sm:$0xff]   ;;  %v12989_v49 = vld [vmem:[#allocation23 + $0x80] ss:$12 sps:$4 sm:$0xff]   ;;  %v12993_v45 = vld [vmem:[#allocation23 + $0x98] ss:$12 sps:$4 sm:$0xff]  }
0x195b   :  { %v12992_v37 = vld [vmem:[#allocation23 + $0x94] ss:$12 sps:$4 sm:$0xff]   ;;  %v12990_v41 = vld [vmem:[#allocation23 + $0x90] ss:$12 sps:$4 sm:$0xff]   ;;  %v12996_v25 = vld [vmem:[#allocation23 + $0xac] ss:$12 sps:$4 sm:$0xff]  }
0x195c   :  { %4365 = vmatprep.mubr.bf16.mxu0 %v4132_v40  ;;  %4406 = vmatprep.mubr.bf16.mxu1 %v4134_v56  ;;  %v12994_v50 = vld [vmem:[#allocation23 + $0xa8] ss:$12 sps:$4 sm:$0xff]   ;;  %v12997_v51 = vld [vmem:[#allocation23 + $0xb0] ss:$12 sps:$4 sm:$0xff]  }
0x195d   :  { %4366 = vmatmul.mubr.bf16.vlgmr.msra.gmra.mrb[48].mxu0 %v4131_v57  ;;  %4407 = vmatmul.mubr.bf16.vlgmr.msra.gmra.mrb[44].mxu1 %v4133_v39 }
0x195e   :  { %4784 = vmatprep.mubr.bf16.mxu0 %v17797_v29  ;;  %12423 = vmatprep.mubr.msk.bf16.mxu1 %vm14701_vm0, %v17795_v0 }
0x195f   :  { %12408 = vmatpush3.bf16.msra.mxu1 %v12969_v27  ;;  %4753 = vmatpush1.bf16.msra.mxu0 %v12966_v22 }
0x1960   :  { %12409 = vmatprep.subr.bf16.mxu1 %v17795_v0  ;;  %4754 = vmatprep.subr.bf16.mxu0 %v12972_v31 }
0x1963   :  { %12410 = vmatpush3.bf16.msra.mxu1 %v12973_v32  ;;  %4755 = vmatpush1.bf16.msra.mxu0 %v12970_v35 }
0x1964   :  { %12411 = vmatprep.subr.bf16.mxu1 %v17795_v0  ;;  %4756 = vmatprep.subr.bf16.mxu0 %v12976_v14 }
0x1967   :  { %4757 = vmatpush1.bf16.msra.mxu0 %v12974_v16  ;;  %12412 = vmatpush3.bf16.msra.mxu1 %v12977_v55 }
0x1968   :  { %12413 = vmatprep.subr.bf16.mxu1 %v17795_v0  ;;  %4758 = vmatprep.subr.bf16.mxu0 %v12980_v58 }
0x196b   :  { %4759 = vmatpush1.bf16.msra.mxu0 %v12978_v60  ;;  %12414 = vmatpush3.bf16.msra.mxu1 %v12981_v26 }
0x196c   :  { %12415 = vmatprep.subr.bf16.mxu1 %v17795_v0  ;;  %4760 = vmatprep.subr.bf16.mxu0 %v12984_v43 }
0x196f   :  { %4761 = vmatpush1.bf16.msra.mxu0 %v12982_v28  ;;  %12416 = vmatpush3.bf16.msra.mxu1 %v12985_v33 }
0x1970   :  { %12417 = vmatprep.subr.bf16.mxu1 %v17795_v0  ;;  %4762 = vmatprep.subr.bf16.mxu0 %v12988_v48 }
0x1973   :  { %4763 = vmatpush1.bf16.msra.mxu0 %v12986_v53  ;;  %12418 = vmatpush3.bf16.msra.mxu1 %v12989_v49 }
0x1974   :  { %12419 = vmatprep.subr.bf16.mxu1 %v17795_v0  ;;  %4764 = vmatprep.subr.bf16.mxu0 %v12992_v37 }
0x1977   :  { %4765 = vmatpush1.bf16.msra.mxu0 %v12990_v41  ;;  %12420 = vmatpush3.bf16.msra.mxu1 %v12993_v45 }
0x1978   :  { %4766 = vmatprep.subr.bf16.mxu0 %v12996_v25  ;;  %12421 = vmatprep.subr.bf16.mxu1 %v17795_v0 }
0x197b   :  { %4767 = vmatpush1.bf16.msra.mxu0 %v12994_v50  ;;  %12422 = vmatpush3.bf16.msra.mxu1 %v12997_v51 }
0x197c   :  { %12427 = vmatprep.subr.mxu0 %v17795_v0  ;;  %12467 = vmatprep.subr.mxu1 %v17795_v0 }
0x1a30   :  { %v12011_v61 = vpop.f32.mrb[48].mxu0  ;;  %v12033_v63 = vpop.f32.mrb[44].mxu1 }
0x1a31   :  { %v12012_v2 = vpop.f32.mrb[49].mxu0  ;;  %v12034_v3 = vpop.f32.mrb[45].mxu1 }
0x1a32   :  { %v12013_v5 = vadd.f32 %v12012_v2, %v12011_v61  ;;  %v12035_v6 = vadd.f32 %v12034_v3, %v12033_v63  ;;  %v12014_v7 = vpop.f32.mrb[50].mxu0  ;;  %v12036_v8 = vpop.f32.mrb[46].mxu1  ;;  %v11574_v63 = vld [vmem:[#allocation20] ss:$0 sm:$0xff] }
0x1a33   :  { %v12015_v9 = vpop.f32.mrb[51].mxu0  ;;  %v12037_v10 = vpop.f32.mrb[47].mxu1 }
0x1a34   :  { %v4368_v62 = vadd.f32 %v12013_v5, %v11541_v59  ;;  %v12016_v11 = vadd.f32 %v12015_v9, %v12014_v7  ;;  %v12038_v13 = vadd.f32 %v12037_v10, %v12036_v8 }
0x1a36   :  { %v4409_v15 = vadd.f32 %v12035_v6, %v4368_v62  ;;  %v4371_v17 = vadd.f32 %v12016_v11, %v11541_v59  ;;  %v11575_v6 = vld [vmem:[#allocation22] ss:$0 sm:$0xff]  ;;  %v4487_v62 = vld [vmem:[%s18235_s2] sm:$0x7] }
0x1a37   :  { %v4616_v11 = vrot.slane %v4487_v62, %v15175_v46 }
0x1a38   :  { %v4412_v18 = vadd.f32 %v12038_v13, %v4371_v17  ;;  %v4415_v19 = vadd.f32 %v4409_v15, %v15583_v21  ;;  %v4612_v17 = vrot.slane %v4487_v62, %v15178_v47 }
0x1a3a   :  { %4417 = vadd.xlane.f32.xlu1 %v4415_v19  ;;  %v4416_v20 = vadd.f32 %v4412_v18, %v15585_v23  ;;  %v4620_v18 = vrot.slane %v4487_v62, %v15172_v44 }
0x1a3c   :  { %4419 = vadd.xlane.f32.xlu0 %v4416_v20 }
0x1ac7   :  { %v4418_v21 = vpop.xlane.xlu1 %4417 }
0x1ac8   :  { %v4421_v30 = vmul.f32 0.0078125, %v4418_v21 }
0x1ac9   :  { %v4420_v23 = vpop.xlane.xlu0 %4419 }
0x1aca   :  { %v4423_v36 = vsub.f32 %v4415_v19, %v4421_v30  ;;  %v4422_v1 = vmul.f32 0.0078125, %v4420_v23 }
0x1acc   :  { %v4424_v38 = vsub.f32 %v4416_v20, %v4422_v1  ;;  %v4425_v42 = vmul.f32 %v4423_v36, %v4423_v36 }
0x1ace   :  { %4427 = vadd.xlane.f32.xlu1 %v4425_v42  ;;  %v4426_v12 = vmul.f32 %v4424_v38, %v4424_v38 }
0x1ad0   :  { %4429 = vadd.xlane.f32.xlu0 %v4426_v12 }
0x1b5b   :  { %v4428_v52 = vpop.xlane.xlu1 %4427 }
0x1b5c   :  { %v4431_v54 = vmul.f32 0.0078125, %v4428_v52 }
0x1b5d   :  { %v4430_v57 = vpop.xlane.xlu0 %4429 }
0x1b5e   :  { %v4433_v39 = vadd.f32 1e-05, %v4431_v54  ;;  %v4432_v40 = vmul.f32 0.0078125, %v4430_v57 }
0x1b60   :  { %13336 = vrsqrt.f32 %v4433_v39  ;;  %v4434_v56 = vadd.f32 1e-05, %v4432_v40 }
0x1b62   :  { %13338 = vrsqrt.f32 %v4434_v56 }
0x1b6a   :  { %v13337_v61 = vpop.eup %13336 }
0x1b6b   :  { %v4437_v59 = vmul.f32 %v13337_v61, %v4423_v36 }
0x1b6c   :  { %v13339_v2 = vpop.eup %13338 }
0x1b6d   :  { %v4438_v3 = vmul.f32 %v13339_v2, %v4424_v38  ;;  %v4445_v5 = vmul.f32 %v11574_v63, %v4437_v59 }
0x1b6f   :  { %v4446_v7 = vmul.f32 %v11574_v63, %v4438_v3  ;;  %v15611_v8 = vadd.f32 %v11575_v6, %v4445_v5 }
0x1b71   :  { %v15613_v9 = vadd.f32 %v11575_v6, %v4446_v7 }
0x1b73   :  { %v4607_v10 = vpack.c.bf16 %v15613_v9, %v15611_v8 }
0x1b75   :  { %4785 = vmatmul.mubr.bf16.vlgmr.msra.gmra.mrb[52].mxu0 %v4607_v10  ;;  %12424 = vmatmul.mubr.bf16.vlgmr.msra.gmra.mrb[48].mxu1 %v4607_v10 }
0x1b76   :  { %12429 = vmatprep.mubr.msk.f32.mxu0 %vm14701_vm0, %v17795_v0  ;;  %12469 = vmatprep.mubr.msk.f32.mxu1 %vm14701_vm0, %v17795_v0 }
0x1c48   :  { %v4786_v13 = vpop.f32.mrb[52].mxu0  ;;  %v4829_v15 = vpop.f32.mrb[48].mxu1 }
0x1c49   :  { %v4788_v19 = vpop.f32.mrb[53].mxu0  ;;  %v12425_v20 = vpop.f32.mrb[49].mxu1  ;;  %v15631_v21 = vadd.f32 %v4786_v13, %v4612_v17  ;;  %v15645_v36 = vadd.f32 %v4829_v15, %v4620_v18 }
0x1c4a   :  { %v15625_v22 = vadd.f32 %v4788_v19, %v4616_v11  ;;  %v4790_v24 = vpop.f32.mrb[54].mxu0  ;;  %v4832_v27 = vpop.f32.mrb[50].mxu1 }
0x1c4b   :  { %v15627_v31 = vadd.f32 %v4832_v27, %v4620_v18  ;;  %v4792_v32 = vpop.f32.mrb[55].mxu0  ;;  %v12426_v35 = vpop.f32.mrb[51].mxu1  ;;  %v15642_v23 = vadd.f32 %v4790_v24, %v4612_v17 }
0x1c4c   :  { %12428 = vmatpush3.xpose.msk.msra.mxu0 %vm579_vm1, %v15625_v22  ;;  %v15634_v30 = vadd.f32 %v4792_v32, %v4616_v11 }
0x1c4d   :  { %12432 = vmatprep.subr.mxu0 %v17795_v0 }
0x1c4f   :  { %12430 = vmatmul.mubr.msk.f32.vlgmr.msra.gmra.mrb[42].mxu0 %vm579_vm1, %v15631_v21 }
0x1c50   :  { %12433 = vmatpush3.xpose.msk.msra.mxu0 %vm579_vm1, %v15634_v30  ;;  %12434 = vmatprep.mubr.msk.f32.mxu0 %vm14701_vm0, %v17795_v0 }
0x1c51   :  { %12437 = vmatprep.subr.mxu0 %v17795_v0 }
0x1c53   :  { %12435 = vmatmul.mubr.msk.f32.vlgmr.msra.gmra.mrb[56].mxu0 %vm579_vm1, %v15642_v23 }
0x1c54   :  { %12438 = vmatpush3.msra.mxu0 %v15645_v36  ;;  %12439 = vmatprep.mubr.msk.f32.mxu0 %vm14701_vm0, %v17795_v0 }
0x1c55   :  { %12442 = vmatprep.subr.mxu0 %v17795_v0 }
0x1d22   :  { %v4908_v1 = vpop.f32.mrb[42].mxu0 }
0x1d23   :  { %v12431_v38 = vpop.f32.mrb[43].mxu0  ;;  %v4988_v42 = vsel %vm1161_vm2, %v4908_v1, -inf }
0x1d24   :  { %4989 = vmax.xlane.f32.xlu1 %v4988_v42 }
0x1d26   :  { %v4984_v12 = vpop.f32.mrb[56].mxu0 }
0x1d27   :  { %v12436_v14 = vpop.f32.mrb[57].mxu0  ;;  %v4991_v16 = vsel %vm1161_vm2, %v4984_v12, -inf }
0x1d28   :  { %4992 = vmax.xlane.f32.xlu0 %v4991_v16 }
0x1db1   :  { %v4990_v55 = vpop.xlane.xlu1 %4989 }
0x1db2   :  { %v4994_v58 = vsub.f32 %v4908_v1, %v4990_v55 }
0x1db4   :  { %v4996_v60 = vmul.f32 1.442695, %v4994_v58 }
0x1db5   :  { %v4993_v26 = vpop.xlane.xlu0 %4992 }
0x1db6   :  { %13340 = vpow2.f32 %v4996_v60  ;;  %v4995_v43 = vsub.f32 %v4984_v12, %v4993_v26 }
0x1db8   :  { %v4998_v28 = vmul.f32 1.442695, %v4995_v43 }
0x1dba   :  { %13342 = vpow2.f32 %v4998_v28 }
0x1dc0   :  { %v13341_v33 = vpop.eup %13340 }
0x1dc1   :  { %v5000_v48 = vsel %vm1161_vm2, %v13341_v33, 0.0 }
0x1dc2   :  { %5001 = vadd.xlane.f32.xlu1 %v5000_v48 }
0x1dc4   :  { %v13343_v53 = vpop.eup %13342 }
0x1dc5   :  { %v5003_v49 = vsel %vm1161_vm2, %v13343_v53, 0.0 }
0x1dc6   :  { %5004 = vadd.xlane.f32.xlu0 %v5003_v49 }
0x1dd3   :  { %5158 = vrot.lane.b32.xlu1 %v15625_v22, %s14703_s0 }
0x1dd7   :  { %5236 = vrot.lane.b32.xlu1 %v15634_v30, %s14703_s0 }
0x1ddb   :  { %5234 = vrot.lane.b32.xlu1 %v15642_v23, %s14703_s0 }
0x1ddc   :  { %5156 = vrot.lane.b32.xlu0 %v15631_v21, %s14703_s0 }
0x1e4f   :  { %v5002_v37 = vpop.xlane.xlu1 %5001 }
0x1e50   :  { %13344 = vrcp.f32 %v5002_v37 }
0x1e53   :  { %v5005_v41 = vpop.xlane.xlu0 %5004  ;;  %v5159_v51 = vpop.permute.xlu1 %5158 }
0x1e54   :  { %13346 = vrcp.f32 %v5005_v41 }
0x1e57   :  { %v5237_v54 = vpop.permute.xlu1 %5236  ;;  %v5157_v57 = vpop.permute.xlu0 %5156 }
0x1e5a   :  { %v13345_v45 = vpop.eup %13344 }
0x1e5b   :  { %v5007_v25 = vmul.f32 %v13345_v45, %v13341_v33  ;;  %v5235_v39 = vpop.permute.xlu1 %5234 }
0x1e5d   :  { %12440 = vmatmul.mubr.msk.f32.vlgmr.msra.gmra.mrb[58].mxu0 %vm1161_vm2, %v5007_v25 }
0x1e5e   :  { %v13347_v50 = vpop.eup %13346  ;;  %12443 = vmatpush3.msra.mxu0 %v15627_v31  ;;  %12444 = vmatprep.mubr.msk.f32.mxu0 %vm14701_vm0, %v17795_v0 }
0x1e5f   :  { %v5009_v52 = vmul.f32 %v13347_v50, %v13343_v53  ;;  %12447 = vmatprep.subr.mxu0 %v17795_v0 }
0x1e61   :  { %12445 = vmatmul.mubr.msk.f32.vlgmr.msra.gmra.mrb[60].mxu0 %vm1161_vm2, %v5009_v52 }
0x1e62   :  { %12449 = vmatprep.mubr.msk.f32.mxu0 %vm14701_vm0, %v17795_v0 }
0x1e65   :  { %12448 = vmatpush3.xpose.msk.msra.mxu0 %vm579_vm1, %v5159_v51 }
0x1e66   :  { %12452 = vmatprep.subr.mxu0 %v17795_v0 }
0x1e68   :  { %12450 = vmatmul.mubr.msk.f32.vlgmr.msra.gmra.mrb[62].mxu0 %vm579_vm1, %v5157_v57 }
0x1e69   :  { %12453 = vmatpush3.xpose.msk.msra.mxu0 %vm579_vm1, %v5237_v54  ;;  %12454 = vmatprep.mubr.msk.f32.mxu0 %vm14701_vm0, %v17795_v0 }
0x1e6a   :  { %12457 = vmatprep.subr.mxu0 %v17795_v0 }
0x1e6c   :  { %12455 = vmatmul.mubr.msk.f32.vlgmr.msra.gmra.mrb[64].mxu0 %vm579_vm1, %v5235_v39 }
0x1e6d   :  { %12459 = vmatprep.mubr.msk.f32.mxu0 %vm14701_vm0, %v17795_v0 }
0x1f30   :  { %v15683_v40 = vpop.f32.mrb[58].mxu0 }
0x1f31   :  { %v12441_v56 = vpop.f32.mrb[59].mxu0 }
0x1f34   :  { %v15685_v61 = vpop.f32.mrb[60].mxu0 }
0x1f35   :  { %v12446_v63 = vpop.f32.mrb[61].mxu0 }
0x1f3b   :  { %v5230_v59 = vpop.f32.mrb[62].mxu0 }
0x1f3c   :  { %v12451_v2 = vpop.f32.mrb[63].mxu0  ;;  %v5312_v3 = vsel %vm1161_vm2, %v5230_v59, -inf }
0x1f3d   :  { %5313 = vmax.xlane.f32.xlu1 %v5312_v3 }
0x1f3f   :  { %v5308_v5 = vpop.f32.mrb[64].mxu0 }
0x1f40   :  { %v12456_v6 = vpop.f32.mrb[65].mxu0  ;;  %v5315_v7 = vsel %vm1161_vm2, %v5308_v5, -inf }
0x1f41   :  { %5316 = vmax.xlane.f32.xlu0 %v5315_v7 }
0x1f4e   :  { %5335 = vrot.lane.b32.xlu1 %v15645_v36, %s14703_s0 }
0x1f52   :  { %5490 = vrot.lane.b32.xlu1 %v15625_v22, %s14704_s9 }
0x1f56   :  { %5568 = vrot.lane.b32.xlu1 %v15634_v30, %s14704_s9 }
0x1f5a   :  { %5488 = vrot.lane.b32.xlu1 %v15631_v21, %s14704_s9 }
0x1fca   :  { %v5314_v10 = vpop.xlane.xlu1 %5313 }
0x1fcb   :  { %v5318_v62 = vsub.f32 %v5230_v59, %v5314_v10 }
0x1fcd   :  { %v5320_v11 = vmul.f32 1.442695, %v5318_v62 }
0x1fce   :  { %v5336_v13 = vpop.permute.xlu1 %5335  ;;  %v5317_v24 = vpop.xlane.xlu0 %5316 }
0x1fcf   :  { %13348 = vpow2.f32 %v5320_v11  ;;  %12458 = vmatpush3.msra.mxu0 %v5336_v13  ;;  %v5319_v27 = vsub.f32 %v5308_v5, %v5317_v24 }
0x1fd0   :  { %12462 = vmatprep.subr.mxu0 %v17795_v0 }
0x1fd1   :  { %v5322_v32 = vmul.f32 1.442695, %v5319_v27 }
0x1fd2   :  { %v5491_v15 = vpop.permute.xlu1 %5490 }
0x1fd3   :  { %12468 = vmatpush3.xpose.msk.msra.mxu1 %vm579_vm1, %v5491_v15  ;;  %13350 = vpow2.f32 %v5322_v32 }
0x1fd4   :  { %12477 = vmatprep.subr.mxu1 %v17795_v0 }
0x1fd6   :  { %v5569_v17 = vpop.permute.xlu1 %5568 }
0x1fd9   :  { %v13349_v18 = vpop.eup %13348 }
0x1fda   :  { %v5489_v19 = vpop.permute.xlu1 %5488  ;;  %v5324_v20 = vsel %vm1161_vm2, %v13349_v18, 0.0 }
0x1fdb   :  { %12470 = vmatmul.mubr.msk.f32.vlgmr.msra.gmra.mrb[34].mxu1 %vm579_vm1, %v5489_v19  ;;  %5325 = vadd.xlane.f32.xlu0 %v5324_v20 }
0x1fdc   :  { %12479 = vmatprep.mubr.msk.f32.mxu1 %vm14701_vm0, %v17795_v0 }
0x1fdd   :  { %v13351_v35 = vpop.eup %13350 }
0x1fde   :  { %v5327_v1 = vsel %vm1161_vm2, %v13351_v35, 0.0 }
0x1ff1   :  { %5412 = vrot.lane.b32.xlu0 %v15627_v31, %s14703_s0 }
0x2010   :  { %5328 = vadd.xlane.f32.xlu0 %v5327_v1 }
0x2026   :  { %5566 = vrot.lane.b32.xlu0 %v15642_v23, %s14704_s9 }
0x2068   :  { %v5326_v38 = vpop.xlane.xlu0 %5325 }
0x2069   :  { %13352 = vrcp.f32 %v5326_v38 }
0x206c   :  { %v5413_v14 = vpop.permute.xlu0 %5412 }
0x2073   :  { %v13353_v42 = vpop.eup %13352 }
0x2074   :  { %v5331_v12 = vmul.f32 %v13353_v42, %v13349_v18 }
0x2076   :  { %12460 = vmatmul.mubr.msk.f32.vlgmr.msra.gmra.mrb[66].mxu0 %vm1161_vm2, %v5331_v12 }
0x2077   :  { %12463 = vmatpush3.msra.mxu0 %v5413_v14  ;;  %12464 = vmatprep.mubr.msk.f32.mxu0 %vm14701_vm0, %v17795_v0 }
0x2078   :  { %12472 = vmatprep.subr.mxu0 %v17795_v0 }
0x209d   :  { %v5329_v16 = vpop.xlane.xlu0 %5328 }
0x209e   :  { %13354 = vrcp.f32 %v5329_v16 }
0x20a1   :  { %v5567_v60 = vpop.permute.xlu0 %5566 }
0x20a8   :  { %v13355_v55 = vpop.eup %13354 }
0x20a9   :  { %v5333_v58 = vmul.f32 %v13355_v55, %v13351_v35 }
0x20ab   :  { %12465 = vmatmul.mubr.msk.f32.vlgmr.msra.gmra.mrb[68].mxu0 %vm1161_vm2, %v5333_v58 }
0x20ac   :  { %12473 = vmatpush3.xpose.msk.msra.mxu0 %vm579_vm1, %v5569_v17  ;;  %12474 = vmatprep.mubr.msk.f32.mxu0 %vm14701_vm0, %v17795_v0 }
0x20ad   :  { %12482 = vmatprep.subr.mxu0 %v17795_v0 }
0x20ae   :  { %v5562_v26 = vpop.f32.mrb[34].mxu1 }
0x20af   :  { %v12471_v43 = vpop.f32.mrb[35].mxu1  ;;  %12475 = vmatmul.mubr.msk.f32.vlgmr.msra.gmra.mrb[70].mxu0 %vm579_vm1, %v5567_v60  ;;  %v5644_v28 = vsel %vm1161_vm2, %v5562_v26, -inf }
0x20b0   :  { %5645 = vmax.xlane.f32.xlu1 %v5644_v28  ;;  %12484 = vmatprep.mubr.msk.f32.mxu0 %vm14701_vm0, %v17795_v0 }
0x20c1   :  { %5666 = vrot.lane.b32.xlu1 %v15645_v36, %s14704_s9 }
0x20c5   :  { %5820 = vrot.lane.b32.xlu1 %v15625_v22, %s14705_s28 }
0x20c9   :  { %5898 = vrot.lane.b32.xlu1 %v15634_v30, %s14705_s28 }
0x20cd   :  { %5818 = vrot.lane.b32.xlu1 %v15631_v21, %s14705_s28 }
0x213d   :  { %v5646_v33 = vpop.xlane.xlu1 %5645 }
0x213e   :  { %v5650_v37 = vsub.f32 %v5562_v26, %v5646_v33 }
0x2140   :  { %v5652_v41 = vmul.f32 1.442695, %v5650_v37 }
0x2141   :  { %v5667_v48 = vpop.permute.xlu1 %5666 }
0x2142   :  { %12478 = vmatpush3.msra.mxu1 %v5667_v48  ;;  %13356 = vpow2.f32 %v5652_v41 }
0x2143   :  { %12487 = vmatprep.subr.mxu1 %v17795_v0 }
0x2145   :  { %v5821_v5 = vpop.permute.xlu1 %5820 }
0x2149   :  { %v15731_v53 = vpop.f32.mrb[66].mxu0  ;;  %v5899_v10 = vpop.permute.xlu1 %5898 }
0x214a   :  { %v12461_v49 = vpop.f32.mrb[67].mxu0 }
0x214c   :  { %v13357_v57 = vpop.eup %13356 }
0x214d   :  { %v5656_v39 = vsel %vm1161_vm2, %v13357_v57, 0.0  ;;  %v5819_v13 = vpop.permute.xlu1 %5818 }
0x217e   :  { %v15733_v45 = vpop.f32.mrb[68].mxu0 }
0x217f   :  { %v12810_v25 = vpack.i.bf16 %v15733_v45, %v15731_v53  ;;  %v12466_v50 = vpop.f32.mrb[69].mxu0 }
0x2182   :  { %v5640_v51 = vpop.f32.mrb[70].mxu0 }
0x2183   :  { %v12476_v52 = vpop.f32.mrb[71].mxu0  ;;  %v5647_v54 = vsel %vm1161_vm2, %v5640_v51, -inf }
0x2184   :  { %5648 = vmax.xlane.f32.xlu0 %v5647_v54 }
0x2188   :  { %5657 = vadd.xlane.f32.xlu0 %v5656_v39 }
0x219e   :  { %5742 = vrot.lane.b32.xlu0 %v15627_v31, %s14704_s9 }
0x2211   :  { %v5649_v56 = vpop.xlane.xlu0 %5648 }
0x2212   :  { %v5651_v63 = vsub.f32 %v5640_v51, %v5649_v56 }
0x2214   :  { %v5654_v59 = vmul.f32 1.442695, %v5651_v63 }
0x2215   :  { %v5658_v2 = vpop.xlane.xlu0 %5657 }
0x2216   :  { %13358 = vpow2.f32 %v5654_v59 }
0x2217   :  { %13360 = vrcp.f32 %v5658_v2 }
0x2219   :  { %v5743_v3 = vpop.permute.xlu0 %5742 }
0x221a   :  { %12483 = vmatpush3.msra.mxu0 %v5743_v3 }
0x221b   :  { %12492 = vmatprep.subr.mxu0 %v17795_v0 }
0x2220   :  { %v13359_v6 = vpop.eup %13358 }
0x2221   :  { %v13361_v7 = vpop.eup %13360  ;;  %v5659_v62 = vsel %vm1161_vm2, %v13359_v6, 0.0 }
0x2222   :  { %v5663_v11 = vmul.f32 %v13361_v7, %v13357_v57  ;;  %5660 = vadd.xlane.f32.xlu0 %v5659_v62 }
0x2224   :  { %12480 = vmatmul.mubr.msk.f32.vlgmr.msra.gmra.mrb[52].mxu1 %vm1161_vm2, %v5663_v11 }
0x2225   :  { %12488 = vmatpush3.xpose.msk.msra.mxu1 %vm579_vm1, %v5821_v5  ;;  %12489 = vmatprep.mubr.msk.f32.mxu1 %vm14701_vm0, %v17795_v0 }
0x2226   :  { %12497 = vmatprep.subr.mxu1 %v17795_v0 }
0x2228   :  { %12490 = vmatmul.mubr.msk.f32.vlgmr.msra.gmra.mrb[54].mxu1 %vm579_vm1, %v5819_v13 }
0x2229   :  { %12499 = vmatprep.mubr.msk.f32.mxu1 %vm14701_vm0, %v17795_v0 }
0x2238   :  { %5896 = vrot.lane.b32.xlu0 %v15642_v23, %s14705_s28 }
0x22af   :  { %v5661_v15 = vpop.xlane.xlu0 %5660 }
0x22b0   :  { %13362 = vrcp.f32 %v5661_v15 }
0x22b3   :  { %v5897_v19 = vpop.permute.xlu0 %5896 }
0x22ba   :  { %v13363_v17 = vpop.eup %13362 }
0x22bb   :  { %v5665_v18 = vmul.f32 %v13363_v17, %v13359_v6 }
0x22bd   :  { %12485 = vmatmul.mubr.msk.f32.vlgmr.msra.gmra.mrb[72].mxu0 %vm1161_vm2, %v5665_v18 }
0x22be   :  { %12493 = vmatpush3.xpose.msk.msra.mxu0 %vm579_vm1, %v5899_v10  ;;  %12494 = vmatprep.mubr.msk.f32.mxu0 %vm14701_vm0, %v17795_v0 }
0x22bf   :  { %12502 = vmatprep.subr.mxu0 %v17795_v0 }
0x22c1   :  { %12495 = vmatmul.mubr.msk.f32.vlgmr.msra.gmra.mrb[74].mxu0 %vm579_vm1, %v5897_v19 }
0x22c2   :  { %12504 = vmatprep.mubr.msk.f32.mxu0 %vm14701_vm0, %v17795_v0 }
0x22f7   :  { %v15761_v20 = vpop.f32.mrb[52].mxu1 }
0x22f8   :  { %v12481_v24 = vpop.f32.mrb[53].mxu1 }
0x22fb   :  { %v5892_v27 = vpop.f32.mrb[54].mxu1 }
0x22fc   :  { %v12491_v32 = vpop.f32.mrb[55].mxu1  ;;  %v5974_v35 = vsel %vm1161_vm2, %v5892_v27, -inf }
0x22fd   :  { %5975 = vmax.xlane.f32.xlu1 %v5974_v35 }
0x230e   :  { %5996 = vrot.lane.b32.xlu1 %v15645_v36, %s14705_s28 }
0x2312   :  { %6150 = vrot.lane.b32.xlu1 %v15625_v22, %s14668_s14 }
0x2316   :  { %6228 = vrot.lane.b32.xlu1 %v15634_v30, %s14668_s14 }
0x231a   :  { %6148 = vrot.lane.b32.xlu1 %v15631_v21, %s14668_s14 }
0x238a   :  { %v5976_v1 = vpop.xlane.xlu1 %5975 }
0x238b   :  { %v5980_v38 = vsub.f32 %v5892_v27, %v5976_v1 }
0x238d   :  { %v5982_v42 = vmul.f32 1.442695, %v5980_v38 }
0x238e   :  { %v5997_v12 = vpop.permute.xlu1 %5996 }
0x238f   :  { %13364 = vpow2.f32 %v5982_v42  ;;  %12498 = vmatpush3.msra.mxu1 %v5997_v12 }
0x2390   :  { %v15772_v14 = vpop.f32.mrb[72].mxu0  ;;  %12507 = vmatprep.subr.mxu1 %v17795_v0 }
0x2391   :  { %v12815_v16 = vpack.i.bf16 %v15772_v14, %v15761_v20  ;;  %v12486_v55 = vpop.f32.mrb[73].mxu0 }
0x2392   :  { %v6151_v50 = vpop.permute.xlu1 %6150 }
0x2394   :  { %v5970_v58 = vpop.f32.mrb[74].mxu0 }
0x2395   :  { %v12496_v60 = vpop.f32.mrb[75].mxu0  ;;  %v5977_v26 = vsel %vm1161_vm2, %v5970_v58, -inf }
0x2396   :  { %5978 = vmax.xlane.f32.xlu0 %v5977_v26  ;;  %v6229_v54 = vpop.permute.xlu1 %6228 }
0x2399   :  { %v13365_v43 = vpop.eup %13364 }
0x239a   :  { %v5986_v28 = vsel %vm1161_vm2, %v13365_v43, 0.0  ;;  %v6149_v56 = vpop.permute.xlu1 %6148 }
0x239b   :  { %5987 = vadd.xlane.f32.xlu0 %v5986_v28 }
0x23b1   :  { %6072 = vrot.lane.b32.xlu0 %v15627_v31, %s14705_s28 }
0x2423   :  { %v5979_v33 = vpop.xlane.xlu0 %5978 }
0x2424   :  { %v5981_v48 = vsub.f32 %v5970_v58, %v5979_v33 }
0x2426   :  { %v5984_v49 = vmul.f32 1.442695, %v5981_v48 }
0x2428   :  { %13366 = vpow2.f32 %v5984_v49  ;;  %v5988_v37 = vpop.xlane.xlu0 %5987 }
0x2429   :  { %13368 = vrcp.f32 %v5988_v37 }
0x242c   :  { %v6073_v41 = vpop.permute.xlu0 %6072 }
0x242d   :  { %12503 = vmatpush3.msra.mxu0 %v6073_v41 }
0x242e   :  { %12512 = vmatprep.subr.mxu0 %v17795_v0 }
0x2432   :  { %v13367_v51 = vpop.eup %13366 }
0x2433   :  { %v13369_v52 = vpop.eup %13368  ;;  %v5989_v57 = vsel %vm1161_vm2, %v13367_v51, 0.0 }
0x2434   :  { %v5993_v39 = vmul.f32 %v13369_v52, %v13365_v43  ;;  %5990 = vadd.xlane.f32.xlu0 %v5989_v57 }
0x2436   :  { %12500 = vmatmul.mubr.msk.f32.vlgmr.msra.gmra.mrb[56].mxu1 %vm1161_vm2, %v5993_v39 }
0x2437   :  { %12508 = vmatpush3.xpose.msk.msra.mxu1 %vm579_vm1, %v6151_v50  ;;  %12509 = vmatprep.mubr.msk.f32.mxu1 %vm14701_vm0, %v17795_v0 }
0x2438   :  { %12517 = vmatprep.subr.mxu1 %v17795_v0 }
0x243a   :  { %12510 = vmatmul.mubr.msk.f32.vlgmr.msra.gmra.mrb[58].mxu1 %vm579_vm1, %v6149_v56 }
0x243b   :  { %12519 = vmatprep.mubr.msk.f32.mxu1 %vm14701_vm0, %v17795_v0 }
0x244a   :  { %6226 = vrot.lane.b32.xlu0 %v15642_v23, %s14668_s14 }
0x24c1   :  { %v5991_v63 = vpop.xlane.xlu0 %5990 }
0x24c2   :  { %13370 = vrcp.f32 %v5991_v63 }
0x24c5   :  { %v6227_v3 = vpop.permute.xlu0 %6226 }
0x24cc   :  { %v13371_v59 = vpop.eup %13370 }
0x24cd   :  { %v5995_v2 = vmul.f32 %v13371_v59, %v13367_v51 }
0x24cf   :  { %12505 = vmatmul.mubr.msk.f32.vlgmr.msra.gmra.mrb[76].mxu0 %vm1161_vm2, %v5995_v2 }
0x24d0   :  { %12513 = vmatpush3.xpose.msk.msra.mxu0 %vm579_vm1, %v6229_v54  ;;  %12514 = vmatprep.mubr.msk.f32.mxu0 %vm14701_vm0, %v17795_v0 }
0x24d1   :  { %12522 = vmatprep.subr.mxu0 %v17795_v0 }
0x24d3   :  { %12515 = vmatmul.mubr.msk.f32.vlgmr.msra.gmra.mrb[78].mxu0 %vm579_vm1, %v6227_v3 }
0x24d4   :  { %12524 = vmatprep.mubr.msk.f32.mxu0 %vm14701_vm0, %v17795_v0 }
0x2509   :  { %v15801_v5 = vpop.f32.mrb[56].mxu1 }
0x250a   :  { %v12501_v6 = vpop.f32.mrb[57].mxu1 }
0x250d   :  { %v6222_v7 = vpop.f32.mrb[58].mxu1 }
0x250e   :  { %v12511_v10 = vpop.f32.mrb[59].mxu1  ;;  %v6304_v62 = vsel %vm1161_vm2, %v6222_v7, -inf }
0x250f   :  { %6305 = vmax.xlane.f32.xlu1 %v6304_v62 }
0x2520   :  { %6326 = vrot.lane.b32.xlu1 %v15645_v36, %s14668_s14 }
0x2524   :  { %6480 = vrot.lane.b32.xlu1 %v15625_v22, %s14706_s1 }
0x2528   :  { %6558 = vrot.lane.b32.xlu1 %v15634_v30, %s14706_s1 }
0x252c   :  { %6478 = vrot.lane.b32.xlu1 %v15631_v21, %s14706_s1 }
0x259c   :  { %v6306_v11 = vpop.xlane.xlu1 %6305 }
0x259d   :  { %v6310_v13 = vsub.f32 %v6222_v7, %v6306_v11 }
0x259f   :  { %v6312_v15 = vmul.f32 1.442695, %v6310_v13 }
0x25a0   :  { %v6327_v17 = vpop.permute.xlu1 %6326 }
0x25a1   :  { %13372 = vpow2.f32 %v6312_v15  ;;  %12518 = vmatpush3.msra.mxu1 %v6327_v17 }
0x25a2   :  { %v15812_v18 = vpop.f32.mrb[76].mxu0  ;;  %12527 = vmatprep.subr.mxu1 %v17795_v0 }
0x25a3   :  { %v12820_v19 = vpack.i.bf16 %v15812_v18, %v15801_v5  ;;  %v12506_v24 = vpop.f32.mrb[77].mxu0 }
0x25a4   :  { %v6481_v26 = vpop.permute.xlu1 %6480 }
0x25a6   :  { %v6300_v27 = vpop.f32.mrb[78].mxu0 }
0x25a7   :  { %v12516_v32 = vpop.f32.mrb[79].mxu0  ;;  %v6307_v35 = vsel %vm1161_vm2, %v6300_v27, -inf }
0x25a8   :  { %6308 = vmax.xlane.f32.xlu0 %v6307_v35  ;;  %v6559_v33 = vpop.permute.xlu1 %6558 }
0x25ab   :  { %v13373_v1 = vpop.eup %13372 }
0x25ac   :  { %v6316_v38 = vsel %vm1161_vm2, %v13373_v1, 0.0  ;;  %v6479_v37 = vpop.permute.xlu1 %6478 }
0x25ad   :  { %6317 = vadd.xlane.f32.xlu0 %v6316_v38 }
0x25c3   :  { %6402 = vrot.lane.b32.xlu0 %v15627_v31, %s14668_s14 }
0x2635   :  { %v6309_v42 = vpop.xlane.xlu0 %6308 }
0x2636   :  { %v6311_v12 = vsub.f32 %v6300_v27, %v6309_v42 }
0x2638   :  { %v6314_v55 = vmul.f32 1.442695, %v6311_v12 }
0x263a   :  { %13374 = vpow2.f32 %v6314_v55  ;;  %v6318_v58 = vpop.xlane.xlu0 %6317 }
0x263b   :  { %13376 = vrcp.f32 %v6318_v58 }
0x263e   :  { %v6403_v60 = vpop.permute.xlu0 %6402 }
0x263f   :  { %12523 = vmatpush3.msra.mxu0 %v6403_v60 }
0x2640   :  { %12532 = vmatprep.subr.mxu0 %v17795_v0 }
0x2644   :  { %v13375_v43 = vpop.eup %13374 }
0x2645   :  { %v13377_v28 = vpop.eup %13376  ;;  %v6319_v48 = vsel %vm1161_vm2, %v13375_v43, 0.0 }
0x2646   :  { %v6323_v49 = vmul.f32 %v13377_v28, %v13373_v1  ;;  %6320 = vadd.xlane.f32.xlu0 %v6319_v48 }
0x2648   :  { %12520 = vmatmul.mubr.msk.f32.vlgmr.msra.gmra.mrb[60].mxu1 %vm1161_vm2, %v6323_v49 }
0x2649   :  { %12528 = vmatpush3.xpose.msk.msra.mxu1 %vm579_vm1, %v6481_v26  ;;  %12529 = vmatprep.mubr.msk.f32.mxu1 %vm14701_vm0, %v17795_v0 }
0x264a   :  { %12537 = vmatprep.subr.mxu1 %v17795_v0 }
0x264c   :  { %12530 = vmatmul.mubr.msk.f32.vlgmr.msra.gmra.mrb[62].mxu1 %vm579_vm1, %v6479_v37 }
0x264d   :  { %12539 = vmatprep.mubr.msk.f32.mxu1 %vm14701_vm0, %v17795_v0 }
0x265c   :  { %6556 = vrot.lane.b32.xlu0 %v15642_v23, %s14706_s1 }
0x26d3   :  { %v6321_v41 = vpop.xlane.xlu0 %6320 }
0x26d4   :  { %13378 = vrcp.f32 %v6321_v41 }
0x26d7   :  { %v6557_v52 = vpop.permute.xlu0 %6556 }
0x26de   :  { %v13379_v50 = vpop.eup %13378 }
0x26df   :  { %v6325_v51 = vmul.f32 %v13379_v50, %v13375_v43 }
0x26e1   :  { %12525 = vmatmul.mubr.msk.f32.vlgmr.msra.gmra.mrb[80].mxu0 %vm1161_vm2, %v6325_v51 }
0x26e2   :  { %12533 = vmatpush3.xpose.msk.msra.mxu0 %vm579_vm1, %v6559_v33  ;;  %12534 = vmatprep.mubr.msk.f32.mxu0 %vm14701_vm0, %v17795_v0 }
0x26e3   :  { %12542 = vmatprep.subr.mxu0 %v17795_v0 }
0x26e5   :  { %12535 = vmatmul.mubr.msk.f32.vlgmr.msra.gmra.mrb[82].mxu0 %vm579_vm1, %v6557_v52 }
0x26e6   :  { %12544 = vmatprep.mubr.msk.f32.mxu0 %vm14701_vm0, %v17795_v0 }
0x271b   :  { %v15841_v54 = vpop.f32.mrb[60].mxu1 }
0x271c   :  { %v12521_v57 = vpop.f32.mrb[61].mxu1 }
0x271f   :  { %v6552_v39 = vpop.f32.mrb[62].mxu1 }
0x2720   :  { %v12531_v56 = vpop.f32.mrb[63].mxu1  ;;  %v6634_v63 = vsel %vm1161_vm2, %v6552_v39, -inf }
0x2721   :  { %6635 = vmax.xlane.f32.xlu1 %v6634_v63 }
0x2732   :  { %6656 = vrot.lane.b32.xlu1 %v15645_v36, %s14706_s1 }
0x2736   :  { %6810 = vrot.lane.b32.xlu1 %v15625_v22, %s14707_s29 }
0x273a   :  { %6888 = vrot.lane.b32.xlu1 %v15634_v30, %s14707_s29 }
0x273e   :  { %6808 = vrot.lane.b32.xlu1 %v15631_v21, %s14707_s29 }
0x27ae   :  { %v6636_v59 = vpop.xlane.xlu1 %6635 }
0x27af   :  { %v6640_v2 = vsub.f32 %v6552_v39, %v6636_v59 }
0x27b1   :  { %v6642_v3 = vmul.f32 1.442695, %v6640_v2 }
0x27b2   :  { %v6657_v6 = vpop.permute.xlu1 %6656 }
0x27b3   :  { %13380 = vpow2.f32 %v6642_v3  ;;  %12538 = vmatpush3.msra.mxu1 %v6657_v6 }
0x27b4   :  { %v15852_v7 = vpop.f32.mrb[80].mxu0  ;;  %12547 = vmatprep.subr.mxu1 %v17795_v0 }
0x27b5   :  { %v12825_v10 = vpack.i.bf16 %v15852_v7, %v15841_v54  ;;  %v12526_v62 = vpop.f32.mrb[81].mxu0  ;;  %v12998_v54 = vld [vmem:[%s18236_s10] sm:$0xff]   ;;  %v12999_v7 = vld [vmem:[%s18236_s10 + $0x8] sm:$0xff]  }
0x27b6   :  { %v6811_v42 = vpop.permute.xlu1 %6810 }
0x27b8   :  { %v6630_v11 = vpop.f32.mrb[82].mxu0 }
0x27b9   :  { %v12536_v13 = vpop.f32.mrb[83].mxu0  ;;  %v6637_v15 = vsel %vm1161_vm2, %v6630_v11, -inf }
0x27ba   :  { %6638 = vmax.xlane.f32.xlu0 %v6637_v15  ;;  %v6889_v58 = vpop.permute.xlu1 %6888 }
0x27bd   :  { %v13381_v17 = vpop.eup %13380 }
0x27be   :  { %v6646_v24 = vsel %vm1161_vm2, %v13381_v17, 0.0  ;;  %v6809_v43 = vpop.permute.xlu1 %6808 }
0x27bf   :  { %6647 = vadd.xlane.f32.xlu0 %v6646_v24 }
0x27d5   :  { %6732 = vrot.lane.b32.xlu0 %v15627_v31, %s14706_s1 }
0x2847   :  { %v6639_v27 = vpop.xlane.xlu0 %6638 }
0x2848   :  { %v6641_v32 = vsub.f32 %v6630_v11, %v6639_v27 }
0x284a   :  { %v6644_v35 = vmul.f32 1.442695, %v6641_v32 }
0x284c   :  { %13382 = vpow2.f32 %v6644_v35  ;;  %v6648_v1 = vpop.xlane.xlu0 %6647 }
0x284d   :  { %13384 = vrcp.f32 %v6648_v1 }
0x2850   :  { %v6733_v38 = vpop.permute.xlu0 %6732 }
0x2851   :  { %12543 = vmatpush3.msra.mxu0 %v6733_v38 }
0x2852   :  { %12552 = vmatprep.subr.mxu0 %v17795_v0 }
0x2856   :  { %v13383_v12 = vpop.eup %13382 }
0x2857   :  { %v13385_v55 = vpop.eup %13384  ;;  %v6649_v60 = vsel %vm1161_vm2, %v13383_v12, 0.0 }
0x2858   :  { %v6653_v26 = vmul.f32 %v13385_v55, %v13381_v17  ;;  %6650 = vadd.xlane.f32.xlu0 %v6649_v60 }
0x285a   :  { %12540 = vmatmul.mubr.msk.f32.vlgmr.msra.gmra.mrb[64].mxu1 %vm1161_vm2, %v6653_v26 }
0x285b   :  { %12548 = vmatpush3.xpose.msk.msra.mxu1 %vm579_vm1, %v6811_v42  ;;  %12549 = vmatprep.mubr.msk.f32.mxu1 %vm14701_vm0, %v17795_v0 }
0x285c   :  { %12557 = vmatprep.subr.mxu1 %v17795_v0 }
0x285e   :  { %12550 = vmatmul.mubr.msk.f32.vlgmr.msra.gmra.mrb[66].mxu1 %vm579_vm1, %v6809_v43 }
0x285f   :  { %12559 = vmatprep.mubr.msk.f32.mxu1 %vm14701_vm0, %v17795_v0 }
0x286e   :  { %6886 = vrot.lane.b32.xlu0 %v15642_v23, %s14707_s29 }
0x28e5   :  { %v6651_v28 = vpop.xlane.xlu0 %6650 }
0x28e6   :  { %13386 = vrcp.f32 %v6651_v28 }
0x28e9   :  { %v6887_v49 = vpop.permute.xlu0 %6886 }
0x28f0   :  { %v13387_v33 = vpop.eup %13386 }
0x28f1   :  { %v6655_v48 = vmul.f32 %v13387_v33, %v13383_v12 }
0x28f3   :  { %12545 = vmatmul.mubr.msk.f32.vlgmr.msra.gmra.mrb[84].mxu0 %vm1161_vm2, %v6655_v48 }
0x28f4   :  { %12553 = vmatpush3.xpose.msk.msra.mxu0 %vm579_vm1, %v6889_v58  ;;  %12554 = vmatprep.mubr.msk.f32.mxu0 %vm14701_vm0, %v17795_v0 }
0x28f5   :  { %12562 = vmatprep.subr.mxu0 %v17795_v0 }
0x28f7   :  { %12555 = vmatmul.mubr.msk.f32.vlgmr.msra.gmra.mrb[86].mxu0 %vm579_vm1, %v6887_v49 }
0x28f8   :  { %12564 = vmatprep.mubr.msk.f32.mxu0 %vm14701_vm0, %v17795_v0 }
0x292d   :  { %v15881_v37 = vpop.f32.mrb[64].mxu1 }
0x292e   :  { %v12541_v41 = vpop.f32.mrb[65].mxu1 }
0x2931   :  { %v6882_v50 = vpop.f32.mrb[66].mxu1 }
0x2932   :  { %v12551_v51 = vpop.f32.mrb[67].mxu1  ;;  %v6964_v52 = vsel %vm1161_vm2, %v6882_v50, -inf }
0x2933   :  { %6965 = vmax.xlane.f32.xlu1 %v6964_v52 }
0x2944   :  { %6986 = vrot.lane.b32.xlu1 %v15645_v36, %s14707_s29 }
0x2948   :  { %7140 = vrot.lane.b32.xlu1 %v15625_v22, %s14681_s17 }
0x294c   :  { %7218 = vrot.lane.b32.xlu1 %v15634_v30, %s14681_s17 }
0x2950   :  { %7138 = vrot.lane.b32.xlu1 %v15631_v21, %s14681_s17 }
0x29c0   :  { %v6966_v57 = vpop.xlane.xlu1 %6965 }
0x29c1   :  { %v6970_v39 = vsub.f32 %v6882_v50, %v6966_v57 }
0x29c3   :  { %v6972_v56 = vmul.f32 1.442695, %v6970_v39 }
0x29c4   :  { %v6987_v63 = vpop.permute.xlu1 %6986 }
0x29c5   :  { %13388 = vpow2.f32 %v6972_v56  ;;  %12558 = vmatpush3.msra.mxu1 %v6987_v63 }
0x29c6   :  { %v6804_v59 = vpop.f32.mrb[84].mxu0  ;;  %12567 = vmatprep.subr.mxu1 %v17795_v0 }
0x29c7   :  { %v12830_v2 = vpack.i.bf16 %v6804_v59, %v15881_v37  ;;  %v12546_v3 = vpop.f32.mrb[85].mxu0 }
0x29c8   :  { %v7141_v27 = vpop.permute.xlu1 %7140 }
0x29ca   :  { %v6960_v6 = vpop.f32.mrb[86].mxu0 }
0x29cb   :  { %v12556_v22 = vpop.f32.mrb[87].mxu0  ;;  %v6967_v62 = vsel %vm1161_vm2, %v6960_v6, -inf }
0x29cc   :  { %6968 = vmax.xlane.f32.xlu0 %v6967_v62  ;;  %v7219_v1 = vpop.permute.xlu1 %7218  ;;  %v13001_v62 = vld [vmem:[%s18236_s10 + $0x18] sm:$0xff]  }
0x29cf   :  { %v13389_v30 = vpop.eup %13388 }
0x29d0   :  { %v6976_v21 = vsel %vm1161_vm2, %v13389_v30, 0.0  ;;  %v7139_v12 = vpop.permute.xlu1 %7138 }
0x29d1   :  { %6977 = vadd.xlane.f32.xlu0 %v6976_v21  ;;  %v13003_v21 = vld [vmem:[%s18236_s10 + $0x28] sm:$0xff]  }
0x29e7   :  { %7062 = vrot.lane.b32.xlu0 %v15627_v31, %s14707_s29 }
0x2a59   :  { %v6969_v11 = vpop.xlane.xlu0 %6968 }
0x2a5a   :  { %v6971_v13 = vsub.f32 %v6960_v6, %v6969_v11  ;;  %v13004_v11 = vld [vmem:[%s18236_s10 + $0x30] sm:$0xff]  }
0x2a5c   :  { %v6974_v15 = vmul.f32 1.442695, %v6971_v13  ;;  %v13005_v13 = vld [vmem:[%s18236_s10 + $0x38] sm:$0xff]  }
0x2a5e   :  { %13390 = vpow2.f32 %v6974_v15  ;;  %v6978_v17 = vpop.xlane.xlu0 %6977 }
0x2a5f   :  { %13392 = vrcp.f32 %v6978_v17 }
0x2a62   :  { %v7063_v24 = vpop.permute.xlu0 %7062 }
0x2a63   :  { %12563 = vmatpush3.msra.mxu0 %v7063_v24 }
0x2a64   :  { %12572 = vmatprep.subr.mxu0 %v17795_v0 }
0x2a68   :  { %v13391_v32 = vpop.eup %13390 }
0x2a69   :  { %v13393_v35 = vpop.eup %13392  ;;  %v6979_v38 = vsel %vm1161_vm2, %v13391_v32, 0.0 }
0x2a6a   :  { %v6983_v42 = vmul.f32 %v13393_v35, %v13389_v30  ;;  %6980 = vadd.xlane.f32.xlu0 %v6979_v38  ;;  %v13002_v30 = vld [vmem:[%s18236_s10 + $0x20] sm:$0xff]  }
0x2a6c   :  { %12560 = vmatmul.mubr.msk.f32.vlgmr.msra.gmra.mrb[68].mxu1 %vm1161_vm2, %v6983_v42 }
0x2a6d   :  { %12568 = vmatpush3.xpose.msk.msra.mxu1 %vm579_vm1, %v7141_v27  ;;  %12569 = vmatprep.mubr.msk.f32.mxu1 %vm14701_vm0, %v17795_v0 }
0x2a6e   :  { %12577 = vmatprep.subr.mxu1 %v17795_v0 }
0x2a70   :  { %12570 = vmatmul.mubr.msk.f32.vlgmr.msra.gmra.mrb[70].mxu1 %vm579_vm1, %v7139_v12 }
0x2a71   :  { %12579 = vmatprep.mubr.msk.f32.mxu1 %vm14701_vm0, %v17795_v0 }
0x2a80   :  { %7216 = vrot.lane.b32.xlu0 %v15642_v23, %s14681_s17 }
0x2af7   :  { %v6981_v55 = vpop.xlane.xlu0 %6980 }
0x2af8   :  { %13394 = vrcp.f32 %v6981_v55 }
0x2afb   :  { %v7217_v26 = vpop.permute.xlu0 %7216 }
0x2b02   :  { %v13395_v58 = vpop.eup %13394 }
0x2b03   :  { %v6985_v60 = vmul.f32 %v13395_v58, %v13391_v32 }
0x2b05   :  { %12565 = vmatmul.mubr.msk.f32.vlgmr.msra.gmra.mrb[88].mxu0 %vm1161_vm2, %v6985_v60 }
0x2b06   :  { %12573 = vmatpush3.xpose.msk.msra.mxu0 %vm579_vm1, %v7219_v1  ;;  %12574 = vmatprep.mubr.msk.f32.mxu0 %vm14701_vm0, %v17795_v0 }
0x2b07   :  { %12582 = vmatprep.subr.mxu0 %v17795_v0 }
0x2b09   :  { %12575 = vmatmul.mubr.msk.f32.vlgmr.msra.gmra.mrb[90].mxu0 %vm579_vm1, %v7217_v26 }
0x2b0a   :  { %12584 = vmatprep.mubr.msk.f32.mxu0 %vm14701_vm0, %v17795_v0 }
0x2b3f   :  { %v7058_v23 = vpop.f32.mrb[68].mxu1 }
0x2b40   :  { %v12561_v43 = vpop.f32.mrb[69].mxu1 }
0x2b43   :  { %v7212_v28 = vpop.f32.mrb[70].mxu1 }
0x2b44   :  { %v12571_v33 = vpop.f32.mrb[71].mxu1  ;;  %v7294_v48 = vsel %vm1161_vm2, %v7212_v28, -inf }
0x2b45   :  { %7295 = vmax.xlane.f32.xlu1 %v7294_v48 }
0x2b56   :  { %7316 = vrot.lane.b32.xlu1 %v15645_v36, %s14681_s17 }
0x2b5a   :  { %12811 = vrot.lane.b32.xlu1 %v12810_v25, %s14681_s17 }
0x2b5e   :  { %12816 = vrot.lane.b32.xlu1 %v12815_v16, %s14707_s29 }
0x2b62   :  { %12821 = vrot.lane.b32.xlu1 %v12820_v19, %s14706_s1 }
0x2b66   :  { %12831 = vrot.lane.b32.xlu1 %v12830_v2, %s14705_s28 }
0x2bd2   :  { %v7296_v49 = vpop.xlane.xlu1 %7295 }
0x2bd3   :  { %v7300_v37 = vsub.f32 %v7212_v28, %v7296_v49 }
0x2bd5   :  { %v7302_v36 = vmul.f32 1.442695, %v7300_v37 }
0x2bd6   :  { %v7317_v41 = vpop.permute.xlu1 %7316 }
0x2bd7   :  { %13396 = vpow2.f32 %v7302_v36  ;;  %12578 = vmatpush3.msra.mxu1 %v7317_v41 }
0x2bd8   :  { %v7134_v53 = vpop.f32.mrb[88].mxu0  ;;  %12587 = vmatprep.subr.bf16.mxu1 %v17795_v0 }
0x2bd9   :  { %v12835_v45 = vpack.i.bf16 %v7134_v53, %v7058_v23  ;;  %v12566_v25 = vpop.f32.mrb[89].mxu0 }
0x2bda   :  { %v12812_v27 = vpop.permute.xlu1 %12811 }
0x2bdb   :  { %v12814_v38 = vunpack.i.h.bf16 %v12812_v27  ;;  %v12813_v42 = vunpack.i.l.bf16 %v12812_v27 }
0x2bdc   :  { %v7290_v20 = vpop.f32.mrb[90].mxu0 }
0x2bdd   :  { %v12576_v14 = vpop.f32.mrb[91].mxu0  ;;  %v7297_v16 = vsel %vm1161_vm2, %v7290_v20, -inf  ;;  %v7525_v43 = vsel %vm579_vm1, %v15685_v61, %v12814_v38  ;;  %v7524_v28 = vsel %vm579_vm1, %v15683_v40, %v12813_v42  ;;  %v13020_v38 = vld [vmem:[#allocation28 + $0x44] ss:$16 sps:$4 sm:$0xff]   ;;  %v13023_v42 = vld [vmem:[#allocation28 + $0x4c] ss:$16 sps:$4 sm:$0xff]  }
0x2bde   :  { %7298 = vmax.xlane.f32.xlu0 %v7297_v16  ;;  %v12817_v32 = vpop.permute.xlu1 %12816 }
0x2bdf   :  { %v12819_v12 = vunpack.i.h.bf16 %v12817_v32  ;;  %v12818_v55 = vunpack.i.l.bf16 %v12817_v32 }
0x2be1   :  { %v13397_v5 = vpop.eup %13396  ;;  %v7526_v48 = vsel %vm3700_vm3, %v7524_v28, %v12818_v55  ;;  %v7527_v49 = vsel %vm3700_vm3, %v7525_v43, %v12819_v12  ;;  %v13018_v12 = vld [vmem:[#allocation28 + $0x40] ss:$16 sps:$4 sm:$0xff]   ;;  %v13021_v55 = vld [vmem:[#allocation28 + $0x48] ss:$16 sps:$4 sm:$0xff]   ;;  %v13032_v43 = vld [vmem:[#allocation28 + $0x84] ss:$16 sps:$4 sm:$0xff]  }
0x2be2   :  { %v7306_v18 = vsel %vm1161_vm2, %v13397_v5, 0.0  ;;  %v12822_v1 = vpop.permute.xlu1 %12821  ;;  %v13035_v28 = vld [vmem:[#allocation28 + $0x8c] ss:$16 sps:$4 sm:$0xff]  }
0x2be3   :  { %7307 = vadd.xlane.f32.xlu0 %v7306_v18  ;;  %v12824_v58 = vunpack.i.h.bf16 %v12822_v1  ;;  %v12823_v60 = vunpack.i.l.bf16 %v12822_v1 }
0x2be5   :  { %v7528_v36 = vsel %vm3703_vm4, %v7526_v48, %v12823_v60  ;;  %v7529_v41 = vsel %vm3703_vm4, %v7527_v49, %v12824_v58  ;;  %v13026_v58 = vld [vmem:[#allocation28 + $0x64] ss:$16 sps:$4 sm:$0xff]   ;;  %v13029_v60 = vld [vmem:[#allocation28 + $0x6c] ss:$16 sps:$4 sm:$0xff]   ;;  %v13033_v48 = vld [vmem:[#allocation28 + $0x88] ss:$16 sps:$4 sm:$0xff]  }
0x2be6   :  { %v12832_v37 = vpop.permute.xlu1 %12831  ;;  %v13038_v49 = vld [vmem:[#allocation28 + $0xa4] ss:$16 sps:$4 sm:$0xff]  }
0x2be7   :  { %v12833_v14 = vunpack.i.l.bf16 %v12832_v37 }
0x2c6b   :  { %v7299_v19 = vpop.xlane.xlu0 %7298 }
0x2c6c   :  { %v7301_v50 = vsub.f32 %v7290_v20, %v7299_v19  ;;  %v12834_v20 = vunpack.i.h.bf16 %v12832_v37  ;;  %v13041_v37 = vld [vmem:[#allocation28 + $0xac] ss:$16 sps:$4 sm:$0xff]  }
0x2c6e   :  { %v7304_v51 = vmul.f32 1.442695, %v7301_v50 }
0x2c70   :  { %13398 = vpow2.f32 %v7304_v51  ;;  %v7308_v52 = vpop.xlane.xlu0 %7307 }
0x2c71   :  { %13400 = vrcp.f32 %v7308_v52 }
0x2c7a   :  { %v13399_v57 = vpop.eup %13398 }
0x2c7b   :  { %v13401_v39 = vpop.eup %13400  ;;  %v7309_v56 = vsel %vm1161_vm2, %v13399_v57, 0.0 }
0x2c7c   :  { %v7313_v63 = vmul.f32 %v13401_v39, %v13397_v5  ;;  %7310 = vadd.xlane.f32.xlu0 %v7309_v56 }
0x2c7e   :  { %12580 = vmatmul.mubr.msk.f32.vlgmr.msra.gmra.mrb[72].mxu1 %vm1161_vm2, %v7313_v63 }
0x2c7f   :  { %12603 = vmatprep.mubr.msk.bf16.mxu1 %vm14701_vm0, %v17795_v0  ;;  %12588 = vmatpush3.bf16.msra.mxu1 %v12998_v54 }
0x2c80   :  { %12589 = vmatprep.subr.bf16.mxu1 %v17795_v0 }
0x2c83   :  { %12590 = vmatpush3.bf16.msra.mxu1 %v12999_v7  ;;  %v13006_v7 = vld [vmem:[#allocation28] ss:$16 sps:$4 sm:$0xff]  }
0x2c84   :  { %12591 = vmatprep.subr.bf16.mxu1 %v17795_v0 }
0x2c92   :  { %7392 = vrot.lane.b32.xlu0 %v15627_v31, %s14681_s17 }
0x2c96   :  { %12826 = vrot.lane.b32.xlu0 %v12825_v10, %s14668_s14  ;;  %v13000_v10 = vld [vmem:[%s18236_s10 + $0x10] sm:$0xff]   ;;  %s18237_s14 = sld [smem:[#allocation83_spill]] }
0x2c97   :  { %12592 = vmatpush3.bf16.msra.mxu1 %v13000_v10  ;;  %v13008_v10 = vld [vmem:[#allocation28 + $0x4] ss:$16 sps:$4 sm:$0xff]  }
0x2c98   :  { %12593 = vmatprep.subr.bf16.mxu1 %v17795_v0 }
0x2c9a   :  { %12836 = vrot.lane.b32.xlu0 %v12835_v45, %s14704_s9 }
0x2c9b   :  { %12594 = vmatpush3.bf16.msra.mxu1 %v13001_v62  ;;  %v13009_v62 = vld [vmem:[#allocation28 + $0x8] ss:$16 sps:$4 sm:$0xff]  }
0x2c9c   :  { %12595 = vmatprep.subr.bf16.mxu1 %v17795_v0  ;;  %v11648_v56 = vld [vmem:[%s18237_s14] ss:$0 sm:$0xff] }
0x2c9f   :  { %12596 = vmatpush3.bf16.msra.mxu1 %v13002_v30  ;;  %v13011_v30 = vld [vmem:[#allocation28 + $0xc] ss:$16 sps:$4 sm:$0xff]  }
0x2ca0   :  { %12597 = vmatprep.subr.bf16.mxu1 %v17795_v0 }
0x2ca3   :  { %12598 = vmatpush3.bf16.msra.mxu1 %v13003_v21  ;;  %v13014_v21 = vld [vmem:[#allocation28 + $0x24] ss:$16 sps:$4 sm:$0xff]  }
0x2ca4   :  { %12599 = vmatprep.subr.bf16.mxu1 %v17795_v0 }
0x2ca7   :  { %12600 = vmatpush3.bf16.msra.mxu1 %v13004_v11  ;;  %v13017_v11 = vld [vmem:[#allocation28 + $0x2c] ss:$16 sps:$4 sm:$0xff]  }
0x2ca8   :  { %12601 = vmatprep.subr.bf16.mxu1 %v17795_v0  ;;  %v16184_v0 = vld [vmem:[#allocation41 + $0xc4] ss:$16 sps:$4 sm:$0xff]  }
0x2ca9   :  { %18262 = vst [vmem:[#allocation122_spill] sm:$0xff] %v16184_v0 }
0x2cab   :  { %12602 = vmatpush3.bf16.msra.mxu1 %v13005_v13  ;;  %v13012_v13 = vld [vmem:[#allocation28 + $0x20] ss:$16 sps:$4 sm:$0xff]  }
0x2cac   :  { %7899 = vmatprep.subr.bf16.mxu1 %v13011_v30 }
0x2d09   :  { %v7311_v59 = vpop.xlane.xlu0 %7310 }
0x2d0a   :  { %13402 = vrcp.f32 %v7311_v59 }
0x2d0d   :  { %v7393_v2 = vpop.permute.xlu0 %7392 }
0x2d0e   :  { %12583 = vmatpush3.msra.mxu0 %v7393_v2 }
0x2d0f   :  { %7856 = vmatprep.subr.bf16.mxu0 %v13008_v10  ;;  %v13056_v10 = vld [vmem:[#allocation31 + $0x80] sm:$0xff]  }
0x2d11   :  { %v12827_v35 = vpop.permute.xlu0 %12826 }
0x2d12   :  { %v12829_v26 = vunpack.i.h.bf16 %v12827_v35  ;;  %v12828_v23 = vunpack.i.l.bf16 %v12827_v35 }
0x2d14   :  { %v13403_v3 = vpop.eup %13402  ;;  %v7531_v53 = vsel %vm3706_vm5, %v7529_v41, %v12829_v26  ;;  %v7530_v45 = vsel %vm3706_vm5, %v7528_v36, %v12828_v23  ;;  %v13024_v26 = vld [vmem:[#allocation28 + $0x60] ss:$16 sps:$4 sm:$0xff]   ;;  %v13027_v23 = vld [vmem:[#allocation28 + $0x68] ss:$16 sps:$4 sm:$0xff]  }
0x2d15   :  { %v7315_v6 = vmul.f32 %v13403_v3, %v13399_v57  ;;  %v12837_v33 = vpop.permute.xlu0 %12836  ;;  %v7532_v16 = vsel %vm3709_vm6, %v7530_v45, %v12833_v14  ;;  %v7533_v5 = vsel %vm3709_vm6, %v7531_v53, %v12834_v20  ;;  %v13036_v36 = vld [vmem:[#allocation28 + $0xa0] ss:$16 sps:$4 sm:$0xff]   ;;  %v13039_v41 = vld [vmem:[#allocation28 + $0xa8] ss:$16 sps:$4 sm:$0xff]   ;;  %v13044_v45 = vld [vmem:[#allocation28 + $0xc4] ss:$16 sps:$4 sm:$0xff]  }
0x2d16   :  { %v12839_v25 = vunpack.i.h.bf16 %v12837_v33  ;;  %v12838_v61 = vunpack.i.l.bf16 %v12837_v33  ;;  %v13030_v33 = vld [vmem:[#allocation28 + $0x80] ss:$16 sps:$4 sm:$0xff]   ;;  %v13050_v20 = vld [vmem:[#allocation28 + $0xe4] ss:$16 sps:$4 sm:$0xff]   ;;  %v13053_v14 = vld [vmem:[#allocation28 + $0xec] ss:$16 sps:$4 sm:$0xff]  }
0x2d17   :  { %12585 = vmatmul.mubr.msk.f32.vlgmr.msra.gmra.mrb[92].mxu0 %vm1161_vm2, %v7315_v6  ;;  %v13042_v53 = vld [vmem:[#allocation28 + $0xc0] ss:$16 sps:$4 sm:$0xff]  }
0x2d18   :  { %7888 = vmatprep.mubr.bf16.mxu0 %v17797_v29  ;;  %v7534_v50 = vsel %vm3712_vm7, %v7532_v16, %v12838_v61  ;;  %v7535_v51 = vsel %vm3712_vm7, %v7533_v5, %v12839_v25  ;;  %7857 = vmatpush1.bf16.msra.mxu0 %v13006_v7  ;;  %v13045_v25 = vld [vmem:[#allocation28 + $0xc8] ss:$16 sps:$4 sm:$0xff]   ;;  %v13047_v61 = vld [vmem:[#allocation28 + $0xcc] ss:$16 sps:$4 sm:$0xff]  }
0x2d19   :  { %7858 = vmatprep.subr.bf16.mxu0 %v13014_v21  ;;  %v13051_v16 = vld [vmem:[#allocation28 + $0xe8] ss:$16 sps:$4 sm:$0xff]   ;;  %v13058_v21 = vld [vmem:[#allocation31 + $0xc8] sm:$0xff]  }
0x2d1a   :  { %v13054_v5 = vld [vmem:[#allocation31 + $0xc0] sm:$0xff]  }
0x2d1c   :  { %7859 = vmatpush1.bf16.msra.mxu0 %v13012_v13  ;;  %v13060_v13 = vld [vmem:[#allocation31 + $0x88] sm:$0xff]  }
0x2d1d   :  { %7860 = vmatprep.subr.bf16.mxu0 %v13020_v38  ;;  %v13070_v38 = vld [vmem:[#allocation31 + $0xe0] sm:$0xff]  }
0x2d20   :  { %7861 = vmatpush1.bf16.msra.mxu0 %v13018_v12  ;;  %v13072_v12 = vld [vmem:[#allocation31 + $0xa0] sm:$0xff]  }
0x2d21   :  { %7862 = vmatprep.subr.bf16.mxu0 %v13026_v58  ;;  %v13074_v58 = vld [vmem:[#allocation31 + $0xe8] sm:$0xff]  }
0x2d24   :  { %7863 = vmatpush1.bf16.msra.mxu0 %v13024_v26  ;;  %v13076_v26 = vld [vmem:[#allocation31 + $0xa8] sm:$0xff]  }
0x2d25   :  { %7864 = vmatprep.subr.bf16.mxu0 %v13032_v43  ;;  %v13078_v43 = vld [vmem:[#allocation31 + $0xf0] sm:$0xff]  }
0x2d28   :  { %7865 = vmatpush1.bf16.msra.mxu0 %v13030_v33  ;;  %v13080_v33 = vld [vmem:[#allocation31 + $0xb0] sm:$0xff]  }
0x2d29   :  { %7866 = vmatprep.subr.bf16.mxu0 %v13038_v49  ;;  %v13082_v49 = vld [vmem:[#allocation31 + $0xf8] sm:$0xff]  }
0x2d2c   :  { %7867 = vmatpush1.bf16.msra.mxu0 %v13036_v36  ;;  %v13084_v36 = vld [vmem:[#allocation31 + $0xb8] sm:$0xff]  }
0x2d2d   :  { %7868 = vmatprep.subr.bf16.mxu0 %v13044_v45  ;;  %v13093_v45 = vld [vmem:[#allocation37 + $0x4] ss:$16 sps:$4 sm:$0xff]  }
0x2d30   :  { %7869 = vmatpush1.bf16.msra.mxu0 %v13042_v53  ;;  %v16002_v53 = vld [vmem:[#allocation40 + $0xc] ss:$16 sps:$4 sm:$0xff]  }
0x2d31   :  { %7870 = vmatprep.subr.bf16.mxu0 %v13050_v20 }
0x2d51   :  { %v7388_v31 = vpop.f32.mrb[72].mxu1 }
0x2d52   :  { %v12581_v22 = vpop.f32.mrb[73].mxu1 }
0x2dea   :  { %v7464_v15 = vpop.f32.mrb[92].mxu0 }
0x2deb   :  { %v12840_v17 = vpack.i.bf16 %v7464_v15, %v7388_v31  ;;  %v12586_v24 = vpop.f32.mrb[93].mxu0  ;;  %v13015_v15 = vld [vmem:[#allocation28 + $0x28] ss:$16 sps:$4 sm:$0xff]  }
0x2ded   :  { %12841 = vrot.lane.b32.xlu1 %v12840_v17, %s14703_s0 }
0x2e5f   :  { %v12842_v40 = vpop.permute.xlu1 %12841 }
0x2e60   :  { %v12844_v18 = vunpack.i.h.bf16 %v12842_v40  ;;  %v12843_v19 = vunpack.i.l.bf16 %v12842_v40  ;;  %v13048_v40 = vld [vmem:[#allocation28 + $0xe0] ss:$16 sps:$4 sm:$0xff]  }
0x2e61   :  { %7871 = vmatpush1.bf16.msra.mxu0 %v13048_v40 }
0x2e62   :  { %v7537_v52 = vsel %vm3715_vm8, %v7535_v51, %v12844_v18  ;;  %v7536_v57 = vsel %vm3715_vm8, %v7534_v50, %v12843_v19  ;;  %v13055_v18 = vld [vmem:[#allocation31 + $0x40] sm:$0xff]  }
0x2e63   :  { %v7538_v39 = vpack.c.bf16 %v7537_v52, %v7536_v57  ;;  %12121 = vmatprep.subr.bf16.mxu0 %v13055_v18 }
0x2e65   :  { %12604 = vmatmul.mubr.bf16.vlgmr.msra.gmra.mrb[76].mxu1 %v7538_v39 }
0x2e66   :  { %7931 = vmatprep.mubr.bf16.mxu1 %v17797_v29  ;;  %7900 = vmatpush1.bf16.msra.mxu1 %v13009_v62  ;;  %v13057_v62 = vld [vmem:[#allocation31] sm:$0xff]  }
0x2e67   :  { %7901 = vmatprep.subr.bf16.mxu1 %v13017_v11  ;;  %v13059_v11 = vld [vmem:[#allocation31 + $0x48] sm:$0xff]  }
0x2e6a   :  { %7902 = vmatpush1.bf16.msra.mxu1 %v13015_v15  ;;  %v13061_v15 = vld [vmem:[#allocation31 + $0x8] sm:$0xff]  }
0x2e6b   :  { %7903 = vmatprep.subr.bf16.mxu1 %v13023_v42  ;;  %v13071_v42 = vld [vmem:[#allocation31 + $0x60] sm:$0xff]  }
0x2e6e   :  { %7904 = vmatpush1.bf16.msra.mxu1 %v13021_v55  ;;  %v13073_v55 = vld [vmem:[#allocation31 + $0x20] sm:$0xff]  }
0x2e6f   :  { %7905 = vmatprep.subr.bf16.mxu1 %v13029_v60  ;;  %v13075_v60 = vld [vmem:[#allocation31 + $0x68] sm:$0xff]  }
0x2e72   :  { %7906 = vmatpush1.bf16.msra.mxu1 %v13027_v23  ;;  %v13077_v23 = vld [vmem:[#allocation31 + $0x28] sm:$0xff]  }
0x2e73   :  { %7907 = vmatprep.subr.bf16.mxu1 %v13035_v28  ;;  %v13079_v28 = vld [vmem:[#allocation31 + $0x70] sm:$0xff]  }
0x2e76   :  { %7908 = vmatpush1.bf16.msra.mxu1 %v13033_v48  ;;  %v13081_v48 = vld [vmem:[#allocation31 + $0x30] sm:$0xff]  }
0x2e77   :  { %7909 = vmatprep.subr.bf16.mxu1 %v13041_v37  ;;  %v13083_v37 = vld [vmem:[#allocation31 + $0x78] sm:$0xff]  }
0x2e7a   :  { %7910 = vmatpush1.bf16.msra.mxu1 %v13039_v41  ;;  %v13085_v41 = vld [vmem:[#allocation31 + $0x38] sm:$0xff]  }
0x2e7b   :  { %7911 = vmatprep.subr.bf16.mxu1 %v13047_v61 }
0x2e7e   :  { %7912 = vmatpush1.bf16.msra.mxu1 %v13045_v25  ;;  %v4539_v25 = vld [vmem:[#allocation29] sm:$0xf] }
0x2e7f   :  { %7913 = vmatprep.subr.bf16.mxu1 %v13053_v14  ;;  %v7679_v61 = vrot.slane %v4539_v25, %v15178_v47  ;;  %v7687_v20 = vrot.slane %v4539_v25, %v15172_v44  ;;  %v7683_v14 = vrot.slane %v4539_v25, %v15175_v46  ;;  %v7691_v40 = vrot.slane %v4539_v25, %v15591_v34  ;;  %v16072_v25 = vld [vmem:[#allocation40 + $0x64] ss:$16 sps:$4 sm:$0xff]  }
0x2e82   :  { %7914 = vmatpush1.bf16.msra.mxu1 %v13051_v16 }
0x2e83   :  { %12143 = vmatprep.subr.bf16.mxu1 %v13054_v5 }
0x2f38   :  { %v7627_v63 = vpop.f32.mrb[76].mxu1 }
0x2f39   :  { %v7628_v59 = vadd.f32 %v11648_v56, %v7627_v63  ;;  %v12605_v2 = vpop.f32.mrb[77].mxu1 }
0x2f3a   :  { %v7630_v3 = vpop.f32.mrb[78].mxu1 }
0x2f3b   :  { %v7634_v6 = vadd.f32 %v7628_v59, %v15611_v8  ;;  %v7631_v31 = vadd.f32 %v11648_v56, %v7630_v3  ;;  %v12606_v22 = vpop.f32.mrb[79].mxu1  ;;  %v11657_v59 = vld [vmem:[#allocation25] ss:$0 sm:$0xff] }
0x2f3d   :  { %v7635_v54 = vadd.f32 %v7631_v31, %v15613_v9  ;;  %7636 = vadd.xlane.f32.xlu0 %v7634_v6  ;;  %v11658_v31 = vld [vmem:[#allocation26] ss:$0 sm:$0xff] }
0x2f3f   :  { %7638 = vadd.xlane.f32.xlu1 %v7635_v54 }
0x2fca   :  { %v7637_v8 = vpop.xlane.xlu0 %7636 }
0x2fcb   :  { %v7640_v9 = vmul.f32 0.0078125, %v7637_v8  ;;  %v13062_v8 = vld [vmem:[#allocation31 + $0xd0] sm:$0xff]  }
0x2fcc   :  { %v7639_v17 = vpop.xlane.xlu1 %7638 }
0x2fcd   :  { %v15986_v24 = vsub.f32 %v7634_v6, %v7640_v9  ;;  %v7641_v27 = vmul.f32 0.0078125, %v7639_v17  ;;  %v13063_v9 = vld [vmem:[#allocation31 + $0x50] sm:$0xff]  }
0x2fce   :  { %v13064_v17 = vld [vmem:[#allocation31 + $0x90] sm:$0xff]  }
0x2fcf   :  { %v15988_v32 = vsub.f32 %v7635_v54, %v7641_v27  ;;  %v7644_v35 = vmul.f32 %v15986_v24, %v15986_v24  ;;  %v13066_v27 = vld [vmem:[#allocation31 + $0xd8] sm:$0xff]  }
0x2fd1   :  { %7646 = vadd.xlane.f32.xlu0 %v7644_v35  ;;  %v7645_v1 = vmul.f32 %v15988_v32, %v15988_v32  ;;  %v13068_v35 = vld [vmem:[#allocation31 + $0x98] sm:$0xff]  }
0x2fd5   :  { %7648 = vadd.xlane.f32.xlu0 %v7645_v1  ;;  %v13069_v1 = vld [vmem:[#allocation31 + $0x18] sm:$0xff]  }
0x305e   :  { %v7647_v19 = vpop.xlane.xlu0 %7646 }
0x305f   :  { %v7650_v50 = vmul.f32 0.0078125, %v7647_v19 }
0x3061   :  { %v7652_v51 = vadd.f32 1e-05, %v7650_v50 }
0x3062   :  { %v7649_v52 = vpop.xlane.xlu0 %7648 }
0x3063   :  { %13404 = vrsqrt.f32 %v7652_v51  ;;  %v7651_v57 = vmul.f32 0.0078125, %v7649_v52 }
0x3065   :  { %v7653_v39 = vadd.f32 1e-05, %v7651_v57 }
0x3067   :  { %13406 = vrsqrt.f32 %v7653_v39 }
0x306d   :  { %v13405_v56 = vpop.eup %13404 }
0x306e   :  { %v7656_v63 = vmul.f32 %v13405_v56, %v15986_v24  ;;  %v13065_v24 = vld [vmem:[#allocation31 + $0x10] sm:$0xff]  }
0x3070   :  { %v7664_v6 = vmul.f32 %v11657_v59, %v7656_v63 }
0x3071   :  { %v13407_v2 = vpop.eup %13406 }
0x3072   :  { %v7657_v3 = vmul.f32 %v13407_v2, %v15988_v32  ;;  %v15996_v54 = vadd.f32 %v11658_v31, %v7664_v6  ;;  %v13067_v32 = vld [vmem:[#allocation31 + $0x58] sm:$0xff]  }
0x3074   :  { %v7665_v22 = vmul.f32 %v11657_v59, %v7657_v3 }
0x3076   :  { %v15998_v7 = vadd.f32 %v11658_v31, %v7665_v22 }
0x3078   :  { %v7674_v30 = vpack.c.bf16 %v15998_v7, %v15996_v54 }
0x307a   :  { %7889 = vmatmul.mubr.bf16.vlgmr.msra.gmra.mrb[96].mxu0 %v7674_v30  ;;  %7932 = vmatmul.mubr.bf16.vlgmr.msra.gmra.mrb[80].mxu1 %v7674_v30 }
0x307b   :  { %12144 = vmatpush3.bf16.msra.mxu1 %v13056_v10  ;;  %12122 = vmatpush3.bf16.msra.mxu0 %v13057_v62 }
0x307c   :  { %12145 = vmatprep.subr.bf16.mxu1 %v13058_v21  ;;  %12123 = vmatprep.subr.bf16.mxu0 %v13059_v11 }
0x307f   :  { %12146 = vmatpush3.bf16.msra.mxu1 %v13060_v13  ;;  %12124 = vmatpush3.bf16.msra.mxu0 %v13061_v15 }
0x3080   :  { %12147 = vmatprep.subr.bf16.mxu1 %v13062_v8  ;;  %12125 = vmatprep.subr.bf16.mxu0 %v13063_v9 }
0x3083   :  { %12148 = vmatpush3.bf16.msra.mxu1 %v13064_v17  ;;  %12126 = vmatpush3.bf16.msra.mxu0 %v13065_v24 }
0x3084   :  { %12149 = vmatprep.subr.bf16.mxu1 %v13066_v27  ;;  %12127 = vmatprep.subr.bf16.mxu0 %v13067_v32  ;;  %v16009_v27 = vld [vmem:[#allocation40 + $0x8] ss:$16 sps:$4 sm:$0xff]   ;;  %v13091_v32 = vld [vmem:[#allocation37] ss:$16 sps:$4 sm:$0xff]  }
0x3087   :  { %12150 = vmatpush3.bf16.msra.mxu1 %v13068_v35  ;;  %12128 = vmatpush3.bf16.msra.mxu0 %v13069_v1  ;;  %v16011_v35 = vld [vmem:[#allocation40 + $0x2c] ss:$16 sps:$4 sm:$0xff]   ;;  %v13100_v1 = vld [vmem:[#allocation37 + $0xc] ss:$16 sps:$4 sm:$0xff]  }
0x3088   :  { %12151 = vmatprep.subr.bf16.mxu1 %v13070_v38  ;;  %12129 = vmatprep.subr.bf16.mxu0 %v13071_v42  ;;  %v16014_v38 = vld [vmem:[#allocation40 + $0x28] ss:$16 sps:$4 sm:$0xff]   ;;  %v16018_v42 = vld [vmem:[#allocation40 + $0x4c] ss:$16 sps:$4 sm:$0xff]  }
0x308b   :  { %12152 = vmatpush3.bf16.msra.mxu1 %v13072_v12  ;;  %12130 = vmatpush3.bf16.msra.mxu0 %v13073_v55  ;;  %v16022_v12 = vld [vmem:[#allocation40 + $0x48] ss:$16 sps:$4 sm:$0xff]   ;;  %v13098_v55 = vld [vmem:[#allocation37 + $0x8] ss:$16 sps:$4 sm:$0xff]  }
0x308c   :  { %12153 = vmatprep.subr.bf16.mxu1 %v13074_v58  ;;  %12131 = vmatprep.subr.bf16.mxu0 %v13075_v60  ;;  %v16025_v58 = vld [vmem:[#allocation40 + $0x6c] ss:$16 sps:$4 sm:$0xff]   ;;  %v16027_v60 = vld [vmem:[#allocation40 + $0x4] ss:$16 sps:$4 sm:$0xff]  }
0x308d   :  { %18238 = vst [vmem:[#allocation98_spill] sm:$0xff] %v16027_v60 }
0x308f   :  { %12154 = vmatpush3.bf16.msra.mxu1 %v13076_v26  ;;  %12132 = vmatpush3.bf16.msra.mxu0 %v13077_v23  ;;  %v16032_v26 = vld [vmem:[#allocation40 + $0x68] ss:$16 sps:$4 sm:$0xff]   ;;  %v16036_v23 = vld [vmem:[#allocation40 + $0x8c] ss:$16 sps:$4 sm:$0xff]  }
0x3090   :  { %12155 = vmatprep.subr.bf16.mxu1 %v13078_v43  ;;  %12133 = vmatprep.subr.bf16.mxu0 %v13079_v28  ;;  %v16040_v43 = vld [vmem:[#allocation40] ss:$16 sps:$4 sm:$0xff]   ;;  %v16042_v28 = vld [vmem:[#allocation40 + $0x88] ss:$16 sps:$4 sm:$0xff]  }
0x3093   :  { %12156 = vmatpush3.bf16.msra.mxu1 %v13080_v33  ;;  %12134 = vmatpush3.bf16.msra.mxu0 %v13081_v48  ;;  %v16045_v33 = vld [vmem:[#allocation40 + $0x24] ss:$16 sps:$4 sm:$0xff]   ;;  %v16047_v48 = vld [vmem:[#allocation40 + $0xac] ss:$16 sps:$4 sm:$0xff]  }
0x3094   :  { %12157 = vmatprep.subr.bf16.mxu1 %v13082_v49  ;;  %12135 = vmatprep.subr.bf16.mxu0 %v13083_v37  ;;  %v16053_v49 = vld [vmem:[#allocation40 + $0x20] ss:$16 sps:$4 sm:$0xff]   ;;  %v16055_v37 = vld [vmem:[#allocation40 + $0xa8] ss:$16 sps:$4 sm:$0xff]  }
0x3097   :  { %12158 = vmatpush3.bf16.msra.mxu1 %v13084_v36  ;;  %12136 = vmatpush3.bf16.msra.mxu0 %v13085_v41  ;;  %v16059_v36 = vld [vmem:[#allocation40 + $0x44] ss:$16 sps:$4 sm:$0xff]   ;;  %v16061_v41 = vld [vmem:[#allocation40 + $0xcc] ss:$16 sps:$4 sm:$0xff]  }
0x3098   :  { %8864 = vmatprep.subr.bf16.mxu1 %v16002_v53  ;;  %8328 = vmatprep.subr.bf16.mxu0 %v13093_v45  ;;  %v16068_v45 = vld [vmem:[#allocation40 + $0xc8] ss:$16 sps:$4 sm:$0xff]  }
0x314d   :  { %v7890_v16 = vpop.f32.mrb[96].mxu0  ;;  %v7933_v5 = vpop.f32.mrb[80].mxu1 }
0x314e   :  { %v7891_v18 = vadd.f32 %v7890_v16, %v7679_v61  ;;  %v7934_v19 = vadd.f32 %v7933_v5, %v7687_v20  ;;  %v7892_v50 = vpop.f32.mrb[97].mxu0  ;;  %v7935_v51 = vpop.f32.mrb[81].mxu1  ;;  %v16088_v16 = vld [vmem:[#allocation40 + $0x80] ss:$16 sps:$4 sm:$0xff]   ;;  %v16091_v5 = vld [vmem:[#allocation40 + $0xa4] ss:$16 sps:$4 sm:$0xff]  }
0x314f   :  { %v7893_v52 = vadd.f32 %v7892_v50, %v7683_v14  ;;  %v7936_v57 = vadd.f32 %v7935_v51, %v7691_v40  ;;  %v7894_v39 = vpop.f32.mrb[98].mxu0  ;;  %v7937_v56 = vpop.f32.mrb[82].mxu1  ;;  %v16101_v50 = vld [vmem:[#allocation40 + $0xc0] ss:$16 sps:$4 sm:$0xff]   ;;  %v16104_v51 = vld [vmem:[#allocation40 + $0xe4] ss:$16 sps:$4 sm:$0xff]  }
0x3150   :  { %v7895_v63 = vadd.f32 %v7894_v39, %v7679_v61  ;;  %v7938_v59 = vadd.f32 %v7937_v56, %v7687_v20  ;;  %v7896_v2 = vpop.f32.mrb[99].mxu0  ;;  %v7939_v3 = vpop.f32.mrb[83].mxu1  ;;  %v7942_v22 = vmax.f32 %v7891_v18, 0.0  ;;  %v7944_v10 = vmax.f32 %v7934_v19, 0.0  ;;  %v16074_v61 = vld [vmem:[#allocation40 + $0xec] ss:$16 sps:$4 sm:$0xff]  }
0x3151   :  { %v7897_v6 = vadd.f32 %v7896_v2, %v7683_v14  ;;  %v7940_v31 = vadd.f32 %v7939_v3, %v7691_v40  ;;  %v7943_v21 = vmax.f32 %v7893_v52, 0.0  ;;  %v7945_v11 = vmax.f32 %v7936_v57, 0.0  ;;  %v16078_v20 = vld [vmem:[#allocation40 + $0x60] ss:$16 sps:$4 sm:$0xff]   ;;  %v16080_v14 = vld [vmem:[#allocation40 + $0xe8] ss:$16 sps:$4 sm:$0xff]  }
0x3152   :  { %v7946_v62 = vmax.f32 %v7895_v63, 0.0  ;;  %v7948_v30 = vmax.f32 %v7938_v59, 0.0  ;;  %v16084_v40 = vld [vmem:[#allocation40 + $0x84] ss:$16 sps:$4 sm:$0xff]   ;;  %v16095_v18 = vld [vmem:[#allocation40 + $0xa0] ss:$16 sps:$4 sm:$0xff]  }
0x3153   :  { %v7947_v13 = vmax.f32 %v7897_v6, 0.0  ;;  %v7949_v15 = vmax.f32 %v7940_v31, 0.0  ;;  %v16098_v19 = vld [vmem:[#allocation40 + $0xc4] ss:$16 sps:$4 sm:$0xff]   ;;  %v16107_v52 = vld [vmem:[#allocation40 + $0xe0] ss:$16 sps:$4 sm:$0xff]  }
0x3154   :  { %v7950_v8 = vpack.c.bf16 %v7946_v62, %v7942_v22  ;;  %v7952_v9 = vpack.c.bf16 %v7948_v30, %v7944_v10  ;;  %v16112_v57 = vld [vmem:[#allocation41 + $0x4] ss:$16 sps:$4 sm:$0xff]   ;;  %v16114_v39 = vld [vmem:[#allocation41 + $0xc] ss:$16 sps:$4 sm:$0xff]   ;;  %v16116_v56 = vld [vmem:[#allocation41] ss:$16 sps:$4 sm:$0xff]  }
0x3155   :  { %v7951_v17 = vpack.c.bf16 %v7947_v13, %v7943_v21  ;;  %v7953_v24 = vpack.c.bf16 %v7949_v15, %v7945_v11  ;;  %18239 = vst [vmem:[#allocation99_spill] sm:$0xff] %v16114_v39  ;;  %18240 = vst [vmem:[#allocation100_spill] sm:$0xff] %v16116_v56  ;;  %v16118_v63 = vld [vmem:[#allocation41 + $0x8] ss:$16 sps:$4 sm:$0xff]   ;;  %v16124_v59 = vld [vmem:[#allocation41 + $0x24] ss:$16 sps:$4 sm:$0xff]  }
0x3156   :  { %18241 = vst [vmem:[#allocation101_spill] sm:$0xff] %v16118_v63  ;;  %18242 = vst [vmem:[#allocation102_spill] sm:$0xff] %v16124_v59  ;;  %v16126_v2 = vld [vmem:[#allocation41 + $0x2c] ss:$16 sps:$4 sm:$0xff]   ;;  %v16128_v3 = vld [vmem:[#allocation41 + $0x20] ss:$16 sps:$4 sm:$0xff]  }
0x3157   :  { %8184 = vmatprep.mubr.bf16.mxu0 %v7951_v17  ;;  %8225 = vmatprep.mubr.bf16.mxu1 %v7953_v24  ;;  %18243 = vst [vmem:[#allocation103_spill] sm:$0xff] %v16126_v2  ;;  %18244 = vst [vmem:[#allocation104_spill] sm:$0xff] %v16128_v3  ;;  %v16130_v6 = vld [vmem:[#allocation41 + $0x28] ss:$16 sps:$4 sm:$0xff]   ;;  %v16136_v31 = vld [vmem:[#allocation41 + $0x44] ss:$16 sps:$4 sm:$0xff]  }
0x3158   :  { %8185 = vmatmul.mubr.bf16.vlgmr.msra.gmra.mrb[100].mxu0 %v7950_v8  ;;  %8226 = vmatmul.mubr.bf16.vlgmr.msra.gmra.mrb[84].mxu1 %v7952_v9  ;;  %18245 = vst [vmem:[#allocation105_spill] sm:$0xff] %v16130_v6  ;;  %18246 = vst [vmem:[#allocation106_spill] sm:$0xff] %v16136_v31  ;;  %v16138_v22 = vld [vmem:[#allocation41 + $0x4c] ss:$16 sps:$4 sm:$0xff]   ;;  %v16140_v10 = vld [vmem:[#allocation41 + $0x40] ss:$16 sps:$4 sm:$0xff]  }
0x3159   :  { %8865 = vmatpush1.bf16.msra.mxu1 %v16009_v27  ;;  %8329 = vmatpush1.bf16.msra.mxu0 %v13091_v32  ;;  %18247 = vst [vmem:[#allocation107_spill] sm:$0xff] %v16138_v22  ;;  %18248 = vst [vmem:[#allocation108_spill] sm:$0xff] %v16140_v10  ;;  %v16142_v62 = vld [vmem:[#allocation41 + $0x48] ss:$16 sps:$4 sm:$0xff]   ;;  %v16148_v30 = vld [vmem:[#allocation41 + $0x64] ss:$16 sps:$4 sm:$0xff]  }
0x315a   :  { %8866 = vmatprep.subr.bf16.mxu1 %v16011_v35  ;;  %8360 = vmatprep.mubr.bf16.mxu0 %v17797_v29  ;;  %18249 = vst [vmem:[#allocation109_spill] sm:$0xff] %v16142_v62  ;;  %18250 = vst [vmem:[#allocation110_spill] sm:$0xff] %v16148_v30  ;;  %v16150_v21 = vld [vmem:[#allocation41 + $0x6c] ss:$16 sps:$4 sm:$0xff]   ;;  %v16152_v11 = vld [vmem:[#allocation41 + $0x60] ss:$16 sps:$4 sm:$0xff]  }
0x315b   :  { %8371 = vmatprep.subr.bf16.mxu0 %v13100_v1  ;;  %8896 = vmatprep.mubr.bf16.mxu1 %v17797_v29  ;;  %18251 = vst [vmem:[#allocation111_spill] sm:$0xff] %v16150_v21  ;;  %18252 = vst [vmem:[#allocation112_spill] sm:$0xff] %v16152_v11  ;;  %v16154_v13 = vld [vmem:[#allocation41 + $0x68] ss:$16 sps:$4 sm:$0xff]   ;;  %v16160_v15 = vld [vmem:[#allocation41 + $0x84] ss:$16 sps:$4 sm:$0xff]  }
0x315c   :  { %18253 = vst [vmem:[#allocation113_spill] sm:$0xff] %v16154_v13  ;;  %18254 = vst [vmem:[#allocation114_spill] sm:$0xff] %v16160_v15  ;;  %v16162_v8 = vld [vmem:[#allocation41 + $0x8c] ss:$16 sps:$4 sm:$0xff]   ;;  %v16164_v9 = vld [vmem:[#allocation41 + $0x80] ss:$16 sps:$4 sm:$0xff]  }
0x315d   :  { %8867 = vmatpush1.bf16.msra.mxu1 %v16014_v38  ;;  %18255 = vst [vmem:[#allocation115_spill] sm:$0xff] %v16162_v8  ;;  %18256 = vst [vmem:[#allocation116_spill] sm:$0xff] %v16164_v9  ;;  %v16166_v17 = vld [vmem:[#allocation41 + $0x88] ss:$16 sps:$4 sm:$0xff]   ;;  %v16172_v24 = vld [vmem:[#allocation41 + $0xa4] ss:$16 sps:$4 sm:$0xff]  }
0x315e   :  { %8868 = vmatprep.subr.bf16.mxu1 %v16018_v42  ;;  %18257 = vst [vmem:[#allocation117_spill] sm:$0xff] %v16166_v17  ;;  %18258 = vst [vmem:[#allocation118_spill] sm:$0xff] %v16172_v24  ;;  %v16174_v32 = vld [vmem:[#allocation41 + $0xac] ss:$16 sps:$4 sm:$0xff]   ;;  %v16176_v1 = vld [vmem:[#allocation41 + $0xa0] ss:$16 sps:$4 sm:$0xff]  }
0x315f   :  { %18259 = vst [vmem:[#allocation119_spill] sm:$0xff] %v16174_v32  ;;  %18260 = vst [vmem:[#allocation120_spill] sm:$0xff] %v16176_v1 }
0x3160   :  { %11730 = vmatmul.mubr.msk.bf16.vlgmr.msra.gmra.mrb[104].mxu0 %vm579_vm1, %v15140_v4 }
0x3161   :  { %8869 = vmatpush1.bf16.msra.mxu1 %v16022_v12  ;;  %8372 = vmatpush1.bf16.msra.mxu0 %v13098_v55  ;;  %v16178_v55 = vld [vmem:[#allocation41 + $0xa8] ss:$16 sps:$4 sm:$0xff]  }
0x3162   :  { %8870 = vmatprep.subr.bf16.mxu1 %v16025_v58  ;;  %8403 = vmatprep.mubr.bf16.mxu0 %v17797_v29  ;;  %18261 = vst [vmem:[#allocation121_spill] sm:$0xff] %v16178_v55 }
0x3163   :  { %8823 = vmatprep.subr.bf16.mxu0 %v16027_v60 }
0x3165   :  { %8871 = vmatpush1.bf16.msra.mxu1 %v16032_v26 }
0x3166   :  { %8872 = vmatprep.subr.bf16.mxu1 %v16036_v23 }
0x3168   :  { %11731 = vmatmul.mubr.msk.bf16.vlgmr.msra.gmra.mrb[108].mxu0 %vm579_vm1, %v15140_v4  ;;  %v16066_v4 = vld [vmem:[#allocation40 + $0x40] ss:$16 sps:$4 sm:$0xff]  }
0x3169   :  { %8824 = vmatpush1.bf16.msra.mxu0 %v16040_v43  ;;  %8873 = vmatpush1.bf16.msra.mxu1 %v16042_v28 }
0x316a   :  { %8825 = vmatprep.subr.bf16.mxu0 %v16045_v33  ;;  %8874 = vmatprep.subr.bf16.mxu1 %v16047_v48 }
0x316b   :  { %8855 = vmatprep.mubr.bf16.mxu0 %v17797_v29 }
0x316d   :  { %8826 = vmatpush1.bf16.msra.mxu0 %v16053_v49  ;;  %8875 = vmatpush1.bf16.msra.mxu1 %v16055_v37 }
0x316e   :  { %8827 = vmatprep.subr.bf16.mxu0 %v16059_v36  ;;  %8876 = vmatprep.subr.bf16.mxu1 %v16061_v41 }
0x3171   :  { %8828 = vmatpush1.bf16.msra.mxu0 %v16066_v4  ;;  %8877 = vmatpush1.bf16.msra.mxu1 %v16068_v45 }
0x3172   :  { %8829 = vmatprep.subr.bf16.mxu0 %v16072_v25  ;;  %8878 = vmatprep.subr.bf16.mxu1 %v16074_v61 }
0x3175   :  { %8830 = vmatpush1.bf16.msra.mxu0 %v16078_v20  ;;  %8879 = vmatpush1.bf16.msra.mxu1 %v16080_v14 }
0x3176   :  { %8831 = vmatprep.subr.bf16.mxu0 %v16084_v40  ;;  %9317 = vmatprep.subr.bf16.mxu1 %v16114_v39 }
0x3178   :  { %8897 = vmatmul.mubr.bf16.vlgmr.msra.gmra.mrb[88].mxu1 %v17797_v29 }
0x3179   :  { %8832 = vmatpush1.bf16.msra.mxu0 %v16088_v16  ;;  %9318 = vmatpush1.bf16.msra.mxu1 %v16118_v63 }
0x317a   :  { %8833 = vmatprep.subr.bf16.mxu0 %v16091_v5  ;;  %9319 = vmatprep.subr.bf16.mxu1 %v16126_v2 }
0x317d   :  { %8834 = vmatpush1.bf16.msra.mxu0 %v16095_v18  ;;  %9320 = vmatpush1.bf16.msra.mxu1 %v16130_v6 }
0x317e   :  { %8835 = vmatprep.subr.bf16.mxu0 %v16098_v19  ;;  %9321 = vmatprep.subr.bf16.mxu1 %v16138_v22 }
0x3181   :  { %8836 = vmatpush1.bf16.msra.mxu0 %v16101_v50  ;;  %9322 = vmatpush1.bf16.msra.mxu1 %v16142_v62 }
0x3182   :  { %8837 = vmatprep.subr.bf16.mxu0 %v16104_v51  ;;  %9323 = vmatprep.subr.bf16.mxu1 %v16150_v21 }
0x3185   :  { %8838 = vmatpush1.bf16.msra.mxu0 %v16107_v52  ;;  %9324 = vmatpush1.bf16.msra.mxu1 %v16154_v13  ;;  %v14708_v13 = vmov 0.0|0.0  }
0x3186   :  { %9276 = vmatprep.subr.bf16.mxu0 %v16112_v57  ;;  %9325 = vmatprep.subr.bf16.mxu1 %v16162_v8  ;;  %v16276_v8 = vld [vmem:[#allocation41 + $0x1c4] ss:$16 sps:$4 sm:$0xff]  }
0x3187   :  { %18294 = vst [vmem:[#allocation154_spill] sm:$0xff] %v16276_v8  ;;  %9349 = vmatprep.mubr.bf16.mxu1 %v14708_v13 }
0x3188   :  { %8856 = vmatmul.mubr.bf16.vlgmr.msra.gmra.mrb[112].mxu0 %v17797_v29  ;;  %v16186_v29 = vld [vmem:[#allocation41 + $0xcc] ss:$16 sps:$4 sm:$0xff]  }
0x3189   :  { %9277 = vmatpush1.bf16.msra.mxu0 %v16116_v56  ;;  %9326 = vmatpush1.bf16.msra.mxu1 %v16166_v17  ;;  %18263 = vst [vmem:[#allocation123_spill] sm:$0xff] %v16186_v29  ;;  %v16188_v17 = vld [vmem:[#allocation41 + $0xc0] ss:$16 sps:$4 sm:$0xff]  }
0x318a   :  { %9278 = vmatprep.subr.bf16.mxu0 %v16124_v59  ;;  %9327 = vmatprep.subr.bf16.mxu1 %v16174_v32  ;;  %18264 = vst [vmem:[#allocation124_spill] sm:$0xff] %v16188_v17  ;;  %v16196_v32 = vld [vmem:[#allocation41 + $0xe4] ss:$16 sps:$4 sm:$0xff]  }
0x318b   :  { %18266 = vst [vmem:[#allocation126_spill] sm:$0xff] %v16196_v32  ;;  %9308 = vmatprep.mubr.bf16.mxu0 %v14708_v13 }
0x318d   :  { %9279 = vmatpush1.bf16.msra.mxu0 %v16128_v3  ;;  %9328 = vmatpush1.bf16.msra.mxu1 %v16178_v55  ;;  %v16200_v55 = vld [vmem:[#allocation41 + $0xe0] ss:$16 sps:$4 sm:$0xff]  }
0x318e   :  { %9280 = vmatprep.subr.bf16.mxu0 %v16136_v31  ;;  %9329 = vmatprep.subr.bf16.mxu1 %v16186_v29  ;;  %18268 = vst [vmem:[#allocation128_spill] sm:$0xff] %v16200_v55  ;;  %v16208_v29 = vld [vmem:[#allocation41 + $0x104] ss:$16 sps:$4 sm:$0xff]  }
0x318f   :  { %18270 = vst [vmem:[#allocation130_spill] sm:$0xff] %v16208_v29 }
0x3191   :  { %9281 = vmatpush1.bf16.msra.mxu0 %v16140_v10 }
0x3192   :  { %9282 = vmatprep.subr.bf16.mxu0 %v16148_v30 }
0x3195   :  { %9283 = vmatpush1.bf16.msra.mxu0 %v16152_v11 }
0x3196   :  { %9284 = vmatprep.subr.bf16.mxu0 %v16160_v15  ;;  %v16278_v15 = vld [vmem:[#allocation41 + $0x1cc] ss:$16 sps:$4 sm:$0xff]  }
0x3197   :  { %18295 = vst [vmem:[#allocation155_spill] sm:$0xff] %v16278_v15 }
0x3199   :  { %9285 = vmatpush1.bf16.msra.mxu0 %v16164_v9  ;;  %v16190_v9 = vld [vmem:[#allocation41 + $0xc8] ss:$16 sps:$4 sm:$0xff]  }
0x319a   :  { %9286 = vmatprep.subr.bf16.mxu0 %v16172_v24  ;;  %18265 = vst [vmem:[#allocation125_spill] sm:$0xff] %v16190_v9  ;;  %9330 = vmatpush1.bf16.msra.mxu1 %v16190_v9  ;;  %v16202_v24 = vld [vmem:[#allocation41 + $0xe8] ss:$16 sps:$4 sm:$0xff]   ;;  %v16212_v9 = vld [vmem:[#allocation41 + $0x100] ss:$16 sps:$4 sm:$0xff]  }
0x319b   :  { %18269 = vst [vmem:[#allocation129_spill] sm:$0xff] %v16202_v24  ;;  %18272 = vst [vmem:[#allocation132_spill] sm:$0xff] %v16212_v9 }
0x319d   :  { %9287 = vmatpush1.bf16.msra.mxu0 %v16176_v1  ;;  %v16198_v1 = vld [vmem:[#allocation41 + $0xec] ss:$16 sps:$4 sm:$0xff]  }
0x319e   :  { %9288 = vmatprep.subr.bf16.mxu0 %v16184_v0  ;;  %18267 = vst [vmem:[#allocation127_spill] sm:$0xff] %v16198_v1  ;;  %9331 = vmatprep.subr.bf16.mxu1 %v16198_v1  ;;  %v16214_v0 = vld [vmem:[#allocation41 + $0x108] ss:$16 sps:$4 sm:$0xff]   ;;  %v16220_v1 = vld [vmem:[#allocation41 + $0x124] ss:$16 sps:$4 sm:$0xff]  }
0x319f   :  { %9332 = vmatpush1.bf16.msra.mxu1 %v16202_v24  ;;  %18273 = vst [vmem:[#allocation133_spill] sm:$0xff] %v16214_v0  ;;  %18274 = vst [vmem:[#allocation134_spill] sm:$0xff] %v16220_v1  ;;  %v16224_v24 = vld [vmem:[#allocation41 + $0x120] ss:$16 sps:$4 sm:$0xff]  }
0x31a0   :  { %18276 = vst [vmem:[#allocation136_spill] sm:$0xff] %v16224_v24 }
0x31a1   :  { %9289 = vmatpush1.bf16.msra.mxu0 %v16188_v17  ;;  %v16210_v17 = vld [vmem:[#allocation41 + $0x10c] ss:$16 sps:$4 sm:$0xff]  }
0x31a2   :  { %9290 = vmatprep.subr.bf16.mxu0 %v16196_v32  ;;  %18271 = vst [vmem:[#allocation131_spill] sm:$0xff] %v16210_v17  ;;  %9333 = vmatprep.subr.bf16.mxu1 %v16210_v17  ;;  %v16226_v32 = vld [vmem:[#allocation41 + $0x128] ss:$16 sps:$4 sm:$0xff]   ;;  %v16232_v17 = vld [vmem:[#allocation41 + $0x144] ss:$16 sps:$4 sm:$0xff]  }
0x31a3   :  { %9334 = vmatpush1.bf16.msra.mxu1 %v16214_v0  ;;  %18277 = vst [vmem:[#allocation137_spill] sm:$0xff] %v16226_v32  ;;  %18278 = vst [vmem:[#allocation138_spill] sm:$0xff] %v16232_v17  ;;  %v16236_v0 = vld [vmem:[#allocation41 + $0x140] ss:$16 sps:$4 sm:$0xff]  }
0x31a4   :  { %18280 = vst [vmem:[#allocation140_spill] sm:$0xff] %v16236_v0 }
0x31a5   :  { %9291 = vmatpush1.bf16.msra.mxu0 %v16200_v55  ;;  %v16222_v55 = vld [vmem:[#allocation41 + $0x12c] ss:$16 sps:$4 sm:$0xff]  }
0x31a6   :  { %9292 = vmatprep.subr.bf16.mxu0 %v16208_v29  ;;  %18275 = vst [vmem:[#allocation135_spill] sm:$0xff] %v16222_v55  ;;  %9335 = vmatprep.subr.bf16.mxu1 %v16222_v55  ;;  %v16238_v29 = vld [vmem:[#allocation41 + $0x148] ss:$16 sps:$4 sm:$0xff]   ;;  %v16244_v55 = vld [vmem:[#allocation41 + $0x164] ss:$16 sps:$4 sm:$0xff]  }
0x31a7   :  { %9336 = vmatpush1.bf16.msra.mxu1 %v16226_v32  ;;  %18281 = vst [vmem:[#allocation141_spill] sm:$0xff] %v16238_v29  ;;  %18282 = vst [vmem:[#allocation142_spill] sm:$0xff] %v16244_v55  ;;  %v16248_v32 = vld [vmem:[#allocation41 + $0x160] ss:$16 sps:$4 sm:$0xff]  }
0x31a8   :  { %18284 = vst [vmem:[#allocation144_spill] sm:$0xff] %v16248_v32 }
0x31a9   :  { %9293 = vmatpush1.bf16.msra.mxu0 %v16212_v9  ;;  %v16234_v9 = vld [vmem:[#allocation41 + $0x14c] ss:$16 sps:$4 sm:$0xff]  }
0x31aa   :  { %9294 = vmatprep.subr.bf16.mxu0 %v16220_v1  ;;  %18279 = vst [vmem:[#allocation139_spill] sm:$0xff] %v16234_v9  ;;  %9337 = vmatprep.subr.bf16.mxu1 %v16234_v9  ;;  %v16250_v1 = vld [vmem:[#allocation41 + $0x168] ss:$16 sps:$4 sm:$0xff]   ;;  %v16256_v9 = vld [vmem:[#allocation41 + $0x184] ss:$16 sps:$4 sm:$0xff]  }
0x31ab   :  { %9338 = vmatpush1.bf16.msra.mxu1 %v16238_v29  ;;  %18285 = vst [vmem:[#allocation145_spill] sm:$0xff] %v16250_v1  ;;  %18286 = vst [vmem:[#allocation146_spill] sm:$0xff] %v16256_v9  ;;  %v16260_v29 = vld [vmem:[#allocation41 + $0x180] ss:$16 sps:$4 sm:$0xff]  }
0x31ac   :  { %18288 = vst [vmem:[#allocation148_spill] sm:$0xff] %v16260_v29 }
0x31ad   :  { %9295 = vmatpush1.bf16.msra.mxu0 %v16224_v24  ;;  %v16246_v24 = vld [vmem:[#allocation41 + $0x16c] ss:$16 sps:$4 sm:$0xff]  }
0x31ae   :  { %9296 = vmatprep.subr.bf16.mxu0 %v16232_v17  ;;  %18283 = vst [vmem:[#allocation143_spill] sm:$0xff] %v16246_v24  ;;  %9339 = vmatprep.subr.bf16.mxu1 %v16246_v24  ;;  %v16262_v17 = vld [vmem:[#allocation41 + $0x188] ss:$16 sps:$4 sm:$0xff]   ;;  %v16268_v24 = vld [vmem:[#allocation41 + $0x1a4] ss:$16 sps:$4 sm:$0xff]  }
0x31af   :  { %9340 = vmatpush1.bf16.msra.mxu1 %v16250_v1  ;;  %18289 = vst [vmem:[#allocation149_spill] sm:$0xff] %v16262_v17  ;;  %18290 = vst [vmem:[#allocation150_spill] sm:$0xff] %v16268_v24  ;;  %v16272_v1 = vld [vmem:[#allocation41 + $0x1a0] ss:$16 sps:$4 sm:$0xff]  }
0x31b0   :  { %18292 = vst [vmem:[#allocation152_spill] sm:$0xff] %v16272_v1 }
0x31b1   :  { %9297 = vmatpush1.bf16.msra.mxu0 %v16236_v0  ;;  %v16258_v0 = vld [vmem:[#allocation41 + $0x18c] ss:$16 sps:$4 sm:$0xff]  }
0x31b2   :  { %9298 = vmatprep.subr.bf16.mxu0 %v16244_v55  ;;  %18287 = vst [vmem:[#allocation147_spill] sm:$0xff] %v16258_v0  ;;  %9341 = vmatprep.subr.bf16.mxu1 %v16258_v0  ;;  %v16274_v55 = vld [vmem:[#allocation41 + $0x1a8] ss:$16 sps:$4 sm:$0xff]   ;;  %v16290_v0 = vld [vmem:[#allocation41 + $0x1e4] ss:$16 sps:$4 sm:$0xff]  }
0x31b3   :  { %9342 = vmatpush1.bf16.msra.mxu1 %v16262_v17  ;;  %18293 = vst [vmem:[#allocation153_spill] sm:$0xff] %v16274_v55  ;;  %v16284_v17 = vld [vmem:[#allocation41 + $0x1c0] ss:$16 sps:$4 sm:$0xff]   ;;  %18298 = vst [vmem:[#allocation158_spill] sm:$0xff] %v16290_v0 }
0x31b4   :  { %18296 = vst [vmem:[#allocation156_spill] sm:$0xff] %v16284_v17 }
0x31b5   :  { %9299 = vmatpush1.bf16.msra.mxu0 %v16248_v32  ;;  %v16270_v32 = vld [vmem:[#allocation41 + $0x1ac] ss:$16 sps:$4 sm:$0xff]  }
0x31b6   :  { %9300 = vmatprep.subr.bf16.mxu0 %v16256_v9  ;;  %18291 = vst [vmem:[#allocation151_spill] sm:$0xff] %v16270_v32  ;;  %9343 = vmatprep.subr.bf16.mxu1 %v16270_v32  ;;  %v16292_v9 = vld [vmem:[#allocation41 + $0x1ec] ss:$16 sps:$4 sm:$0xff]  }
0x31b7   :  { %9344 = vmatpush1.bf16.msra.mxu1 %v16274_v55  ;;  %18299 = vst [vmem:[#allocation159_spill] sm:$0xff] %v16292_v9  ;;  %v16296_v55 = vld [vmem:[#allocation41 + $0x1e0] ss:$16 sps:$4 sm:$0xff]  }
0x31b8   :  { %9345 = vmatprep.subr.bf16.mxu1 %v16278_v15  ;;  %18300 = vst [vmem:[#allocation160_spill] sm:$0xff] %v16296_v55  ;;  %v11691_v15 = vld [vmem:[#allocation32] ss:$0 sm:$0xff] }
0x31b9   :  { %9301 = vmatpush1.bf16.msra.mxu0 %v16260_v29  ;;  %v16286_v29 = vld [vmem:[#allocation41 + $0x1c8] ss:$16 sps:$4 sm:$0xff]  }
0x31ba   :  { %9302 = vmatprep.subr.bf16.mxu0 %v16268_v24  ;;  %18297 = vst [vmem:[#allocation157_spill] sm:$0xff] %v16286_v29 }
0x31bb   :  { %9346 = vmatpush1.bf16.msra.mxu1 %v16286_v29 }
0x31bc   :  { %9347 = vmatprep.subr.bf16.mxu1 %v16292_v9 }
0x31bd   :  { %9303 = vmatpush1.bf16.msra.mxu0 %v16272_v1  ;;  %v16298_v1 = vld [vmem:[#allocation41 + $0x1e8] ss:$16 sps:$4 sm:$0xff]  }
0x31be   :  { %9304 = vmatprep.subr.bf16.mxu0 %v16276_v8  ;;  %18301 = vst [vmem:[#allocation161_spill] sm:$0xff] %v16298_v1 }
0x31bf   :  { %9348 = vmatpush1.bf16.msra.mxu1 %v16298_v1 }
0x31c0   :  { %9423 = vmatprep.subr.bf16.mxu1 %v16002_v53 }
0x31c1   :  { %9305 = vmatpush1.bf16.msra.mxu0 %v16284_v17 }
0x31c2   :  { %9306 = vmatprep.subr.bf16.mxu0 %v16290_v0  ;;  %v8286_v0 = vld [vmem:[#allocation38] sm:$0xf] }
0x31c3   :  { %v8291_v1 = vrot.slane %v8286_v0, %v15178_v47  ;;  %v8295_v53 = vrot.slane %v8286_v0, %v15175_v46 }
0x31c5   :  { %9307 = vmatpush1.bf16.msra.mxu0 %v16296_v55 }
0x31c6   :  { %9382 = vmatprep.subr.bf16.mxu0 %v16027_v60 }
0x322b   :  { %v12137_v13 = vpop.f32.mrb[100].mxu0  ;;  %v12159_v17 = vpop.f32.mrb[84].mxu1 }
0x322c   :  { %v12138_v29 = vpop.f32.mrb[101].mxu0  ;;  %v12160_v8 = vpop.f32.mrb[85].mxu1 }
0x322d   :  { %v12139_v32 = vadd.f32 %v12138_v29, %v12137_v13  ;;  %v12161_v24 = vadd.f32 %v12160_v8, %v12159_v17  ;;  %v12140_v11 = vpop.f32.mrb[102].mxu0  ;;  %v12162_v21 = vpop.f32.mrb[86].mxu1  ;;  %v8299_v17 = vrot.slane %v8286_v0, %v15172_v44 }
0x322e   :  { %v12141_v30 = vpop.f32.mrb[103].mxu0  ;;  %v12163_v9 = vpop.f32.mrb[87].mxu1 }
0x322f   :  { %v8187_v62 = vadd.f32 %v12139_v32, %v11691_v15  ;;  %v12142_v55 = vadd.f32 %v12141_v30, %v12140_v11  ;;  %v12164_v10 = vadd.f32 %v12163_v9, %v12162_v21  ;;  %v8303_v21 = vrot.slane %v8286_v0, %v15591_v34 }
0x3231   :  { %v8228_v60 = vadd.f32 %v12161_v24, %v8187_v62  ;;  %v8190_v22 = vadd.f32 %v12142_v55, %v11691_v15 }
0x3233   :  { %v8231_v31 = vadd.f32 %v12164_v10, %v8190_v22  ;;  %v8362_v6 = vpop.f32.mrb[104].mxu0  ;;  %v16309_v3 = vadd.f32 %v8228_v60, %v15996_v54 }
0x3234   :  { %v16311_v29 = vadd.f32 %v8362_v6, %v8291_v1  ;;  %v8364_v8 = vpop.f32.mrb[105].mxu0 }
0x3235   :  { %18302 = vst [vmem:[#allocation162_spill] sm:$0xff] %v16309_v3  ;;  %v16314_v13 = vadd.f32 %v8364_v8, %v8295_v53  ;;  %v8366_v30 = vpop.f32.mrb[106].mxu0  ;;  %8236 = vadd.xlane.f32.xlu0 %v16309_v3  ;;  %v16318_v62 = vadd.f32 %v8231_v31, %v15998_v7 }
0x3236   :  { %v16321_v22 = vadd.f32 %v8366_v30, %v8291_v1  ;;  %v8368_v54 = vpop.f32.mrb[107].mxu0  ;;  %v8531_v60 = vrot.slane %v16311_v29, 1  ;;  %v8543_v6 = vrot.slane %v16311_v29, 2  ;;  %v8563_v10 = vrot.slane %v16311_v29, 3 }
0x3237   :  { %18303 = vst [vmem:[#allocation163_spill] sm:$0xff] %v16318_v62  ;;  %v16326_v11 = vadd.f32 %v8368_v54, %v8295_v53  ;;  %8238 = vadd.xlane.f32.xlu1 %v16318_v62  ;;  %v8532_v15 = vrot.slane %v16314_v13, 1  ;;  %v8544_v7 = vrot.slane %v16314_v13, 2  ;;  %v8564_v0 = vrot.slane %v16314_v13, 3 }
0x3238   :  { %v8515_v31 = vrot.slane %v16321_v22, 7  ;;  %v16335_v9 = vsel %vm8280_vm9, %v8531_v60, %v16321_v22  ;;  %v8551_v24 = vrot.slane %v16321_v22, 1  ;;  %v8571_v32 = vrot.slane %v16321_v22, 2 }
0x3239   :  { %18304 = vst [vmem:[#allocation164_spill] sm:$0xff] %v16335_v9  ;;  %v8516_v1 = vrot.slane %v16326_v11, 7  ;;  %v16342_v55 = vsel %vm8280_vm9, %v8532_v15, %v16326_v11  ;;  %v8552_v53 = vrot.slane %v16326_v11, 1  ;;  %v8572_v8 = vrot.slane %v16326_v11, 2 }
0x323a   :  { %18305 = vst [vmem:[#allocation165_spill] sm:$0xff] %v16342_v55  ;;  %v16348_v30 = vsel %vm8280_vm9, %v16311_v29, %v8515_v31  ;;  %v16351_v54 = vsel %vm8280_vm9, %v8543_v6, %v8551_v24  ;;  %v16354_v60 = vsel %vm8280_vm9, %v8563_v10, %v8571_v32  ;;  %v8583_v9 = vrot.slane %v16311_v29, 4 }
0x323b   :  { %18306 = vst [vmem:[#allocation166_spill] sm:$0xff] %v16351_v54  ;;  %18307 = vst [vmem:[#allocation167_spill] sm:$0xff] %v16354_v60  ;;  %v8405_v44 = vpop.f32.mrb[108].mxu0  ;;  %v16359_v15 = vsel %vm8280_vm9, %v16314_v13, %v8516_v1  ;;  %v16362_v55 = vsel %vm8280_vm9, %v8544_v7, %v8552_v53  ;;  %v16365_v34 = vsel %vm8280_vm9, %v8564_v0, %v8572_v8  ;;  %v8591_v31 = vrot.slane %v16321_v22, 3 }
0x323c   :  { %18308 = vst [vmem:[#allocation168_spill] sm:$0xff] %v16362_v55  ;;  %18309 = vst [vmem:[#allocation169_spill] sm:$0xff] %v16365_v34  ;;  %v16368_v6 = vadd.f32 %v8405_v44, %v8299_v17  ;;  %v8407_v24 = vpop.f32.mrb[109].mxu0  ;;  %v8584_v10 = vrot.slane %v16314_v13, 4  ;;  %v8592_v32 = vrot.slane %v16326_v11, 3  ;;  %v8603_v60 = vrot.slane %v16311_v29, 5 }
0x323d   :  { %v16373_v54 = vadd.f32 %v8407_v24, %v8303_v21  ;;  %v8409_v1 = vpop.f32.mrb[110].mxu0  ;;  %v16376_v7 = vsel %vm8280_vm9, %v8583_v9, %v8591_v31  ;;  %v8611_v0 = vrot.slane %v16321_v22, 4  ;;  %v8604_v53 = vrot.slane %v16314_v13, 5 }
0x323e   :  { %18310 = vst [vmem:[#allocation170_spill] sm:$0xff] %v16376_v7  ;;  %v16380_v8 = vadd.f32 %v8409_v1, %v8299_v17  ;;  %v8411_v44 = vpop.f32.mrb[111].mxu0  ;;  %v8533_v34 = vrot.slane %v16368_v6, 1  ;;  %v8545_v55 = vrot.slane %v16368_v6, 2  ;;  %v8565_v46 = vrot.slane %v16368_v6, 3 }
0x323f   :  { %v16385_v47 = vadd.f32 %v8411_v44, %v8303_v21  ;;  %v8534_v24 = vrot.slane %v16373_v54, 1  ;;  %v8546_v9 = vrot.slane %v16373_v54, 2  ;;  %v8566_v31 = vrot.slane %v16373_v54, 3 }
0x3240   :  { %v8517_v7 = vrot.slane %v16380_v8, 7  ;;  %v16393_v17 = vsel %vm8280_vm9, %v8533_v34, %v16380_v8  ;;  %v8553_v1 = vrot.slane %v16380_v8, 1  ;;  %v8573_v62 = vrot.slane %v16380_v8, 2 }
0x3241   :  { %18311 = vst [vmem:[#allocation171_spill] sm:$0xff] %v16393_v17  ;;  %v8518_v3 = vrot.slane %v16385_v47, 7  ;;  %v16400_v21 = vsel %vm8280_vm9, %v8534_v24, %v16385_v47  ;;  %v8554_v44 = vrot.slane %v16385_v47, 1  ;;  %v8574_v2 = vrot.slane %v16385_v47, 2 }
0x3242   :  { %18312 = vst [vmem:[#allocation172_spill] sm:$0xff] %v16400_v21  ;;  %v8525_v59 = vsel %vm8280_vm9, %v16368_v6, %v8517_v7  ;;  %v16407_v34 = vsel %vm8280_vm9, %v8545_v55, %v8553_v1  ;;  %v16410_v17 = vsel %vm8280_vm9, %v8565_v46, %v8573_v62  ;;  %v8585_v63 = vrot.slane %v16368_v6, 4 }
0x3243   :  { %18313 = vst [vmem:[#allocation173_spill] sm:$0xff] %v16407_v34  ;;  %18314 = vst [vmem:[#allocation174_spill] sm:$0xff] %v16410_v17  ;;  %v8526_v56 = vsel %vm8280_vm9, %v16373_v54, %v8518_v3  ;;  %v16416_v24 = vsel %vm8280_vm9, %v8546_v9, %v8554_v44  ;;  %v16419_v21 = vsel %vm8280_vm9, %v8566_v31, %v8574_v2  ;;  %v8593_v39 = vrot.slane %v16380_v8, 3 }
0x3244   :  { %18315 = vst [vmem:[#allocation175_spill] sm:$0xff] %v16416_v24  ;;  %18316 = vst [vmem:[#allocation176_spill] sm:$0xff] %v16419_v21  ;;  %v16423_v7 = vsel %vm8280_vm9, %v8584_v10, %v8592_v32  ;;  %v8586_v55 = vrot.slane %v16373_v54, 4  ;;  %v8594_v46 = vrot.slane %v16385_v47, 3  ;;  %v16428_v62 = vsel %vm8280_vm9, %v8603_v60, %v8611_v0 }
0x3245   :  { %18317 = vst [vmem:[#allocation177_spill] sm:$0xff] %v16423_v7  ;;  %18318 = vst [vmem:[#allocation178_spill] sm:$0xff] %v16428_v62  ;;  %v16431_v3 = vsel %vm8280_vm9, %v8585_v63, %v8593_v39  ;;  %v8605_v9 = vrot.slane %v16368_v6, 5  ;;  %v8613_v2 = vrot.slane %v16380_v8, 4  ;;  %v8612_v31 = vrot.slane %v16326_v11, 4 }
0x3246   :  { %18319 = vst [vmem:[#allocation179_spill] sm:$0xff] %v16431_v3  ;;  %v16437_v1 = vsel %vm8280_vm9, %v8586_v55, %v8594_v46  ;;  %v8606_v10 = vrot.slane %v16373_v54, 5  ;;  %v8614_v32 = vrot.slane %v16385_v47, 4  ;;  %v8623_v44 = vrot.slane %v16311_v29, 6 }
0x3247   :  { %18320 = vst [vmem:[#allocation180_spill] sm:$0xff] %v16437_v1  ;;  %v16443_v60 = vsel %vm8280_vm9, %v8605_v9, %v8613_v2  ;;  %v16446_v39 = vsel %vm8280_vm9, %v8604_v53, %v8612_v31  ;;  %v8631_v63 = vrot.slane %v16321_v22, 5  ;;  %v8625_v0 = vrot.slane %v16368_v6, 6 }
0x3248   :  { %18321 = vst [vmem:[#allocation181_spill] sm:$0xff] %v16443_v60  ;;  %18322 = vst [vmem:[#allocation182_spill] sm:$0xff] %v16446_v39  ;;  %v16451_v62 = vsel %vm8280_vm9, %v8606_v10, %v8614_v32  ;;  %v8633_v55 = vrot.slane %v16380_v8, 5  ;;  %v8624_v46 = vrot.slane %v16314_v13, 6  ;;  %v8632_v1 = vrot.slane %v16326_v11, 5 }
0x3249   :  { %18323 = vst [vmem:[#allocation183_spill] sm:$0xff] %v16451_v62  ;;  %v16457_v7 = vsel %vm8280_vm9, %v8623_v44, %v8631_v63  ;;  %v8626_v9 = vrot.slane %v16373_v54, 6  ;;  %v8634_v53 = vrot.slane %v16385_v47, 5  ;;  %v8643_v2 = vrot.slane %v16311_v29, 7  ;;  %v18413_v17 = vld [vmem:[#allocation172_spill] sm:$0xff] }
0x324a   :  { %18324 = vst [vmem:[#allocation184_spill] sm:$0xff] %v16457_v7  ;;  %v16463_v31 = vsel %vm8280_vm9, %v8625_v0, %v8633_v55  ;;  %v16466_v10 = vsel %vm8280_vm9, %v8624_v46, %v8632_v1  ;;  %v8651_v32 = vrot.slane %v16321_v22, 6  ;;  %v8645_v62 = vrot.slane %v16368_v6, 7 }
0x324b   :  { %18325 = vst [vmem:[#allocation185_spill] sm:$0xff] %v16463_v31  ;;  %18326 = vst [vmem:[#allocation186_spill] sm:$0xff] %v16466_v10  ;;  %v8898_v39 = vpop.f32.mrb[88].mxu1  ;;  %v16471_v44 = vsel %vm8280_vm9, %v8626_v9, %v8634_v53  ;;  %v8653_v63 = vrot.slane %v16380_v8, 6  ;;  %v8644_v7 = vrot.slane %v16314_v13, 7  ;;  %v8652_v29 = vrot.slane %v16326_v11, 6 }
0x324c   :  { %18327 = vst [vmem:[#allocation187_spill] sm:$0xff] %v16471_v44  ;;  %v8907_v60 = vadd.f32 %v8898_v39, %v8525_v59  ;;  %v8900_v0 = vpop.f32.mrb[89].mxu1  ;;  %v16477_v55 = vsel %vm8280_vm9, %v8643_v2, %v8651_v32  ;;  %v8646_v1 = vrot.slane %v16373_v54, 7  ;;  %v8654_v22 = vrot.slane %v16385_v47, 6  ;;  %v18407_v10 = vld [vmem:[#allocation94_spill] sm:$0xff] }
0x324d   :  { %18328 = vst [vmem:[#allocation188_spill] sm:$0xff] %v16477_v55  ;;  %v8908_v6 = vadd.f32 %v8900_v0, %v8526_v56  ;;  %v8902_v46 = vpop.f32.mrb[90].mxu1  ;;  %v16482_v9 = vsel %vm8280_vm9, %v8645_v62, %v8653_v63  ;;  %v16485_v8 = vsel %vm8280_vm9, %v8644_v7, %v8652_v29  ;;  %v18405_v55 = vld [vmem:[#allocation97_spill] sm:$0xff] }
0x324e   :  { %18329 = vst [vmem:[#allocation189_spill] sm:$0xff] %v16482_v9  ;;  %18330 = vst [vmem:[#allocation190_spill] sm:$0xff] %v16485_v8  ;;  %v8903_v13 = vpop.f32.mrb[91].mxu1  ;;  %v16488_v11 = vsel %vm8280_vm9, %v8646_v1, %v8654_v22 }
0x324f   :  { %18331 = vst [vmem:[#allocation191_spill] sm:$0xff] %v16488_v11  ;;  %v11766_v62 = vmul.f32 -1.442695, %v8908_v6 }
0x325b   :  { %v8857_v59 = vpop.f32.mrb[112].mxu0 }
0x325c   :  { %v8905_v39 = vadd.f32 %v8857_v59, %v16348_v30  ;;  %v8859_v53 = vpop.f32.mrb[113].mxu0 }
0x325d   :  { %v8906_v54 = vadd.f32 %v8859_v53, %v16359_v15  ;;  %v8861_v2 = vpop.f32.mrb[114].mxu0 }
0x325e   :  { %v11764_v47 = vmul.f32 -1.442695, %v8905_v39  ;;  %v8862_v56 = vpop.f32.mrb[115].mxu0 }
0x325f   :  { %v11765_v32 = vmul.f32 -1.442695, %v8906_v54  ;;  %v18361_v56 = vld [vmem:[#allocation125_spill] sm:$0xff] }
0x3260   :  { %13408 = vpow2.f32 %v11764_v47  ;;  %v18360_v47 = vld [vmem:[#allocation124_spill] sm:$0xff] }
0x3261   :  { %13410 = vpow2.f32 %v11765_v32  ;;  %v18362_v32 = vld [vmem:[#allocation126_spill] sm:$0xff] }
0x3262   :  { %13412 = vpow2.f32 %v11766_v62  ;;  %v18363_v62 = vld [vmem:[#allocation127_spill] sm:$0xff] }
0x3263   :  { %13414 = vtanh.f32 %v8907_v60  ;;  %v18332_v60 = vmov 0  }
0x326a   :  { %v13409_v63 = vpop.eup %13408 }
0x326b   :  { %v13411_v7 = vpop.eup %13410  ;;  %v8912_v29 = vadd.f32 1.0, %v13409_v63  ;;  %v18364_v63 = vld [vmem:[#allocation163_spill] sm:$0xff] }
0x326c   :  { %v8918_v0 = vadd.f32 1.0, %v13411_v7  ;;  %v13413_v1 = vpop.eup %13412 }
0x326d   :  { %13416 = vrcp.f32 %v8912_v29  ;;  %v13415_v30 = vpop.eup %13414  ;;  %v8925_v15 = vadd.f32 1.0, %v13413_v1  ;;  %v18366_v1 = vld [vmem:[#allocation128_spill] sm:$0xff] }
0x326e   :  { %13418 = vrcp.f32 %v8918_v0 }
0x326f   :  { %13420 = vrcp.f32 %v8925_v15  ;;  %v18370_v15 = vld [vmem:[#allocation132_spill] sm:$0xff] }
0x3277   :  { %v13417_v22 = vpop.eup %13416 }
0x3278   :  { %v13419_v46 = vpop.eup %13418  ;;  %v8929_v13 = vmul.f32 %v13417_v22, %v13415_v30  ;;  %v18367_v30 = vld [vmem:[#allocation129_spill] sm:$0xff]  ;;  %v18368_v22 = vld [vmem:[#allocation130_spill] sm:$0xff] }
0x3279   :  { %v8928_v59 = vmul.f32 0.0, %v13419_v46  ;;  %v13421_v6 = vpop.eup %13420  ;;  %v18369_v46 = vld [vmem:[#allocation131_spill] sm:$0xff] }
0x327b   :  { %v16492_v39 = vadd.f32 %v8929_v13, %v8928_v59  ;;  %v18371_v13 = vld [vmem:[#allocation133_spill] sm:$0xff]  ;;  %v18372_v59 = vld [vmem:[#allocation134_spill] sm:$0xff] }
0x327d   :  { %13422 = vtanh.f32 %v16492_v39 }
0x3287   :  { %v13423_v53 = vpop.eup %13422 }
0x3288   :  { %v8932_v54 = vmul.f32 %v13423_v53, %v13421_v6  ;;  %v18373_v6 = vld [vmem:[#allocation135_spill] sm:$0xff]  ;;  %v18374_v53 = vld [vmem:[#allocation136_spill] sm:$0xff] }
0x328a   :  { %v8933_v2 = vpack.c.bf16 %v8932_v54, %v8932_v54  ;;  %v18375_v54 = vld [vmem:[#allocation137_spill] sm:$0xff] }
0x328c   :  { %9309 = vmatmul.mubr.bf16.vlgmr.msra.gmra.mrb[116].mxu0 %v8933_v2  ;;  %9350 = vmatmul.mubr.bf16.vlgmr.msra.gmra.mrb[92].mxu1 %v8933_v2 }
0x328d   :  { %9383 = vmatpush1.bf16.msra.mxu0 %v16040_v43  ;;  %9424 = vmatpush1.bf16.msra.mxu1 %v16009_v27  ;;  %v18333_v27 = vld [vmem:[#allocation99_spill] sm:$0xff] }
0x328e   :  { %9384 = vmatprep.subr.bf16.mxu0 %v16045_v33  ;;  %9425 = vmatprep.subr.bf16.mxu1 %v16011_v35  ;;  %v18334_v35 = vld [vmem:[#allocation100_spill] sm:$0xff]  ;;  %v18341_v43 = vld [vmem:[#allocation107_spill] sm:$0xff]  ;;  %v18343_v33 = vld [vmem:[#allocation109_spill] sm:$0xff] }
0x328f   :  { %9414 = vmatprep.mubr.bf16.mxu0 %v18332_v60  ;;  %9455 = vmatprep.mubr.bf16.mxu1 %v18332_v60 }
0x3291   :  { %9385 = vmatpush1.bf16.msra.mxu0 %v16053_v49  ;;  %9426 = vmatpush1.bf16.msra.mxu1 %v16014_v38  ;;  %v18335_v38 = vld [vmem:[#allocation101_spill] sm:$0xff]  ;;  %v18345_v49 = vld [vmem:[#allocation111_spill] sm:$0xff] }
0x3292   :  { %9386 = vmatprep.subr.bf16.mxu0 %v16059_v36  ;;  %9427 = vmatprep.subr.bf16.mxu1 %v16018_v42  ;;  %v18336_v42 = vld [vmem:[#allocation102_spill] sm:$0xff]  ;;  %v18347_v36 = vld [vmem:[#allocation113_spill] sm:$0xff] }
0x3295   :  { %9387 = vmatpush1.bf16.msra.mxu0 %v16066_v4  ;;  %9428 = vmatpush1.bf16.msra.mxu1 %v16022_v12  ;;  %v18337_v12 = vld [vmem:[#allocation103_spill] sm:$0xff] }
0x3296   :  { %9388 = vmatprep.subr.bf16.mxu0 %v16072_v25  ;;  %9429 = vmatprep.subr.bf16.mxu1 %v16025_v58  ;;  %v18338_v58 = vld [vmem:[#allocation104_spill] sm:$0xff]  ;;  %v18349_v4 = vld [vmem:[#allocation115_spill] sm:$0xff]  ;;  %v18351_v25 = vld [vmem:[#allocation117_spill] sm:$0xff] }
0x3299   :  { %9389 = vmatpush1.bf16.msra.mxu0 %v16078_v20  ;;  %9430 = vmatpush1.bf16.msra.mxu1 %v16032_v26  ;;  %v18339_v26 = vld [vmem:[#allocation105_spill] sm:$0xff]  ;;  %v18353_v20 = vld [vmem:[#allocation119_spill] sm:$0xff] }
0x329a   :  { %9390 = vmatprep.subr.bf16.mxu0 %v16084_v40  ;;  %9431 = vmatprep.subr.bf16.mxu1 %v16036_v23  ;;  %v18340_v23 = vld [vmem:[#allocation106_spill] sm:$0xff]  ;;  %v18355_v40 = vld [vmem:[#allocation121_spill] sm:$0xff] }
0x329d   :  { %9391 = vmatpush1.bf16.msra.mxu0 %v16088_v16  ;;  %9432 = vmatpush1.bf16.msra.mxu1 %v16042_v28  ;;  %v18342_v28 = vld [vmem:[#allocation108_spill] sm:$0xff] }
0x329e   :  { %9392 = vmatprep.subr.bf16.mxu0 %v16091_v5  ;;  %9433 = vmatprep.subr.bf16.mxu1 %v16047_v48  ;;  %v18344_v48 = vld [vmem:[#allocation110_spill] sm:$0xff] }
0x329f   :  { %v18356_v5 = vld [vmem:[#allocation122_spill] sm:$0xff] }
0x32a1   :  { %9393 = vmatpush1.bf16.msra.mxu0 %v16095_v18  ;;  %9434 = vmatpush1.bf16.msra.mxu1 %v16055_v37  ;;  %v18346_v37 = vld [vmem:[#allocation112_spill] sm:$0xff]  ;;  %v18357_v18 = vld [vmem:[#allocation123_spill] sm:$0xff] }
0x32a2   :  { %9394 = vmatprep.subr.bf16.mxu0 %v16098_v19  ;;  %9435 = vmatprep.subr.bf16.mxu1 %v16061_v41  ;;  %v18348_v41 = vld [vmem:[#allocation114_spill] sm:$0xff] }
0x32a5   :  { %9395 = vmatpush1.bf16.msra.mxu0 %v16101_v50  ;;  %9436 = vmatpush1.bf16.msra.mxu1 %v16068_v45  ;;  %v18350_v45 = vld [vmem:[#allocation116_spill] sm:$0xff] }
0x32a6   :  { %9396 = vmatprep.subr.bf16.mxu0 %v16104_v51  ;;  %9437 = vmatprep.subr.bf16.mxu1 %v16074_v61  ;;  %v18352_v61 = vld [vmem:[#allocation118_spill] sm:$0xff] }
0x32a7   :  { %v18358_v51 = vld [vmem:[#allocation162_spill] sm:$0xff] }
0x32a9   :  { %9397 = vmatpush1.bf16.msra.mxu0 %v16107_v52  ;;  %9438 = vmatpush1.bf16.msra.mxu1 %v16080_v14  ;;  %v18354_v14 = vld [vmem:[#allocation120_spill] sm:$0xff] }
0x32aa   :  { %9494 = vmatprep.subr.bf16.mxu0 %v16112_v57  ;;  %9535 = vmatprep.subr.bf16.mxu1 %v18333_v27  ;;  %v18377_v27 = vld [vmem:[#allocation139_spill] sm:$0xff] }
0x32ac   :  { %9415 = vmatmul.mubr.bf16.vlgmr.msra.gmra.mrb[120].mxu0 %v8933_v2  ;;  %9456 = vmatmul.mubr.bf16.vlgmr.msra.gmra.mrb[96].mxu1 %v8933_v2  ;;  %v18376_v2 = vld [vmem:[#allocation138_spill] sm:$0xff] }
0x32ad   :  { %9495 = vmatpush1.bf16.msra.mxu0 %v18334_v35  ;;  %9536 = vmatpush1.bf16.msra.mxu1 %v18335_v38  ;;  %v18378_v35 = vld [vmem:[#allocation140_spill] sm:$0xff]  ;;  %v18379_v38 = vld [vmem:[#allocation141_spill] sm:$0xff] }
0x32ae   :  { %9496 = vmatprep.subr.bf16.mxu0 %v18336_v42  ;;  %9537 = vmatprep.subr.bf16.mxu1 %v18337_v12  ;;  %v18380_v42 = vld [vmem:[#allocation142_spill] sm:$0xff]  ;;  %v18381_v12 = vld [vmem:[#allocation143_spill] sm:$0xff] }
0x32b1   :  { %9497 = vmatpush1.bf16.msra.mxu0 %v18338_v58  ;;  %9538 = vmatpush1.bf16.msra.mxu1 %v18339_v26  ;;  %v18382_v58 = vld [vmem:[#allocation144_spill] sm:$0xff]  ;;  %v18383_v26 = vld [vmem:[#allocation145_spill] sm:$0xff] }
0x32b2   :  { %9498 = vmatprep.subr.bf16.mxu0 %v18340_v23  ;;  %9539 = vmatprep.subr.bf16.mxu1 %v18341_v43  ;;  %v18384_v23 = vld [vmem:[#allocation146_spill] sm:$0xff]  ;;  %v18385_v43 = vld [vmem:[#allocation147_spill] sm:$0xff] }
0x32b5   :  { %9499 = vmatpush1.bf16.msra.mxu0 %v18342_v28  ;;  %9540 = vmatpush1.bf16.msra.mxu1 %v18343_v33  ;;  %v18386_v28 = vld [vmem:[#allocation148_spill] sm:$0xff]  ;;  %v18387_v33 = vld [vmem:[#allocation149_spill] sm:$0xff] }
0x32b6   :  { %9500 = vmatprep.subr.bf16.mxu0 %v18344_v48  ;;  %9541 = vmatprep.subr.bf16.mxu1 %v18345_v49  ;;  %v18388_v48 = vld [vmem:[#allocation150_spill] sm:$0xff]  ;;  %v18389_v49 = vld [vmem:[#allocation151_spill] sm:$0xff] }
0x32b9   :  { %9501 = vmatpush1.bf16.msra.mxu0 %v18346_v37  ;;  %9542 = vmatpush1.bf16.msra.mxu1 %v18347_v36  ;;  %v18390_v37 = vld [vmem:[#allocation152_spill] sm:$0xff]  ;;  %v18391_v36 = vld [vmem:[#allocation153_spill] sm:$0xff] }
0x32ba   :  { %9502 = vmatprep.subr.bf16.mxu0 %v18348_v41  ;;  %9543 = vmatprep.subr.bf16.mxu1 %v18349_v4  ;;  %v18392_v41 = vld [vmem:[#allocation154_spill] sm:$0xff]  ;;  %v18393_v4 = vld [vmem:[#allocation155_spill] sm:$0xff] }
0x32bd   :  { %9503 = vmatpush1.bf16.msra.mxu0 %v18350_v45  ;;  %9544 = vmatpush1.bf16.msra.mxu1 %v18351_v25  ;;  %v18394_v45 = vld [vmem:[#allocation156_spill] sm:$0xff]  ;;  %v18395_v25 = vld [vmem:[#allocation157_spill] sm:$0xff] }
0x32be   :  { %9504 = vmatprep.subr.bf16.mxu0 %v18352_v61  ;;  %9545 = vmatprep.subr.bf16.mxu1 %v18353_v20  ;;  %v18396_v61 = vld [vmem:[#allocation158_spill] sm:$0xff]  ;;  %v18397_v20 = vld [vmem:[#allocation159_spill] sm:$0xff] }
0x32c1   :  { %9505 = vmatpush1.bf16.msra.mxu0 %v18354_v14  ;;  %9546 = vmatpush1.bf16.msra.mxu1 %v18355_v40  ;;  %v18398_v14 = vld [vmem:[#allocation160_spill] sm:$0xff]  ;;  %v18399_v40 = vld [vmem:[#allocation161_spill] sm:$0xff] }
0x32c2   :  { %v8237_v16 = vpop.xlane.xlu0 %8236  ;;  %9506 = vmatprep.subr.bf16.mxu0 %v18356_v5  ;;  %9547 = vmatprep.subr.bf16.mxu1 %v18357_v18  ;;  %v16602_v5 = vld [vmem:[#allocation40 + $0xc] ss:$16 sps:$4 sm:$0xff]   ;;  %v8510_v18 = vld [vmem:[#allocation43] sm:$0xf] }
0x32c3   :  { %v8240_v19 = vmul.f32 0.0078125, %v8237_v16  ;;  %v18400_v16 = vld [vmem:[#allocation98_spill] sm:$0xff]  ;;  %v16614_v44 = vrot.slane %v8510_v18, %v18405_v55  ;;  %v16618_v31 = vrot.slane %v8510_v18, %v18407_v10 }
0x32c4   :  { %v8239_v50 = vpop.xlane.xlu1 %8238 }
0x32c5   :  { %v16554_v52 = vsub.f32 %v18358_v51, %v8240_v19  ;;  %v8241_v57 = vmul.f32 0.0078125, %v8239_v50  ;;  %9507 = vmatpush1.bf16.msra.mxu0 %v18360_v47  ;;  %9548 = vmatpush1.bf16.msra.mxu1 %v18361_v56  ;;  %v18401_v19 = vld [vmem:[#allocation96_spill] sm:$0xff]  ;;  %v18403_v51 = vld [vmem:[#allocation95_spill] sm:$0xff]  ;;  %18406 = vst [vmem:[#allocation103_spill] sm:$0xff] %v16614_v44  ;;  %18408 = vst [vmem:[#allocation104_spill] sm:$0xff] %v16618_v31 }
0x32c6   :  { %9508 = vmatprep.subr.bf16.mxu0 %v18362_v32  ;;  %9549 = vmatprep.subr.bf16.mxu1 %v18363_v62  ;;  %v16606_v50 = vrot.slane %v8510_v18, %v18401_v19 }
0x32c7   :  { %18359 = vst [vmem:[#allocation99_spill] sm:$0xff] %v16554_v52  ;;  %v16561_v7 = vsub.f32 %v18364_v63, %v8241_v57  ;;  %v8244_v29 = vmul.f32 %v16554_v52, %v16554_v52  ;;  %v16609_v57 = vrot.slane %v8510_v18, %v18403_v51 }
0x32c8   :  { %18402 = vst [vmem:[#allocation101_spill] sm:$0xff] %v16606_v50 }
0x32c9   :  { %18365 = vst [vmem:[#allocation100_spill] sm:$0xff] %v16561_v7  ;;  %8246 = vadd.xlane.f32.xlu0 %v8244_v29  ;;  %v8245_v0 = vmul.f32 %v16561_v7, %v16561_v7  ;;  %9509 = vmatpush1.bf16.msra.mxu0 %v18366_v1  ;;  %18404 = vst [vmem:[#allocation102_spill] sm:$0xff] %v16609_v57 }
0x32ca   :  { %9550 = vmatpush1.bf16.msra.mxu1 %v18367_v30  ;;  %9510 = vmatprep.subr.bf16.mxu0 %v18368_v22 }
0x32cb   :  { %8248 = vadd.xlane.f32.xlu1 %v8245_v0  ;;  %9551 = vmatprep.subr.bf16.mxu1 %v18369_v46 }
0x32cd   :  { %9511 = vmatpush1.bf16.msra.mxu0 %v18370_v15 }
0x32ce   :  { %9552 = vmatpush1.bf16.msra.mxu1 %v18371_v13  ;;  %9512 = vmatprep.subr.bf16.mxu0 %v18372_v59 }
0x32cf   :  { %9553 = vmatprep.subr.bf16.mxu1 %v18373_v6 }
0x32d1   :  { %9513 = vmatpush1.bf16.msra.mxu0 %v18374_v53 }
0x32d2   :  { %9554 = vmatpush1.bf16.msra.mxu1 %v18375_v54  ;;  %9514 = vmatprep.subr.bf16.mxu0 %v18376_v2 }
0x32d3   :  { %9555 = vmatprep.subr.bf16.mxu1 %v18377_v27 }
0x32d5   :  { %9515 = vmatpush1.bf16.msra.mxu0 %v18378_v35 }
0x32d6   :  { %9556 = vmatpush1.bf16.msra.mxu1 %v18379_v38  ;;  %9516 = vmatprep.subr.bf16.mxu0 %v18380_v42 }
0x32d7   :  { %9557 = vmatprep.subr.bf16.mxu1 %v18381_v12 }
0x32d9   :  { %9517 = vmatpush1.bf16.msra.mxu0 %v18382_v58 }
0x32da   :  { %9558 = vmatpush1.bf16.msra.mxu1 %v18383_v26  ;;  %9518 = vmatprep.subr.bf16.mxu0 %v18384_v23 }
0x32db   :  { %9559 = vmatprep.subr.bf16.mxu1 %v18385_v43 }
0x32dd   :  { %9519 = vmatpush1.bf16.msra.mxu0 %v18386_v28 }
0x32de   :  { %9560 = vmatpush1.bf16.msra.mxu1 %v18387_v33  ;;  %9520 = vmatprep.subr.bf16.mxu0 %v18388_v48 }
0x32df   :  { %9561 = vmatprep.subr.bf16.mxu1 %v18389_v49 }
0x32e1   :  { %9521 = vmatpush1.bf16.msra.mxu0 %v18390_v37 }
0x32e2   :  { %9562 = vmatpush1.bf16.msra.mxu1 %v18391_v36  ;;  %9522 = vmatprep.subr.bf16.mxu0 %v18392_v41 }
0x32e3   :  { %9563 = vmatprep.subr.bf16.mxu1 %v18393_v4 }
0x32e5   :  { %9523 = vmatpush1.bf16.msra.mxu0 %v18394_v45 }
0x32e6   :  { %9564 = vmatpush1.bf16.msra.mxu1 %v18395_v25  ;;  %9524 = vmatprep.subr.bf16.mxu0 %v18396_v61 }
0x32e7   :  { %9565 = vmatprep.subr.bf16.mxu1 %v18397_v20 }
0x32e9   :  { %9525 = vmatpush1.bf16.msra.mxu0 %v18398_v14 }
0x32ea   :  { %9566 = vmatpush1.bf16.msra.mxu1 %v18399_v40  ;;  %9600 = vmatprep.subr.bf16.mxu0 %v18400_v16 }
0x32eb   :  { %9641 = vmatprep.subr.bf16.mxu1 %v16602_v5 }
0x335f   :  { %v9310_v47 = vpop.f32.mrb[116].mxu0  ;;  %v9351_v56 = vpop.f32.mrb[92].mxu1 }
0x3360   :  { %v9311_v63 = vadd.f32 %v9310_v47, %v16606_v50  ;;  %v9312_v29 = vpop.f32.mrb[117].mxu0  ;;  %v9353_v0 = vpop.f32.mrb[93].mxu1  ;;  %v9352_v3 = vadd.f32 %v9351_v56, %v16618_v31  ;;  %v18410_v56 = vld [vmem:[#allocation164_spill] sm:$0xff] }
0x3361   :  { %v9313_v52 = vadd.f32 %v9312_v29, %v16609_v57  ;;  %v9314_v16 = vpop.f32.mrb[118].mxu0  ;;  %v9355_v7 = vpop.f32.mrb[94].mxu1  ;;  %v9354_v51 = vadd.f32 %v9353_v0, %v16614_v44 }
0x3362   :  { %v11831_v11 = vmul.f32 -1.442695, %v9311_v63  ;;  %v9315_v8 = vpop.f32.mrb[119].mxu0  ;;  %v9356_v9 = vpop.f32.mrb[95].mxu1 }
0x3363   :  { %v11832_v19 = vmul.f32 -1.442695, %v9313_v52  ;;  %v11833_v47 = vmul.f32 -1.442695, %v9354_v51 }
0x3364   :  { %13424 = vpow2.f32 %v11831_v11 }
0x3365   :  { %13426 = vpow2.f32 %v11832_v19 }
0x3366   :  { %13428 = vpow2.f32 %v11833_v47 }
0x3367   :  { %13430 = vtanh.f32 %v9352_v3 }
0x336e   :  { %v13425_v29 = vpop.eup %13424 }
0x336f   :  { %v13427_v16 = vpop.eup %13426  ;;  %v9361_v7 = vadd.f32 1.0, %v13425_v29  ;;  %v18411_v29 = vld [vmem:[#allocation171_spill] sm:$0xff] }
0x3370   :  { %v9367_v9 = vadd.f32 1.0, %v13427_v16  ;;  %v13429_v55 = vpop.eup %13428 }
0x3371   :  { %13432 = vrcp.f32 %v9361_v7  ;;  %v13431_v8 = vpop.eup %13430  ;;  %v9374_v0 = vadd.f32 1.0, %v13429_v55  ;;  %v18412_v7 = vld [vmem:[#allocation165_spill] sm:$0xff] }
0x3372   :  { %13434 = vrcp.f32 %v9367_v9 }
0x3373   :  { %13436 = vrcp.f32 %v9374_v0 }
0x337b   :  { %v13433_v11 = vpop.eup %13432 }
0x337c   :  { %v13435_v52 = vpop.eup %13434  ;;  %v9378_v63 = vmul.f32 %v13433_v11, %v13431_v8 }
0x337d   :  { %v9377_v19 = vmul.f32 0.0, %v13435_v52  ;;  %v13437_v0 = vpop.eup %13436 }
0x337f   :  { %v16621_v10 = vadd.f32 %v9378_v63, %v9377_v19  ;;  %v9416_v18 = vpop.f32.mrb[120].mxu0  ;;  %v9457_v51 = vpop.f32.mrb[96].mxu1 }
0x3380   :  { %v9464_v21 = vadd.f32 %v9416_v18, %v18410_v56  ;;  %v9466_v47 = vadd.f32 %v9457_v51, %v18411_v29  ;;  %v9418_v3 = vpop.f32.mrb[121].mxu0  ;;  %v9459_v16 = vpop.f32.mrb[97].mxu1 }
0x3381   :  { %18409 = vst [vmem:[#allocation105_spill] sm:$0xff] %v16621_v10  ;;  %13438 = vtanh.f32 %v16621_v10  ;;  %v9465_v9 = vadd.f32 %v9418_v3, %v18412_v7  ;;  %v9467_v24 = vadd.f32 %v9459_v16, %v18413_v17  ;;  %v9420_v8 = vpop.f32.mrb[122].mxu0  ;;  %v9461_v55 = vpop.f32.mrb[98].mxu1 }
0x3382   :  { %v11834_v11 = vmul.f32 -1.442695, %v9464_v21  ;;  %v9421_v52 = vpop.f32.mrb[123].mxu0  ;;  %v9462_v63 = vpop.f32.mrb[99].mxu1 }
0x3383   :  { %v11835_v19 = vmul.f32 -1.442695, %v9465_v9  ;;  %v11836_v56 = vmul.f32 -1.442695, %v9467_v24  ;;  %v16645_v63 = vld [vmem:[#allocation40 + $0x2c] ss:$16 sps:$4 sm:$0xff]  }
0x3384   :  { %13440 = vpow2.f32 %v11834_v11 }
0x3385   :  { %13442 = vpow2.f32 %v11835_v19  ;;  %v16650_v19 = vld [vmem:[#allocation40 + $0x20] ss:$16 sps:$4 sm:$0xff]  }
0x3386   :  { %13444 = vpow2.f32 %v11836_v56  ;;  %v16659_v56 = vld [vmem:[#allocation40 + $0x4c] ss:$16 sps:$4 sm:$0xff]  }
0x3387   :  { %13446 = vtanh.f32 %v9466_v47 }
0x338b   :  { %v13439_v18 = vpop.eup %13438 }
0x338c   :  { %v9381_v51 = vmul.f32 %v13439_v18, %v13437_v0  ;;  %v16653_v0 = vld [vmem:[#allocation40 + $0x28] ss:$16 sps:$4 sm:$0xff]   ;;  %v16656_v18 = vld [vmem:[#allocation40 + $0x44] ss:$16 sps:$4 sm:$0xff]  }
0x338e   :  { %v13441_v29 = vpop.eup %13440  ;;  %v9493_v34 = vpack.c.bf16 %v9381_v51, %v9381_v51  ;;  %v16662_v51 = vld [vmem:[#allocation40 + $0x40] ss:$16 sps:$4 sm:$0xff]  }
0x338f   :  { %v13443_v31 = vpop.eup %13442  ;;  %v9471_v10 = vadd.f32 1.0, %v13441_v29  ;;  %v16665_v29 = vld [vmem:[#allocation40 + $0x48] ss:$16 sps:$4 sm:$0xff]  }
0x3390   :  { %v9477_v3 = vadd.f32 1.0, %v13443_v31  ;;  %9526 = vmatprep.mubr.bf16.mxu0 %v9493_v34  ;;  %9567 = vmatprep.mubr.bf16.mxu1 %v9493_v34  ;;  %v13445_v17 = vpop.eup %13444  ;;  %v16636_v34 = vld [vmem:[#allocation40] ss:$16 sps:$4 sm:$0xff]  }
0x3391   :  { %13448 = vrcp.f32 %v9471_v10  ;;  %v13447_v21 = vpop.eup %13446  ;;  %v9484_v8 = vadd.f32 1.0, %v13445_v17  ;;  %v16639_v10 = vld [vmem:[#allocation40 + $0x8] ss:$16 sps:$4 sm:$0xff]   ;;  %v16671_v17 = vld [vmem:[#allocation40 + $0x6c] ss:$16 sps:$4 sm:$0xff]  }
0x3392   :  { %13450 = vrcp.f32 %v9477_v3  ;;  %v16668_v3 = vld [vmem:[#allocation40 + $0x64] ss:$16 sps:$4 sm:$0xff]  }
0x3393   :  { %13452 = vrcp.f32 %v9484_v8  ;;  %v16686_v8 = vld [vmem:[#allocation40 + $0x80] ss:$16 sps:$4 sm:$0xff]  }
0x3394   :  { %18415 = vst [vmem:[#allocation107_spill] sm:$0xff] %v16686_v8 }
0x339b   :  { %v13449_v16 = vpop.eup %13448 }
0x339c   :  { %v13451_v7 = vpop.eup %13450  ;;  %v9488_v9 = vmul.f32 %v13449_v16, %v13447_v21  ;;  %v16674_v21 = vld [vmem:[#allocation40 + $0x60] ss:$16 sps:$4 sm:$0xff]   ;;  %v16677_v16 = vld [vmem:[#allocation40 + $0x68] ss:$16 sps:$4 sm:$0xff]  }
0x339d   :  { %v9487_v24 = vmul.f32 %v13451_v7, %v16492_v39  ;;  %v13453_v11 = vpop.eup %13452  ;;  %v16642_v39 = vld [vmem:[#allocation40 + $0x24] ss:$16 sps:$4 sm:$0xff]  }
0x339e   :  { %v16680_v7 = vld [vmem:[#allocation40 + $0x84] ss:$16 sps:$4 sm:$0xff]  }
0x339f   :  { %v16629_v55 = vadd.f32 %v9488_v9, %v9487_v24  ;;  %v16683_v9 = vld [vmem:[#allocation40 + $0x8c] ss:$16 sps:$4 sm:$0xff]   ;;  %v16689_v24 = vld [vmem:[#allocation40 + $0x88] ss:$16 sps:$4 sm:$0xff]  }
0x33a0   :  { %18414 = vst [vmem:[#allocation106_spill] sm:$0xff] %v16683_v9  ;;  %18416 = vst [vmem:[#allocation108_spill] sm:$0xff] %v16689_v24 }
0x33a1   :  { %13454 = vtanh.f32 %v16629_v55 }
0x33ab   :  { %v13455_v47 = vpop.eup %13454 }
0x33ac   :  { %v9491_v31 = vmul.f32 %v13455_v47, %v13453_v11  ;;  %v16692_v11 = vld [vmem:[#allocation40 + $0xa4] ss:$16 sps:$4 sm:$0xff]   ;;  %v16695_v47 = vld [vmem:[#allocation40 + $0xac] ss:$16 sps:$4 sm:$0xff]  }
0x33ad   :  { %18417 = vst [vmem:[#allocation109_spill] sm:$0xff] %v16692_v11  ;;  %18418 = vst [vmem:[#allocation110_spill] sm:$0xff] %v16695_v47 }
0x33ae   :  { %v16632_v52 = vpack.c.bf16 %v9491_v31, %v9491_v31  ;;  %v16698_v31 = vld [vmem:[#allocation40 + $0xa0] ss:$16 sps:$4 sm:$0xff]  }
0x33af   :  { %18419 = vst [vmem:[#allocation111_spill] sm:$0xff] %v16698_v31 }
0x33b0   :  { %9527 = vmatmul.mubr.bf16.vlgmr.msra.gmra.mrb[124].mxu0 %v16632_v52  ;;  %9568 = vmatmul.mubr.bf16.vlgmr.msra.gmra.mrb[100].mxu1 %v16632_v52 }
0x33b1   :  { %9601 = vmatpush1.bf16.msra.mxu0 %v16636_v34  ;;  %9642 = vmatpush1.bf16.msra.mxu1 %v16639_v10 }
0x33b2   :  { %9602 = vmatprep.subr.bf16.mxu0 %v16642_v39  ;;  %9643 = vmatprep.subr.bf16.mxu1 %v16645_v63 }
0x33b3   :  { %9632 = vmatprep.mubr.bf16.mxu0 %v18332_v60  ;;  %9673 = vmatprep.mubr.bf16.mxu1 %v18332_v60 }
0x33b5   :  { %9603 = vmatpush1.bf16.msra.mxu0 %v16650_v19  ;;  %9644 = vmatpush1.bf16.msra.mxu1 %v16653_v0 }
0x33b6   :  { %9604 = vmatprep.subr.bf16.mxu0 %v16656_v18  ;;  %9645 = vmatprep.subr.bf16.mxu1 %v16659_v56 }
0x33b9   :  { %9605 = vmatpush1.bf16.msra.mxu0 %v16662_v51  ;;  %9646 = vmatpush1.bf16.msra.mxu1 %v16665_v29 }
0x33ba   :  { %9606 = vmatprep.subr.bf16.mxu0 %v16668_v3  ;;  %9647 = vmatprep.subr.bf16.mxu1 %v16671_v17 }
0x33bd   :  { %9607 = vmatpush1.bf16.msra.mxu0 %v16674_v21  ;;  %9648 = vmatpush1.bf16.msra.mxu1 %v16677_v16 }
0x33be   :  { %9608 = vmatprep.subr.bf16.mxu0 %v16680_v7  ;;  %9649 = vmatprep.subr.bf16.mxu1 %v16683_v9  ;;  %v16701_v9 = vld [vmem:[#allocation40 + $0xa8] ss:$16 sps:$4 sm:$0xff]  }
0x33bf   :  { %18420 = vst [vmem:[#allocation112_spill] sm:$0xff] %v16701_v9 }
0x33c1   :  { %9609 = vmatpush1.bf16.msra.mxu0 %v16686_v8  ;;  %9650 = vmatpush1.bf16.msra.mxu1 %v16689_v24  ;;  %v16704_v8 = vld [vmem:[#allocation40 + $0xc4] ss:$16 sps:$4 sm:$0xff]   ;;  %v16707_v24 = vld [vmem:[#allocation40 + $0xcc] ss:$16 sps:$4 sm:$0xff]  }
0x33c2   :  { %9610 = vmatprep.subr.bf16.mxu0 %v16692_v11  ;;  %9651 = vmatprep.subr.bf16.mxu1 %v16695_v47  ;;  %18421 = vst [vmem:[#allocation113_spill] sm:$0xff] %v16704_v8  ;;  %18422 = vst [vmem:[#allocation114_spill] sm:$0xff] %v16707_v24  ;;  %v16710_v11 = vld [vmem:[#allocation40 + $0xc0] ss:$16 sps:$4 sm:$0xff]   ;;  %v16713_v47 = vld [vmem:[#allocation40 + $0xc8] ss:$16 sps:$4 sm:$0xff]  }
0x33c3   :  { %18423 = vst [vmem:[#allocation115_spill] sm:$0xff] %v16710_v11  ;;  %18424 = vst [vmem:[#allocation116_spill] sm:$0xff] %v16713_v47 }
0x33c5   :  { %9611 = vmatpush1.bf16.msra.mxu0 %v16698_v31  ;;  %9652 = vmatpush1.bf16.msra.mxu1 %v16701_v9  ;;  %v16716_v31 = vld [vmem:[#allocation40 + $0xe4] ss:$16 sps:$4 sm:$0xff]   ;;  %v16719_v9 = vld [vmem:[#allocation40 + $0xec] ss:$16 sps:$4 sm:$0xff]  }
0x33c6   :  { %9612 = vmatprep.subr.bf16.mxu0 %v16704_v8  ;;  %9653 = vmatprep.subr.bf16.mxu1 %v16707_v24  ;;  %18425 = vst [vmem:[#allocation117_spill] sm:$0xff] %v16719_v9  ;;  %v16722_v8 = vld [vmem:[#allocation40 + $0xe0] ss:$16 sps:$4 sm:$0xff]   ;;  %v16725_v24 = vld [vmem:[#allocation40 + $0xe8] ss:$16 sps:$4 sm:$0xff]  }
0x33c7   :  { %18426 = vst [vmem:[#allocation118_spill] sm:$0xff] %v16722_v8  ;;  %18427 = vst [vmem:[#allocation119_spill] sm:$0xff] %v16725_v24 }
0x33c9   :  { %9613 = vmatpush1.bf16.msra.mxu0 %v16710_v11  ;;  %9654 = vmatpush1.bf16.msra.mxu1 %v16713_v47  ;;  %v16728_v11 = vld [vmem:[#allocation41 + $0x4] ss:$16 sps:$4 sm:$0xff]   ;;  %v16731_v47 = vld [vmem:[#allocation41 + $0xc] ss:$16 sps:$4 sm:$0xff]  }
0x33ca   :  { %9614 = vmatprep.subr.bf16.mxu0 %v16716_v31  ;;  %9655 = vmatprep.subr.bf16.mxu1 %v16719_v9  ;;  %18428 = vst [vmem:[#allocation120_spill] sm:$0xff] %v16728_v11  ;;  %18429 = vst [vmem:[#allocation121_spill] sm:$0xff] %v16731_v47  ;;  %v16736_v9 = vld [vmem:[#allocation41] ss:$16 sps:$4 sm:$0xff]  }
0x33cb   :  { %18430 = vst [vmem:[#allocation122_spill] sm:$0xff] %v16736_v9 }
0x33cd   :  { %9615 = vmatpush1.bf16.msra.mxu0 %v16722_v8  ;;  %9656 = vmatpush1.bf16.msra.mxu1 %v16725_v24  ;;  %v16739_v8 = vld [vmem:[#allocation41 + $0x8] ss:$16 sps:$4 sm:$0xff]   ;;  %v16742_v24 = vld [vmem:[#allocation41 + $0x24] ss:$16 sps:$4 sm:$0xff]  }
0x33ce   :  { %9712 = vmatprep.subr.bf16.mxu0 %v16728_v11  ;;  %9753 = vmatprep.subr.bf16.mxu1 %v16731_v47  ;;  %18431 = vst [vmem:[#allocation123_spill] sm:$0xff] %v16739_v8  ;;  %18432 = vst [vmem:[#allocation162_spill] sm:$0xff] %v16742_v24  ;;  %v16745_v11 = vld [vmem:[#allocation41 + $0x2c] ss:$16 sps:$4 sm:$0xff]   ;;  %v16748_v47 = vld [vmem:[#allocation41 + $0x20] ss:$16 sps:$4 sm:$0xff]  }
0x33cf   :  { %18433 = vst [vmem:[#allocation124_spill] sm:$0xff] %v16745_v11  ;;  %18434 = vst [vmem:[#allocation125_spill] sm:$0xff] %v16748_v47 }
0x33d0   :  { %9633 = vmatmul.mubr.bf16.vlgmr.msra.gmra.mrb[128].mxu0 %v16632_v52  ;;  %9674 = vmatmul.mubr.bf16.vlgmr.msra.gmra.mrb[104].mxu1 %v16632_v52  ;;  %v16751_v52 = vld [vmem:[#allocation41 + $0x28] ss:$16 sps:$4 sm:$0xff]  }
0x33d1   :  { %9713 = vmatpush1.bf16.msra.mxu0 %v16736_v9  ;;  %9754 = vmatpush1.bf16.msra.mxu1 %v16739_v8  ;;  %18435 = vst [vmem:[#allocation126_spill] sm:$0xff] %v16751_v52  ;;  %v16754_v9 = vld [vmem:[#allocation41 + $0x44] ss:$16 sps:$4 sm:$0xff]   ;;  %v16757_v8 = vld [vmem:[#allocation41 + $0x4c] ss:$16 sps:$4 sm:$0xff]  }
0x33d2   :  { %9714 = vmatprep.subr.bf16.mxu0 %v16742_v24  ;;  %9755 = vmatprep.subr.bf16.mxu1 %v16745_v11  ;;  %18436 = vst [vmem:[#allocation127_spill] sm:$0xff] %v16754_v9  ;;  %18437 = vst [vmem:[#allocation163_spill] sm:$0xff] %v16757_v8  ;;  %v16760_v24 = vld [vmem:[#allocation41 + $0x40] ss:$16 sps:$4 sm:$0xff]   ;;  %v16763_v11 = vld [vmem:[#allocation41 + $0x48] ss:$16 sps:$4 sm:$0xff]  }
0x33d3   :  { %18438 = vst [vmem:[#allocation128_spill] sm:$0xff] %v16760_v24  ;;  %18439 = vst [vmem:[#allocation129_spill] sm:$0xff] %v16763_v11 }
0x33d5   :  { %9715 = vmatpush1.bf16.msra.mxu0 %v16748_v47  ;;  %9756 = vmatpush1.bf16.msra.mxu1 %v16751_v52  ;;  %v16766_v47 = vld [vmem:[#allocation41 + $0x64] ss:$16 sps:$4 sm:$0xff]   ;;  %v16769_v52 = vld [vmem:[#allocation41 + $0x6c] ss:$16 sps:$4 sm:$0xff]  }
0x33d6   :  { %9716 = vmatprep.subr.bf16.mxu0 %v16754_v9  ;;  %9757 = vmatprep.subr.bf16.mxu1 %v16757_v8  ;;  %18440 = vst [vmem:[#allocation130_spill] sm:$0xff] %v16766_v47  ;;  %18441 = vst [vmem:[#allocation131_spill] sm:$0xff] %v16769_v52  ;;  %v16772_v9 = vld [vmem:[#allocation41 + $0x60] ss:$16 sps:$4 sm:$0xff]   ;;  %v16775_v8 = vld [vmem:[#allocation41 + $0x68] ss:$16 sps:$4 sm:$0xff]  }
0x33d7   :  { %18442 = vst [vmem:[#allocation132_spill] sm:$0xff] %v16772_v9  ;;  %18443 = vst [vmem:[#allocation133_spill] sm:$0xff] %v16775_v8 }
0x33d9   :  { %9717 = vmatpush1.bf16.msra.mxu0 %v16760_v24  ;;  %9758 = vmatpush1.bf16.msra.mxu1 %v16763_v11  ;;  %v16778_v24 = vld [vmem:[#allocation41 + $0x84] ss:$16 sps:$4 sm:$0xff]   ;;  %v16781_v11 = vld [vmem:[#allocation41 + $0x8c] ss:$16 sps:$4 sm:$0xff]  }
0x33da   :  { %9718 = vmatprep.subr.bf16.mxu0 %v16766_v47  ;;  %9759 = vmatprep.subr.bf16.mxu1 %v16769_v52  ;;  %18444 = vst [vmem:[#allocation134_spill] sm:$0xff] %v16778_v24  ;;  %18445 = vst [vmem:[#allocation135_spill] sm:$0xff] %v16781_v11  ;;  %v16784_v47 = vld [vmem:[#allocation41 + $0x80] ss:$16 sps:$4 sm:$0xff]   ;;  %v16787_v52 = vld [vmem:[#allocation41 + $0x88] ss:$16 sps:$4 sm:$0xff]  }
0x33db   :  { %18446 = vst [vmem:[#allocation136_spill] sm:$0xff] %v16784_v47  ;;  %18447 = vst [vmem:[#allocation137_spill] sm:$0xff] %v16787_v52 }
0x33dd   :  { %9719 = vmatpush1.bf16.msra.mxu0 %v16772_v9  ;;  %9760 = vmatpush1.bf16.msra.mxu1 %v16775_v8  ;;  %v16790_v9 = vld [vmem:[#allocation41 + $0xa4] ss:$16 sps:$4 sm:$0xff]   ;;  %v16793_v8 = vld [vmem:[#allocation41 + $0xac] ss:$16 sps:$4 sm:$0xff]  }
0x33de   :  { %9720 = vmatprep.subr.bf16.mxu0 %v16778_v24  ;;  %9761 = vmatprep.subr.bf16.mxu1 %v16781_v11  ;;  %18448 = vst [vmem:[#allocation138_spill] sm:$0xff] %v16790_v9  ;;  %18449 = vst [vmem:[#allocation139_spill] sm:$0xff] %v16793_v8  ;;  %v16796_v24 = vld [vmem:[#allocation41 + $0xa0] ss:$16 sps:$4 sm:$0xff]   ;;  %v16799_v11 = vld [vmem:[#allocation41 + $0xa8] ss:$16 sps:$4 sm:$0xff]  }
0x33df   :  { %18450 = vst [vmem:[#allocation140_spill] sm:$0xff] %v16796_v24  ;;  %18451 = vst [vmem:[#allocation141_spill] sm:$0xff] %v16799_v11 }
0x33e1   :  { %9721 = vmatpush1.bf16.msra.mxu0 %v16784_v47  ;;  %9762 = vmatpush1.bf16.msra.mxu1 %v16787_v52  ;;  %v16802_v47 = vld [vmem:[#allocation41 + $0xc4] ss:$16 sps:$4 sm:$0xff]   ;;  %v16805_v52 = vld [vmem:[#allocation41 + $0xcc] ss:$16 sps:$4 sm:$0xff]  }
0x33e2   :  { %9722 = vmatprep.subr.bf16.mxu0 %v16790_v9  ;;  %9763 = vmatprep.subr.bf16.mxu1 %v16793_v8  ;;  %18452 = vst [vmem:[#allocation142_spill] sm:$0xff] %v16802_v47  ;;  %18453 = vst [vmem:[#allocation143_spill] sm:$0xff] %v16805_v52  ;;  %v16808_v9 = vld [vmem:[#allocation41 + $0xc0] ss:$16 sps:$4 sm:$0xff]   ;;  %v16811_v8 = vld [vmem:[#allocation41 + $0xc8] ss:$16 sps:$4 sm:$0xff]  }
0x33e3   :  { %18454 = vst [vmem:[#allocation144_spill] sm:$0xff] %v16808_v9  ;;  %18455 = vst [vmem:[#allocation145_spill] sm:$0xff] %v16811_v8 }
0x33e5   :  { %9723 = vmatpush1.bf16.msra.mxu0 %v16796_v24  ;;  %9764 = vmatpush1.bf16.msra.mxu1 %v16799_v11 }
0x33e6   :  { %9724 = vmatprep.subr.bf16.mxu0 %v16802_v47  ;;  %9765 = vmatprep.subr.bf16.mxu1 %v16805_v52 }
0x33e9   :  { %9725 = vmatpush1.bf16.msra.mxu0 %v16808_v9  ;;  %9766 = vmatpush1.bf16.msra.mxu1 %v16811_v8 }
0x33ea   :  { %9726 = vmatprep.subr.bf16.mxu0 %v18362_v32  ;;  %9767 = vmatprep.subr.bf16.mxu1 %v18363_v62  ;;  %v16850_v32 = vld [vmem:[#allocation40 + $0x4] ss:$16 sps:$4 sm:$0xff]  }
0x33eb   :  { %18456 = vst [vmem:[#allocation146_spill] sm:$0xff] %v16850_v32 }
0x33ed   :  { %9727 = vmatpush1.bf16.msra.mxu0 %v18366_v1  ;;  %9768 = vmatpush1.bf16.msra.mxu1 %v18367_v30 }
0x33ee   :  { %9728 = vmatprep.subr.bf16.mxu0 %v18368_v22  ;;  %9769 = vmatprep.subr.bf16.mxu1 %v18369_v46 }
0x33f1   :  { %9729 = vmatpush1.bf16.msra.mxu0 %v18370_v15  ;;  %9770 = vmatpush1.bf16.msra.mxu1 %v18371_v13 }
0x33f2   :  { %9730 = vmatprep.subr.bf16.mxu0 %v18372_v59  ;;  %9771 = vmatprep.subr.bf16.mxu1 %v18373_v6 }
0x33f5   :  { %9731 = vmatpush1.bf16.msra.mxu0 %v18374_v53  ;;  %9772 = vmatpush1.bf16.msra.mxu1 %v18375_v54 }
0x33f6   :  { %9732 = vmatprep.subr.bf16.mxu0 %v18376_v2  ;;  %9773 = vmatprep.subr.bf16.mxu1 %v18377_v27 }
0x33f9   :  { %9733 = vmatpush1.bf16.msra.mxu0 %v18378_v35  ;;  %9774 = vmatpush1.bf16.msra.mxu1 %v18379_v38  ;;  %v18457_v38 = vld [vmem:[#allocation104_spill] sm:$0xff] }
0x33fa   :  { %9734 = vmatprep.subr.bf16.mxu0 %v18380_v42  ;;  %9775 = vmatprep.subr.bf16.mxu1 %v18381_v12 }
0x33fd   :  { %9735 = vmatpush1.bf16.msra.mxu0 %v18382_v58  ;;  %9776 = vmatpush1.bf16.msra.mxu1 %v18383_v26 }
0x33fe   :  { %9736 = vmatprep.subr.bf16.mxu0 %v18384_v23  ;;  %9777 = vmatprep.subr.bf16.mxu1 %v18385_v43 }
0x3401   :  { %9737 = vmatpush1.bf16.msra.mxu0 %v18386_v28  ;;  %9778 = vmatpush1.bf16.msra.mxu1 %v18387_v33 }
0x3402   :  { %9738 = vmatprep.subr.bf16.mxu0 %v18388_v48  ;;  %9779 = vmatprep.subr.bf16.mxu1 %v18389_v49 }
0x3405   :  { %9739 = vmatpush1.bf16.msra.mxu0 %v18390_v37  ;;  %9780 = vmatpush1.bf16.msra.mxu1 %v18391_v36  ;;  %v18458_v36 = vld [vmem:[#allocation105_spill] sm:$0xff] }
0x3406   :  { %9740 = vmatprep.subr.bf16.mxu0 %v18392_v41  ;;  %9781 = vmatprep.subr.bf16.mxu1 %v18393_v4 }
0x3409   :  { %9741 = vmatpush1.bf16.msra.mxu0 %v18394_v45  ;;  %9782 = vmatpush1.bf16.msra.mxu1 %v18395_v25 }
0x340a   :  { %9742 = vmatprep.subr.bf16.mxu0 %v18396_v61  ;;  %9783 = vmatprep.subr.bf16.mxu1 %v18397_v20  ;;  %v18459_v61 = vld [vmem:[#allocation166_spill] sm:$0xff] }
0x340d   :  { %9743 = vmatpush1.bf16.msra.mxu0 %v18398_v14  ;;  %9784 = vmatpush1.bf16.msra.mxu1 %v18399_v40  ;;  %v18460_v14 = vld [vmem:[#allocation173_spill] sm:$0xff] }
0x340e   :  { %9818 = vmatprep.subr.bf16.mxu0 %v16850_v32  ;;  %9859 = vmatprep.subr.bf16.mxu1 %v16602_v5 }
0x3483   :  { %v9528_v62 = vpop.f32.mrb[124].mxu0  ;;  %v9569_v1 = vpop.f32.mrb[100].mxu1 }
0x3484   :  { %v9529_v30 = vadd.f32 %v9528_v62, %v16606_v50  ;;  %v9530_v22 = vpop.f32.mrb[125].mxu0  ;;  %v9571_v46 = vpop.f32.mrb[101].mxu1  ;;  %v9570_v42 = vadd.f32 %v9569_v1, %v18457_v38 }
0x3485   :  { %v9531_v15 = vadd.f32 %v9530_v22, %v16609_v57  ;;  %v9532_v13 = vpop.f32.mrb[126].mxu0  ;;  %v9573_v59 = vpop.f32.mrb[102].mxu1  ;;  %v9572_v27 = vadd.f32 %v9571_v46, %v16614_v44  ;;  %v18462_v46 = vld [vmem:[#allocation175_spill] sm:$0xff] }
0x3486   :  { %v11837_v6 = vmul.f32 -1.442695, %v9529_v30  ;;  %v9533_v53 = vpop.f32.mrb[127].mxu0  ;;  %v9574_v54 = vpop.f32.mrb[103].mxu1  ;;  %v18461_v30 = vld [vmem:[#allocation168_spill] sm:$0xff] }
0x3487   :  { %v11838_v2 = vmul.f32 -1.442695, %v9531_v15  ;;  %v11839_v35 = vmul.f32 -1.442695, %v9572_v27 }
0x3488   :  { %13456 = vpow2.f32 %v11837_v6 }
0x3489   :  { %13458 = vpow2.f32 %v11838_v2 }
0x348a   :  { %13460 = vpow2.f32 %v11839_v35 }
0x348b   :  { %13462 = vtanh.f32 %v9570_v42 }
0x3492   :  { %v13457_v12 = vpop.eup %13456 }
0x3493   :  { %v13459_v58 = vpop.eup %13458  ;;  %v9579_v26 = vadd.f32 1.0, %v13457_v12 }
0x3494   :  { %v9585_v23 = vadd.f32 1.0, %v13459_v58  ;;  %v13461_v43 = vpop.eup %13460 }
0x3495   :  { %13464 = vrcp.f32 %v9579_v26  ;;  %v13463_v28 = vpop.eup %13462  ;;  %v9592_v37 = vadd.f32 1.0, %v13461_v43 }
0x3496   :  { %13466 = vrcp.f32 %v9585_v23 }
0x3497   :  { %13468 = vrcp.f32 %v9592_v37 }
0x349f   :  { %v13465_v33 = vpop.eup %13464 }
0x34a0   :  { %v13467_v48 = vpop.eup %13466  ;;  %v9596_v49 = vmul.f32 %v13465_v33, %v13463_v28 }
0x34a1   :  { %v9595_v41 = vmul.f32 %v13467_v48, %v18458_v36  ;;  %v13469_v27 = vpop.eup %13468 }
0x34a3   :  { %v9634_v4 = vpop.f32.mrb[128].mxu0  ;;  %v9675_v45 = vpop.f32.mrb[104].mxu1  ;;  %v16859_v25 = vadd.f32 %v9596_v49, %v9595_v41 }
0x34a4   :  { %v9682_v20 = vadd.f32 %v9634_v4, %v18459_v61  ;;  %v9684_v40 = vadd.f32 %v9675_v45, %v18460_v14  ;;  %v9636_v62 = vpop.f32.mrb[129].mxu0  ;;  %v9677_v1 = vpop.f32.mrb[105].mxu1 }
0x34a5   :  { %v9683_v22 = vadd.f32 %v9636_v62, %v18461_v30  ;;  %v9685_v15 = vadd.f32 %v9677_v1, %v18462_v46  ;;  %v9638_v13 = vpop.f32.mrb[130].mxu0  ;;  %v9679_v59 = vpop.f32.mrb[106].mxu1  ;;  %13470 = vtanh.f32 %v16859_v25  ;;  %v18464_v62 = vld [vmem:[#allocation107_spill] sm:$0xff]  ;;  %v18465_v1 = vld [vmem:[#allocation108_spill] sm:$0xff]  ;;  %v18466_v30 = vld [vmem:[#allocation109_spill] sm:$0xff] }
0x34a6   :  { %v11840_v6 = vmul.f32 -1.442695, %v9682_v20  ;;  %v9639_v53 = vpop.f32.mrb[131].mxu0  ;;  %v9680_v54 = vpop.f32.mrb[107].mxu1  ;;  %v18468_v46 = vld [vmem:[#allocation111_spill] sm:$0xff]  ;;  %v18470_v13 = vld [vmem:[#allocation113_spill] sm:$0xff] }
0x34a7   :  { %v11841_v2 = vmul.f32 -1.442695, %v9683_v22  ;;  %v11842_v42 = vmul.f32 -1.442695, %v9685_v15  ;;  %v18467_v22 = vld [vmem:[#allocation110_spill] sm:$0xff]  ;;  %v18469_v15 = vld [vmem:[#allocation112_spill] sm:$0xff] }
0x34a8   :  { %13472 = vpow2.f32 %v11840_v6  ;;  %v18471_v59 = vld [vmem:[#allocation114_spill] sm:$0xff]  ;;  %v18472_v6 = vld [vmem:[#allocation115_spill] sm:$0xff]  ;;  %v18473_v53 = vld [vmem:[#allocation116_spill] sm:$0xff] }
0x34a9   :  { %13474 = vpow2.f32 %v11841_v2  ;;  %v18474_v54 = vld [vmem:[#allocation117_spill] sm:$0xff]  ;;  %v18475_v2 = vld [vmem:[#allocation118_spill] sm:$0xff] }
0x34aa   :  { %13476 = vpow2.f32 %v11842_v42  ;;  %v18478_v42 = vld [vmem:[#allocation121_spill] sm:$0xff] }
0x34ab   :  { %13478 = vtanh.f32 %v9684_v40 }
0x34af   :  { %v13471_v35 = vpop.eup %13470 }
0x34b0   :  { %v9599_v12 = vmul.f32 %v13471_v35, %v13469_v27  ;;  %v18476_v27 = vld [vmem:[#allocation119_spill] sm:$0xff]  ;;  %v18477_v35 = vld [vmem:[#allocation120_spill] sm:$0xff] }
0x34b2   :  { %v13473_v58 = vpop.eup %13472  ;;  %v9711_v26 = vpack.c.bf16 %v9599_v12, %v9599_v12  ;;  %v18479_v12 = vld [vmem:[#allocation122_spill] sm:$0xff] }
0x34b3   :  { %v13475_v23 = vpop.eup %13474  ;;  %v9689_v43 = vadd.f32 1.0, %v13473_v58  ;;  %v18480_v58 = vld [vmem:[#allocation123_spill] sm:$0xff] }
0x34b4   :  { %v9695_v28 = vadd.f32 1.0, %v13475_v23  ;;  %9744 = vmatprep.mubr.bf16.mxu0 %v9711_v26  ;;  %9785 = vmatprep.mubr.bf16.mxu1 %v9711_v26  ;;  %v13477_v33 = vpop.eup %13476  ;;  %v18481_v26 = vld [vmem:[#allocation162_spill] sm:$0xff]  ;;  %v18482_v23 = vld [vmem:[#allocation124_spill] sm:$0xff] }
0x34b5   :  { %13480 = vrcp.f32 %v9689_v43  ;;  %v13479_v48 = vpop.eup %13478  ;;  %v9702_v41 = vadd.f32 1.0, %v13477_v33  ;;  %v18483_v43 = vld [vmem:[#allocation125_spill] sm:$0xff]  ;;  %v18485_v33 = vld [vmem:[#allocation127_spill] sm:$0xff] }
0x34b6   :  { %13482 = vrcp.f32 %v9695_v28  ;;  %v18484_v28 = vld [vmem:[#allocation126_spill] sm:$0xff] }
0x34b7   :  { %13484 = vrcp.f32 %v9702_v41  ;;  %v18490_v41 = vld [vmem:[#allocation131_spill] sm:$0xff] }
0x34bf   :  { %v13481_v49 = vpop.eup %13480 }
0x34c0   :  { %v13483_v37 = vpop.eup %13482  ;;  %v9706_v36 = vmul.f32 %v13481_v49, %v13479_v48  ;;  %v18486_v48 = vld [vmem:[#allocation163_spill] sm:$0xff]  ;;  %v18487_v49 = vld [vmem:[#allocation128_spill] sm:$0xff] }
0x34c1   :  { %v9705_v4 = vmul.f32 %v13483_v37, %v16629_v55  ;;  %v13485_v61 = vpop.eup %13484  ;;  %v18463_v55 = vld [vmem:[#allocation106_spill] sm:$0xff]  ;;  %v18488_v37 = vld [vmem:[#allocation129_spill] sm:$0xff] }
0x34c3   :  { %v16867_v45 = vadd.f32 %v9706_v36, %v9705_v4  ;;  %v18489_v36 = vld [vmem:[#allocation130_spill] sm:$0xff]  ;;  %v18491_v4 = vld [vmem:[#allocation132_spill] sm:$0xff] }
0x34c5   :  { %13486 = vtanh.f32 %v16867_v45 }
0x34cf   :  { %v13487_v20 = vpop.eup %13486 }
0x34d0   :  { %v9709_v14 = vmul.f32 %v13487_v20, %v13485_v61  ;;  %v18492_v61 = vld [vmem:[#allocation133_spill] sm:$0xff]  ;;  %v18493_v20 = vld [vmem:[#allocation134_spill] sm:$0xff] }
0x34d2   :  { %v9710_v40 = vpack.c.bf16 %v9709_v14, %v9709_v14  ;;  %v18494_v14 = vld [vmem:[#allocation135_spill] sm:$0xff] }
0x34d4   :  { %9745 = vmatmul.mubr.bf16.vlgmr.msra.gmra.mrb[132].mxu0 %v9710_v40  ;;  %9786 = vmatmul.mubr.bf16.vlgmr.msra.gmra.mrb[108].mxu1 %v9710_v40 }
0x34d5   :  { %9819 = vmatpush1.bf16.msra.mxu0 %v16636_v34  ;;  %9860 = vmatpush1.bf16.msra.mxu1 %v16639_v10 }
0x34d6   :  { %9820 = vmatprep.subr.bf16.mxu0 %v16642_v39  ;;  %9861 = vmatprep.subr.bf16.mxu1 %v16645_v63 }
0x34d7   :  { %9850 = vmatprep.mubr.bf16.mxu0 %v18332_v60  ;;  %9891 = vmatprep.mubr.bf16.mxu1 %v18332_v60 }
0x34d9   :  { %9821 = vmatpush1.bf16.msra.mxu0 %v16650_v19  ;;  %9862 = vmatpush1.bf16.msra.mxu1 %v16653_v0 }
0x34da   :  { %9822 = vmatprep.subr.bf16.mxu0 %v16656_v18  ;;  %9863 = vmatprep.subr.bf16.mxu1 %v16659_v56 }
0x34dd   :  { %9823 = vmatpush1.bf16.msra.mxu0 %v16662_v51  ;;  %9864 = vmatpush1.bf16.msra.mxu1 %v16665_v29 }
0x34de   :  { %9824 = vmatprep.subr.bf16.mxu0 %v16668_v3  ;;  %9865 = vmatprep.subr.bf16.mxu1 %v16671_v17 }
0x34e1   :  { %9825 = vmatpush1.bf16.msra.mxu0 %v16674_v21  ;;  %9866 = vmatpush1.bf16.msra.mxu1 %v16677_v16 }
0x34e2   :  { %9826 = vmatprep.subr.bf16.mxu0 %v16680_v7  ;;  %9867 = vmatprep.subr.bf16.mxu1 %v18463_v55 }
0x34e5   :  { %9827 = vmatpush1.bf16.msra.mxu0 %v18464_v62  ;;  %9868 = vmatpush1.bf16.msra.mxu1 %v18465_v1 }
0x34e6   :  { %9828 = vmatprep.subr.bf16.mxu0 %v18466_v30  ;;  %9869 = vmatprep.subr.bf16.mxu1 %v18467_v22 }
0x34e9   :  { %9829 = vmatpush1.bf16.msra.mxu0 %v18468_v46  ;;  %9870 = vmatpush1.bf16.msra.mxu1 %v18469_v15 }
0x34ea   :  { %9830 = vmatprep.subr.bf16.mxu0 %v18470_v13  ;;  %9871 = vmatprep.subr.bf16.mxu1 %v18471_v59 }
0x34ed   :  { %9831 = vmatpush1.bf16.msra.mxu0 %v18472_v6  ;;  %9872 = vmatpush1.bf16.msra.mxu1 %v18473_v53 }
0x34ee   :  { %9832 = vmatprep.subr.bf16.mxu0 %v16716_v31  ;;  %9873 = vmatprep.subr.bf16.mxu1 %v18474_v54 }
0x34f1   :  { %9833 = vmatpush1.bf16.msra.mxu0 %v18475_v2  ;;  %9874 = vmatpush1.bf16.msra.mxu1 %v18476_v27 }
0x34f2   :  { %9930 = vmatprep.subr.bf16.mxu0 %v18477_v35  ;;  %9971 = vmatprep.subr.bf16.mxu1 %v18478_v42 }
0x34f4   :  { %9851 = vmatmul.mubr.bf16.vlgmr.msra.gmra.mrb[136].mxu0 %v9710_v40  ;;  %9892 = vmatmul.mubr.bf16.vlgmr.msra.gmra.mrb[112].mxu1 %v9710_v40  ;;  %v18495_v40 = vld [vmem:[#allocation136_spill] sm:$0xff] }
0x34f5   :  { %9931 = vmatpush1.bf16.msra.mxu0 %v18479_v12  ;;  %9972 = vmatpush1.bf16.msra.mxu1 %v18480_v58 }
0x34f6   :  { %9932 = vmatprep.subr.bf16.mxu0 %v18481_v26  ;;  %9973 = vmatprep.subr.bf16.mxu1 %v18482_v23 }
0x34f9   :  { %9933 = vmatpush1.bf16.msra.mxu0 %v18483_v43  ;;  %9974 = vmatpush1.bf16.msra.mxu1 %v18484_v28 }
0x34fa   :  { %9934 = vmatprep.subr.bf16.mxu0 %v18485_v33  ;;  %9975 = vmatprep.subr.bf16.mxu1 %v18486_v48  ;;  %v18496_v33 = vld [vmem:[#allocation137_spill] sm:$0xff]  ;;  %v18497_v48 = vld [vmem:[#allocation138_spill] sm:$0xff] }
0x34fd   :  { %9935 = vmatpush1.bf16.msra.mxu0 %v18487_v49  ;;  %9976 = vmatpush1.bf16.msra.mxu1 %v18488_v37  ;;  %v18498_v49 = vld [vmem:[#allocation139_spill] sm:$0xff] }
0x34fe   :  { %9936 = vmatprep.subr.bf16.mxu0 %v18489_v36  ;;  %9977 = vmatprep.subr.bf16.mxu1 %v18490_v41 }
0x3501   :  { %9937 = vmatpush1.bf16.msra.mxu0 %v18491_v4  ;;  %9978 = vmatpush1.bf16.msra.mxu1 %v18492_v61 }
0x3502   :  { %9938 = vmatprep.subr.bf16.mxu0 %v18493_v20  ;;  %9979 = vmatprep.subr.bf16.mxu1 %v18494_v14  ;;  %v16930_v14 = vld [vmem:[#allocation41 + $0xe4] ss:$16 sps:$4 sm:$0xff]  }
0x3503   :  { %18499 = vst [vmem:[#allocation147_spill] sm:$0xff] %v16930_v14 }
0x3505   :  { %9939 = vmatpush1.bf16.msra.mxu0 %v18495_v40  ;;  %9980 = vmatpush1.bf16.msra.mxu1 %v18496_v33  ;;  %v16933_v33 = vld [vmem:[#allocation41 + $0xec] ss:$16 sps:$4 sm:$0xff]  }
0x3506   :  { %9940 = vmatprep.subr.bf16.mxu0 %v18497_v48  ;;  %9981 = vmatprep.subr.bf16.mxu1 %v18498_v49  ;;  %18500 = vst [vmem:[#allocation148_spill] sm:$0xff] %v16933_v33  ;;  %v16936_v49 = vld [vmem:[#allocation41 + $0xe0] ss:$16 sps:$4 sm:$0xff]  }
0x3507   :  { %18501 = vst [vmem:[#allocation149_spill] sm:$0xff] %v16936_v49 }
0x3509   :  { %9941 = vmatpush1.bf16.msra.mxu0 %v16796_v24  ;;  %9982 = vmatpush1.bf16.msra.mxu1 %v16799_v11  ;;  %v16939_v11 = vld [vmem:[#allocation41 + $0xe8] ss:$16 sps:$4 sm:$0xff]  }
0x350a   :  { %9942 = vmatprep.subr.bf16.mxu0 %v16802_v47  ;;  %9983 = vmatprep.subr.bf16.mxu1 %v16805_v52  ;;  %18502 = vst [vmem:[#allocation150_spill] sm:$0xff] %v16939_v11  ;;  %v16942_v52 = vld [vmem:[#allocation41 + $0x104] ss:$16 sps:$4 sm:$0xff]  }
0x350b   :  { %18503 = vst [vmem:[#allocation151_spill] sm:$0xff] %v16942_v52 }
0x350d   :  { %9943 = vmatpush1.bf16.msra.mxu0 %v16808_v9  ;;  %9984 = vmatpush1.bf16.msra.mxu1 %v16811_v8  ;;  %v16945_v8 = vld [vmem:[#allocation41 + $0x10c] ss:$16 sps:$4 sm:$0xff]  }
0x350e   :  { %9944 = vmatprep.subr.bf16.mxu0 %v16930_v14  ;;  %9985 = vmatprep.subr.bf16.mxu1 %v16933_v33  ;;  %18504 = vst [vmem:[#allocation152_spill] sm:$0xff] %v16945_v8  ;;  %v16948_v14 = vld [vmem:[#allocation41 + $0x100] ss:$16 sps:$4 sm:$0xff]   ;;  %v16951_v33 = vld [vmem:[#allocation41 + $0x108] ss:$16 sps:$4 sm:$0xff]  }
0x350f   :  { %18505 = vst [vmem:[#allocation153_spill] sm:$0xff] %v16948_v14  ;;  %18506 = vst [vmem:[#allocation154_spill] sm:$0xff] %v16951_v33 }
0x3511   :  { %9945 = vmatpush1.bf16.msra.mxu0 %v16936_v49  ;;  %9986 = vmatpush1.bf16.msra.mxu1 %v16939_v11  ;;  %v16954_v49 = vld [vmem:[#allocation41 + $0x124] ss:$16 sps:$4 sm:$0xff]   ;;  %v16957_v11 = vld [vmem:[#allocation41 + $0x12c] ss:$16 sps:$4 sm:$0xff]  }
0x3512   :  { %9946 = vmatprep.subr.bf16.mxu0 %v16942_v52  ;;  %9987 = vmatprep.subr.bf16.mxu1 %v16945_v8  ;;  %18507 = vst [vmem:[#allocation155_spill] sm:$0xff] %v16954_v49  ;;  %18508 = vst [vmem:[#allocation156_spill] sm:$0xff] %v16957_v11  ;;  %v16960_v52 = vld [vmem:[#allocation41 + $0x120] ss:$16 sps:$4 sm:$0xff]   ;;  %v16963_v8 = vld [vmem:[#allocation41 + $0x128] ss:$16 sps:$4 sm:$0xff]  }
0x3513   :  { %18509 = vst [vmem:[#allocation157_spill] sm:$0xff] %v16960_v52  ;;  %18510 = vst [vmem:[#allocation158_spill] sm:$0xff] %v16963_v8 }
0x3515   :  { %9947 = vmatpush1.bf16.msra.mxu0 %v16948_v14  ;;  %9988 = vmatpush1.bf16.msra.mxu1 %v16951_v33  ;;  %v16966_v14 = vld [vmem:[#allocation41 + $0x144] ss:$16 sps:$4 sm:$0xff]   ;;  %v16969_v33 = vld [vmem:[#allocation41 + $0x14c] ss:$16 sps:$4 sm:$0xff]  }
0x3516   :  { %9948 = vmatprep.subr.bf16.mxu0 %v16954_v49  ;;  %9989 = vmatprep.subr.bf16.mxu1 %v16957_v11  ;;  %18511 = vst [vmem:[#allocation159_spill] sm:$0xff] %v16966_v14  ;;  %18512 = vst [vmem:[#allocation160_spill] sm:$0xff] %v16969_v33  ;;  %v16972_v49 = vld [vmem:[#allocation41 + $0x140] ss:$16 sps:$4 sm:$0xff]   ;;  %v16975_v11 = vld [vmem:[#allocation41 + $0x148] ss:$16 sps:$4 sm:$0xff]  }
0x3517   :  { %18513 = vst [vmem:[#allocation161_spill] sm:$0xff] %v16972_v49  ;;  %18514 = vst [vmem:[#allocation98_spill] sm:$0xff] %v16975_v11 }
0x3519   :  { %9949 = vmatpush1.bf16.msra.mxu0 %v16960_v52  ;;  %9990 = vmatpush1.bf16.msra.mxu1 %v16963_v8  ;;  %v16978_v52 = vld [vmem:[#allocation41 + $0x164] ss:$16 sps:$4 sm:$0xff]   ;;  %v16981_v8 = vld [vmem:[#allocation41 + $0x16c] ss:$16 sps:$4 sm:$0xff]  }
0x351a   :  { %9950 = vmatprep.subr.bf16.mxu0 %v16966_v14  ;;  %9991 = vmatprep.subr.bf16.mxu1 %v16969_v33  ;;  %18515 = vst [vmem:[#allocation96_spill] sm:$0xff] %v16978_v52  ;;  %18516 = vst [vmem:[#allocation95_spill] sm:$0xff] %v16981_v8  ;;  %v16984_v14 = vld [vmem:[#allocation41 + $0x160] ss:$16 sps:$4 sm:$0xff]   ;;  %v16987_v33 = vld [vmem:[#allocation41 + $0x168] ss:$16 sps:$4 sm:$0xff]  }
0x351b   :  { %18517 = vst [vmem:[#allocation97_spill] sm:$0xff] %v16984_v14  ;;  %18518 = vst [vmem:[#allocation94_spill] sm:$0xff] %v16987_v33 }
0x351d   :  { %9951 = vmatpush1.bf16.msra.mxu0 %v16972_v49  ;;  %9992 = vmatpush1.bf16.msra.mxu1 %v16975_v11  ;;  %v16990_v49 = vld [vmem:[#allocation41 + $0x184] ss:$16 sps:$4 sm:$0xff]   ;;  %v16993_v11 = vld [vmem:[#allocation41 + $0x18c] ss:$16 sps:$4 sm:$0xff]  }
0x351e   :  { %9952 = vmatprep.subr.bf16.mxu0 %v16978_v52  ;;  %9993 = vmatprep.subr.bf16.mxu1 %v16981_v8  ;;  %18519 = vst [vmem:[#allocation164_spill] sm:$0xff] %v16990_v49  ;;  %18520 = vst [vmem:[#allocation171_spill] sm:$0xff] %v16993_v11  ;;  %v16996_v52 = vld [vmem:[#allocation41 + $0x180] ss:$16 sps:$4 sm:$0xff]   ;;  %v16999_v8 = vld [vmem:[#allocation41 + $0x188] ss:$16 sps:$4 sm:$0xff]  }
0x351f   :  { %18521 = vst [vmem:[#allocation165_spill] sm:$0xff] %v16996_v52  ;;  %18522 = vst [vmem:[#allocation172_spill] sm:$0xff] %v16999_v8 }
0x3521   :  { %9953 = vmatpush1.bf16.msra.mxu0 %v16984_v14  ;;  %9994 = vmatpush1.bf16.msra.mxu1 %v16987_v33  ;;  %v17002_v14 = vld [vmem:[#allocation41 + $0x1a4] ss:$16 sps:$4 sm:$0xff]   ;;  %v17005_v33 = vld [vmem:[#allocation41 + $0x1ac] ss:$16 sps:$4 sm:$0xff]  }
0x3522   :  { %9954 = vmatprep.subr.bf16.mxu0 %v16990_v49  ;;  %9995 = vmatprep.subr.bf16.mxu1 %v16993_v11  ;;  %18523 = vst [vmem:[#allocation105_spill] sm:$0xff] %v17002_v14  ;;  %18524 = vst [vmem:[#allocation166_spill] sm:$0xff] %v17005_v33  ;;  %v17008_v49 = vld [vmem:[#allocation41 + $0x1a0] ss:$16 sps:$4 sm:$0xff]   ;;  %v17011_v11 = vld [vmem:[#allocation41 + $0x1a8] ss:$16 sps:$4 sm:$0xff]  }
0x3523   :  { %18525 = vst [vmem:[#allocation173_spill] sm:$0xff] %v17008_v49  ;;  %18526 = vst [vmem:[#allocation168_spill] sm:$0xff] %v17011_v11 }
0x3525   :  { %9955 = vmatpush1.bf16.msra.mxu0 %v16996_v52  ;;  %9996 = vmatpush1.bf16.msra.mxu1 %v16999_v8  ;;  %v17014_v52 = vld [vmem:[#allocation41 + $0x1c4] ss:$16 sps:$4 sm:$0xff]   ;;  %v17017_v8 = vld [vmem:[#allocation41 + $0x1cc] ss:$16 sps:$4 sm:$0xff]  }
0x3526   :  { %9956 = vmatprep.subr.bf16.mxu0 %v17002_v14  ;;  %9997 = vmatprep.subr.bf16.mxu1 %v17005_v33  ;;  %18527 = vst [vmem:[#allocation175_spill] sm:$0xff] %v17014_v52  ;;  %18528 = vst [vmem:[#allocation106_spill] sm:$0xff] %v17017_v8  ;;  %v17020_v14 = vld [vmem:[#allocation41 + $0x1c0] ss:$16 sps:$4 sm:$0xff]   ;;  %v17023_v33 = vld [vmem:[#allocation41 + $0x1c8] ss:$16 sps:$4 sm:$0xff]  }
0x3527   :  { %18529 = vst [vmem:[#allocation107_spill] sm:$0xff] %v17020_v14  ;;  %18530 = vst [vmem:[#allocation108_spill] sm:$0xff] %v17023_v33 }
0x3529   :  { %9957 = vmatpush1.bf16.msra.mxu0 %v17008_v49  ;;  %9998 = vmatpush1.bf16.msra.mxu1 %v17011_v11  ;;  %v17026_v49 = vld [vmem:[#allocation41 + $0x1e4] ss:$16 sps:$4 sm:$0xff]   ;;  %v17029_v11 = vld [vmem:[#allocation41 + $0x1ec] ss:$16 sps:$4 sm:$0xff]  }
0x352a   :  { %9958 = vmatprep.subr.bf16.mxu0 %v17014_v52  ;;  %9999 = vmatprep.subr.bf16.mxu1 %v17017_v8  ;;  %18531 = vst [vmem:[#allocation109_spill] sm:$0xff] %v17026_v49  ;;  %18532 = vst [vmem:[#allocation110_spill] sm:$0xff] %v17029_v11  ;;  %v17032_v52 = vld [vmem:[#allocation41 + $0x1e0] ss:$16 sps:$4 sm:$0xff]   ;;  %v17035_v8 = vld [vmem:[#allocation41 + $0x1e8] ss:$16 sps:$4 sm:$0xff]  }
0x352b   :  { %18533 = vst [vmem:[#allocation111_spill] sm:$0xff] %v17032_v52  ;;  %18534 = vst [vmem:[#allocation112_spill] sm:$0xff] %v17035_v8 }
0x352d   :  { %9959 = vmatpush1.bf16.msra.mxu0 %v17020_v14  ;;  %10000 = vmatpush1.bf16.msra.mxu1 %v17023_v33 }
0x352e   :  { %9960 = vmatprep.subr.bf16.mxu0 %v17026_v49  ;;  %10001 = vmatprep.subr.bf16.mxu1 %v17029_v11 }
0x3531   :  { %9961 = vmatpush1.bf16.msra.mxu0 %v17032_v52  ;;  %10002 = vmatpush1.bf16.msra.mxu1 %v17035_v8 }
0x3532   :  { %10036 = vmatprep.subr.bf16.mxu0 %v16850_v32  ;;  %10077 = vmatprep.subr.bf16.mxu1 %v16602_v5 }
0x35a7   :  { %v9746_v33 = vpop.f32.mrb[132].mxu0  ;;  %v9787_v14 = vpop.f32.mrb[108].mxu1 }
0x35a8   :  { %v9747_v49 = vadd.f32 %v9746_v33, %v16606_v50  ;;  %v9748_v9 = vpop.f32.mrb[133].mxu0  ;;  %v9789_v47 = vpop.f32.mrb[109].mxu1  ;;  %v9788_v5 = vadd.f32 %v9787_v14, %v18457_v38  ;;  %v18535_v14 = vld [vmem:[#allocation167_spill] sm:$0xff]  ;;  %v18538_v38 = vld [vmem:[#allocation176_spill] sm:$0xff] }
0x35a9   :  { %v9749_v11 = vadd.f32 %v9748_v9, %v16609_v57  ;;  %v9750_v24 = vpop.f32.mrb[134].mxu0  ;;  %v9791_v48 = vpop.f32.mrb[110].mxu1  ;;  %v9790_v32 = vadd.f32 %v9789_v47, %v16614_v44 }
0x35aa   :  { %v11843_v40 = vmul.f32 -1.442695, %v9747_v49  ;;  %v9751_v52 = vpop.f32.mrb[135].mxu0  ;;  %v9792_v20 = vpop.f32.mrb[111].mxu1 }
0x35ab   :  { %v11844_v61 = vmul.f32 -1.442695, %v9749_v11  ;;  %v11845_v8 = vmul.f32 -1.442695, %v9790_v32 }
0x35ac   :  { %13488 = vpow2.f32 %v11843_v40 }
0x35ad   :  { %13490 = vpow2.f32 %v11844_v61 }
0x35ae   :  { %13492 = vpow2.f32 %v11845_v8  ;;  %v18536_v8 = vld [vmem:[#allocation174_spill] sm:$0xff] }
0x35af   :  { %13494 = vtanh.f32 %v9788_v5 }
0x35b6   :  { %v13489_v4 = vpop.eup %13488 }
0x35b7   :  { %v13491_v41 = vpop.eup %13490  ;;  %v9797_v33 = vadd.f32 1.0, %v13489_v4 }
0x35b8   :  { %v9803_v50 = vadd.f32 1.0, %v13491_v41  ;;  %v13493_v9 = vpop.eup %13492 }
0x35b9   :  { %13496 = vrcp.f32 %v9797_v33  ;;  %v13495_v24 = vpop.eup %13494  ;;  %v9810_v49 = vadd.f32 1.0, %v13493_v9 }
0x35ba   :  { %13498 = vrcp.f32 %v9803_v50  ;;  %v18537_v50 = vld [vmem:[#allocation169_spill] sm:$0xff] }
0x35bb   :  { %13500 = vrcp.f32 %v9810_v49 }
0x35c3   :  { %v13497_v52 = vpop.eup %13496 }
0x35c4   :  { %v13499_v48 = vpop.eup %13498  ;;  %v9814_v11 = vmul.f32 %v13497_v52, %v13495_v24 }
0x35c5   :  { %v9813_v61 = vmul.f32 %v13499_v48, %v16859_v25 }
0x35c7   :  { %v9852_v47 = vpop.f32.mrb[136].mxu0  ;;  %v9893_v32 = vpop.f32.mrb[112].mxu1  ;;  %v17045_v20 = vadd.f32 %v9814_v11, %v9813_v61 }
0x35c8   :  { %v9900_v4 = vadd.f32 %v9852_v47, %v18535_v14  ;;  %v9902_v40 = vadd.f32 %v9893_v32, %v18536_v8  ;;  %v9854_v41 = vpop.f32.mrb[137].mxu0  ;;  %v9895_v5 = vpop.f32.mrb[113].mxu1 }
0x35c9   :  { %v9901_v33 = vadd.f32 %v9854_v41, %v18537_v50  ;;  %v9903_v44 = vadd.f32 %v9895_v5, %v18538_v38  ;;  %v9856_v57 = vpop.f32.mrb[138].mxu0  ;;  %v9897_v24 = vpop.f32.mrb[114].mxu1  ;;  %13502 = vtanh.f32 %v17045_v20 }
0x35ca   :  { %v11846_v25 = vmul.f32 -1.442695, %v9900_v4  ;;  %v9857_v9 = vpop.f32.mrb[139].mxu0  ;;  %v9898_v52 = vpop.f32.mrb[115].mxu1 }
0x35cb   :  { %v11847_v48 = vmul.f32 -1.442695, %v9901_v33  ;;  %v13501_v11 = vpop.eup %13500  ;;  %v11848_v61 = vmul.f32 -1.442695, %v9903_v44 }
0x35cc   :  { %13504 = vpow2.f32 %v11846_v25 }
0x35cd   :  { %13506 = vpow2.f32 %v11847_v48 }
0x35ce   :  { %13508 = vpow2.f32 %v11848_v61  ;;  %v18582_v61 = vld [vmem:[#allocation166_spill] sm:$0xff] }
0x35cf   :  { %13510 = vtanh.f32 %v9902_v40 }
0x35d3   :  { %v13503_v49 = vpop.eup %13502 }
0x35d4   :  { %v9817_v47 = vmul.f32 %v13503_v49, %v13501_v11  ;;  %v18580_v11 = vld [vmem:[#allocation172_spill] sm:$0xff]  ;;  %v18581_v49 = vld [vmem:[#allocation105_spill] sm:$0xff] }
0x35d6   :  { %v13505_v32 = vpop.eup %13504  ;;  %v9929_v14 = vpack.c.bf16 %v9817_v47, %v9817_v47  ;;  %v18583_v47 = vld [vmem:[#allocation173_spill] sm:$0xff] }
0x35d7   :  { %v13507_v8 = vpop.eup %13506  ;;  %v9907_v41 = vadd.f32 1.0, %v13505_v32  ;;  %v18584_v32 = vld [vmem:[#allocation168_spill] sm:$0xff] }
0x35d8   :  { %v9913_v57 = vadd.f32 1.0, %v13507_v8  ;;  %9962 = vmatprep.mubr.bf16.mxu0 %v9929_v14  ;;  %10003 = vmatprep.mubr.bf16.mxu1 %v9929_v14  ;;  %v13509_v38 = vpop.eup %13508  ;;  %v18585_v14 = vld [vmem:[#allocation175_spill] sm:$0xff]  ;;  %v18586_v8 = vld [vmem:[#allocation106_spill] sm:$0xff] }
0x35d9   :  { %13512 = vrcp.f32 %v9907_v41  ;;  %v13511_v4 = vpop.eup %13510  ;;  %v9920_v24 = vadd.f32 1.0, %v13509_v38  ;;  %v18587_v41 = vld [vmem:[#allocation107_spill] sm:$0xff]  ;;  %v18589_v38 = vld [vmem:[#allocation109_spill] sm:$0xff] }
0x35da   :  { %13514 = vrcp.f32 %v9913_v57  ;;  %v18588_v57 = vld [vmem:[#allocation108_spill] sm:$0xff] }
0x35db   :  { %13516 = vrcp.f32 %v9920_v24  ;;  %v17153_v24 = vld [vmem:[#allocation40 + $0xc] ss:$16 sps:$4 sm:$0xff]  }
0x35e3   :  { %v13513_v5 = vpop.eup %13512 }
0x35e4   :  { %v13515_v50 = vpop.eup %13514  ;;  %v9924_v33 = vmul.f32 %v13513_v5, %v13511_v4  ;;  %v18590_v4 = vld [vmem:[#allocation110_spill] sm:$0xff]  ;;  %v18591_v5 = vld [vmem:[#allocation111_spill] sm:$0xff] }
0x35e5   :  { %v9923_v44 = vmul.f32 %v13515_v50, %v16867_v45  ;;  %v13517_v9 = vpop.eup %13516  ;;  %v18555_v45 = vld [vmem:[#allocation144_spill] sm:$0xff] }
0x35e6   :  { %v18592_v50 = vld [vmem:[#allocation112_spill] sm:$0xff] }
0x35e7   :  { %v17053_v25 = vadd.f32 %v9924_v33, %v9923_v44  ;;  %v18593_v33 = vld [vmem:[#allocation146_spill] sm:$0xff] }
0x35e9   :  { %13518 = vtanh.f32 %v17053_v25 }
0x35f3   :  { %v13519_v40 = vpop.eup %13518 }
0x35f4   :  { %v9927_v52 = vmul.f32 %v13519_v40, %v13517_v9  ;;  %v18594_v40 = vld [vmem:[#allocation101_spill] sm:$0xff] }
0x35f6   :  { %v9928_v48 = vpack.c.bf16 %v9927_v52, %v9927_v52 }
0x35f8   :  { %9963 = vmatmul.mubr.bf16.vlgmr.msra.gmra.mrb[140].mxu0 %v9928_v48  ;;  %10004 = vmatmul.mubr.bf16.vlgmr.msra.gmra.mrb[116].mxu1 %v9928_v48 }
0x35f9   :  { %10037 = vmatpush1.bf16.msra.mxu0 %v16636_v34  ;;  %10078 = vmatpush1.bf16.msra.mxu1 %v16639_v10  ;;  %v18539_v34 = vld [vmem:[#allocation127_spill] sm:$0xff] }
0x35fa   :  { %10038 = vmatprep.subr.bf16.mxu0 %v16642_v39  ;;  %10079 = vmatprep.subr.bf16.mxu1 %v16645_v63  ;;  %v18540_v10 = vld [vmem:[#allocation163_spill] sm:$0xff]  ;;  %v18541_v39 = vld [vmem:[#allocation128_spill] sm:$0xff] }
0x35fb   :  { %10068 = vmatprep.mubr.bf16.mxu0 %v18332_v60  ;;  %10109 = vmatprep.mubr.bf16.mxu1 %v18332_v60  ;;  %v18542_v63 = vld [vmem:[#allocation131_spill] sm:$0xff] }
0x35fd   :  { %10039 = vmatpush1.bf16.msra.mxu0 %v16650_v19  ;;  %10080 = vmatpush1.bf16.msra.mxu1 %v16653_v0  ;;  %v18543_v19 = vld [vmem:[#allocation132_spill] sm:$0xff]  ;;  %v18544_v0 = vld [vmem:[#allocation133_spill] sm:$0xff] }
0x35fe   :  { %10040 = vmatprep.subr.bf16.mxu0 %v16656_v18  ;;  %10081 = vmatprep.subr.bf16.mxu1 %v16659_v56  ;;  %v18545_v18 = vld [vmem:[#allocation134_spill] sm:$0xff]  ;;  %v18546_v56 = vld [vmem:[#allocation135_spill] sm:$0xff] }
0x3601   :  { %10041 = vmatpush1.bf16.msra.mxu0 %v16662_v51  ;;  %10082 = vmatpush1.bf16.msra.mxu1 %v16665_v29  ;;  %v18547_v51 = vld [vmem:[#allocation136_spill] sm:$0xff]  ;;  %v18548_v29 = vld [vmem:[#allocation137_spill] sm:$0xff] }
0x3602   :  { %10042 = vmatprep.subr.bf16.mxu0 %v16668_v3  ;;  %10083 = vmatprep.subr.bf16.mxu1 %v16671_v17  ;;  %v18549_v3 = vld [vmem:[#allocation138_spill] sm:$0xff]  ;;  %v18550_v17 = vld [vmem:[#allocation139_spill] sm:$0xff] }
0x3605   :  { %10043 = vmatpush1.bf16.msra.mxu0 %v16674_v21  ;;  %10084 = vmatpush1.bf16.msra.mxu1 %v16677_v16  ;;  %v18551_v21 = vld [vmem:[#allocation140_spill] sm:$0xff]  ;;  %v18552_v16 = vld [vmem:[#allocation141_spill] sm:$0xff] }
0x3606   :  { %10044 = vmatprep.subr.bf16.mxu0 %v16680_v7  ;;  %10085 = vmatprep.subr.bf16.mxu1 %v18463_v55  ;;  %v18553_v7 = vld [vmem:[#allocation142_spill] sm:$0xff]  ;;  %v18556_v55 = vld [vmem:[#allocation145_spill] sm:$0xff] }
0x3609   :  { %10045 = vmatpush1.bf16.msra.mxu0 %v18464_v62  ;;  %10086 = vmatpush1.bf16.msra.mxu1 %v18465_v1  ;;  %v18557_v62 = vld [vmem:[#allocation147_spill] sm:$0xff]  ;;  %v18558_v1 = vld [vmem:[#allocation148_spill] sm:$0xff] }
0x360a   :  { %10046 = vmatprep.subr.bf16.mxu0 %v18466_v30  ;;  %10087 = vmatprep.subr.bf16.mxu1 %v18467_v22  ;;  %v18559_v30 = vld [vmem:[#allocation149_spill] sm:$0xff]  ;;  %v18560_v22 = vld [vmem:[#allocation150_spill] sm:$0xff] }
0x360d   :  { %10047 = vmatpush1.bf16.msra.mxu0 %v18468_v46  ;;  %10088 = vmatpush1.bf16.msra.mxu1 %v18469_v15  ;;  %v18561_v46 = vld [vmem:[#allocation151_spill] sm:$0xff]  ;;  %v18562_v15 = vld [vmem:[#allocation152_spill] sm:$0xff] }
0x360e   :  { %10048 = vmatprep.subr.bf16.mxu0 %v18470_v13  ;;  %10089 = vmatprep.subr.bf16.mxu1 %v18471_v59  ;;  %v18563_v13 = vld [vmem:[#allocation153_spill] sm:$0xff]  ;;  %v18564_v59 = vld [vmem:[#allocation154_spill] sm:$0xff] }
0x3611   :  { %10049 = vmatpush1.bf16.msra.mxu0 %v18472_v6  ;;  %10090 = vmatpush1.bf16.msra.mxu1 %v18473_v53  ;;  %v18565_v6 = vld [vmem:[#allocation155_spill] sm:$0xff]  ;;  %v18566_v53 = vld [vmem:[#allocation156_spill] sm:$0xff] }
0x3612   :  { %10050 = vmatprep.subr.bf16.mxu0 %v16716_v31  ;;  %10091 = vmatprep.subr.bf16.mxu1 %v18474_v54  ;;  %v18554_v31 = vld [vmem:[#allocation143_spill] sm:$0xff]  ;;  %v18567_v54 = vld [vmem:[#allocation157_spill] sm:$0xff] }
0x3615   :  { %10051 = vmatpush1.bf16.msra.mxu0 %v18475_v2  ;;  %10092 = vmatpush1.bf16.msra.mxu1 %v18476_v27  ;;  %v18568_v2 = vld [vmem:[#allocation158_spill] sm:$0xff]  ;;  %v18569_v27 = vld [vmem:[#allocation159_spill] sm:$0xff] }
0x3616   :  { %10148 = vmatprep.subr.bf16.mxu0 %v18477_v35  ;;  %10189 = vmatprep.subr.bf16.mxu1 %v18478_v42  ;;  %v18570_v35 = vld [vmem:[#allocation160_spill] sm:$0xff]  ;;  %v18571_v42 = vld [vmem:[#allocation161_spill] sm:$0xff] }
0x3618   :  { %10069 = vmatmul.mubr.bf16.vlgmr.msra.gmra.mrb[144].mxu0 %v9928_v48  ;;  %10110 = vmatmul.mubr.bf16.vlgmr.msra.gmra.mrb[120].mxu1 %v9928_v48 }
0x3619   :  { %10149 = vmatpush1.bf16.msra.mxu0 %v18479_v12  ;;  %10190 = vmatpush1.bf16.msra.mxu1 %v18480_v58  ;;  %v18572_v12 = vld [vmem:[#allocation98_spill] sm:$0xff]  ;;  %v18573_v58 = vld [vmem:[#allocation96_spill] sm:$0xff] }
0x361a   :  { %10150 = vmatprep.subr.bf16.mxu0 %v18481_v26  ;;  %10191 = vmatprep.subr.bf16.mxu1 %v18482_v23  ;;  %v18574_v26 = vld [vmem:[#allocation95_spill] sm:$0xff]  ;;  %v18575_v23 = vld [vmem:[#allocation97_spill] sm:$0xff] }
0x361d   :  { %10151 = vmatpush1.bf16.msra.mxu0 %v18483_v43  ;;  %10192 = vmatpush1.bf16.msra.mxu1 %v18484_v28  ;;  %v18576_v43 = vld [vmem:[#allocation94_spill] sm:$0xff]  ;;  %v18577_v28 = vld [vmem:[#allocation164_spill] sm:$0xff] }
0x361e   :  { %10152 = vmatprep.subr.bf16.mxu0 %v18539_v34  ;;  %10193 = vmatprep.subr.bf16.mxu1 %v18540_v10  ;;  %v18595_v10 = vld [vmem:[#allocation102_spill] sm:$0xff] }
0x3621   :  { %10153 = vmatpush1.bf16.msra.mxu0 %v18541_v39  ;;  %10194 = vmatpush1.bf16.msra.mxu1 %v18488_v37  ;;  %v18578_v37 = vld [vmem:[#allocation171_spill] sm:$0xff] }
0x3622   :  { %10154 = vmatprep.subr.bf16.mxu0 %v18489_v36  ;;  %10195 = vmatprep.subr.bf16.mxu1 %v18542_v63  ;;  %v18579_v36 = vld [vmem:[#allocation165_spill] sm:$0xff] }
0x3625   :  { %10155 = vmatpush1.bf16.msra.mxu0 %v18543_v19  ;;  %10196 = vmatpush1.bf16.msra.mxu1 %v18544_v0 }
0x3626   :  { %10156 = vmatprep.subr.bf16.mxu0 %v18545_v18  ;;  %10197 = vmatprep.subr.bf16.mxu1 %v18546_v56 }
0x3629   :  { %10157 = vmatpush1.bf16.msra.mxu0 %v18547_v51  ;;  %10198 = vmatpush1.bf16.msra.mxu1 %v18548_v29  ;;  %v18596_v29 = vld [vmem:[#allocation103_spill] sm:$0xff] }
0x362a   :  { %10158 = vmatprep.subr.bf16.mxu0 %v18549_v3  ;;  %10199 = vmatprep.subr.bf16.mxu1 %v18550_v17 }
0x362d   :  { %10159 = vmatpush1.bf16.msra.mxu0 %v18551_v21  ;;  %10200 = vmatpush1.bf16.msra.mxu1 %v18552_v16  ;;  %v18597_v21 = vld [vmem:[#allocation104_spill] sm:$0xff] }
0x362e   :  { %10160 = vmatprep.subr.bf16.mxu0 %v18553_v7  ;;  %10201 = vmatprep.subr.bf16.mxu1 %v18554_v31 }
0x3631   :  { %10161 = vmatpush1.bf16.msra.mxu0 %v18555_v45  ;;  %10202 = vmatpush1.bf16.msra.mxu1 %v18556_v55 }
0x3632   :  { %10162 = vmatprep.subr.bf16.mxu0 %v18557_v62  ;;  %10203 = vmatprep.subr.bf16.mxu1 %v18558_v1 }
0x3635   :  { %10163 = vmatpush1.bf16.msra.mxu0 %v18559_v30  ;;  %10204 = vmatpush1.bf16.msra.mxu1 %v18560_v22 }
0x3636   :  { %10164 = vmatprep.subr.bf16.mxu0 %v18561_v46  ;;  %10205 = vmatprep.subr.bf16.mxu1 %v18562_v15 }
0x3639   :  { %10165 = vmatpush1.bf16.msra.mxu0 %v18563_v13  ;;  %10206 = vmatpush1.bf16.msra.mxu1 %v18564_v59 }
0x363a   :  { %10166 = vmatprep.subr.bf16.mxu0 %v18565_v6  ;;  %10207 = vmatprep.subr.bf16.mxu1 %v18566_v53 }
0x363d   :  { %10167 = vmatpush1.bf16.msra.mxu0 %v18567_v54  ;;  %10208 = vmatpush1.bf16.msra.mxu1 %v18568_v2 }
0x363e   :  { %10168 = vmatprep.subr.bf16.mxu0 %v18569_v27  ;;  %10209 = vmatprep.subr.bf16.mxu1 %v18570_v35 }
0x3641   :  { %10169 = vmatpush1.bf16.msra.mxu0 %v18571_v42  ;;  %10210 = vmatpush1.bf16.msra.mxu1 %v18572_v12 }
0x3642   :  { %10170 = vmatprep.subr.bf16.mxu0 %v18573_v58  ;;  %10211 = vmatprep.subr.bf16.mxu1 %v18574_v26 }
0x3645   :  { %10171 = vmatpush1.bf16.msra.mxu0 %v18575_v23  ;;  %10212 = vmatpush1.bf16.msra.mxu1 %v18576_v43 }
0x3646   :  { %10172 = vmatprep.subr.bf16.mxu0 %v18577_v28  ;;  %10213 = vmatprep.subr.bf16.mxu1 %v18578_v37 }
0x3649   :  { %10173 = vmatpush1.bf16.msra.mxu0 %v18579_v36  ;;  %10214 = vmatpush1.bf16.msra.mxu1 %v18580_v11 }
0x364a   :  { %10174 = vmatprep.subr.bf16.mxu0 %v18581_v49  ;;  %10215 = vmatprep.subr.bf16.mxu1 %v18582_v61 }
0x364d   :  { %10175 = vmatpush1.bf16.msra.mxu0 %v18583_v47  ;;  %10216 = vmatpush1.bf16.msra.mxu1 %v18584_v32 }
0x364e   :  { %10176 = vmatprep.subr.bf16.mxu0 %v18585_v14  ;;  %10217 = vmatprep.subr.bf16.mxu1 %v18586_v8 }
0x3651   :  { %10177 = vmatpush1.bf16.msra.mxu0 %v18587_v41  ;;  %10218 = vmatpush1.bf16.msra.mxu1 %v18588_v57 }
0x3652   :  { %10178 = vmatprep.subr.bf16.mxu0 %v18589_v38  ;;  %10219 = vmatprep.subr.bf16.mxu1 %v18590_v4 }
0x3655   :  { %10179 = vmatpush1.bf16.msra.mxu0 %v18591_v5  ;;  %10220 = vmatpush1.bf16.msra.mxu1 %v18592_v50 }
0x3656   :  { %10254 = vmatprep.subr.bf16.mxu0 %v18593_v33  ;;  %10295 = vmatprep.subr.bf16.mxu1 %v17153_v24 }
0x36cb   :  { %v9964_v44 = vpop.f32.mrb[140].mxu0  ;;  %v10005_v9 = vpop.f32.mrb[116].mxu1 }
0x36cc   :  { %v9965_v52 = vadd.f32 %v9964_v44, %v18594_v40  ;;  %v9966_v48 = vpop.f32.mrb[141].mxu0  ;;  %v10007_v34 = vpop.f32.mrb[117].mxu1  ;;  %v10006_v16 = vadd.f32 %v10005_v9, %v18597_v21  ;;  %v18598_v9 = vld [vmem:[#allocation170_spill] sm:$0xff] }
0x36cd   :  { %v9967_v39 = vadd.f32 %v9966_v48, %v18595_v10  ;;  %v9968_v63 = vpop.f32.mrb[142].mxu0  ;;  %v10009_v19 = vpop.f32.mrb[118].mxu1  ;;  %v10008_v3 = vadd.f32 %v10007_v34, %v18596_v29 }
0x36ce   :  { %v11849_v0 = vmul.f32 -1.442695, %v9965_v52  ;;  %v9969_v18 = vpop.f32.mrb[143].mxu0  ;;  %v10010_v56 = vpop.f32.mrb[119].mxu1 }
0x36cf   :  { %v11850_v51 = vmul.f32 -1.442695, %v9967_v39  ;;  %v11851_v17 = vmul.f32 -1.442695, %v10008_v3 }
0x36d0   :  { %13520 = vpow2.f32 %v11849_v0 }
0x36d1   :  { %13522 = vpow2.f32 %v11850_v51  ;;  %v18599_v51 = vld [vmem:[#allocation179_spill] sm:$0xff] }
0x36d2   :  { %13524 = vpow2.f32 %v11851_v17 }
0x36d3   :  { %13526 = vtanh.f32 %v10006_v16 }
0x36da   :  { %v13521_v7 = vpop.eup %13520 }
0x36db   :  { %v13523_v31 = vpop.eup %13522  ;;  %v10015_v45 = vadd.f32 1.0, %v13521_v7  ;;  %v18600_v7 = vld [vmem:[#allocation177_spill] sm:$0xff] }
0x36dc   :  { %v10021_v55 = vadd.f32 1.0, %v13523_v31  ;;  %v13525_v33 = vpop.eup %13524 }
0x36dd   :  { %13528 = vrcp.f32 %v10015_v45  ;;  %v13527_v44 = vpop.eup %13526  ;;  %v10028_v63 = vadd.f32 1.0, %v13525_v33  ;;  %v18601_v45 = vld [vmem:[#allocation180_spill] sm:$0xff] }
0x36de   :  { %13530 = vrcp.f32 %v10021_v55 }
0x36df   :  { %13532 = vrcp.f32 %v10028_v63 }
0x36e7   :  { %v13529_v52 = vpop.eup %13528 }
0x36e8   :  { %v13531_v48 = vpop.eup %13530  ;;  %v10032_v39 = vmul.f32 %v13529_v52, %v13527_v44 }
0x36e9   :  { %v10031_v19 = vmul.f32 %v13531_v48, %v17045_v20 }
0x36eb   :  { %v10070_v34 = vpop.f32.mrb[144].mxu0  ;;  %v10111_v0 = vpop.f32.mrb[120].mxu1  ;;  %v17161_v18 = vadd.f32 %v10032_v39, %v10031_v19 }
0x36ec   :  { %v10118_v56 = vadd.f32 %v10070_v34, %v18598_v9  ;;  %v10120_v3 = vadd.f32 %v10111_v0, %v18599_v51  ;;  %v10072_v17 = vpop.f32.mrb[145].mxu0  ;;  %v10113_v16 = vpop.f32.mrb[121].mxu1 }
0x36ed   :  { %v10119_v31 = vadd.f32 %v10072_v17, %v18600_v7  ;;  %v10121_v55 = vadd.f32 %v10113_v16, %v18601_v45  ;;  %v10074_v21 = vpop.f32.mrb[146].mxu0  ;;  %v10115_v44 = vpop.f32.mrb[122].mxu1  ;;  %13534 = vtanh.f32 %v17161_v18 }
0x36ee   :  { %v11852_v20 = vmul.f32 -1.442695, %v10118_v56  ;;  %v10075_v33 = vpop.f32.mrb[147].mxu0  ;;  %v10116_v52 = vpop.f32.mrb[123].mxu1 }
0x36ef   :  { %v11853_v48 = vmul.f32 -1.442695, %v10119_v31  ;;  %v13533_v39 = vpop.eup %13532  ;;  %v11854_v19 = vmul.f32 -1.442695, %v10121_v55 }
0x36f0   :  { %13536 = vpow2.f32 %v11852_v20 }
0x36f1   :  { %13538 = vpow2.f32 %v11853_v48 }
0x36f2   :  { %13540 = vpow2.f32 %v11854_v19  ;;  %v17185_v19 = vld [vmem:[#allocation40 + $0x2c] ss:$16 sps:$4 sm:$0xff]  }
0x36f3   :  { %13542 = vtanh.f32 %v10120_v3 }
0x36f7   :  { %v13535_v63 = vpop.eup %13534 }
0x36f8   :  { %v10035_v34 = vmul.f32 %v13535_v63, %v13533_v39  ;;  %v17176_v39 = vld [vmem:[#allocation40] ss:$16 sps:$4 sm:$0xff]   ;;  %v17179_v63 = vld [vmem:[#allocation40 + $0x8] ss:$16 sps:$4 sm:$0xff]  }
0x36fa   :  { %v13537_v0 = vpop.eup %13536  ;;  %v10147_v9 = vpack.c.bf16 %v10035_v34, %v10035_v34  ;;  %v17190_v34 = vld [vmem:[#allocation40 + $0x20] ss:$16 sps:$4 sm:$0xff]  }
0x36fb   :  { %v13539_v51 = vpop.eup %13538  ;;  %v10125_v17 = vadd.f32 1.0, %v13537_v0  ;;  %v17193_v0 = vld [vmem:[#allocation40 + $0x28] ss:$16 sps:$4 sm:$0xff]  }
0x36fc   :  { %v10131_v21 = vadd.f32 1.0, %v13539_v51  ;;  %10180 = vmatprep.mubr.bf16.mxu0 %v10147_v9  ;;  %10221 = vmatprep.mubr.bf16.mxu1 %v10147_v9  ;;  %v13541_v56 = vpop.eup %13540  ;;  %v17196_v9 = vld [vmem:[#allocation40 + $0x44] ss:$16 sps:$4 sm:$0xff]   ;;  %v17199_v51 = vld [vmem:[#allocation40 + $0x4c] ss:$16 sps:$4 sm:$0xff]  }
0x36fd   :  { %13544 = vrcp.f32 %v10125_v17  ;;  %v13543_v16 = vpop.eup %13542  ;;  %v10138_v44 = vadd.f32 1.0, %v13541_v56  ;;  %v17202_v17 = vld [vmem:[#allocation40 + $0x40] ss:$16 sps:$4 sm:$0xff]   ;;  %v17208_v56 = vld [vmem:[#allocation40 + $0x64] ss:$16 sps:$4 sm:$0xff]  }
0x36fe   :  { %13546 = vrcp.f32 %v10131_v21  ;;  %v17205_v21 = vld [vmem:[#allocation40 + $0x48] ss:$16 sps:$4 sm:$0xff]  }
0x36ff   :  { %13548 = vrcp.f32 %v10138_v44  ;;  %v17223_v44 = vld [vmem:[#allocation40 + $0x8c] ss:$16 sps:$4 sm:$0xff]  }
0x3700   :  { %18603 = vst [vmem:[#allocation114_spill] sm:$0xff] %v17223_v44 }
0x3707   :  { %v13545_v7 = vpop.eup %13544 }
0x3708   :  { %v13547_v31 = vpop.eup %13546  ;;  %v10142_v45 = vmul.f32 %v13545_v7, %v13543_v16  ;;  %v17211_v16 = vld [vmem:[#allocation40 + $0x6c] ss:$16 sps:$4 sm:$0xff]   ;;  %v17214_v7 = vld [vmem:[#allocation40 + $0x60] ss:$16 sps:$4 sm:$0xff]  }
0x3709   :  { %v10141_v55 = vmul.f32 %v13547_v31, %v17053_v25  ;;  %v13549_v33 = vpop.eup %13548  ;;  %v17182_v25 = vld [vmem:[#allocation40 + $0x24] ss:$16 sps:$4 sm:$0xff]   ;;  %v17217_v31 = vld [vmem:[#allocation40 + $0x68] ss:$16 sps:$4 sm:$0xff]  }
0x370b   :  { %v17169_v20 = vadd.f32 %v10142_v45, %v10141_v55  ;;  %v17220_v45 = vld [vmem:[#allocation40 + $0x84] ss:$16 sps:$4 sm:$0xff]   ;;  %v17226_v55 = vld [vmem:[#allocation40 + $0x80] ss:$16 sps:$4 sm:$0xff]  }
0x370c   :  { %18602 = vst [vmem:[#allocation113_spill] sm:$0xff] %v17220_v45  ;;  %18604 = vst [vmem:[#allocation115_spill] sm:$0xff] %v17226_v55 }
0x370d   :  { %13550 = vtanh.f32 %v17169_v20 }
0x3717   :  { %v13551_v3 = vpop.eup %13550 }
0x3718   :  { %v10145_v52 = vmul.f32 %v13551_v3, %v13549_v33  ;;  %v17229_v33 = vld [vmem:[#allocation40 + $0x88] ss:$16 sps:$4 sm:$0xff]   ;;  %v17232_v3 = vld [vmem:[#allocation40 + $0xa4] ss:$16 sps:$4 sm:$0xff]  }
0x3719   :  { %18605 = vst [vmem:[#allocation116_spill] sm:$0xff] %v17229_v33  ;;  %18606 = vst [vmem:[#allocation117_spill] sm:$0xff] %v17232_v3 }
0x371a   :  { %v17172_v48 = vpack.c.bf16 %v10145_v52, %v10145_v52  ;;  %v17235_v52 = vld [vmem:[#allocation40 + $0xac] ss:$16 sps:$4 sm:$0xff]  }
0x371b   :  { %18607 = vst [vmem:[#allocation118_spill] sm:$0xff] %v17235_v52 }
0x371c   :  { %10181 = vmatmul.mubr.bf16.vlgmr.msra.gmra.mrb[148].mxu0 %v17172_v48  ;;  %10222 = vmatmul.mubr.bf16.vlgmr.msra.gmra.mrb[124].mxu1 %v17172_v48 }
0x371d   :  { %10255 = vmatpush1.bf16.msra.mxu0 %v17176_v39  ;;  %10296 = vmatpush1.bf16.msra.mxu1 %v17179_v63 }
0x371e   :  { %10256 = vmatprep.subr.bf16.mxu0 %v17182_v25  ;;  %10297 = vmatprep.subr.bf16.mxu1 %v17185_v19 }
0x371f   :  { %10286 = vmatprep.mubr.bf16.mxu0 %v18332_v60  ;;  %10327 = vmatprep.mubr.bf16.mxu1 %v18332_v60 }
0x3721   :  { %10257 = vmatpush1.bf16.msra.mxu0 %v17190_v34  ;;  %10298 = vmatpush1.bf16.msra.mxu1 %v17193_v0 }
0x3722   :  { %10258 = vmatprep.subr.bf16.mxu0 %v17196_v9  ;;  %10299 = vmatprep.subr.bf16.mxu1 %v17199_v51 }
0x3725   :  { %10259 = vmatpush1.bf16.msra.mxu0 %v17202_v17  ;;  %10300 = vmatpush1.bf16.msra.mxu1 %v17205_v21 }
0x3726   :  { %10260 = vmatprep.subr.bf16.mxu0 %v17208_v56  ;;  %10301 = vmatprep.subr.bf16.mxu1 %v17211_v16 }
0x3729   :  { %10261 = vmatpush1.bf16.msra.mxu0 %v17214_v7  ;;  %10302 = vmatpush1.bf16.msra.mxu1 %v17217_v31 }
0x372a   :  { %10262 = vmatprep.subr.bf16.mxu0 %v17220_v45  ;;  %10303 = vmatprep.subr.bf16.mxu1 %v17223_v44  ;;  %v17238_v45 = vld [vmem:[#allocation40 + $0xa0] ss:$16 sps:$4 sm:$0xff]   ;;  %v17241_v44 = vld [vmem:[#allocation40 + $0xa8] ss:$16 sps:$4 sm:$0xff]  }
0x372b   :  { %18608 = vst [vmem:[#allocation119_spill] sm:$0xff] %v17238_v45  ;;  %18609 = vst [vmem:[#allocation120_spill] sm:$0xff] %v17241_v44 }
0x372d   :  { %10263 = vmatpush1.bf16.msra.mxu0 %v17226_v55  ;;  %10304 = vmatpush1.bf16.msra.mxu1 %v17229_v33  ;;  %v17244_v55 = vld [vmem:[#allocation40 + $0xc4] ss:$16 sps:$4 sm:$0xff]   ;;  %v17247_v33 = vld [vmem:[#allocation40 + $0xcc] ss:$16 sps:$4 sm:$0xff]  }
0x372e   :  { %10264 = vmatprep.subr.bf16.mxu0 %v17232_v3  ;;  %10305 = vmatprep.subr.bf16.mxu1 %v17235_v52  ;;  %18610 = vst [vmem:[#allocation121_spill] sm:$0xff] %v17244_v55  ;;  %18611 = vst [vmem:[#allocation122_spill] sm:$0xff] %v17247_v33  ;;  %v17250_v3 = vld [vmem:[#allocation40 + $0xc0] ss:$16 sps:$4 sm:$0xff]   ;;  %v17253_v52 = vld [vmem:[#allocation40 + $0xc8] ss:$16 sps:$4 sm:$0xff]  }
0x372f   :  { %18612 = vst [vmem:[#allocation123_spill] sm:$0xff] %v17250_v3  ;;  %18613 = vst [vmem:[#allocation162_spill] sm:$0xff] %v17253_v52 }
0x3731   :  { %10265 = vmatpush1.bf16.msra.mxu0 %v17238_v45  ;;  %10306 = vmatpush1.bf16.msra.mxu1 %v17241_v44  ;;  %v17256_v45 = vld [vmem:[#allocation40 + $0xe4] ss:$16 sps:$4 sm:$0xff]   ;;  %v17259_v44 = vld [vmem:[#allocation40 + $0xec] ss:$16 sps:$4 sm:$0xff]  }
0x3732   :  { %10266 = vmatprep.subr.bf16.mxu0 %v17244_v55  ;;  %10307 = vmatprep.subr.bf16.mxu1 %v17247_v33  ;;  %18614 = vst [vmem:[#allocation124_spill] sm:$0xff] %v17259_v44  ;;  %v17262_v55 = vld [vmem:[#allocation40 + $0xe0] ss:$16 sps:$4 sm:$0xff]   ;;  %v17265_v33 = vld [vmem:[#allocation40 + $0xe8] ss:$16 sps:$4 sm:$0xff]  }
0x3733   :  { %18615 = vst [vmem:[#allocation125_spill] sm:$0xff] %v17262_v55  ;;  %18616 = vst [vmem:[#allocation126_spill] sm:$0xff] %v17265_v33 }
0x3735   :  { %10267 = vmatpush1.bf16.msra.mxu0 %v17250_v3  ;;  %10308 = vmatpush1.bf16.msra.mxu1 %v17253_v52  ;;  %v17268_v3 = vld [vmem:[#allocation41 + $0x4] ss:$16 sps:$4 sm:$0xff]   ;;  %v17271_v52 = vld [vmem:[#allocation41 + $0xc] ss:$16 sps:$4 sm:$0xff]  }
0x3736   :  { %10268 = vmatprep.subr.bf16.mxu0 %v17256_v45  ;;  %10309 = vmatprep.subr.bf16.mxu1 %v17259_v44  ;;  %18617 = vst [vmem:[#allocation129_spill] sm:$0xff] %v17268_v3  ;;  %18618 = vst [vmem:[#allocation130_spill] sm:$0xff] %v17271_v52  ;;  %v17276_v44 = vld [vmem:[#allocation41] ss:$16 sps:$4 sm:$0xff]  }
0x3737   :  { %18619 = vst [vmem:[#allocation167_spill] sm:$0xff] %v17276_v44 }
0x3739   :  { %10269 = vmatpush1.bf16.msra.mxu0 %v17262_v55  ;;  %10310 = vmatpush1.bf16.msra.mxu1 %v17265_v33  ;;  %v17279_v55 = vld [vmem:[#allocation41 + $0x8] ss:$16 sps:$4 sm:$0xff]   ;;  %v17282_v33 = vld [vmem:[#allocation41 + $0x24] ss:$16 sps:$4 sm:$0xff]  }
0x373a   :  { %10366 = vmatprep.subr.bf16.mxu0 %v17268_v3  ;;  %10407 = vmatprep.subr.bf16.mxu1 %v17271_v52  ;;  %18620 = vst [vmem:[#allocation174_spill] sm:$0xff] %v17279_v55  ;;  %18621 = vst [vmem:[#allocation169_spill] sm:$0xff] %v17282_v33  ;;  %v17285_v3 = vld [vmem:[#allocation41 + $0x2c] ss:$16 sps:$4 sm:$0xff]   ;;  %v17288_v52 = vld [vmem:[#allocation41 + $0x20] ss:$16 sps:$4 sm:$0xff]  }
0x373b   :  { %18622 = vst [vmem:[#allocation176_spill] sm:$0xff] %v17285_v3  ;;  %18623 = vst [vmem:[#allocation127_spill] sm:$0xff] %v17288_v52 }
0x373c   :  { %10287 = vmatmul.mubr.bf16.vlgmr.msra.gmra.mrb[152].mxu0 %v17172_v48  ;;  %10328 = vmatmul.mubr.bf16.vlgmr.msra.gmra.mrb[128].mxu1 %v17172_v48  ;;  %v17291_v48 = vld [vmem:[#allocation41 + $0x28] ss:$16 sps:$4 sm:$0xff]  }
0x373d   :  { %10367 = vmatpush1.bf16.msra.mxu0 %v17276_v44  ;;  %10408 = vmatpush1.bf16.msra.mxu1 %v17279_v55  ;;  %18624 = vst [vmem:[#allocation163_spill] sm:$0xff] %v17291_v48  ;;  %v17294_v44 = vld [vmem:[#allocation41 + $0x44] ss:$16 sps:$4 sm:$0xff]   ;;  %v17297_v55 = vld [vmem:[#allocation41 + $0x4c] ss:$16 sps:$4 sm:$0xff]  }
0x373e   :  { %10368 = vmatprep.subr.bf16.mxu0 %v17282_v33  ;;  %10409 = vmatprep.subr.bf16.mxu1 %v17285_v3  ;;  %18625 = vst [vmem:[#allocation128_spill] sm:$0xff] %v17294_v44  ;;  %18626 = vst [vmem:[#allocation131_spill] sm:$0xff] %v17297_v55  ;;  %v17300_v33 = vld [vmem:[#allocation41 + $0x40] ss:$16 sps:$4 sm:$0xff]   ;;  %v17303_v3 = vld [vmem:[#allocation41 + $0x48] ss:$16 sps:$4 sm:$0xff]  }
0x373f   :  { %18627 = vst [vmem:[#allocation132_spill] sm:$0xff] %v17300_v33  ;;  %18628 = vst [vmem:[#allocation133_spill] sm:$0xff] %v17303_v3 }
0x3741   :  { %10369 = vmatpush1.bf16.msra.mxu0 %v17288_v52  ;;  %10410 = vmatpush1.bf16.msra.mxu1 %v17291_v48  ;;  %v17306_v52 = vld [vmem:[#allocation41 + $0x64] ss:$16 sps:$4 sm:$0xff]   ;;  %v17309_v48 = vld [vmem:[#allocation41 + $0x6c] ss:$16 sps:$4 sm:$0xff]  }
0x3742   :  { %10370 = vmatprep.subr.bf16.mxu0 %v17294_v44  ;;  %10411 = vmatprep.subr.bf16.mxu1 %v17297_v55  ;;  %18629 = vst [vmem:[#allocation134_spill] sm:$0xff] %v17306_v52  ;;  %18630 = vst [vmem:[#allocation135_spill] sm:$0xff] %v17309_v48  ;;  %v17312_v44 = vld [vmem:[#allocation41 + $0x60] ss:$16 sps:$4 sm:$0xff]   ;;  %v17315_v55 = vld [vmem:[#allocation41 + $0x68] ss:$16 sps:$4 sm:$0xff]  }
0x3743   :  { %18631 = vst [vmem:[#allocation136_spill] sm:$0xff] %v17312_v44  ;;  %18632 = vst [vmem:[#allocation137_spill] sm:$0xff] %v17315_v55 }
0x3745   :  { %10371 = vmatpush1.bf16.msra.mxu0 %v17300_v33  ;;  %10412 = vmatpush1.bf16.msra.mxu1 %v17303_v3  ;;  %v17318_v33 = vld [vmem:[#allocation41 + $0x84] ss:$16 sps:$4 sm:$0xff]   ;;  %v17321_v3 = vld [vmem:[#allocation41 + $0x8c] ss:$16 sps:$4 sm:$0xff]  }
0x3746   :  { %10372 = vmatprep.subr.bf16.mxu0 %v17306_v52  ;;  %10413 = vmatprep.subr.bf16.mxu1 %v17309_v48  ;;  %18633 = vst [vmem:[#allocation138_spill] sm:$0xff] %v17318_v33  ;;  %18634 = vst [vmem:[#allocation139_spill] sm:$0xff] %v17321_v3  ;;  %v17324_v52 = vld [vmem:[#allocation41 + $0x80] ss:$16 sps:$4 sm:$0xff]   ;;  %v17327_v48 = vld [vmem:[#allocation41 + $0x88] ss:$16 sps:$4 sm:$0xff]  }
0x3747   :  { %18635 = vst [vmem:[#allocation140_spill] sm:$0xff] %v17324_v52  ;;  %18636 = vst [vmem:[#allocation141_spill] sm:$0xff] %v17327_v48 }
0x3749   :  { %10373 = vmatpush1.bf16.msra.mxu0 %v17312_v44  ;;  %10414 = vmatpush1.bf16.msra.mxu1 %v17315_v55  ;;  %v17330_v44 = vld [vmem:[#allocation41 + $0xa4] ss:$16 sps:$4 sm:$0xff]   ;;  %v17333_v55 = vld [vmem:[#allocation41 + $0xac] ss:$16 sps:$4 sm:$0xff]  }
0x374a   :  { %10374 = vmatprep.subr.bf16.mxu0 %v17318_v33  ;;  %10415 = vmatprep.subr.bf16.mxu1 %v17321_v3  ;;  %18637 = vst [vmem:[#allocation142_spill] sm:$0xff] %v17330_v44  ;;  %18638 = vst [vmem:[#allocation143_spill] sm:$0xff] %v17333_v55  ;;  %v17336_v33 = vld [vmem:[#allocation41 + $0xa0] ss:$16 sps:$4 sm:$0xff]   ;;  %v17339_v3 = vld [vmem:[#allocation41 + $0xa8] ss:$16 sps:$4 sm:$0xff]  }
0x374b   :  { %18639 = vst [vmem:[#allocation144_spill] sm:$0xff] %v17336_v33  ;;  %18640 = vst [vmem:[#allocation145_spill] sm:$0xff] %v17339_v3 }
0x374d   :  { %10375 = vmatpush1.bf16.msra.mxu0 %v17324_v52  ;;  %10416 = vmatpush1.bf16.msra.mxu1 %v17327_v48  ;;  %v17342_v52 = vld [vmem:[#allocation41 + $0xc4] ss:$16 sps:$4 sm:$0xff]   ;;  %v17345_v48 = vld [vmem:[#allocation41 + $0xcc] ss:$16 sps:$4 sm:$0xff]  }
0x374e   :  { %10376 = vmatprep.subr.bf16.mxu0 %v17330_v44  ;;  %10417 = vmatprep.subr.bf16.mxu1 %v17333_v55  ;;  %18641 = vst [vmem:[#allocation147_spill] sm:$0xff] %v17342_v52  ;;  %18642 = vst [vmem:[#allocation148_spill] sm:$0xff] %v17345_v48  ;;  %v17348_v44 = vld [vmem:[#allocation41 + $0xc0] ss:$16 sps:$4 sm:$0xff]   ;;  %v17351_v55 = vld [vmem:[#allocation41 + $0xc8] ss:$16 sps:$4 sm:$0xff]  }
0x374f   :  { %18643 = vst [vmem:[#allocation149_spill] sm:$0xff] %v17348_v44  ;;  %18644 = vst [vmem:[#allocation150_spill] sm:$0xff] %v17351_v55 }
0x3751   :  { %10377 = vmatpush1.bf16.msra.mxu0 %v17336_v33  ;;  %10418 = vmatpush1.bf16.msra.mxu1 %v17339_v3 }
0x3752   :  { %10378 = vmatprep.subr.bf16.mxu0 %v17342_v52  ;;  %10419 = vmatprep.subr.bf16.mxu1 %v17345_v48 }
0x3755   :  { %10379 = vmatpush1.bf16.msra.mxu0 %v17348_v44  ;;  %10420 = vmatpush1.bf16.msra.mxu1 %v17351_v55 }
0x3756   :  { %10380 = vmatprep.subr.bf16.mxu0 %v18557_v62  ;;  %10421 = vmatprep.subr.bf16.mxu1 %v18558_v1  ;;  %v17390_v62 = vld [vmem:[#allocation40 + $0x4] ss:$16 sps:$4 sm:$0xff]  }
0x3759   :  { %10381 = vmatpush1.bf16.msra.mxu0 %v18559_v30  ;;  %10422 = vmatpush1.bf16.msra.mxu1 %v18560_v22 }
0x375a   :  { %10382 = vmatprep.subr.bf16.mxu0 %v18561_v46  ;;  %10423 = vmatprep.subr.bf16.mxu1 %v18562_v15 }
0x375d   :  { %10383 = vmatpush1.bf16.msra.mxu0 %v18563_v13  ;;  %10424 = vmatpush1.bf16.msra.mxu1 %v18564_v59 }
0x375e   :  { %10384 = vmatprep.subr.bf16.mxu0 %v18565_v6  ;;  %10425 = vmatprep.subr.bf16.mxu1 %v18566_v53 }
0x3761   :  { %10385 = vmatpush1.bf16.msra.mxu0 %v18567_v54  ;;  %10426 = vmatpush1.bf16.msra.mxu1 %v18568_v2 }
0x3762   :  { %10386 = vmatprep.subr.bf16.mxu0 %v18569_v27  ;;  %10427 = vmatprep.subr.bf16.mxu1 %v18570_v35 }
0x3765   :  { %10387 = vmatpush1.bf16.msra.mxu0 %v18571_v42  ;;  %10428 = vmatpush1.bf16.msra.mxu1 %v18572_v12  ;;  %v18645_v12 = vld [vmem:[#allocation104_spill] sm:$0xff] }
0x3766   :  { %10388 = vmatprep.subr.bf16.mxu0 %v18573_v58  ;;  %10429 = vmatprep.subr.bf16.mxu1 %v18574_v26 }
0x3769   :  { %10389 = vmatpush1.bf16.msra.mxu0 %v18575_v23  ;;  %10430 = vmatpush1.bf16.msra.mxu1 %v18576_v43 }
0x376a   :  { %10390 = vmatprep.subr.bf16.mxu0 %v18577_v28  ;;  %10431 = vmatprep.subr.bf16.mxu1 %v18578_v37 }
0x376d   :  { %10391 = vmatpush1.bf16.msra.mxu0 %v18579_v36  ;;  %10432 = vmatpush1.bf16.msra.mxu1 %v18580_v11 }
0x376e   :  { %10392 = vmatprep.subr.bf16.mxu0 %v18581_v49  ;;  %10433 = vmatprep.subr.bf16.mxu1 %v18582_v61 }
0x3771   :  { %10393 = vmatpush1.bf16.msra.mxu0 %v18583_v47  ;;  %10434 = vmatpush1.bf16.msra.mxu1 %v18584_v32 }
0x3772   :  { %10394 = vmatprep.subr.bf16.mxu0 %v18585_v14  ;;  %10435 = vmatprep.subr.bf16.mxu1 %v18586_v8 }
0x3775   :  { %10395 = vmatpush1.bf16.msra.mxu0 %v18587_v41  ;;  %10436 = vmatpush1.bf16.msra.mxu1 %v18588_v57  ;;  %v18646_v57 = vld [vmem:[#allocation178_spill] sm:$0xff] }
0x3776   :  { %10396 = vmatprep.subr.bf16.mxu0 %v18589_v38  ;;  %10437 = vmatprep.subr.bf16.mxu1 %v18590_v4  ;;  %v18647_v4 = vld [vmem:[#allocation181_spill] sm:$0xff] }
0x3779   :  { %10397 = vmatpush1.bf16.msra.mxu0 %v18591_v5  ;;  %10438 = vmatpush1.bf16.msra.mxu1 %v18592_v50 }
0x377a   :  { %10472 = vmatprep.subr.bf16.mxu0 %v17390_v62  ;;  %10513 = vmatprep.subr.bf16.mxu1 %v17153_v24 }
0x37ef   :  { %v10182_v1 = vpop.f32.mrb[148].mxu0  ;;  %v10223_v30 = vpop.f32.mrb[124].mxu1 }
0x37f0   :  { %v10183_v22 = vadd.f32 %v10182_v1, %v18594_v40  ;;  %v10184_v46 = vpop.f32.mrb[149].mxu0  ;;  %v10225_v15 = vpop.f32.mrb[125].mxu1  ;;  %v10224_v58 = vadd.f32 %v10223_v30, %v18645_v12  ;;  %v18648_v30 = vld [vmem:[#allocation182_spill] sm:$0xff] }
0x37f1   :  { %v10185_v13 = vadd.f32 %v10184_v46, %v18595_v10  ;;  %v10186_v59 = vpop.f32.mrb[150].mxu0  ;;  %v10227_v6 = vpop.f32.mrb[126].mxu1  ;;  %v10226_v35 = vadd.f32 %v10225_v15, %v18596_v29  ;;  %v18649_v46 = vld [vmem:[#allocation183_spill] sm:$0xff] }
0x37f2   :  { %v11855_v53 = vmul.f32 -1.442695, %v10183_v22  ;;  %v10187_v54 = vpop.f32.mrb[151].mxu0  ;;  %v10228_v2 = vpop.f32.mrb[127].mxu1 }
0x37f3   :  { %v11856_v27 = vmul.f32 -1.442695, %v10185_v13  ;;  %v11857_v42 = vmul.f32 -1.442695, %v10226_v35 }
0x37f4   :  { %13552 = vpow2.f32 %v11855_v53 }
0x37f5   :  { %13554 = vpow2.f32 %v11856_v27 }
0x37f6   :  { %13556 = vpow2.f32 %v11857_v42 }
0x37f7   :  { %13558 = vtanh.f32 %v10224_v58 }
0x37fe   :  { %v13553_v26 = vpop.eup %13552 }
0x37ff   :  { %v13555_v23 = vpop.eup %13554  ;;  %v10233_v43 = vadd.f32 1.0, %v13553_v26 }
0x3800   :  { %v10239_v28 = vadd.f32 1.0, %v13555_v23  ;;  %v13557_v37 = vpop.eup %13556 }
0x3801   :  { %13560 = vrcp.f32 %v10233_v43  ;;  %v13559_v36 = vpop.eup %13558  ;;  %v10246_v47 = vadd.f32 1.0, %v13557_v37 }
0x3802   :  { %13562 = vrcp.f32 %v10239_v28 }
0x3803   :  { %13564 = vrcp.f32 %v10246_v47 }
0x380b   :  { %v13561_v11 = vpop.eup %13560 }
0x380c   :  { %v13563_v49 = vpop.eup %13562  ;;  %v10250_v61 = vmul.f32 %v13561_v11, %v13559_v36 }
0x380d   :  { %v10249_v32 = vmul.f32 %v13563_v49, %v17161_v18  ;;  %v13565_v2 = vpop.eup %13564 }
0x380f   :  { %v10288_v14 = vpop.f32.mrb[152].mxu0  ;;  %v10329_v8 = vpop.f32.mrb[128].mxu1  ;;  %v17399_v41 = vadd.f32 %v10250_v61, %v10249_v32 }
0x3810   :  { %v10336_v38 = vadd.f32 %v10288_v14, %v18646_v57  ;;  %v10338_v5 = vadd.f32 %v10329_v8, %v18647_v4  ;;  %v10290_v50 = vpop.f32.mrb[153].mxu0  ;;  %v10331_v1 = vpop.f32.mrb[129].mxu1 }
0x3811   :  { %v10337_v22 = vadd.f32 %v10290_v50, %v18648_v30  ;;  %v10339_v15 = vadd.f32 %v10331_v1, %v18649_v46  ;;  %v10292_v13 = vpop.f32.mrb[154].mxu0  ;;  %v10333_v59 = vpop.f32.mrb[130].mxu1  ;;  %13566 = vtanh.f32 %v17399_v41  ;;  %v18652_v50 = vld [vmem:[#allocation115_spill] sm:$0xff]  ;;  %v18653_v1 = vld [vmem:[#allocation116_spill] sm:$0xff]  ;;  %v18654_v30 = vld [vmem:[#allocation117_spill] sm:$0xff] }
0x3812   :  { %v11858_v18 = vmul.f32 -1.442695, %v10336_v38  ;;  %v10293_v6 = vpop.f32.mrb[155].mxu0  ;;  %v10334_v53 = vpop.f32.mrb[131].mxu1  ;;  %v18656_v46 = vld [vmem:[#allocation119_spill] sm:$0xff]  ;;  %v18658_v13 = vld [vmem:[#allocation121_spill] sm:$0xff] }
0x3813   :  { %v11859_v54 = vmul.f32 -1.442695, %v10337_v22  ;;  %v11860_v35 = vmul.f32 -1.442695, %v10339_v15  ;;  %v18655_v22 = vld [vmem:[#allocation118_spill] sm:$0xff]  ;;  %v18657_v15 = vld [vmem:[#allocation120_spill] sm:$0xff] }
0x3814   :  { %13568 = vpow2.f32 %v11858_v18  ;;  %v18659_v59 = vld [vmem:[#allocation122_spill] sm:$0xff]  ;;  %v18660_v18 = vld [vmem:[#allocation123_spill] sm:$0xff]  ;;  %v18662_v53 = vld [vmem:[#allocation124_spill] sm:$0xff] }
0x3815   :  { %13570 = vpow2.f32 %v11859_v54  ;;  %v18661_v6 = vld [vmem:[#allocation162_spill] sm:$0xff]  ;;  %v18663_v54 = vld [vmem:[#allocation125_spill] sm:$0xff] }
0x3816   :  { %13572 = vpow2.f32 %v11860_v35  ;;  %v18666_v35 = vld [vmem:[#allocation130_spill] sm:$0xff] }
0x3817   :  { %13574 = vtanh.f32 %v10338_v5  ;;  %v18651_v5 = vld [vmem:[#allocation114_spill] sm:$0xff] }
0x381b   :  { %v13567_v27 = vpop.eup %13566 }
0x381c   :  { %v10253_v42 = vmul.f32 %v13567_v27, %v13565_v2  ;;  %v18664_v2 = vld [vmem:[#allocation126_spill] sm:$0xff]  ;;  %v18665_v27 = vld [vmem:[#allocation129_spill] sm:$0xff] }
0x381e   :  { %v13569_v58 = vpop.eup %13568  ;;  %v10365_v26 = vpack.c.bf16 %v10253_v42, %v10253_v42  ;;  %v18667_v42 = vld [vmem:[#allocation167_spill] sm:$0xff] }
0x381f   :  { %v13571_v23 = vpop.eup %13570  ;;  %v10343_v43 = vadd.f32 1.0, %v13569_v58  ;;  %v18668_v58 = vld [vmem:[#allocation174_spill] sm:$0xff] }
0x3820   :  { %v10349_v28 = vadd.f32 1.0, %v13571_v23  ;;  %10398 = vmatprep.mubr.bf16.mxu0 %v10365_v26  ;;  %10439 = vmatprep.mubr.bf16.mxu1 %v10365_v26  ;;  %v13573_v37 = vpop.eup %13572  ;;  %v18669_v26 = vld [vmem:[#allocation169_spill] sm:$0xff]  ;;  %v18670_v23 = vld [vmem:[#allocation176_spill] sm:$0xff] }
0x3821   :  { %13576 = vrcp.f32 %v10343_v43  ;;  %v13575_v36 = vpop.eup %13574  ;;  %v10356_v47 = vadd.f32 1.0, %v13573_v37  ;;  %v18671_v43 = vld [vmem:[#allocation127_spill] sm:$0xff]  ;;  %v18673_v37 = vld [vmem:[#allocation128_spill] sm:$0xff] }
0x3822   :  { %13578 = vrcp.f32 %v10349_v28  ;;  %v18672_v28 = vld [vmem:[#allocation163_spill] sm:$0xff] }
0x3823   :  { %13580 = vrcp.f32 %v10356_v47  ;;  %v18678_v47 = vld [vmem:[#allocation135_spill] sm:$0xff] }
0x382b   :  { %v13577_v11 = vpop.eup %13576 }
0x382c   :  { %v13579_v49 = vpop.eup %13578  ;;  %v10360_v61 = vmul.f32 %v13577_v11, %v13575_v36  ;;  %v18674_v36 = vld [vmem:[#allocation131_spill] sm:$0xff]  ;;  %v18675_v11 = vld [vmem:[#allocation132_spill] sm:$0xff] }
0x382d   :  { %v10359_v32 = vmul.f32 %v13579_v49, %v17169_v20  ;;  %v13581_v8 = vpop.eup %13580  ;;  %v18650_v20 = vld [vmem:[#allocation113_spill] sm:$0xff] }
0x382e   :  { %v18676_v49 = vld [vmem:[#allocation133_spill] sm:$0xff] }
0x382f   :  { %v17407_v14 = vadd.f32 %v10360_v61, %v10359_v32  ;;  %v18677_v61 = vld [vmem:[#allocation134_spill] sm:$0xff]  ;;  %v18679_v32 = vld [vmem:[#allocation136_spill] sm:$0xff] }
0x3831   :  { %13582 = vtanh.f32 %v17407_v14 }
0x383b   :  { %v13583_v57 = vpop.eup %13582 }
0x383c   :  { %v10363_v38 = vmul.f32 %v13583_v57, %v13581_v8  ;;  %v18680_v8 = vld [vmem:[#allocation137_spill] sm:$0xff]  ;;  %v18681_v57 = vld [vmem:[#allocation138_spill] sm:$0xff] }
0x383e   :  { %v10364_v4 = vpack.c.bf16 %v10363_v38, %v10363_v38  ;;  %v18682_v38 = vld [vmem:[#allocation139_spill] sm:$0xff] }
0x3840   :  { %10399 = vmatmul.mubr.bf16.vlgmr.msra.gmra.mrb[156].mxu0 %v10364_v4  ;;  %10440 = vmatmul.mubr.bf16.vlgmr.msra.gmra.mrb[132].mxu1 %v10364_v4 }
0x3841   :  { %10473 = vmatpush1.bf16.msra.mxu0 %v17176_v39  ;;  %10514 = vmatpush1.bf16.msra.mxu1 %v17179_v63 }
0x3842   :  { %10474 = vmatprep.subr.bf16.mxu0 %v17182_v25  ;;  %10515 = vmatprep.subr.bf16.mxu1 %v17185_v19 }
0x3843   :  { %10504 = vmatprep.mubr.bf16.mxu0 %v18332_v60  ;;  %10545 = vmatprep.mubr.bf16.mxu1 %v18332_v60 }
0x3845   :  { %10475 = vmatpush1.bf16.msra.mxu0 %v17190_v34  ;;  %10516 = vmatpush1.bf16.msra.mxu1 %v17193_v0 }
0x3846   :  { %10476 = vmatprep.subr.bf16.mxu0 %v17196_v9  ;;  %10517 = vmatprep.subr.bf16.mxu1 %v17199_v51 }
0x3849   :  { %10477 = vmatpush1.bf16.msra.mxu0 %v17202_v17  ;;  %10518 = vmatpush1.bf16.msra.mxu1 %v17205_v21 }
0x384a   :  { %10478 = vmatprep.subr.bf16.mxu0 %v17208_v56  ;;  %10519 = vmatprep.subr.bf16.mxu1 %v17211_v16 }
0x384d   :  { %10479 = vmatpush1.bf16.msra.mxu0 %v17214_v7  ;;  %10520 = vmatpush1.bf16.msra.mxu1 %v17217_v31 }
0x384e   :  { %10480 = vmatprep.subr.bf16.mxu0 %v18650_v20  ;;  %10521 = vmatprep.subr.bf16.mxu1 %v18651_v5 }
0x3851   :  { %10481 = vmatpush1.bf16.msra.mxu0 %v18652_v50  ;;  %10522 = vmatpush1.bf16.msra.mxu1 %v18653_v1 }
0x3852   :  { %10482 = vmatprep.subr.bf16.mxu0 %v18654_v30  ;;  %10523 = vmatprep.subr.bf16.mxu1 %v18655_v22 }
0x3855   :  { %10483 = vmatpush1.bf16.msra.mxu0 %v18656_v46  ;;  %10524 = vmatpush1.bf16.msra.mxu1 %v18657_v15 }
0x3856   :  { %10484 = vmatprep.subr.bf16.mxu0 %v18658_v13  ;;  %10525 = vmatprep.subr.bf16.mxu1 %v18659_v59 }
0x3859   :  { %10485 = vmatpush1.bf16.msra.mxu0 %v18660_v18  ;;  %10526 = vmatpush1.bf16.msra.mxu1 %v18661_v6 }
0x385a   :  { %10486 = vmatprep.subr.bf16.mxu0 %v17256_v45  ;;  %10527 = vmatprep.subr.bf16.mxu1 %v18662_v53 }
0x385d   :  { %10487 = vmatpush1.bf16.msra.mxu0 %v18663_v54  ;;  %10528 = vmatpush1.bf16.msra.mxu1 %v18664_v2 }
0x385e   :  { %10584 = vmatprep.subr.bf16.mxu0 %v18665_v27  ;;  %10625 = vmatprep.subr.bf16.mxu1 %v18666_v35 }
0x3860   :  { %10505 = vmatmul.mubr.bf16.vlgmr.msra.gmra.mrb[160].mxu0 %v10364_v4  ;;  %10546 = vmatmul.mubr.bf16.vlgmr.msra.gmra.mrb[136].mxu1 %v10364_v4  ;;  %v18683_v4 = vld [vmem:[#allocation140_spill] sm:$0xff] }
0x3861   :  { %10585 = vmatpush1.bf16.msra.mxu0 %v18667_v42  ;;  %10626 = vmatpush1.bf16.msra.mxu1 %v18668_v58 }
0x3862   :  { %10586 = vmatprep.subr.bf16.mxu0 %v18669_v26  ;;  %10627 = vmatprep.subr.bf16.mxu1 %v18670_v23 }
0x3865   :  { %10587 = vmatpush1.bf16.msra.mxu0 %v18671_v43  ;;  %10628 = vmatpush1.bf16.msra.mxu1 %v18672_v28 }
0x3866   :  { %10588 = vmatprep.subr.bf16.mxu0 %v18673_v37  ;;  %10629 = vmatprep.subr.bf16.mxu1 %v18674_v36  ;;  %v18684_v37 = vld [vmem:[#allocation141_spill] sm:$0xff]  ;;  %v18685_v36 = vld [vmem:[#allocation142_spill] sm:$0xff] }
0x3869   :  { %10589 = vmatpush1.bf16.msra.mxu0 %v18675_v11  ;;  %10630 = vmatpush1.bf16.msra.mxu1 %v18676_v49  ;;  %v18686_v11 = vld [vmem:[#allocation143_spill] sm:$0xff] }
0x386a   :  { %10590 = vmatprep.subr.bf16.mxu0 %v18677_v61  ;;  %10631 = vmatprep.subr.bf16.mxu1 %v18678_v47 }
0x386d   :  { %10591 = vmatpush1.bf16.msra.mxu0 %v18679_v32  ;;  %10632 = vmatpush1.bf16.msra.mxu1 %v18680_v8 }
0x386e   :  { %10592 = vmatprep.subr.bf16.mxu0 %v18681_v57  ;;  %10633 = vmatprep.subr.bf16.mxu1 %v18682_v38  ;;  %v17470_v57 = vld [vmem:[#allocation41 + $0xe4] ss:$16 sps:$4 sm:$0xff]  }
0x386f   :  { %18687 = vst [vmem:[#allocation151_spill] sm:$0xff] %v17470_v57 }
0x3871   :  { %10593 = vmatpush1.bf16.msra.mxu0 %v18683_v4  ;;  %10634 = vmatpush1.bf16.msra.mxu1 %v18684_v37  ;;  %v17473_v4 = vld [vmem:[#allocation41 + $0xec] ss:$16 sps:$4 sm:$0xff]  }
0x3872   :  { %10594 = vmatprep.subr.bf16.mxu0 %v18685_v36  ;;  %10635 = vmatprep.subr.bf16.mxu1 %v18686_v11  ;;  %18688 = vst [vmem:[#allocation152_spill] sm:$0xff] %v17473_v4  ;;  %v17476_v36 = vld [vmem:[#allocation41 + $0xe0] ss:$16 sps:$4 sm:$0xff]  }
0x3873   :  { %18689 = vst [vmem:[#allocation153_spill] sm:$0xff] %v17476_v36 }
0x3875   :  { %10595 = vmatpush1.bf16.msra.mxu0 %v17336_v33  ;;  %10636 = vmatpush1.bf16.msra.mxu1 %v17339_v3  ;;  %v17479_v33 = vld [vmem:[#allocation41 + $0xe8] ss:$16 sps:$4 sm:$0xff]  }
0x3876   :  { %10596 = vmatprep.subr.bf16.mxu0 %v17342_v52  ;;  %10637 = vmatprep.subr.bf16.mxu1 %v17345_v48  ;;  %18690 = vst [vmem:[#allocation154_spill] sm:$0xff] %v17479_v33  ;;  %v17482_v52 = vld [vmem:[#allocation41 + $0x104] ss:$16 sps:$4 sm:$0xff]  }
0x3877   :  { %18691 = vst [vmem:[#allocation155_spill] sm:$0xff] %v17482_v52 }
0x3879   :  { %10597 = vmatpush1.bf16.msra.mxu0 %v17348_v44  ;;  %10638 = vmatpush1.bf16.msra.mxu1 %v17351_v55  ;;  %v17485_v44 = vld [vmem:[#allocation41 + $0x10c] ss:$16 sps:$4 sm:$0xff]  }
0x387a   :  { %10598 = vmatprep.subr.bf16.mxu0 %v17470_v57  ;;  %10639 = vmatprep.subr.bf16.mxu1 %v17473_v4  ;;  %18692 = vst [vmem:[#allocation156_spill] sm:$0xff] %v17485_v44  ;;  %v17488_v57 = vld [vmem:[#allocation41 + $0x100] ss:$16 sps:$4 sm:$0xff]   ;;  %v17491_v4 = vld [vmem:[#allocation41 + $0x108] ss:$16 sps:$4 sm:$0xff]  }
0x387b   :  { %18693 = vst [vmem:[#allocation157_spill] sm:$0xff] %v17488_v57  ;;  %18694 = vst [vmem:[#allocation158_spill] sm:$0xff] %v17491_v4 }
0x387d   :  { %10599 = vmatpush1.bf16.msra.mxu0 %v17476_v36  ;;  %10640 = vmatpush1.bf16.msra.mxu1 %v17479_v33  ;;  %v17494_v36 = vld [vmem:[#allocation41 + $0x124] ss:$16 sps:$4 sm:$0xff]   ;;  %v17497_v33 = vld [vmem:[#allocation41 + $0x12c] ss:$16 sps:$4 sm:$0xff]  }
0x387e   :  { %10600 = vmatprep.subr.bf16.mxu0 %v17482_v52  ;;  %10641 = vmatprep.subr.bf16.mxu1 %v17485_v44  ;;  %18695 = vst [vmem:[#allocation159_spill] sm:$0xff] %v17494_v36  ;;  %18696 = vst [vmem:[#allocation160_spill] sm:$0xff] %v17497_v33  ;;  %v17500_v52 = vld [vmem:[#allocation41 + $0x120] ss:$16 sps:$4 sm:$0xff]   ;;  %v17503_v44 = vld [vmem:[#allocation41 + $0x128] ss:$16 sps:$4 sm:$0xff]  }
0x387f   :  { %18697 = vst [vmem:[#allocation161_spill] sm:$0xff] %v17500_v52  ;;  %18698 = vst [vmem:[#allocation98_spill] sm:$0xff] %v17503_v44 }
0x3881   :  { %10601 = vmatpush1.bf16.msra.mxu0 %v17488_v57  ;;  %10642 = vmatpush1.bf16.msra.mxu1 %v17491_v4  ;;  %v17506_v57 = vld [vmem:[#allocation41 + $0x144] ss:$16 sps:$4 sm:$0xff]   ;;  %v17509_v4 = vld [vmem:[#allocation41 + $0x14c] ss:$16 sps:$4 sm:$0xff]  }
0x3882   :  { %10602 = vmatprep.subr.bf16.mxu0 %v17494_v36  ;;  %10643 = vmatprep.subr.bf16.mxu1 %v17497_v33  ;;  %18699 = vst [vmem:[#allocation96_spill] sm:$0xff] %v17506_v57  ;;  %18700 = vst [vmem:[#allocation95_spill] sm:$0xff] %v17509_v4  ;;  %v17512_v36 = vld [vmem:[#allocation41 + $0x140] ss:$16 sps:$4 sm:$0xff]   ;;  %v17515_v33 = vld [vmem:[#allocation41 + $0x148] ss:$16 sps:$4 sm:$0xff]  }
0x3883   :  { %18701 = vst [vmem:[#allocation97_spill] sm:$0xff] %v17512_v36  ;;  %18702 = vst [vmem:[#allocation94_spill] sm:$0xff] %v17515_v33 }
0x3885   :  { %10603 = vmatpush1.bf16.msra.mxu0 %v17500_v52  ;;  %10644 = vmatpush1.bf16.msra.mxu1 %v17503_v44  ;;  %v17518_v52 = vld [vmem:[#allocation41 + $0x164] ss:$16 sps:$4 sm:$0xff]   ;;  %v17521_v44 = vld [vmem:[#allocation41 + $0x16c] ss:$16 sps:$4 sm:$0xff]  }
0x3886   :  { %10604 = vmatprep.subr.bf16.mxu0 %v17506_v57  ;;  %10645 = vmatprep.subr.bf16.mxu1 %v17509_v4  ;;  %18703 = vst [vmem:[#allocation164_spill] sm:$0xff] %v17518_v52  ;;  %18704 = vst [vmem:[#allocation171_spill] sm:$0xff] %v17521_v44  ;;  %v17524_v57 = vld [vmem:[#allocation41 + $0x160] ss:$16 sps:$4 sm:$0xff]   ;;  %v17527_v4 = vld [vmem:[#allocation41 + $0x168] ss:$16 sps:$4 sm:$0xff]  }
0x3887   :  { %18705 = vst [vmem:[#allocation165_spill] sm:$0xff] %v17524_v57  ;;  %18706 = vst [vmem:[#allocation172_spill] sm:$0xff] %v17527_v4 }
0x3889   :  { %10605 = vmatpush1.bf16.msra.mxu0 %v17512_v36  ;;  %10646 = vmatpush1.bf16.msra.mxu1 %v17515_v33  ;;  %v17530_v36 = vld [vmem:[#allocation41 + $0x184] ss:$16 sps:$4 sm:$0xff]   ;;  %v17533_v33 = vld [vmem:[#allocation41 + $0x18c] ss:$16 sps:$4 sm:$0xff]  }
0x388a   :  { %10606 = vmatprep.subr.bf16.mxu0 %v17518_v52  ;;  %10647 = vmatprep.subr.bf16.mxu1 %v17521_v44  ;;  %18707 = vst [vmem:[#allocation105_spill] sm:$0xff] %v17530_v36  ;;  %18708 = vst [vmem:[#allocation166_spill] sm:$0xff] %v17533_v33  ;;  %v17536_v52 = vld [vmem:[#allocation41 + $0x180] ss:$16 sps:$4 sm:$0xff]   ;;  %v17539_v44 = vld [vmem:[#allocation41 + $0x188] ss:$16 sps:$4 sm:$0xff]  }
0x388b   :  { %18709 = vst [vmem:[#allocation173_spill] sm:$0xff] %v17536_v52  ;;  %18710 = vst [vmem:[#allocation168_spill] sm:$0xff] %v17539_v44 }
0x388d   :  { %10607 = vmatpush1.bf16.msra.mxu0 %v17524_v57  ;;  %10648 = vmatpush1.bf16.msra.mxu1 %v17527_v4  ;;  %v17542_v57 = vld [vmem:[#allocation41 + $0x1a4] ss:$16 sps:$4 sm:$0xff]   ;;  %v17545_v4 = vld [vmem:[#allocation41 + $0x1ac] ss:$16 sps:$4 sm:$0xff]  }
0x388e   :  { %10608 = vmatprep.subr.bf16.mxu0 %v17530_v36  ;;  %10649 = vmatprep.subr.bf16.mxu1 %v17533_v33  ;;  %18711 = vst [vmem:[#allocation175_spill] sm:$0xff] %v17542_v57  ;;  %18712 = vst [vmem:[#allocation106_spill] sm:$0xff] %v17545_v4  ;;  %v17548_v36 = vld [vmem:[#allocation41 + $0x1a0] ss:$16 sps:$4 sm:$0xff]   ;;  %v17551_v33 = vld [vmem:[#allocation41 + $0x1a8] ss:$16 sps:$4 sm:$0xff]  }
0x388f   :  { %18713 = vst [vmem:[#allocation107_spill] sm:$0xff] %v17548_v36  ;;  %18714 = vst [vmem:[#allocation108_spill] sm:$0xff] %v17551_v33 }
0x3891   :  { %10609 = vmatpush1.bf16.msra.mxu0 %v17536_v52  ;;  %10650 = vmatpush1.bf16.msra.mxu1 %v17539_v44  ;;  %v17554_v52 = vld [vmem:[#allocation41 + $0x1c4] ss:$16 sps:$4 sm:$0xff]   ;;  %v17557_v44 = vld [vmem:[#allocation41 + $0x1cc] ss:$16 sps:$4 sm:$0xff]  }
0x3892   :  { %10610 = vmatprep.subr.bf16.mxu0 %v17542_v57  ;;  %10651 = vmatprep.subr.bf16.mxu1 %v17545_v4  ;;  %18715 = vst [vmem:[#allocation109_spill] sm:$0xff] %v17554_v52  ;;  %18716 = vst [vmem:[#allocation110_spill] sm:$0xff] %v17557_v44  ;;  %v17560_v57 = vld [vmem:[#allocation41 + $0x1c0] ss:$16 sps:$4 sm:$0xff]   ;;  %v17563_v4 = vld [vmem:[#allocation41 + $0x1c8] ss:$16 sps:$4 sm:$0xff]  }
0x3893   :  { %18717 = vst [vmem:[#allocation111_spill] sm:$0xff] %v17560_v57  ;;  %18718 = vst [vmem:[#allocation112_spill] sm:$0xff] %v17563_v4 }
0x3895   :  { %10611 = vmatpush1.bf16.msra.mxu0 %v17548_v36  ;;  %10652 = vmatpush1.bf16.msra.mxu1 %v17551_v33  ;;  %v17566_v36 = vld [vmem:[#allocation41 + $0x1e4] ss:$16 sps:$4 sm:$0xff]   ;;  %v17569_v33 = vld [vmem:[#allocation41 + $0x1ec] ss:$16 sps:$4 sm:$0xff]  }
0x3896   :  { %10612 = vmatprep.subr.bf16.mxu0 %v17554_v52  ;;  %10653 = vmatprep.subr.bf16.mxu1 %v17557_v44  ;;  %18719 = vst [vmem:[#allocation146_spill] sm:$0xff] %v17566_v36  ;;  %18720 = vst [vmem:[#allocation170_spill] sm:$0xff] %v17569_v33  ;;  %v17572_v52 = vld [vmem:[#allocation41 + $0x1e0] ss:$16 sps:$4 sm:$0xff]   ;;  %v17575_v44 = vld [vmem:[#allocation41 + $0x1e8] ss:$16 sps:$4 sm:$0xff]  }
0x3897   :  { %18721 = vst [vmem:[#allocation179_spill] sm:$0xff] %v17572_v52  ;;  %18722 = vst [vmem:[#allocation177_spill] sm:$0xff] %v17575_v44 }
0x3899   :  { %10613 = vmatpush1.bf16.msra.mxu0 %v17560_v57  ;;  %10654 = vmatpush1.bf16.msra.mxu1 %v17563_v4 }
0x389a   :  { %10614 = vmatprep.subr.bf16.mxu0 %v17566_v36  ;;  %10655 = vmatprep.subr.bf16.mxu1 %v17569_v33 }
0x389d   :  { %10615 = vmatpush1.bf16.msra.mxu0 %v17572_v52  ;;  %10656 = vmatpush1.bf16.msra.mxu1 %v17575_v44 }
0x389e   :  { %10690 = vmatprep.subr.bf16.mxu0 %v17390_v62  ;;  %10731 = vmatprep.subr.bf16.mxu1 %v17153_v24 }
0x3913   :  { %v10400_v57 = vpop.f32.mrb[156].mxu0  ;;  %v10441_v4 = vpop.f32.mrb[132].mxu1 }
0x3914   :  { %v10401_v36 = vadd.f32 %v10400_v57, %v18594_v40  ;;  %v10402_v55 = vpop.f32.mrb[157].mxu0  ;;  %v10443_v48 = vpop.f32.mrb[133].mxu1  ;;  %v10442_v24 = vadd.f32 %v10441_v4, %v18645_v12  ;;  %v18723_v4 = vld [vmem:[#allocation184_spill] sm:$0xff]  ;;  %v18726_v12 = vld [vmem:[#allocation187_spill] sm:$0xff] }
0x3915   :  { %v10403_v33 = vadd.f32 %v10402_v55, %v18595_v10  ;;  %v10404_v3 = vpop.f32.mrb[158].mxu0  ;;  %v10445_v11 = vpop.f32.mrb[134].mxu1  ;;  %v10444_v62 = vadd.f32 %v10443_v48, %v18596_v29 }
0x3916   :  { %v11861_v37 = vmul.f32 -1.442695, %v10401_v36  ;;  %v10405_v52 = vpop.f32.mrb[159].mxu0  ;;  %v10446_v38 = vpop.f32.mrb[135].mxu1 }
0x3917   :  { %v11862_v32 = vmul.f32 -1.442695, %v10403_v33  ;;  %v11863_v44 = vmul.f32 -1.442695, %v10444_v62 }
0x3918   :  { %13584 = vpow2.f32 %v11861_v37 }
0x3919   :  { %13586 = vpow2.f32 %v11862_v32 }
0x391a   :  { %13588 = vpow2.f32 %v11863_v44  ;;  %v18724_v44 = vld [vmem:[#allocation185_spill] sm:$0xff] }
0x391b   :  { %13590 = vtanh.f32 %v10442_v24 }
0x3922   :  { %v13585_v8 = vpop.eup %13584 }
0x3923   :  { %v13587_v61 = vpop.eup %13586  ;;  %v10451_v57 = vadd.f32 1.0, %v13585_v8 }
0x3924   :  { %v10457_v40 = vadd.f32 1.0, %v13587_v61  ;;  %v13589_v55 = vpop.eup %13588 }
0x3925   :  { %13592 = vrcp.f32 %v10451_v57  ;;  %v13591_v3 = vpop.eup %13590  ;;  %v10464_v37 = vadd.f32 1.0, %v13589_v55 }
0x3926   :  { %13594 = vrcp.f32 %v10457_v40  ;;  %v18725_v40 = vld [vmem:[#allocation186_spill] sm:$0xff] }
0x3927   :  { %13596 = vrcp.f32 %v10464_v37 }
0x392f   :  { %v13593_v52 = vpop.eup %13592 }
0x3930   :  { %v13595_v36 = vpop.eup %13594  ;;  %v10468_v33 = vmul.f32 %v13593_v52, %v13591_v3 }
0x3931   :  { %v10467_v11 = vmul.f32 %v13595_v36, %v17399_v41 }
0x3933   :  { %v10506_v48 = vpop.f32.mrb[160].mxu0  ;;  %v10547_v32 = vpop.f32.mrb[136].mxu1  ;;  %v17585_v38 = vadd.f32 %v10468_v33, %v10467_v11 }
0x3934   :  { %v10554_v8 = vadd.f32 %v10506_v48, %v18723_v4  ;;  %v10556_v62 = vadd.f32 %v10547_v32, %v18724_v44  ;;  %v10508_v61 = vpop.f32.mrb[161].mxu0  ;;  %v10549_v24 = vpop.f32.mrb[137].mxu1 }
0x3935   :  { %v10555_v57 = vadd.f32 %v10508_v61, %v18725_v40  ;;  %v10557_v29 = vadd.f32 %v10549_v24, %v18726_v12  ;;  %v10510_v10 = vpop.f32.mrb[162].mxu0  ;;  %v10551_v3 = vpop.f32.mrb[138].mxu1  ;;  %13598 = vtanh.f32 %v17585_v38 }
0x3936   :  { %v11864_v41 = vmul.f32 -1.442695, %v10554_v8  ;;  %v10511_v55 = vpop.f32.mrb[163].mxu0  ;;  %v10552_v52 = vpop.f32.mrb[139].mxu1 }
0x3937   :  { %v11865_v36 = vmul.f32 -1.442695, %v10555_v57  ;;  %v13597_v33 = vpop.eup %13596  ;;  %v11866_v11 = vmul.f32 -1.442695, %v10557_v29 }
0x3938   :  { %13600 = vpow2.f32 %v11864_v41 }
0x3939   :  { %13602 = vpow2.f32 %v11865_v36 }
0x393a   :  { %13604 = vpow2.f32 %v11866_v11  ;;  %v18771_v11 = vld [vmem:[#allocation108_spill] sm:$0xff] }
0x393b   :  { %13606 = vtanh.f32 %v10556_v62 }
0x393f   :  { %v13599_v37 = vpop.eup %13598 }
0x3940   :  { %v10471_v48 = vmul.f32 %v13599_v37, %v13597_v33  ;;  %v18769_v33 = vld [vmem:[#allocation106_spill] sm:$0xff]  ;;  %v18770_v37 = vld [vmem:[#allocation175_spill] sm:$0xff] }
0x3942   :  { %v13601_v32 = vpop.eup %13600  ;;  %v10583_v4 = vpack.c.bf16 %v10471_v48, %v10471_v48  ;;  %v18772_v48 = vld [vmem:[#allocation107_spill] sm:$0xff] }
0x3943   :  { %v13603_v44 = vpop.eup %13602  ;;  %v10561_v61 = vadd.f32 1.0, %v13601_v32  ;;  %v18773_v32 = vld [vmem:[#allocation110_spill] sm:$0xff] }
0x3944   :  { %v10567_v10 = vadd.f32 1.0, %v13603_v44  ;;  %10616 = vmatprep.mubr.bf16.mxu0 %v10583_v4  ;;  %10657 = vmatprep.mubr.bf16.mxu1 %v10583_v4  ;;  %v13605_v12 = vpop.eup %13604  ;;  %v18774_v4 = vld [vmem:[#allocation109_spill] sm:$0xff]  ;;  %v18775_v44 = vld [vmem:[#allocation112_spill] sm:$0xff] }
0x3945   :  { %13608 = vrcp.f32 %v10561_v61  ;;  %v13607_v8 = vpop.eup %13606  ;;  %v10574_v3 = vadd.f32 1.0, %v13605_v12  ;;  %v18776_v61 = vld [vmem:[#allocation111_spill] sm:$0xff]  ;;  %v18778_v12 = vld [vmem:[#allocation146_spill] sm:$0xff] }
0x3946   :  { %13610 = vrcp.f32 %v10567_v10  ;;  %v18777_v10 = vld [vmem:[#allocation170_spill] sm:$0xff] }
0x3947   :  { %13612 = vrcp.f32 %v10574_v3 }
0x394f   :  { %v13609_v24 = vpop.eup %13608 }
0x3950   :  { %v13611_v40 = vpop.eup %13610  ;;  %v10578_v57 = vmul.f32 %v13609_v24, %v13607_v8  ;;  %v18779_v8 = vld [vmem:[#allocation177_spill] sm:$0xff]  ;;  %v18780_v24 = vld [vmem:[#allocation179_spill] sm:$0xff] }
0x3951   :  { %v10577_v29 = vmul.f32 %v13611_v40, %v17407_v14  ;;  %v13613_v55 = vpop.eup %13612  ;;  %v18743_v14 = vld [vmem:[#allocation150_spill] sm:$0xff]  ;;  %v18781_v40 = vmov 0.0  }
0x3953   :  { %v17593_v41 = vadd.f32 %v10578_v57, %v10577_v29  ;;  %v18782_v29 = vld [vmem:[#allocation101_spill] sm:$0xff] }
0x3955   :  { %13614 = vtanh.f32 %v17593_v41 }
0x395f   :  { %v13615_v62 = vpop.eup %13614 }
0x3960   :  { %v10581_v52 = vmul.f32 %v13615_v62, %v13613_v55 }
0x3962   :  { %v10582_v36 = vpack.c.bf16 %v10581_v52, %v10581_v52 }
0x3964   :  { %10617 = vmatmul.mubr.bf16.vlgmr.msra.gmra.mrb[164].mxu0 %v10582_v36  ;;  %10658 = vmatmul.mubr.bf16.vlgmr.msra.gmra.mrb[140].mxu1 %v10582_v36 }
0x3965   :  { %10691 = vmatpush1.bf16.msra.mxu0 %v17176_v39  ;;  %10732 = vmatpush1.bf16.msra.mxu1 %v17179_v63  ;;  %v18728_v39 = vld [vmem:[#allocation128_spill] sm:$0xff] }
0x3966   :  { %10692 = vmatprep.subr.bf16.mxu0 %v17182_v25  ;;  %10733 = vmatprep.subr.bf16.mxu1 %v17185_v19  ;;  %v18729_v63 = vld [vmem:[#allocation132_spill] sm:$0xff]  ;;  %v18730_v25 = vld [vmem:[#allocation134_spill] sm:$0xff]  ;;  %v18731_v19 = vld [vmem:[#allocation137_spill] sm:$0xff] }
0x3967   :  { %10722 = vmatprep.mubr.bf16.mxu0 %v18332_v60  ;;  %10763 = vmatprep.mubr.bf16.mxu1 %v18332_v60  ;;  %v18727_v60 = vld [vmem:[#allocation131_spill] sm:$0xff] }
0x3969   :  { %10693 = vmatpush1.bf16.msra.mxu0 %v17190_v34  ;;  %10734 = vmatpush1.bf16.msra.mxu1 %v17193_v0  ;;  %v18732_v34 = vld [vmem:[#allocation136_spill] sm:$0xff]  ;;  %v18733_v0 = vld [vmem:[#allocation139_spill] sm:$0xff] }
0x396a   :  { %10694 = vmatprep.subr.bf16.mxu0 %v17196_v9  ;;  %10735 = vmatprep.subr.bf16.mxu1 %v17199_v51  ;;  %v18734_v9 = vld [vmem:[#allocation138_spill] sm:$0xff]  ;;  %v18735_v51 = vld [vmem:[#allocation141_spill] sm:$0xff] }
0x396d   :  { %10695 = vmatpush1.bf16.msra.mxu0 %v17202_v17  ;;  %10736 = vmatpush1.bf16.msra.mxu1 %v17205_v21  ;;  %v18736_v17 = vld [vmem:[#allocation140_spill] sm:$0xff]  ;;  %v18737_v21 = vld [vmem:[#allocation143_spill] sm:$0xff] }
0x396e   :  { %10696 = vmatprep.subr.bf16.mxu0 %v17208_v56  ;;  %10737 = vmatprep.subr.bf16.mxu1 %v17211_v16  ;;  %v18738_v56 = vld [vmem:[#allocation142_spill] sm:$0xff]  ;;  %v18739_v16 = vld [vmem:[#allocation145_spill] sm:$0xff] }
0x3971   :  { %10697 = vmatpush1.bf16.msra.mxu0 %v17214_v7  ;;  %10738 = vmatpush1.bf16.msra.mxu1 %v17217_v31  ;;  %v18740_v7 = vld [vmem:[#allocation144_spill] sm:$0xff] }
0x3972   :  { %10698 = vmatprep.subr.bf16.mxu0 %v18650_v20  ;;  %10739 = vmatprep.subr.bf16.mxu1 %v18651_v5  ;;  %v18741_v31 = vld [vmem:[#allocation148_spill] sm:$0xff]  ;;  %v18744_v20 = vld [vmem:[#allocation149_spill] sm:$0xff] }
0x3973   :  { %v18745_v5 = vld [vmem:[#allocation152_spill] sm:$0xff] }
0x3975   :  { %10699 = vmatpush1.bf16.msra.mxu0 %v18652_v50  ;;  %10740 = vmatpush1.bf16.msra.mxu1 %v18653_v1  ;;  %v18746_v50 = vld [vmem:[#allocation151_spill] sm:$0xff]  ;;  %v18747_v1 = vld [vmem:[#allocation154_spill] sm:$0xff] }
0x3976   :  { %10700 = vmatprep.subr.bf16.mxu0 %v18654_v30  ;;  %10741 = vmatprep.subr.bf16.mxu1 %v18655_v22  ;;  %v18748_v30 = vld [vmem:[#allocation153_spill] sm:$0xff]  ;;  %v18749_v22 = vld [vmem:[#allocation156_spill] sm:$0xff] }
0x3979   :  { %10701 = vmatpush1.bf16.msra.mxu0 %v18656_v46  ;;  %10742 = vmatpush1.bf16.msra.mxu1 %v18657_v15  ;;  %v18750_v46 = vld [vmem:[#allocation155_spill] sm:$0xff]  ;;  %v18751_v15 = vld [vmem:[#allocation158_spill] sm:$0xff] }
0x397a   :  { %10702 = vmatprep.subr.bf16.mxu0 %v18658_v13  ;;  %10743 = vmatprep.subr.bf16.mxu1 %v18659_v59  ;;  %v18752_v13 = vld [vmem:[#allocation157_spill] sm:$0xff]  ;;  %v18753_v59 = vld [vmem:[#allocation160_spill] sm:$0xff] }
0x397d   :  { %10703 = vmatpush1.bf16.msra.mxu0 %v18660_v18  ;;  %10744 = vmatpush1.bf16.msra.mxu1 %v18661_v6  ;;  %v18754_v18 = vld [vmem:[#allocation159_spill] sm:$0xff]  ;;  %v18755_v6 = vld [vmem:[#allocation98_spill] sm:$0xff] }
0x397e   :  { %10704 = vmatprep.subr.bf16.mxu0 %v17256_v45  ;;  %10745 = vmatprep.subr.bf16.mxu1 %v18662_v53  ;;  %v18742_v45 = vld [vmem:[#allocation147_spill] sm:$0xff]  ;;  %v18756_v53 = vld [vmem:[#allocation161_spill] sm:$0xff] }
0x3981   :  { %10705 = vmatpush1.bf16.msra.mxu0 %v18663_v54  ;;  %10746 = vmatpush1.bf16.msra.mxu1 %v18664_v2  ;;  %v18757_v54 = vld [vmem:[#allocation95_spill] sm:$0xff]  ;;  %v18758_v2 = vld [vmem:[#allocation96_spill] sm:$0xff] }
0x3982   :  { %10843 = vmatprep.subr.bf16.mxu1 %v18666_v35  ;;  %10802 = vmatprep.subr.bf16.mxu0 %v18665_v27  ;;  %v18759_v27 = vld [vmem:[#allocation94_spill] sm:$0xff]  ;;  %v18760_v35 = vld [vmem:[#allocation97_spill] sm:$0xff] }
0x3984   :  { %10723 = vmatmul.mubr.bf16.vlgmr.msra.gmra.mrb[168].mxu0 %v10582_v36  ;;  %10764 = vmatmul.mubr.bf16.vlgmr.msra.gmra.mrb[144].mxu1 %v10582_v36  ;;  %v18783_v36 = vld [vmem:[#allocation102_spill] sm:$0xff] }
0x3985   :  { %10844 = vmatpush1.bf16.msra.mxu1 %v18668_v58  ;;  %10803 = vmatpush1.bf16.msra.mxu0 %v18667_v42  ;;  %v18761_v42 = vld [vmem:[#allocation171_spill] sm:$0xff]  ;;  %v18762_v58 = vld [vmem:[#allocation164_spill] sm:$0xff] }
0x3986   :  { %10845 = vmatprep.subr.bf16.mxu1 %v18670_v23  ;;  %10804 = vmatprep.subr.bf16.mxu0 %v18669_v26  ;;  %v18763_v26 = vld [vmem:[#allocation172_spill] sm:$0xff]  ;;  %v18764_v23 = vld [vmem:[#allocation165_spill] sm:$0xff] }
0x3989   :  { %10846 = vmatpush1.bf16.msra.mxu1 %v18672_v28  ;;  %10805 = vmatpush1.bf16.msra.mxu0 %v18671_v43  ;;  %v18765_v43 = vld [vmem:[#allocation166_spill] sm:$0xff]  ;;  %v18766_v28 = vld [vmem:[#allocation105_spill] sm:$0xff] }
0x398a   :  { %10847 = vmatprep.subr.bf16.mxu1 %v18727_v60  ;;  %10806 = vmatprep.subr.bf16.mxu0 %v18728_v39 }
0x398d   :  { %10848 = vmatpush1.bf16.msra.mxu1 %v18676_v49  ;;  %10807 = vmatpush1.bf16.msra.mxu0 %v18729_v63  ;;  %v18767_v49 = vld [vmem:[#allocation168_spill] sm:$0xff] }
0x398e   :  { %10849 = vmatprep.subr.bf16.mxu1 %v18678_v47  ;;  %10808 = vmatprep.subr.bf16.mxu0 %v18730_v25  ;;  %v18768_v47 = vld [vmem:[#allocation173_spill] sm:$0xff] }
0x3991   :  { %10850 = vmatpush1.bf16.msra.mxu1 %v18731_v19  ;;  %10809 = vmatpush1.bf16.msra.mxu0 %v18732_v34 }
0x3992   :  { %10851 = vmatprep.subr.bf16.mxu1 %v18733_v0  ;;  %10810 = vmatprep.subr.bf16.mxu0 %v18734_v9  ;;  %v18784_v9 = vld [vmem:[#allocation103_spill] sm:$0xff] }
0x3995   :  { %10852 = vmatpush1.bf16.msra.mxu1 %v18735_v51  ;;  %10811 = vmatpush1.bf16.msra.mxu0 %v18736_v17 }
0x3996   :  { %10853 = vmatprep.subr.bf16.mxu1 %v18737_v21  ;;  %10812 = vmatprep.subr.bf16.mxu0 %v18738_v56  ;;  %v18785_v21 = vld [vmem:[#allocation104_spill] sm:$0xff] }
0x3999   :  { %10854 = vmatpush1.bf16.msra.mxu1 %v18739_v16  ;;  %10813 = vmatpush1.bf16.msra.mxu0 %v18740_v7 }
0x399a   :  { %10855 = vmatprep.subr.bf16.mxu1 %v18741_v31  ;;  %10814 = vmatprep.subr.bf16.mxu0 %v18742_v45 }
0x399d   :  { %10856 = vmatpush1.bf16.msra.mxu1 %v18743_v14  ;;  %10815 = vmatpush1.bf16.msra.mxu0 %v18744_v20 }
0x399e   :  { %10857 = vmatprep.subr.bf16.mxu1 %v18745_v5  ;;  %10816 = vmatprep.subr.bf16.mxu0 %v18746_v50 }
0x39a1   :  { %10858 = vmatpush1.bf16.msra.mxu1 %v18747_v1  ;;  %10817 = vmatpush1.bf16.msra.mxu0 %v18748_v30 }
0x39a2   :  { %10859 = vmatprep.subr.bf16.mxu1 %v18749_v22  ;;  %10818 = vmatprep.subr.bf16.mxu0 %v18750_v46 }
0x39a5   :  { %10860 = vmatpush1.bf16.msra.mxu1 %v18751_v15  ;;  %10819 = vmatpush1.bf16.msra.mxu0 %v18752_v13 }
0x39a6   :  { %10861 = vmatprep.subr.bf16.mxu1 %v18753_v59  ;;  %10820 = vmatprep.subr.bf16.mxu0 %v18754_v18  ;;  %v18786_v59 = vld [vmem:[#allocation188_spill] sm:$0xff] }
0x39a9   :  { %10862 = vmatpush1.bf16.msra.mxu1 %v18755_v6  ;;  %10821 = vmatpush1.bf16.msra.mxu0 %v18756_v53  ;;  %v18787_v6 = vld [vmem:[#allocation189_spill] sm:$0xff] }
0x39aa   :  { %10863 = vmatprep.subr.bf16.mxu1 %v18757_v54  ;;  %10822 = vmatprep.subr.bf16.mxu0 %v18758_v2 }
0x39ad   :  { %10864 = vmatpush1.bf16.msra.mxu1 %v18759_v27  ;;  %10823 = vmatpush1.bf16.msra.mxu0 %v18760_v35  ;;  %v18788_v27 = vld [vmem:[#allocation190_spill] sm:$0xff] }
0x39ae   :  { %10865 = vmatprep.subr.bf16.mxu1 %v18761_v42  ;;  %10824 = vmatprep.subr.bf16.mxu0 %v18762_v58  ;;  %v18789_v42 = vld [vmem:[#allocation191_spill] sm:$0xff] }
0x39b1   :  { %10866 = vmatpush1.bf16.msra.mxu1 %v18763_v26  ;;  %10825 = vmatpush1.bf16.msra.mxu0 %v18764_v23 }
0x39b2   :  { %10867 = vmatprep.subr.bf16.mxu1 %v18765_v43  ;;  %10826 = vmatprep.subr.bf16.mxu0 %v18766_v28 }
0x39b5   :  { %10868 = vmatpush1.bf16.msra.mxu1 %v18767_v49  ;;  %10827 = vmatpush1.bf16.msra.mxu0 %v18768_v47 }
0x39b6   :  { %10869 = vmatprep.subr.bf16.mxu1 %v18769_v33  ;;  %10828 = vmatprep.subr.bf16.mxu0 %v18770_v37 }
0x39b9   :  { %10870 = vmatpush1.bf16.msra.mxu1 %v18771_v11  ;;  %10829 = vmatpush1.bf16.msra.mxu0 %v18772_v48 }
0x39ba   :  { %10871 = vmatprep.subr.bf16.mxu1 %v18773_v32  ;;  %10830 = vmatprep.subr.bf16.mxu0 %v18774_v4 }
0x39bd   :  { %10872 = vmatpush1.bf16.msra.mxu1 %v18775_v44  ;;  %10831 = vmatpush1.bf16.msra.mxu0 %v18776_v61 }
0x39be   :  { %10873 = vmatprep.subr.bf16.mxu1 %v18777_v10  ;;  %10832 = vmatprep.subr.bf16.mxu0 %v18778_v12 }
0x39c1   :  { %10874 = vmatpush1.bf16.msra.mxu1 %v18779_v8  ;;  %10833 = vmatpush1.bf16.msra.mxu0 %v18780_v24 }
0x39c2   :  { %12627 = vmatprep.subr.bf16.mxu1 %v18781_v40  ;;  %12607 = vmatprep.subr.bf16.mxu0 %v18781_v40 }
0x3a37   :  { %v10618_v57 = vpop.f32.mrb[164].mxu0  ;;  %v10659_v3 = vpop.f32.mrb[140].mxu1 }
0x3a38   :  { %v10619_v55 = vadd.f32 %v10618_v57, %v18782_v29  ;;  %v10620_v62 = vpop.f32.mrb[165].mxu0  ;;  %v10661_v52 = vpop.f32.mrb[141].mxu1  ;;  %v10660_v56 = vadd.f32 %v10659_v3, %v18785_v21 }
0x3a39   :  { %v10621_v60 = vadd.f32 %v10620_v62, %v18783_v36  ;;  %v10622_v39 = vpop.f32.mrb[166].mxu0  ;;  %v10663_v63 = vpop.f32.mrb[142].mxu1  ;;  %v10662_v51 = vadd.f32 %v10661_v52, %v18784_v9 }
0x3a3a   :  { %v11867_v25 = vmul.f32 -1.442695, %v10619_v55  ;;  %v10623_v19 = vpop.f32.mrb[167].mxu0  ;;  %v10664_v34 = vpop.f32.mrb[143].mxu1 }
0x3a3b   :  { %v11868_v0 = vmul.f32 -1.442695, %v10621_v60  ;;  %v11869_v17 = vmul.f32 -1.442695, %v10662_v51  ;;  %v8249_v52 = vpop.xlane.xlu1 %8248  ;;  %v8247_v60 = vpop.xlane.xlu0 %8246 }
0x3a3c   :  { %13616 = vpow2.f32 %v11867_v25  ;;  %v8251_v39 = vmul.f32 0.0078125, %v8249_v52  ;;  %v8250_v63 = vmul.f32 0.0078125, %v8247_v60 }
0x3a3d   :  { %13618 = vpow2.f32 %v11868_v0 }
0x3a3e   :  { %13620 = vpow2.f32 %v11869_v17  ;;  %v8253_v19 = vadd.f32 1e-05, %v8251_v39  ;;  %v8252_v0 = vadd.f32 1e-05, %v8250_v63  ;;  %v13236_v17 = vld [vmem:[#allocation47] sm:$0xff]  }
0x3a3f   :  { %13622 = vtanh.f32 %v10660_v56 }
0x3a46   :  { %v13617_v16 = vpop.eup %13616 }
0x3a47   :  { %v13619_v7 = vpop.eup %13618  ;;  %v10669_v31 = vadd.f32 1.0, %v13617_v16  ;;  %v13238_v16 = vld [vmem:[#allocation47 + $0x10] sm:$0xff]  }
0x3a48   :  { %v10675_v45 = vadd.f32 1.0, %v13619_v7  ;;  %v13621_v14 = vpop.eup %13620 }
0x3a49   :  { %13624 = vrcp.f32 %v10669_v31  ;;  %v13623_v20 = vpop.eup %13622  ;;  %v10682_v30 = vadd.f32 1.0, %v13621_v14  ;;  %v13239_v31 = vld [vmem:[#allocation47 + $0x18] sm:$0xff]  }
0x3a4a   :  { %13626 = vrcp.f32 %v10675_v45  ;;  %v18790_v14 = vld [vmem:[#allocation100_spill] sm:$0xff] }
0x3a4b   :  { %13628 = vrcp.f32 %v10682_v30  ;;  %v11724_v30 = vld [vmem:[#allocation34] ss:$0 sm:$0xff] }
0x3a53   :  { %v13625_v5 = vpop.eup %13624 }
0x3a54   :  { %v13627_v50 = vpop.eup %13626  ;;  %v10686_v1 = vmul.f32 %v13625_v5, %v13623_v20  ;;  %v18791_v5 = vld [vmem:[#allocation99_spill] sm:$0xff] }
0x3a55   :  { %v10685_v22 = vmul.f32 %v13627_v50, %v17585_v38  ;;  %v13629_v47 = vpop.eup %13628 }
0x3a57   :  { %v10724_v46 = vpop.f32.mrb[168].mxu0  ;;  %v10765_v15 = vpop.f32.mrb[144].mxu1  ;;  %v17699_v13 = vadd.f32 %v10686_v1, %v10685_v22  ;;  %v13240_v1 = vld [vmem:[#allocation47 + $0x20] sm:$0xff]  }
0x3a58   :  { %v10772_v18 = vadd.f32 %v10724_v46, %v18786_v59  ;;  %v10774_v53 = vadd.f32 %v10765_v15, %v18787_v6  ;;  %v10726_v54 = vpop.f32.mrb[169].mxu0  ;;  %v10767_v2 = vpop.f32.mrb[145].mxu1  ;;  %v13241_v15 = vld [vmem:[#allocation47 + $0x28] sm:$0xff]   ;;  %v11725_v59 = vld [vmem:[#allocation35] ss:$0 sm:$0xff] }
0x3a59   :  { %v10773_v35 = vadd.f32 %v10726_v54, %v18788_v27  ;;  %v10775_v58 = vadd.f32 %v10767_v2, %v18789_v42  ;;  %v10728_v26 = vpop.f32.mrb[170].mxu0  ;;  %v10769_v23 = vpop.f32.mrb[146].mxu1  ;;  %13630 = vtanh.f32 %v17699_v13  ;;  %v13242_v6 = vld [vmem:[#allocation47 + $0x30] sm:$0xff]   ;;  %v13243_v2 = vld [vmem:[#allocation47 + $0x38] sm:$0xff]  }
0x3a5a   :  { %v11870_v38 = vmul.f32 -1.442695, %v10772_v18  ;;  %v10729_v43 = vpop.f32.mrb[171].mxu0  ;;  %v10770_v28 = vpop.f32.mrb[147].mxu1  ;;  %v13245_v26 = vld [vmem:[#allocation44 + $0x8] sm:$0xff]   ;;  %v13246_v23 = vld [vmem:[#allocation44 + $0x10] sm:$0xff]  }
0x3a5b   :  { %v11871_v49 = vmul.f32 -1.442695, %v10773_v35  ;;  %v11872_v37 = vmul.f32 -1.442695, %v10775_v58  ;;  %v13244_v58 = vld [vmem:[#allocation44] sm:$0xff]   ;;  %v13249_v28 = vld [vmem:[#allocation44 + $0x28] sm:$0xff]  }
0x3a5c   :  { %13632 = vpow2.f32 %v11870_v38  ;;  %v13247_v38 = vld [vmem:[#allocation44 + $0x18] sm:$0xff]   ;;  %v13248_v43 = vld [vmem:[#allocation44 + $0x20] sm:$0xff]  }
0x3a5d   :  { %13634 = vpow2.f32 %v11871_v49  ;;  %v13250_v49 = vld [vmem:[#allocation44 + $0x30] sm:$0xff]  }
0x3a5e   :  { %13636 = vpow2.f32 %v11872_v37  ;;  %v13261_v37 = vld [vmem:[%s14903_s13 + $0x8] sm:$0xff]  }
0x3a5f   :  { %13638 = vtanh.f32 %v10774_v53 }
0x3a63   :  { %v13631_v33 = vpop.eup %13630 }
0x3a64   :  { %v10689_v11 = vmul.f32 %v13631_v33, %v13629_v47  ;;  %v13251_v47 = vld [vmem:[#allocation44 + $0x38] sm:$0xff]   ;;  %v13260_v33 = vld [vmem:[%s14903_s13] sm:$0xff]  }
0x3a66   :  { %v13633_v48 = vpop.eup %13632  ;;  %v10801_v32 = vpack.c.bf16 %v10689_v11, %v10689_v11  ;;  %v13262_v11 = vld [vmem:[%s14903_s13 + $0x10] sm:$0xff]  }
0x3a67   :  { %v13635_v4 = vpop.eup %13634  ;;  %v10779_v44 = vadd.f32 1.0, %v13633_v48  ;;  %v13263_v48 = vld [vmem:[%s14903_s13 + $0x18] sm:$0xff]  }
0x3a68   :  { %v10785_v61 = vadd.f32 1.0, %v13635_v4  ;;  %10834 = vmatprep.mubr.bf16.mxu0 %v10801_v32  ;;  %10875 = vmatprep.mubr.bf16.mxu1 %v10801_v32  ;;  %v13637_v10 = vpop.eup %13636  ;;  %v13264_v32 = vld [vmem:[%s14903_s13 + $0x20] sm:$0xff]   ;;  %v13265_v4 = vld [vmem:[%s14903_s13 + $0x28] sm:$0xff]  }
0x3a69   :  { %13640 = vrcp.f32 %v10779_v44  ;;  %v13639_v12 = vpop.eup %13638  ;;  %v10792_v3 = vadd.f32 1.0, %v13637_v10  ;;  %v13266_v44 = vld [vmem:[%s14903_s13 + $0x30] sm:$0xff]  }
0x3a6a   :  { %13642 = vrcp.f32 %v10785_v61 }
0x3a6b   :  { %13644 = vrcp.f32 %v10792_v3 }
0x3a73   :  { %v13641_v8 = vpop.eup %13640 }
0x3a74   :  { %v13643_v24 = vpop.eup %13642  ;;  %v10796_v57 = vmul.f32 %v13641_v8, %v13639_v12 }
0x3a75   :  { %v10795_v55 = vmul.f32 %v13643_v24, %v17593_v41  ;;  %v13645_v25 = vpop.eup %13644  ;;  %v13237_v41 = vld [vmem:[#allocation47 + $0x8] sm:$0xff]  }
0x3a77   :  { %v10797_v62 = vadd.f32 %v10796_v57, %v10795_v55 }
0x3a79   :  { %13646 = vtanh.f32 %v10797_v62 }
0x3a7a   :  { %13648 = vrsqrt.f32 %v8253_v19 }
0x3a7b   :  { %13650 = vrsqrt.f32 %v8252_v0 }
0x3a83   :  { %v13647_v34 = vpop.eup %13646 }
0x3a84   :  { %v10799_v51 = vmul.f32 %v13647_v34, %v13645_v25  ;;  %v13649_v7 = vpop.eup %13648 }
0x3a85   :  { %v13651_v45 = vpop.eup %13650  ;;  %v8257_v20 = vmul.f32 %v13649_v7, %v18790_v14 }
0x3a86   :  { %v10800_v56 = vpack.c.bf16 %v10799_v51, %v10799_v51  ;;  %v8256_v50 = vmul.f32 %v13651_v45, %v18791_v5 }
0x3a87   :  { %v8265_v22 = vmul.f32 %v11724_v30, %v8257_v20 }
0x3a88   :  { %10835 = vmatmul.mubr.bf16.vlgmr.msra.gmra.mrb[172].mxu0 %v10800_v56  ;;  %10876 = vmatmul.mubr.bf16.vlgmr.msra.gmra.mrb[148].mxu1 %v10800_v56  ;;  %v8264_v46 = vmul.f32 %v11724_v30, %v8256_v50  ;;  %v13252_v30 = vld [vmem:[%s14908_s19] sm:$0xff]  }
0x3a89   :  { %12628 = vmatpush3.bf16.msra.mxu1 %v13236_v17  ;;  %12643 = vmatprep.mubr.msk.bf16.mxu1 %vm14701_vm0, %v18781_v40  ;;  %v8273_v18 = vadd.f32 %v11725_v59, %v8265_v22 }
0x3a8a   :  { %12629 = vmatprep.subr.bf16.mxu1 %v18781_v40  ;;  %12623 = vmatprep.mubr.msk.bf16.mxu0 %vm14701_vm0, %v18781_v40  ;;  %v8272_v53 = vadd.f32 %v11725_v59, %v8264_v46  ;;  %v13253_v46 = vld [vmem:[%s14908_s19 + $0x8] sm:$0xff]   ;;  %v13256_v59 = vld [vmem:[%s14908_s19 + $0x20] sm:$0xff]  }
0x3a8b   :  { %v8278_v54 = vrot.slane %v8273_v18, 6  ;;  %12608 = vmatpush3.bf16.msra.mxu0 %v13244_v58  ;;  %v13257_v18 = vld [vmem:[%s14908_s19 + $0x28] sm:$0xff]  }
0x3a8c   :  { %v8275_v27 = vrot.slane %v8272_v53, 7  ;;  %12609 = vmatprep.subr.bf16.mxu0 %v18781_v40  ;;  %v11885_v53 = vld [vmem:[#allocation49] ss:$0 sm:$0xff] }
0x3a8d   :  { %12630 = vmatpush3.bf16.msra.mxu1 %v13237_v41 }
0x3a8e   :  { %12631 = vmatprep.subr.bf16.mxu1 %v18781_v40  ;;  %v8281_v35 = vsel %vm8280_vm9, %v8275_v27, %v8278_v54  ;;  %v13259_v54 = vld [vmem:[%s14908_s19 + $0x38] sm:$0xff]  }
0x3a8f   :  { %v11020_v42 = vpack.c.bf16 %v8281_v35, %v8281_v35  ;;  %12610 = vmatpush3.bf16.msra.mxu0 %v13245_v26  ;;  %v13267_v35 = vld [vmem:[%s14903_s13 + $0x38] sm:$0xff]  }
0x3a90   :  { %12611 = vmatprep.subr.bf16.mxu0 %v18781_v40 }
0x3a91   :  { %12632 = vmatpush3.bf16.msra.mxu1 %v13238_v16 }
0x3a92   :  { %12633 = vmatprep.subr.bf16.mxu1 %v18781_v40 }
0x3a93   :  { %12612 = vmatpush3.bf16.msra.mxu0 %v13246_v23 }
0x3a94   :  { %12613 = vmatprep.subr.bf16.mxu0 %v18781_v40 }
0x3a95   :  { %12634 = vmatpush3.bf16.msra.mxu1 %v13239_v31 }
0x3a96   :  { %12635 = vmatprep.subr.bf16.mxu1 %v18781_v40 }
0x3a97   :  { %12614 = vmatpush3.bf16.msra.mxu0 %v13247_v38 }
0x3a98   :  { %12615 = vmatprep.subr.bf16.mxu0 %v18781_v40 }
0x3a99   :  { %12636 = vmatpush3.bf16.msra.mxu1 %v13240_v1 }
0x3a9a   :  { %12637 = vmatprep.subr.bf16.mxu1 %v18781_v40 }
0x3a9b   :  { %12616 = vmatpush3.bf16.msra.mxu0 %v13248_v43 }
0x3a9c   :  { %12617 = vmatprep.subr.bf16.mxu0 %v18781_v40 }
0x3a9d   :  { %12638 = vmatpush3.bf16.msra.mxu1 %v13241_v15  ;;  %v13255_v15 = vld [vmem:[%s14908_s19 + $0x18] sm:$0xff]  }
0x3a9e   :  { %12639 = vmatprep.subr.bf16.mxu1 %v18781_v40 }
0x3a9f   :  { %12618 = vmatpush3.bf16.msra.mxu0 %v13249_v28 }
0x3aa0   :  { %12619 = vmatprep.subr.bf16.mxu0 %v18781_v40 }
0x3aa1   :  { %12640 = vmatpush3.bf16.msra.mxu1 %v13242_v6  ;;  %v13258_v6 = vld [vmem:[%s14908_s19 + $0x30] sm:$0xff]  }
0x3aa2   :  { %12641 = vmatprep.subr.bf16.mxu1 %v18781_v40 }
0x3aa3   :  { %12620 = vmatpush3.bf16.msra.mxu0 %v13250_v49 }
0x3aa4   :  { %12621 = vmatprep.subr.bf16.mxu0 %v18781_v40 }
0x3aa5   :  { %12642 = vmatpush3.bf16.msra.mxu1 %v13243_v2 }
0x3aa6   :  { %12667 = vmatprep.subr.bf16.mxu1 %v18781_v40 }
0x3aa7   :  { %12622 = vmatpush3.bf16.msra.mxu0 %v13251_v47 }
0x3aa8   :  { %12644 = vmatmul.mubr.bf16.vlgmr.msra.gmra.mrb[152].mxu1 %v11020_v42  ;;  %12647 = vmatprep.subr.bf16.mxu0 %v18781_v40  ;;  %v11876_v42 = vld [vmem:[#allocation46] ss:$0 sm:$0xff] }
0x3aa9   :  { %12683 = vmatprep.mubr.msk.bf16.mxu1 %vm14701_vm0, %v18781_v40  ;;  %12668 = vmatpush3.bf16.msra.mxu1 %v13260_v33 }
0x3aaa   :  { %12669 = vmatprep.subr.bf16.mxu1 %v18781_v40 }
0x3aad   :  { %12670 = vmatpush3.bf16.msra.mxu1 %v13261_v37 }
0x3aae   :  { %12671 = vmatprep.subr.bf16.mxu1 %v18781_v40 }
0x3ab1   :  { %12672 = vmatpush3.bf16.msra.mxu1 %v13262_v11 }
0x3ab2   :  { %12673 = vmatprep.subr.bf16.mxu1 %v18781_v40 }
0x3ab5   :  { %12674 = vmatpush3.bf16.msra.mxu1 %v13263_v48  ;;  %v11910_v48 = vld [vmem:[#allocation50] ss:$0 sm:$0xff] }
0x3ab6   :  { %12675 = vmatprep.subr.bf16.mxu1 %v18781_v40 }
0x3ab9   :  { %12676 = vmatpush3.bf16.msra.mxu1 %v13264_v32 }
0x3aba   :  { %12677 = vmatprep.subr.bf16.mxu1 %v18781_v40 }
0x3abd   :  { %12678 = vmatpush3.bf16.msra.mxu1 %v13265_v4 }
0x3abe   :  { %12679 = vmatprep.subr.bf16.mxu1 %v18781_v40 }
0x3ac1   :  { %12680 = vmatpush3.bf16.msra.mxu1 %v13266_v44 }
0x3ac2   :  { %12681 = vmatprep.subr.bf16.mxu1 %v18781_v40 }
0x3ac5   :  { %12682 = vmatpush3.bf16.msra.mxu1 %v13267_v35 }
0x3b5b   :  { %v10836_v61 = vpop.f32.mrb[172].mxu0  ;;  %v10877_v10 = vpop.f32.mrb[148].mxu1 }
0x3b5c   :  { %v10837_v12 = vadd.f32 %v10836_v61, %v18782_v29  ;;  %v10838_v8 = vpop.f32.mrb[173].mxu0  ;;  %v10879_v24 = vpop.f32.mrb[149].mxu1  ;;  %v10878_v19 = vadd.f32 %v10877_v10, %v18785_v21 }
0x3b5d   :  { %v10839_v57 = vadd.f32 %v10838_v8, %v18783_v36  ;;  %v10840_v3 = vpop.f32.mrb[174].mxu0  ;;  %v10881_v55 = vpop.f32.mrb[150].mxu1  ;;  %v10880_v63 = vadd.f32 %v10879_v24, %v18784_v9 }
0x3b5e   :  { %v11873_v62 = vmul.f32 -1.442695, %v10837_v12  ;;  %v10841_v52 = vpop.f32.mrb[175].mxu0  ;;  %v10882_v60 = vpop.f32.mrb[151].mxu1 }
0x3b5f   :  { %v11874_v39 = vmul.f32 -1.442695, %v10839_v57  ;;  %v11875_v25 = vmul.f32 -1.442695, %v10880_v63 }
0x3b60   :  { %13652 = vpow2.f32 %v11873_v62 }
0x3b61   :  { %13654 = vpow2.f32 %v11874_v39 }
0x3b62   :  { %13656 = vpow2.f32 %v11875_v25 }
0x3b63   :  { %13658 = vtanh.f32 %v10878_v19 }
0x3b6a   :  { %v13653_v34 = vpop.eup %13652 }
0x3b6b   :  { %v13655_v0 = vpop.eup %13654  ;;  %v10887_v29 = vadd.f32 1.0, %v13653_v34 }
0x3b6c   :  { %v10893_v51 = vadd.f32 1.0, %v13655_v0  ;;  %v13657_v36 = vpop.eup %13656 }
0x3b6d   :  { %13660 = vrcp.f32 %v10887_v29  ;;  %v13659_v17 = vpop.eup %13658  ;;  %v10900_v7 = vadd.f32 1.0, %v13657_v36 }
0x3b6e   :  { %13662 = vrcp.f32 %v10893_v51 }
0x3b6f   :  { %13664 = vrcp.f32 %v10900_v7 }
0x3b77   :  { %v13661_v56 = vpop.eup %13660 }
0x3b78   :  { %v13663_v41 = vpop.eup %13662  ;;  %v10904_v16 = vmul.f32 %v13661_v56, %v13659_v17 }
0x3b79   :  { %v10903_v9 = vmul.f32 %v13663_v41, %v17699_v13  ;;  %v13665_v5 = vpop.eup %13664  ;;  %v13254_v13 = vld [vmem:[%s14908_s19 + $0x10] sm:$0xff]   ;;  %s14709_s19 = smov [#allocation52]  }
0x3b7a   :  { %s11358_s17 = sshll.u32 %s14709_s19, 4  ;;  %s11359_s17 = int_to_ptr.vmem [resolvable:$true] %s11358_s17 }
0x3b7b   :  { %v10905_v31 = vadd.f32 %v10904_v16, %v10903_v9  ;;  %v11126_v21 = vpop.f32.mrb[152].mxu1  ;;  %s14564_s13 = scalar_lea.vmem %s11359_s17, 32  ;;  %p14569_p5 = scmp.lt.s32.totalorder %s11359_s17, %s11359_s17 }
0x3b7c   :  { %v12645_v45 = vpop.f32.mrb[153].mxu1  ;;  %v11127_v2 = vadd.f32 %v11885_v53, %v11126_v21  ;;  %p14565_p4 = scmp.ne.s32.totalorder %s11359_s17, %s14564_s13  ;;  %p14570_p6 = scmp.lt.s32.totalorder %s14564_s13, %s14564_s13 }
0x3b7d   :  { %13666 = vtanh.f32 %v10905_v31  ;;  %v11129_v14 = vpop.f32.mrb[154].mxu1 }
0x3b7e   :  { %v12646_v20 = vpop.f32.mrb[155].mxu1  ;;  %v11149_v27 = vpack.c.bf16 %v11127_v2, %v11127_v2  ;;  %p14571_p7 = por %p14570_p6, %p14569_p5 }
0x3b80   :  { %p14572_p8 = pnand %p14571_p7, %p14565_p4 }
0x3b87   :  { %v13667_v50 = vpop.eup %13666 }
0x3b88   :  { %v10907_v1 = vmul.f32 %v13667_v50, %v13665_v5 }
0x3b8a   :  { %v10908_v22 = vpack.c.bf16 %v10907_v1, %v10907_v1 }
0x3b8c   :  { %12624 = vmatmul.mubr.bf16.vlgmr.msra.gmra.mrb[176].mxu0 %v10908_v22 }
0x3b8d   :  { %12648 = vmatpush3.bf16.msra.mxu0 %v13252_v30  ;;  %12663 = vmatprep.mubr.msk.bf16.mxu0 %vm14701_vm0, %v18781_v40 }
0x3b8e   :  { %12649 = vmatprep.subr.bf16.mxu0 %v18781_v40 }
0x3b91   :  { %12650 = vmatpush3.bf16.msra.mxu0 %v13253_v46 }
0x3b92   :  { %12651 = vmatprep.subr.bf16.mxu0 %v18781_v40 }
0x3b95   :  { %12652 = vmatpush3.bf16.msra.mxu0 %v13254_v13 }
0x3b96   :  { %12653 = vmatprep.subr.bf16.mxu0 %v18781_v40 }
0x3b99   :  { %12654 = vmatpush3.bf16.msra.mxu0 %v13255_v15 }
0x3b9a   :  { %12655 = vmatprep.subr.bf16.mxu0 %v18781_v40 }
0x3b9d   :  { %12656 = vmatpush3.bf16.msra.mxu0 %v13256_v59 }
0x3b9e   :  { %12657 = vmatprep.subr.bf16.mxu0 %v18781_v40 }
0x3ba1   :  { %12658 = vmatpush3.bf16.msra.mxu0 %v13257_v18 }
0x3ba2   :  { %12659 = vmatprep.subr.bf16.mxu0 %v18781_v40 }
0x3ba5   :  { %12660 = vmatpush3.bf16.msra.mxu0 %v13258_v6 }
0x3ba6   :  { %12661 = vmatprep.subr.bf16.mxu0 %v18781_v40 }
0x3ba9   :  { %12662 = vmatpush3.bf16.msra.mxu0 %v13259_v54 }
0x3bac   :  { %12664 = vmatmul.mubr.bf16.vlgmr.msra.gmra.mrb[180].mxu0 %v11149_v27 }
0x3c5f   :  { %v11014_v58 = vpop.f32.mrb[176].mxu0 }
0x3c60   :  { %v11015_v26 = vadd.f32 %v11876_v42, %v11014_v58  ;;  %v12625_v23 = vpop.f32.mrb[177].mxu0 }
0x3c61   :  { %v11017_v38 = vpop.f32.mrb[178].mxu0 }
0x3c62   :  { %v11132_v43 = vpack.c.bf16 %v11015_v26, %v11015_v26  ;;  %v12626_v28 = vpop.f32.mrb[179].mxu0 }
0x3c64   :  { %12684 = vmatmul.mubr.bf16.vlgmr.msra.gmra.mrb[156].mxu1 %v11132_v43 }
0x3c7f   :  { %v11248_v49 = vpop.f32.mrb[180].mxu0 }
0x3c80   :  { %v12665_v47 = vpop.f32.mrb[181].mxu0 }
0x3c81   :  { %v11251_v33 = vpop.f32.mrb[182].mxu0 }
0x3c82   :  { %v12666_v37 = vpop.f32.mrb[183].mxu0 }
0x3d37   :  { %v11336_v11 = vpop.f32.mrb[156].mxu1 }
0x3d38   :  { %v11337_v40 = vadd.f32 %v11336_v11, %v11248_v49  ;;  %v12685_v32 = vpop.f32.mrb[157].mxu1 }
0x3d39   :  { %v11339_v4 = vpop.f32.mrb[158].mxu1 }
0x3d3a   :  { %v11349_v44 = vadd.f32 %v11910_v48, %v11337_v40  ;;  %v12686_v61 = vpop.f32.mrb[159].mxu1 }
0x3d3c   :  { %11351 = vst.msk [vmem:[#allocation52] sm:$0x3] %vm11350_vm10, %v11349_v44 }
0x3d3d   :  { %14575 = shalt.err (!%p14572_p8)
}
0x3d3e   :  { %s14576_s20 = scalar_lea.hbm %s14918_s5, 32 }
0x3d3f   :  { %p14577_p9 = scmp.ne.s32.totalorder %s14918_s5, %s14576_s20  ;;  %p14580_p10 = scmp.lt.u32.totalorder %s14576_s20, %s14918_s5 }
0x3d41   :  { %p14582_p11 = pnand %p14580_p10, %p14577_p9 }
0x3d43   :  { %14585 = shalt.err (!%p14582_p11)
}
0x3d44   :  { %11361 = dma.vmem_to_hbm [thread:$0]  %s11359_s17, 32, %s14918_s5, [#allocation4]  }
0x3d45   :  { %14620 = dma.done.wait [#allocation4], 32  }
0x3d46   :  { %14621 = vsyncadd [#allocation4], 4294967264 }
0x3d47   :  { %11365 = vsyncpa [#allocation3], 1 }
0x3d48   :  { %11366 = vsyncpa [#allocation6], 1 }
0x3d49   :  { %11367 = vsyncpa [#allocation9], 1 }
0x3d4a   :  { %11368 = vsyncpa [#allocation12], 1 }
0x3d4b   :  { %11369 = vsyncpa [#allocation15], 1 }
0x3d4c   :  { %11370 = vsyncpa [#allocation18], 1 }
0x3d4d   :  { %11371 = vsyncpa [#allocation21], 1 }
0x3d4e   :  { %11372 = vsyncpa [#allocation24], 1 }
0x3d4f   :  { %11373 = vsyncpa [#allocation27], 1 }
0x3d50   :  { %11374 = vsyncpa [#allocation30], 1 }
0x3d51   :  { %11375 = vsyncpa [#allocation33], 1 }
0x3d52   :  { %11376 = vsyncpa [#allocation36], 1 }
0x3d53   :  { %11377 = vsyncpa [#allocation39], 1 }
0x3d54   :  { %11378 = vsyncpa [#allocation42], 1 }
0x3d55   :  { %11379 = vsyncpa [#allocation45], 1 }
0x3d56   :  { %11380 = vsyncpa [#allocation48], 1 }
0x3d57   :  { %11381 = vsyncpa [#allocation51], 1 }
0x3d58   :  { %11382 = vsyncpa [#allocation4], 1 }

</bundles_post_ra>
